<compile_context>
chip_gen: v6e
topology: v6e:2x2x1
jax: 0.10.0
libtpu: 0.0.40
codegen_flags: <defaults>
</compile_context>

<pallas_src>
import functools

import jax
import jax.numpy as jnp
from jax import lax
from jax.experimental import pallas as pl
from jax.experimental.pallas import tpu as pltpu


# ---------------------------------------------------------------------------
# Layout constants
# ---------------------------------------------------------------------------
C0, C1, C2 = 3, 16, 32           # channels: input, conv1 out, conv2 out
HW = 32                          # CIFAR spatial size
WPAD = 32                        # row stride of the flattened spatial index p = h*32 + w
K1 = 9 * C0                      # 27  conv1 contraction (tap-major, then cin)
K2 = 9 * C1                      # 144 conv2 contraction (tap-major, then cin)
P1 = 30 * WPAD + 8               # 968 conv1 output columns (incl. 8 guard cols)
P2 = 28 * WPAD                   # 896 conv2 output columns (incl. junk cols p%32>=28)
NOUT = 10
OFFS = tuple(a * WPAD + b for a in range(3) for b in range(3))   # 3x3 tap lane shifts
XCOLS = HW * HW + 16             # 1040 >= 1024 and >= max(OFFS) + P1 = 1034


# ---------------------------------------------------------------------------
# Kernel 1: fused relu(conv1) -> transpose(2,3) -> relu(conv2), B images / step
# ---------------------------------------------------------------------------
def _fused_conv_kernel(x_ref, w1_ref, b1_ref, w2_ref, b2_ref, o_ref, r2_ref):
    # x_ref : (B, 27, 968)  bf16  conv1 im2col, channel-major, row = tap*3 + cin
    # w1_ref: (16, 27)      bf16  conv1 weight, K order matches x_ref rows
    # b1_ref: (16, 1)       f32
    # w2_ref: (32, 144)     bf16  conv2 weight, spatial taps swapped (transpose fold)
    # b2_ref: (32, 1)       f32
    # o_ref : (B, 32, 896)  bf16  channel-major conv2 activations (lane-dense)
    # r2_ref: (144, 896)    bf16  VMEM scratch holding conv2's im2col
    bsz = o_ref.shape[0]
    for b in range(bsz):
        # conv1: one wide-K matmul, f32 accumulate, f32 bias+relu.
        u1 = jnp.dot(w1_ref[...], x_ref[b, :, :],
                     preferred_element_type=jnp.float32)          # (16, 968)
        y1 = jnp.maximum(u1 + b1_ref[...], 0.0).astype(jnp.bfloat16)

        # conv2 im2col: 9 lane-shifted copies of y1 stacked along K (sublanes).
        # Pieces are 16 rows each -> sublane-tile aligned placement in r2_ref.
        for t, off in enumerate(OFFS):
            r2_ref[t * C1:(t + 1) * C1, :] = y1[:, off:off + P2]

        # conv2: one wide-K matmul (K = 144).
        u2 = jnp.dot(w2_ref[...], r2_ref[...],
                     preferred_element_type=jnp.float32)          # (32, 896)
        z = jnp.maximum(u2 + b2_ref[...], 0.0)
        o_ref[b, :, :] = z.astype(jnp.bfloat16)


def fused_convs(x_im2col, w1_k, b1_col, w2_k, b2_col, *, block_b):
    n = x_im2col.shape[0]
    assert n % block_b == 0
    return pl.pallas_call(
        _fused_conv_kernel,
        out_shape=jax.ShapeDtypeStruct((n, C2, P2), jnp.bfloat16),
        grid=(n // block_b,),
        in_specs=[
            pl.BlockSpec((block_b, K1, P1), lambda i: (i, 0, 0)),
            pl.BlockSpec((C1, K1), lambda i: (0, 0)),
            pl.BlockSpec((C1, 1), lambda i: (0, 0)),
            pl.BlockSpec((C2, K2), lambda i: (0, 0)),
            pl.BlockSpec((C2, 1), lambda i: (0, 0)),
        ],
        out_specs=pl.BlockSpec((block_b, C2, P2), lambda i: (i, 0, 0)),
        scratch_shapes=[pltpu.VMEM((K2, P2), jnp.bfloat16)],
        compiler_params=pltpu.CompilerParams(
            dimension_semantics=("parallel",)),
    )(x_im2col, w1_k, b1_col, w2_k, b2_col)


# ---------------------------------------------------------------------------
# Kernel 2: fully-connected layer, single grid step (whole batch, whole K)
# ---------------------------------------------------------------------------
def _fc_kernel(x_ref, w_ref, b_ref, o_ref):
    # x_ref: (M, 28672) bf16 ; w_ref: (10, 28672) bf16 lane-dense ; b_ref: (1, 10) f32
    acc = lax.dot_general(
        x_ref[...], w_ref[...],
        dimension_numbers=(((1,), (1,)), ((), ())),
        preferred_element_type=jnp.float32)                       # (M, 10)
    o_ref[...] = acc + b_ref[...]


def fc(x, w, b_row):
    m, k = x.shape
    nout = w.shape[0]
    return pl.pallas_call(
        _fc_kernel,
        out_shape=jax.ShapeDtypeStruct((m, nout), jnp.float32),
        grid=(1,),
        in_specs=[
            pl.BlockSpec((m, k), lambda i: (0, 0)),
            pl.BlockSpec((nout, k), lambda i: (0, 0)),
            pl.BlockSpec((1, nout), lambda i: (0, 0)),
        ],
        out_specs=pl.BlockSpec((m, nout), lambda i: (0, 0)),
        compiler_params=pltpu.CompilerParams(
            dimension_semantics=("arbitrary",)),
    )(x, w, b_row)


# ---------------------------------------------------------------------------
# Full forward
# ---------------------------------------------------------------------------
@functools.partial(jax.jit, static_argnames=("block_b",))
def cnn_basic_forward(x, w1, b1, w2, b2, wfc, bfc, *, block_b=4):
    """Pallas equivalent of CNNBasic.forward. x is NCHW (N, 3, 32, 32)."""
    n = x.shape[0]

    # ---- layout prep in XLA (cheap slicing/transposes, no heavy compute) ----
    # Channel-major flattened image, zero-padded along the spatial axis.
    x_flat = x.reshape(n, C0, HW * HW)                                  # (N, 3, 1024)
    x_pad = jnp.pad(x_flat, ((0, 0), (0, 0), (0, XCOLS - HW * HW)))     # (N, 3, 1040)
    # conv1 im2col, channel-major: row r = (kh*3 + kw)*3 + cin, lane-dense columns.
    x_im2col = jnp.concatenate(
        [x_pad[:, :, off:off + P1] for off in OFFS], axis=1
    ).astype(jnp.bfloat16)                                              # (N, 27, 968)

    w1_k = jnp.transpose(w1, (0, 2, 3, 1)).reshape(C1, K1).astype(jnp.bfloat16)
    b1_col = b1.reshape(C1, 1).astype(jnp.float32)
    # Fold torch's x.transpose(2,3) into a swap of conv2's spatial taps:
    # w2_k[c2, (a*3+b)*16 + c1] = w2[c2, c1, b, a]   (tap shift = a*32 + b)
    w2_k = jnp.transpose(w2, (0, 3, 2, 1)).reshape(C2, K2).astype(jnp.bfloat16)
    b2_col = b2.reshape(C2, 1).astype(jnp.float32)

    y2 = fused_convs(x_im2col, w1_k, b1_col, w2_k, b2_col, block_b=block_b)
    y2_flat = y2.reshape(n, C2 * P2)            # (N, 28672), free row-major reshape

    # FC weight relaid out (once, ~0.6 MB bf16) to the kernel's activation layout
    # [c2*896 + q] with q = w2*32 + h2; padded columns h2 = 28..31 get zero weight
    # (this is what masks the junk activation columns).
    wfc4 = wfc.reshape(NOUT, C2, 28, 28)                    # (o, c2, h2, w2)
    wfc_r = jnp.transpose(wfc4, (0, 1, 3, 2))               # (o, c2, w2, h2)
    wfc_r = jnp.pad(wfc_r, ((0, 0), (0, 0), (0, 0), (0, WPAD - 28)))
    wfc_k = wfc_r.reshape(NOUT, C2 * P2).astype(jnp.bfloat16)   # (10, 28672) lane-dense

    return fc(y2_flat, wfc_k, bfc.reshape(1, NOUT).astype(jnp.float32))   # (N, 10)


def reference_forward(x, w1, b1, w2, b2, wfc, bfc):
    """Pure-JAX (XLA conv) reference reproducing the PyTorch forward."""
    dn = ("NCHW", "OIHW", "NCHW")
    y = lax.conv_general_dilated(x, w1, (1, 1), "VALID", dimension_numbers=dn)
    y = jax.nn.relu(y + b1[None, :, None, None])
    y = jnp.swapaxes(y, 2, 3)
    y = lax.conv_general_dilated(y, w2, (1, 1), "VALID", dimension_numbers=dn)
    y = jax.nn.relu(y + b2[None, :, None, None])
    y = y.reshape(y.shape[0], -1)
    return y @ wfc.T + bfc


if __name__ == "__main__":
    key = jax.random.PRNGKey(0)
    ks = jax.random.split(key, 7)
    N = 8          # grid = N / block_b = 2 steps -> both v7x TensorCores get work
    # Deterministic synthetic parameters with the exact PyTorch shapes.
    x = jax.random.normal(ks[0], (N, 3, 32, 32), jnp.float32)
    w1 = jax.random.normal(ks[1], (16, 3, 3, 3), jnp.float32) * 0.1
    b1 = jax.random.normal(ks[2], (16,), jnp.float32) * 0.1
    w2 = jax.random.normal(ks[3], (32, 16, 3, 3), jnp.float32) * 0.05
    b2 = jax.random.normal(ks[4], (32,), jnp.float32) * 0.05
    wfc = jax.random.normal(ks[5], (10, 32 * 28 * 28), jnp.float32) * 0.01
    bfc = jax.random.normal(ks[6], (10,), jnp.float32) * 0.01

    out = cnn_basic_forward(x, w1, b1, w2, b2, wfc, bfc, block_b=4)
    out = jax.block_until_ready(out)
    assert out.shape == (N, 10)

    # The kernel runs its matmuls in bf16 (f32 accumulate), so compare against an
    # f32 reference whose inputs are bf16-rounded; tolerance covers the remaining
    # bf16 intermediate-activation rounding (per review's correctness note).
    def q(a):
        return a.astype(jnp.bfloat16).astype(jnp.float32)

    ref = reference_forward(q(x), q(w1), b1, q(w2), b2, q(wfc), bfc)
    assert jnp.allclose(out, ref, rtol=5e-2, atol=1.5e-2), "mismatch vs reference"

    print("KERNEL_OK")
</pallas_src>

<mosaic_0001>
module attributes {stable_mosaic.version = 11 : i64} {
  func.func @_fused_conv_kernel(%arg0: i32, %arg1: memref<4x27x968xbf16, #tpu.memory_space<vmem>>, %arg2: memref<16x27xbf16, #tpu.memory_space<vmem>>, %arg3: memref<16x1xf32, #tpu.memory_space<vmem>>, %arg4: memref<32x144xbf16, #tpu.memory_space<vmem>>, %arg5: memref<32x1xf32, #tpu.memory_space<vmem>>, %arg6: memref<4x32x896xbf16, #tpu.memory_space<vmem>>, %arg7: memref<144x896xbf16, #tpu.memory_space<vmem>>) attributes {dimension_semantics = [#tpu.dimension_semantics<parallel>], iteration_bounds = array<i64: 2>, scalar_prefetch = 0 : i64, scratch_operands = 1 : i64, tpu.core_type = #tpu.core_type<tc>, window_params = [{transform_indices = @transform_0, window_bounds = array<i64: 4, 27, 968>}, {pipeline_mode = #tpu.pipeline_mode<synchronous>, transform_indices = @transform_1, window_bounds = array<i64: 16, 27>}, {pipeline_mode = #tpu.pipeline_mode<synchronous>, transform_indices = @transform_2, window_bounds = array<i64: 16, 1>}, {pipeline_mode = #tpu.pipeline_mode<synchronous>, transform_indices = @transform_3, window_bounds = array<i64: 32, 144>}, {pipeline_mode = #tpu.pipeline_mode<synchronous>, transform_indices = @transform_4, window_bounds = array<i64: 32, 1>}, {transform_indices = @transform_5, window_bounds = array<i64: 4, 32, 896>}]} {
    %c0 = arith.constant 0 : index
    %c0_0 = arith.constant 0 : index
    %0 = vector.load %arg2[%c0, %c0_0] : memref<16x27xbf16, #tpu.memory_space<vmem>>, vector<16x27xbf16>
    %c0_1 = arith.constant 0 : index
    %c0_2 = arith.constant 0 : index
    %c0_3 = arith.constant 0 : index
    %1 = vector.load %arg1[%c0_1, %c0_2, %c0_3] : memref<4x27x968xbf16, #tpu.memory_space<vmem>>, vector<1x27x968xbf16>
    %2 = vector.shape_cast %1 : vector<1x27x968xbf16> to vector<27x968xbf16>
    %cst = arith.constant dense<0.000000e+00> : vector<16x968xf32>
    %3 = tpu.matmul %0, %2, %cst {dimension_numbers = #tpu.dot_dimension_numbers<[1], [0], [0], [1], [0, 0, 1, 1], [], []>} : vector<16x27xbf16>, vector<27x968xbf16>, vector<16x968xf32> -> vector<16x968xf32>
    %c0_4 = arith.constant 0 : index
    %c0_5 = arith.constant 0 : index
    %4 = vector.load %arg3[%c0_4, %c0_5] : memref<16x1xf32, #tpu.memory_space<vmem>>, vector<16x1xf32>
    %5 = vector.broadcast %4 : vector<16x1xf32> to vector<16x968xf32>
    %6 = arith.addf %3, %5 : vector<16x968xf32>
    %cst_6 = arith.constant 0.000000e+00 : f32
    %7 = vector.broadcast %cst_6 : f32 to vector<16x968xf32>
    %8 = arith.maximumf %6, %7 : vector<16x968xf32>
    %9 = arith.truncf %8 : vector<16x968xf32> to vector<16x968xbf16>
    %10 = vector.extract_strided_slice %9 {offsets = [0, 0], sizes = [16, 896], strides = [1, 1]} : vector<16x968xbf16> to vector<16x896xbf16>
    %c0_7 = arith.constant 0 : index
    %c0_8 = arith.constant 0 : index
    %11 = vector.load %arg7[%c0_7, %c0_8] : memref<144x896xbf16, #tpu.memory_space<vmem>>, vector<16x896xbf16>
    tpu.vector_store %arg7[%c0_7, %c0_8], %10 {strides = array<i32>} : memref<144x896xbf16, #tpu.memory_space<vmem>>, vector<16x896xbf16>,
    %12 = vector.extract_strided_slice %9 {offsets = [0, 1], sizes = [16, 896], strides = [1, 1]} : vector<16x968xbf16> to vector<16x896xbf16>
    %c16 = arith.constant 16 : index
    %c0_9 = arith.constant 0 : index
    %13 = vector.load %arg7[%c16, %c0_9] : memref<144x896xbf16, #tpu.memory_space<vmem>>, vector<16x896xbf16>
    tpu.vector_store %arg7[%c16, %c0_9], %12 {strides = array<i32>} : memref<144x896xbf16, #tpu.memory_space<vmem>>, vector<16x896xbf16>,
    %14 = vector.extract_strided_slice %9 {offsets = [0, 2], sizes = [16, 896], strides = [1, 1]} : vector<16x968xbf16> to vector<16x896xbf16>
    %c32 = arith.constant 32 : index
    %c0_10 = arith.constant 0 : index
    %15 = vector.load %arg7[%c32, %c0_10] : memref<144x896xbf16, #tpu.memory_space<vmem>>, vector<16x896xbf16>
    tpu.vector_store %arg7[%c32, %c0_10], %14 {strides = array<i32>} : memref<144x896xbf16, #tpu.memory_space<vmem>>, vector<16x896xbf16>,
    %16 = vector.extract_strided_slice %9 {offsets = [0, 32], sizes = [16, 896], strides = [1, 1]} : vector<16x968xbf16> to vector<16x896xbf16>
    %c48 = arith.constant 48 : index
    %c0_11 = arith.constant 0 : index
    %17 = vector.load %arg7[%c48, %c0_11] : memref<144x896xbf16, #tpu.memory_space<vmem>>, vector<16x896xbf16>
    tpu.vector_store %arg7[%c48, %c0_11], %16 {strides = array<i32>} : memref<144x896xbf16, #tpu.memory_space<vmem>>, vector<16x896xbf16>,
    %18 = vector.extract_strided_slice %9 {offsets = [0, 33], sizes = [16, 896], strides = [1, 1]} : vector<16x968xbf16> to vector<16x896xbf16>
    %c64 = arith.constant 64 : index
    %c0_12 = arith.constant 0 : index
    %19 = vector.load %arg7[%c64, %c0_12] : memref<144x896xbf16, #tpu.memory_space<vmem>>, vector<16x896xbf16>
    tpu.vector_store %arg7[%c64, %c0_12], %18 {strides = array<i32>} : memref<144x896xbf16, #tpu.memory_space<vmem>>, vector<16x896xbf16>,
    %20 = vector.extract_strided_slice %9 {offsets = [0, 34], sizes = [16, 896], strides = [1, 1]} : vector<16x968xbf16> to vector<16x896xbf16>
    %c80 = arith.constant 80 : index
    %c0_13 = arith.constant 0 : index
    %21 = vector.load %arg7[%c80, %c0_13] : memref<144x896xbf16, #tpu.memory_space<vmem>>, vector<16x896xbf16>
    tpu.vector_store %arg7[%c80, %c0_13], %20 {strides = array<i32>} : memref<144x896xbf16, #tpu.memory_space<vmem>>, vector<16x896xbf16>,
    %22 = vector.extract_strided_slice %9 {offsets = [0, 64], sizes = [16, 896], strides = [1, 1]} : vector<16x968xbf16> to vector<16x896xbf16>
    %c96 = arith.constant 96 : index
    %c0_14 = arith.constant 0 : index
    %23 = vector.load %arg7[%c96, %c0_14] : memref<144x896xbf16, #tpu.memory_space<vmem>>, vector<16x896xbf16>
    tpu.vector_store %arg7[%c96, %c0_14], %22 {strides = array<i32>} : memref<144x896xbf16, #tpu.memory_space<vmem>>, vector<16x896xbf16>,
    %24 = vector.extract_strided_slice %9 {offsets = [0, 65], sizes = [16, 896], strides = [1, 1]} : vector<16x968xbf16> to vector<16x896xbf16>
    %c112 = arith.constant 112 : index
    %c0_15 = arith.constant 0 : index
    %25 = vector.load %arg7[%c112, %c0_15] : memref<144x896xbf16, #tpu.memory_space<vmem>>, vector<16x896xbf16>
    tpu.vector_store %arg7[%c112, %c0_15], %24 {strides = array<i32>} : memref<144x896xbf16, #tpu.memory_space<vmem>>, vector<16x896xbf16>,
    %26 = vector.extract_strided_slice %9 {offsets = [0, 66], sizes = [16, 896], strides = [1, 1]} : vector<16x968xbf16> to vector<16x896xbf16>
    %c128 = arith.constant 128 : index
    %c0_16 = arith.constant 0 : index
    %27 = vector.load %arg7[%c128, %c0_16] : memref<144x896xbf16, #tpu.memory_space<vmem>>, vector<16x896xbf16>
    tpu.vector_store %arg7[%c128, %c0_16], %26 {strides = array<i32>} : memref<144x896xbf16, #tpu.memory_space<vmem>>, vector<16x896xbf16>,
    %c0_17 = arith.constant 0 : index
    %c0_18 = arith.constant 0 : index
    %28 = vector.load %arg4[%c0_17, %c0_18] : memref<32x144xbf16, #tpu.memory_space<vmem>>, vector<32x144xbf16>
    %c0_19 = arith.constant 0 : index
    %c0_20 = arith.constant 0 : index
    %29 = vector.load %arg7[%c0_19, %c0_20] : memref<144x896xbf16, #tpu.memory_space<vmem>>, vector<144x896xbf16>
    %cst_21 = arith.constant dense<0.000000e+00> : vector<32x896xf32>
    %30 = tpu.matmul %28, %29, %cst_21 {dimension_numbers = #tpu.dot_dimension_numbers<[1], [0], [0], [1], [0, 0, 1, 1], [], []>} : vector<32x144xbf16>, vector<144x896xbf16>, vector<32x896xf32> -> vector<32x896xf32>
    %c0_22 = arith.constant 0 : index
    %c0_23 = arith.constant 0 : index
    %31 = vector.load %arg5[%c0_22, %c0_23] : memref<32x1xf32, #tpu.memory_space<vmem>>, vector<32x1xf32>
    %32 = vector.broadcast %31 : vector<32x1xf32> to vector<32x896xf32>
    %33 = arith.addf %30, %32 : vector<32x896xf32>
    %cst_24 = arith.constant 0.000000e+00 : f32
    %34 = vector.broadcast %cst_24 : f32 to vector<32x896xf32>
    %35 = arith.maximumf %33, %34 : vector<32x896xf32>
    %36 = arith.truncf %35 : vector<32x896xf32> to vector<32x896xbf16>
    %c0_25 = arith.constant 0 : index
    %c0_26 = arith.constant 0 : index
    %c0_27 = arith.constant 0 : index
    %37 = vector.load %arg6[%c0_25, %c0_26, %c0_27] : memref<4x32x896xbf16, #tpu.memory_space<vmem>>, vector<1x32x896xbf16>
    %38 = vector.shape_cast %37 : vector<1x32x896xbf16> to vector<32x896xbf16>
    %39 = vector.shape_cast %36 : vector<32x896xbf16> to vector<1x32x896xbf16>
    tpu.vector_store %arg6[%c0_25, %c0_26, %c0_27], %39 {strides = array<i32>} : memref<4x32x896xbf16, #tpu.memory_space<vmem>>, vector<1x32x896xbf16>,
    %c0_28 = arith.constant 0 : index
    %c0_29 = arith.constant 0 : index
    %40 = vector.load %arg2[%c0_28, %c0_29] : memref<16x27xbf16, #tpu.memory_space<vmem>>, vector<16x27xbf16>
    %c1 = arith.constant 1 : index
    %c0_30 = arith.constant 0 : index
    %c0_31 = arith.constant 0 : index
    %41 = vector.load %arg1[%c1, %c0_30, %c0_31] : memref<4x27x968xbf16, #tpu.memory_space<vmem>>, vector<1x27x968xbf16>
    %42 = vector.shape_cast %41 : vector<1x27x968xbf16> to vector<27x968xbf16>
    %cst_32 = arith.constant dense<0.000000e+00> : vector<16x968xf32>
    %43 = tpu.matmul %40, %42, %cst_32 {dimension_numbers = #tpu.dot_dimension_numbers<[1], [0], [0], [1], [0, 0, 1, 1], [], []>} : vector<16x27xbf16>, vector<27x968xbf16>, vector<16x968xf32> -> vector<16x968xf32>
    %c0_33 = arith.constant 0 : index
    %c0_34 = arith.constant 0 : index
    %44 = vector.load %arg3[%c0_33, %c0_34] : memref<16x1xf32, #tpu.memory_space<vmem>>, vector<16x1xf32>
    %45 = vector.broadcast %44 : vector<16x1xf32> to vector<16x968xf32>
    %46 = arith.addf %43, %45 : vector<16x968xf32>
    %cst_35 = arith.constant 0.000000e+00 : f32
    %47 = vector.broadcast %cst_35 : f32 to vector<16x968xf32>
    %48 = arith.maximumf %46, %47 : vector<16x968xf32>
    %49 = arith.truncf %48 : vector<16x968xf32> to vector<16x968xbf16>
    %50 = vector.extract_strided_slice %49 {offsets = [0, 0], sizes = [16, 896], strides = [1, 1]} : vector<16x968xbf16> to vector<16x896xbf16>
    %c0_36 = arith.constant 0 : index
    %c0_37 = arith.constant 0 : index
    %51 = vector.load %arg7[%c0_36, %c0_37] : memref<144x896xbf16, #tpu.memory_space<vmem>>, vector<16x896xbf16>
    tpu.vector_store %arg7[%c0_36, %c0_37], %50 {strides = array<i32>} : memref<144x896xbf16, #tpu.memory_space<vmem>>, vector<16x896xbf16>,
    %52 = vector.extract_strided_slice %49 {offsets = [0, 1], sizes = [16, 896], strides = [1, 1]} : vector<16x968xbf16> to vector<16x896xbf16>
    %c16_38 = arith.constant 16 : index
    %c0_39 = arith.constant 0 : index
    %53 = vector.load %arg7[%c16_38, %c0_39] : memref<144x896xbf16, #tpu.memory_space<vmem>>, vector<16x896xbf16>
    tpu.vector_store %arg7[%c16_38, %c0_39], %52 {strides = array<i32>} : memref<144x896xbf16, #tpu.memory_space<vmem>>, vector<16x896xbf16>,
    %54 = vector.extract_strided_slice %49 {offsets = [0, 2], sizes = [16, 896], strides = [1, 1]} : vector<16x968xbf16> to vector<16x896xbf16>
    %c32_40 = arith.constant 32 : index
    %c0_41 = arith.constant 0 : index
    %55 = vector.load %arg7[%c32_40, %c0_41] : memref<144x896xbf16, #tpu.memory_space<vmem>>, vector<16x896xbf16>
    tpu.vector_store %arg7[%c32_40, %c0_41], %54 {strides = array<i32>} : memref<144x896xbf16, #tpu.memory_space<vmem>>, vector<16x896xbf16>,
    %56 = vector.extract_strided_slice %49 {offsets = [0, 32], sizes = [16, 896], strides = [1, 1]} : vector<16x968xbf16> to vector<16x896xbf16>
    %c48_42 = arith.constant 48 : index
    %c0_43 = arith.constant 0 : index
    %57 = vector.load %arg7[%c48_42, %c0_43] : memref<144x896xbf16, #tpu.memory_space<vmem>>, vector<16x896xbf16>
    tpu.vector_store %arg7[%c48_42, %c0_43], %56 {strides = array<i32>} : memref<144x896xbf16, #tpu.memory_space<vmem>>, vector<16x896xbf16>,
    %58 = vector.extract_strided_slice %49 {offsets = [0, 33], sizes = [16, 896], strides = [1, 1]} : vector<16x968xbf16> to vector<16x896xbf16>
    %c64_44 = arith.constant 64 : index
    %c0_45 = arith.constant 0 : index
    %59 = vector.load %arg7[%c64_44, %c0_45] : memref<144x896xbf16, #tpu.memory_space<vmem>>, vector<16x896xbf16>
    tpu.vector_store %arg7[%c64_44, %c0_45], %58 {strides = array<i32>} : memref<144x896xbf16, #tpu.memory_space<vmem>>, vector<16x896xbf16>,
    %60 = vector.extract_strided_slice %49 {offsets = [0, 34], sizes = [16, 896], strides = [1, 1]} : vector<16x968xbf16> to vector<16x896xbf16>
    %c80_46 = arith.constant 80 : index
    %c0_47 = arith.constant 0 : index
    %61 = vector.load %arg7[%c80_46, %c0_47] : memref<144x896xbf16, #tpu.memory_space<vmem>>, vector<16x896xbf16>
    tpu.vector_store %arg7[%c80_46, %c0_47], %60 {strides = array<i32>} : memref<144x896xbf16, #tpu.memory_space<vmem>>, vector<16x896xbf16>,
    %62 = vector.extract_strided_slice %49 {offsets = [0, 64], sizes = [16, 896], strides = [1, 1]} : vector<16x968xbf16> to vector<16x896xbf16>
    %c96_48 = arith.constant 96 : index
    %c0_49 = arith.constant 0 : index
    %63 = vector.load %arg7[%c96_48, %c0_49] : memref<144x896xbf16, #tpu.memory_space<vmem>>, vector<16x896xbf16>
    tpu.vector_store %arg7[%c96_48, %c0_49], %62 {strides = array<i32>} : memref<144x896xbf16, #tpu.memory_space<vmem>>, vector<16x896xbf16>,
    %64 = vector.extract_strided_slice %49 {offsets = [0, 65], sizes = [16, 896], strides = [1, 1]} : vector<16x968xbf16> to vector<16x896xbf16>
    %c112_50 = arith.constant 112 : index
    %c0_51 = arith.constant 0 : index
    %65 = vector.load %arg7[%c112_50, %c0_51] : memref<144x896xbf16, #tpu.memory_space<vmem>>, vector<16x896xbf16>
    tpu.vector_store %arg7[%c112_50, %c0_51], %64 {strides = array<i32>} : memref<144x896xbf16, #tpu.memory_space<vmem>>, vector<16x896xbf16>,
    %66 = vector.extract_strided_slice %49 {offsets = [0, 66], sizes = [16, 896], strides = [1, 1]} : vector<16x968xbf16> to vector<16x896xbf16>
    %c128_52 = arith.constant 128 : index
    %c0_53 = arith.constant 0 : index
    %67 = vector.load %arg7[%c128_52, %c0_53] : memref<144x896xbf16, #tpu.memory_space<vmem>>, vector<16x896xbf16>
    tpu.vector_store %arg7[%c128_52, %c0_53], %66 {strides = array<i32>} : memref<144x896xbf16, #tpu.memory_space<vmem>>, vector<16x896xbf16>,
    %c0_54 = arith.constant 0 : index
    %c0_55 = arith.constant 0 : index
    %68 = vector.load %arg4[%c0_54, %c0_55] : memref<32x144xbf16, #tpu.memory_space<vmem>>, vector<32x144xbf16>
    %c0_56 = arith.constant 0 : index
    %c0_57 = arith.constant 0 : index
    %69 = vector.load %arg7[%c0_56, %c0_57] : memref<144x896xbf16, #tpu.memory_space<vmem>>, vector<144x896xbf16>
    %cst_58 = arith.constant dense<0.000000e+00> : vector<32x896xf32>
    %70 = tpu.matmul %68, %69, %cst_58 {dimension_numbers = #tpu.dot_dimension_numbers<[1], [0], [0], [1], [0, 0, 1, 1], [], []>} : vector<32x144xbf16>, vector<144x896xbf16>, vector<32x896xf32> -> vector<32x896xf32>
    %c0_59 = arith.constant 0 : index
    %c0_60 = arith.constant 0 : index
    %71 = vector.load %arg5[%c0_59, %c0_60] : memref<32x1xf32, #tpu.memory_space<vmem>>, vector<32x1xf32>
    %72 = vector.broadcast %71 : vector<32x1xf32> to vector<32x896xf32>
    %73 = arith.addf %70, %72 : vector<32x896xf32>
    %cst_61 = arith.constant 0.000000e+00 : f32
    %74 = vector.broadcast %cst_61 : f32 to vector<32x896xf32>
    %75 = arith.maximumf %73, %74 : vector<32x896xf32>
    %76 = arith.truncf %75 : vector<32x896xf32> to vector<32x896xbf16>
    %c1_62 = arith.constant 1 : index
    %c0_63 = arith.constant 0 : index
    %c0_64 = arith.constant 0 : index
    %77 = vector.load %arg6[%c1_62, %c0_63, %c0_64] : memref<4x32x896xbf16, #tpu.memory_space<vmem>>, vector<1x32x896xbf16>
    %78 = vector.shape_cast %77 : vector<1x32x896xbf16> to vector<32x896xbf16>
    %79 = vector.shape_cast %76 : vector<32x896xbf16> to vector<1x32x896xbf16>
    tpu.vector_store %arg6[%c1_62, %c0_63, %c0_64], %79 {strides = array<i32>} : memref<4x32x896xbf16, #tpu.memory_space<vmem>>, vector<1x32x896xbf16>,
    %c0_65 = arith.constant 0 : index
    %c0_66 = arith.constant 0 : index
    %80 = vector.load %arg2[%c0_65, %c0_66] : memref<16x27xbf16, #tpu.memory_space<vmem>>, vector<16x27xbf16>
    %c2 = arith.constant 2 : index
    %c0_67 = arith.constant 0 : index
    %c0_68 = arith.constant 0 : index
    %81 = vector.load %arg1[%c2, %c0_67, %c0_68] : memref<4x27x968xbf16, #tpu.memory_space<vmem>>, vector<1x27x968xbf16>
    %82 = vector.shape_cast %81 : vector<1x27x968xbf16> to vector<27x968xbf16>
    %cst_69 = arith.constant dense<0.000000e+00> : vector<16x968xf32>
    %83 = tpu.matmul %80, %82, %cst_69 {dimension_numbers = #tpu.dot_dimension_numbers<[1], [0], [0], [1], [0, 0, 1, 1], [], []>} : vector<16x27xbf16>, vector<27x968xbf16>, vector<16x968xf32> -> vector<16x968xf32>
    %c0_70 = arith.constant 0 : index
    %c0_71 = arith.constant 0 : index
    %84 = vector.load %arg3[%c0_70, %c0_71] : memref<16x1xf32, #tpu.memory_space<vmem>>, vector<16x1xf32>
    %85 = vector.broadcast %84 : vector<16x1xf32> to vector<16x968xf32>
    %86 = arith.addf %83, %85 : vector<16x968xf32>
    %cst_72 = arith.constant 0.000000e+00 : f32
    %87 = vector.broadcast %cst_72 : f32 to vector<16x968xf32>
    %88 = arith.maximumf %86, %87 : vector<16x968xf32>
    %89 = arith.truncf %88 : vector<16x968xf32> to vector<16x968xbf16>
    %90 = vector.extract_strided_slice %89 {offsets = [0, 0], sizes = [16, 896], strides = [1, 1]} : vector<16x968xbf16> to vector<16x896xbf16>
    %c0_73 = arith.constant 0 : index
    %c0_74 = arith.constant 0 : index
    %91 = vector.load %arg7[%c0_73, %c0_74] : memref<144x896xbf16, #tpu.memory_space<vmem>>, vector<16x896xbf16>
    tpu.vector_store %arg7[%c0_73, %c0_74], %90 {strides = array<i32>} : memref<144x896xbf16, #tpu.memory_space<vmem>>, vector<16x896xbf16>,
    %92 = vector.extract_strided_slice %89 {offsets = [0, 1], sizes = [16, 896], strides = [1, 1]} : vector<16x968xbf16> to vector<16x896xbf16>
    %c16_75 = arith.constant 16 : index
    %c0_76 = arith.constant 0 : index
    %93 = vector.load %arg7[%c16_75, %c0_76] : memref<144x896xbf16, #tpu.memory_space<vmem>>, vector<16x896xbf16>
    tpu.vector_store %arg7[%c16_75, %c0_76], %92 {strides = array<i32>} : memref<144x896xbf16, #tpu.memory_space<vmem>>, vector<16x896xbf16>,
    %94 = vector.extract_strided_slice %89 {offsets = [0, 2], sizes = [16, 896], strides = [1, 1]} : vector<16x968xbf16> to vector<16x896xbf16>
    %c32_77 = arith.constant 32 : index
    %c0_78 = arith.constant 0 : index
    %95 = vector.load %arg7[%c32_77, %c0_78] : memref<144x896xbf16, #tpu.memory_space<vmem>>, vector<16x896xbf16>
    tpu.vector_store %arg7[%c32_77, %c0_78], %94 {strides = array<i32>} : memref<144x896xbf16, #tpu.memory_space<vmem>>, vector<16x896xbf16>,
    %96 = vector.extract_strided_slice %89 {offsets = [0, 32], sizes = [16, 896], strides = [1, 1]} : vector<16x968xbf16> to vector<16x896xbf16>
    %c48_79 = arith.constant 48 : index
    %c0_80 = arith.constant 0 : index
    %97 = vector.load %arg7[%c48_79, %c0_80] : memref<144x896xbf16, #tpu.memory_space<vmem>>, vector<16x896xbf16>
    tpu.vector_store %arg7[%c48_79, %c0_80], %96 {strides = array<i32>} : memref<144x896xbf16, #tpu.memory_space<vmem>>, vector<16x896xbf16>,
    %98 = vector.extract_strided_slice %89 {offsets = [0, 33], sizes = [16, 896], strides = [1, 1]} : vector<16x968xbf16> to vector<16x896xbf16>
    %c64_81 = arith.constant 64 : index
    %c0_82 = arith.constant 0 : index
    %99 = vector.load %arg7[%c64_81, %c0_82] : memref<144x896xbf16, #tpu.memory_space<vmem>>, vector<16x896xbf16>
    tpu.vector_store %arg7[%c64_81, %c0_82], %98 {strides = array<i32>} : memref<144x896xbf16, #tpu.memory_space<vmem>>, vector<16x896xbf16>,
    %100 = vector.extract_strided_slice %89 {offsets = [0, 34], sizes = [16, 896], strides = [1, 1]} : vector<16x968xbf16> to vector<16x896xbf16>
    %c80_83 = arith.constant 80 : index
    %c0_84 = arith.constant 0 : index
    %101 = vector.load %arg7[%c80_83, %c0_84] : memref<144x896xbf16, #tpu.memory_space<vmem>>, vector<16x896xbf16>
    tpu.vector_store %arg7[%c80_83, %c0_84], %100 {strides = array<i32>} : memref<144x896xbf16, #tpu.memory_space<vmem>>, vector<16x896xbf16>,
    %102 = vector.extract_strided_slice %89 {offsets = [0, 64], sizes = [16, 896], strides = [1, 1]} : vector<16x968xbf16> to vector<16x896xbf16>
    %c96_85 = arith.constant 96 : index
    %c0_86 = arith.constant 0 : index
    %103 = vector.load %arg7[%c96_85, %c0_86] : memref<144x896xbf16, #tpu.memory_space<vmem>>, vector<16x896xbf16>
    tpu.vector_store %arg7[%c96_85, %c0_86], %102 {strides = array<i32>} : memref<144x896xbf16, #tpu.memory_space<vmem>>, vector<16x896xbf16>,
    %104 = vector.extract_strided_slice %89 {offsets = [0, 65], sizes = [16, 896], strides = [1, 1]} : vector<16x968xbf16> to vector<16x896xbf16>
    %c112_87 = arith.constant 112 : index
    %c0_88 = arith.constant 0 : index
    %105 = vector.load %arg7[%c112_87, %c0_88] : memref<144x896xbf16, #tpu.memory_space<vmem>>, vector<16x896xbf16>
    tpu.vector_store %arg7[%c112_87, %c0_88], %104 {strides = array<i32>} : memref<144x896xbf16, #tpu.memory_space<vmem>>, vector<16x896xbf16>,
    %106 = vector.extract_strided_slice %89 {offsets = [0, 66], sizes = [16, 896], strides = [1, 1]} : vector<16x968xbf16> to vector<16x896xbf16>
    %c128_89 = arith.constant 128 : index
    %c0_90 = arith.constant 0 : index
    %107 = vector.load %arg7[%c128_89, %c0_90] : memref<144x896xbf16, #tpu.memory_space<vmem>>, vector<16x896xbf16>
    tpu.vector_store %arg7[%c128_89, %c0_90], %106 {strides = array<i32>} : memref<144x896xbf16, #tpu.memory_space<vmem>>, vector<16x896xbf16>,
    %c0_91 = arith.constant 0 : index
    %c0_92 = arith.constant 0 : index
    %108 = vector.load %arg4[%c0_91, %c0_92] : memref<32x144xbf16, #tpu.memory_space<vmem>>, vector<32x144xbf16>
    %c0_93 = arith.constant 0 : index
    %c0_94 = arith.constant 0 : index
    %109 = vector.load %arg7[%c0_93, %c0_94] : memref<144x896xbf16, #tpu.memory_space<vmem>>, vector<144x896xbf16>
    %cst_95 = arith.constant dense<0.000000e+00> : vector<32x896xf32>
    %110 = tpu.matmul %108, %109, %cst_95 {dimension_numbers = #tpu.dot_dimension_numbers<[1], [0], [0], [1], [0, 0, 1, 1], [], []>} : vector<32x144xbf16>, vector<144x896xbf16>, vector<32x896xf32> -> vector<32x896xf32>
    %c0_96 = arith.constant 0 : index
    %c0_97 = arith.constant 0 : index
    %111 = vector.load %arg5[%c0_96, %c0_97] : memref<32x1xf32, #tpu.memory_space<vmem>>, vector<32x1xf32>
    %112 = vector.broadcast %111 : vector<32x1xf32> to vector<32x896xf32>
    %113 = arith.addf %110, %112 : vector<32x896xf32>
    %cst_98 = arith.constant 0.000000e+00 : f32
    %114 = vector.broadcast %cst_98 : f32 to vector<32x896xf32>
    %115 = arith.maximumf %113, %114 : vector<32x896xf32>
    %116 = arith.truncf %115 : vector<32x896xf32> to vector<32x896xbf16>
    %c2_99 = arith.constant 2 : index
    %c0_100 = arith.constant 0 : index
    %c0_101 = arith.constant 0 : index
    %117 = vector.load %arg6[%c2_99, %c0_100, %c0_101] : memref<4x32x896xbf16, #tpu.memory_space<vmem>>, vector<1x32x896xbf16>
    %118 = vector.shape_cast %117 : vector<1x32x896xbf16> to vector<32x896xbf16>
    %119 = vector.shape_cast %116 : vector<32x896xbf16> to vector<1x32x896xbf16>
    tpu.vector_store %arg6[%c2_99, %c0_100, %c0_101], %119 {strides = array<i32>} : memref<4x32x896xbf16, #tpu.memory_space<vmem>>, vector<1x32x896xbf16>,
    %c0_102 = arith.constant 0 : index
    %c0_103 = arith.constant 0 : index
    %120 = vector.load %arg2[%c0_102, %c0_103] : memref<16x27xbf16, #tpu.memory_space<vmem>>, vector<16x27xbf16>
    %c3 = arith.constant 3 : index
    %c0_104 = arith.constant 0 : index
    %c0_105 = arith.constant 0 : index
    %121 = vector.load %arg1[%c3, %c0_104, %c0_105] : memref<4x27x968xbf16, #tpu.memory_space<vmem>>, vector<1x27x968xbf16>
    %122 = vector.shape_cast %121 : vector<1x27x968xbf16> to vector<27x968xbf16>
    %cst_106 = arith.constant dense<0.000000e+00> : vector<16x968xf32>
    %123 = tpu.matmul %120, %122, %cst_106 {dimension_numbers = #tpu.dot_dimension_numbers<[1], [0], [0], [1], [0, 0, 1, 1], [], []>} : vector<16x27xbf16>, vector<27x968xbf16>, vector<16x968xf32> -> vector<16x968xf32>
    %c0_107 = arith.constant 0 : index
    %c0_108 = arith.constant 0 : index
    %124 = vector.load %arg3[%c0_107, %c0_108] : memref<16x1xf32, #tpu.memory_space<vmem>>, vector<16x1xf32>
    %125 = vector.broadcast %124 : vector<16x1xf32> to vector<16x968xf32>
    %126 = arith.addf %123, %125 : vector<16x968xf32>
    %cst_109 = arith.constant 0.000000e+00 : f32
    %127 = vector.broadcast %cst_109 : f32 to vector<16x968xf32>
    %128 = arith.maximumf %126, %127 : vector<16x968xf32>
    %129 = arith.truncf %128 : vector<16x968xf32> to vector<16x968xbf16>
    %130 = vector.extract_strided_slice %129 {offsets = [0, 0], sizes = [16, 896], strides = [1, 1]} : vector<16x968xbf16> to vector<16x896xbf16>
    %c0_110 = arith.constant 0 : index
    %c0_111 = arith.constant 0 : index
    %131 = vector.load %arg7[%c0_110, %c0_111] : memref<144x896xbf16, #tpu.memory_space<vmem>>, vector<16x896xbf16>
    tpu.vector_store %arg7[%c0_110, %c0_111], %130 {strides = array<i32>} : memref<144x896xbf16, #tpu.memory_space<vmem>>, vector<16x896xbf16>,
    %132 = vector.extract_strided_slice %129 {offsets = [0, 1], sizes = [16, 896], strides = [1, 1]} : vector<16x968xbf16> to vector<16x896xbf16>
    %c16_112 = arith.constant 16 : index
    %c0_113 = arith.constant 0 : index
    %133 = vector.load %arg7[%c16_112, %c0_113] : memref<144x896xbf16, #tpu.memory_space<vmem>>, vector<16x896xbf16>
    tpu.vector_store %arg7[%c16_112, %c0_113], %132 {strides = array<i32>} : memref<144x896xbf16, #tpu.memory_space<vmem>>, vector<16x896xbf16>,
    %134 = vector.extract_strided_slice %129 {offsets = [0, 2], sizes = [16, 896], strides = [1, 1]} : vector<16x968xbf16> to vector<16x896xbf16>
    %c32_114 = arith.constant 32 : index
    %c0_115 = arith.constant 0 : index
    %135 = vector.load %arg7[%c32_114, %c0_115] : memref<144x896xbf16, #tpu.memory_space<vmem>>, vector<16x896xbf16>
    tpu.vector_store %arg7[%c32_114, %c0_115], %134 {strides = array<i32>} : memref<144x896xbf16, #tpu.memory_space<vmem>>, vector<16x896xbf16>,
    %136 = vector.extract_strided_slice %129 {offsets = [0, 32], sizes = [16, 896], strides = [1, 1]} : vector<16x968xbf16> to vector<16x896xbf16>
    %c48_116 = arith.constant 48 : index
    %c0_117 = arith.constant 0 : index
    %137 = vector.load %arg7[%c48_116, %c0_117] : memref<144x896xbf16, #tpu.memory_space<vmem>>, vector<16x896xbf16>
    tpu.vector_store %arg7[%c48_116, %c0_117], %136 {strides = array<i32>} : memref<144x896xbf16, #tpu.memory_space<vmem>>, vector<16x896xbf16>,
    %138 = vector.extract_strided_slice %129 {offsets = [0, 33], sizes = [16, 896], strides = [1, 1]} : vector<16x968xbf16> to vector<16x896xbf16>
    %c64_118 = arith.constant 64 : index
    %c0_119 = arith.constant 0 : index
    %139 = vector.load %arg7[%c64_118, %c0_119] : memref<144x896xbf16, #tpu.memory_space<vmem>>, vector<16x896xbf16>
    tpu.vector_store %arg7[%c64_118, %c0_119], %138 {strides = array<i32>} : memref<144x896xbf16, #tpu.memory_space<vmem>>, vector<16x896xbf16>,
    %140 = vector.extract_strided_slice %129 {offsets = [0, 34], sizes = [16, 896], strides = [1, 1]} : vector<16x968xbf16> to vector<16x896xbf16>
    %c80_120 = arith.constant 80 : index
    %c0_121 = arith.constant 0 : index
    %141 = vector.load %arg7[%c80_120, %c0_121] : memref<144x896xbf16, #tpu.memory_space<vmem>>, vector<16x896xbf16>
    tpu.vector_store %arg7[%c80_120, %c0_121], %140 {strides = array<i32>} : memref<144x896xbf16, #tpu.memory_space<vmem>>, vector<16x896xbf16>,
    %142 = vector.extract_strided_slice %129 {offsets = [0, 64], sizes = [16, 896], strides = [1, 1]} : vector<16x968xbf16> to vector<16x896xbf16>
    %c96_122 = arith.constant 96 : index
    %c0_123 = arith.constant 0 : index
    %143 = vector.load %arg7[%c96_122, %c0_123] : memref<144x896xbf16, #tpu.memory_space<vmem>>, vector<16x896xbf16>
    tpu.vector_store %arg7[%c96_122, %c0_123], %142 {strides = array<i32>} : memref<144x896xbf16, #tpu.memory_space<vmem>>, vector<16x896xbf16>,
    %144 = vector.extract_strided_slice %129 {offsets = [0, 65], sizes = [16, 896], strides = [1, 1]} : vector<16x968xbf16> to vector<16x896xbf16>
    %c112_124 = arith.constant 112 : index
    %c0_125 = arith.constant 0 : index
    %145 = vector.load %arg7[%c112_124, %c0_125] : memref<144x896xbf16, #tpu.memory_space<vmem>>, vector<16x896xbf16>
    tpu.vector_store %arg7[%c112_124, %c0_125], %144 {strides = array<i32>} : memref<144x896xbf16, #tpu.memory_space<vmem>>, vector<16x896xbf16>,
    %146 = vector.extract_strided_slice %129 {offsets = [0, 66], sizes = [16, 896], strides = [1, 1]} : vector<16x968xbf16> to vector<16x896xbf16>
    %c128_126 = arith.constant 128 : index
    %c0_127 = arith.constant 0 : index
    %147 = vector.load %arg7[%c128_126, %c0_127] : memref<144x896xbf16, #tpu.memory_space<vmem>>, vector<16x896xbf16>
    tpu.vector_store %arg7[%c128_126, %c0_127], %146 {strides = array<i32>} : memref<144x896xbf16, #tpu.memory_space<vmem>>, vector<16x896xbf16>,
    %c0_128 = arith.constant 0 : index
    %c0_129 = arith.constant 0 : index
    %148 = vector.load %arg4[%c0_128, %c0_129] : memref<32x144xbf16, #tpu.memory_space<vmem>>, vector<32x144xbf16>
    %c0_130 = arith.constant 0 : index
    %c0_131 = arith.constant 0 : index
    %149 = vector.load %arg7[%c0_130, %c0_131] : memref<144x896xbf16, #tpu.memory_space<vmem>>, vector<144x896xbf16>
    %cst_132 = arith.constant dense<0.000000e+00> : vector<32x896xf32>
    %150 = tpu.matmul %148, %149, %cst_132 {dimension_numbers = #tpu.dot_dimension_numbers<[1], [0], [0], [1], [0, 0, 1, 1], [], []>} : vector<32x144xbf16>, vector<144x896xbf16>, vector<32x896xf32> -> vector<32x896xf32>
    %c0_133 = arith.constant 0 : index
    %c0_134 = arith.constant 0 : index
    %151 = vector.load %arg5[%c0_133, %c0_134] : memref<32x1xf32, #tpu.memory_space<vmem>>, vector<32x1xf32>
    %152 = vector.broadcast %151 : vector<32x1xf32> to vector<32x896xf32>
    %153 = arith.addf %150, %152 : vector<32x896xf32>
    %cst_135 = arith.constant 0.000000e+00 : f32
    %154 = vector.broadcast %cst_135 : f32 to vector<32x896xf32>
    %155 = arith.maximumf %153, %154 : vector<32x896xf32>
    %156 = arith.truncf %155 : vector<32x896xf32> to vector<32x896xbf16>
    %c3_136 = arith.constant 3 : index
    %c0_137 = arith.constant 0 : index
    %c0_138 = arith.constant 0 : index
    %157 = vector.load %arg6[%c3_136, %c0_137, %c0_138] : memref<4x32x896xbf16, #tpu.memory_space<vmem>>, vector<1x32x896xbf16>
    %158 = vector.shape_cast %157 : vector<1x32x896xbf16> to vector<32x896xbf16>
    %159 = vector.shape_cast %156 : vector<32x896xbf16> to vector<1x32x896xbf16>
    tpu.vector_store %arg6[%c3_136, %c0_137, %c0_138], %159 {strides = array<i32>} : memref<4x32x896xbf16, #tpu.memory_space<vmem>>, vector<1x32x896xbf16>,
    return
  }
  func.func @transform_0(%arg0: i32) -> (i32, i32, i32) {
    %c0_i32 = arith.constant 0 : i32
    %c0_i32_0 = arith.constant 0 : i32
    %c0_i32_1 = arith.constant 0 : i32
    return %arg0, %c0_i32, %c0_i32_0 : i32, i32, i32
  }
  func.func @transform_1(%arg0: i32) -> (i32, i32) {
    %c0_i32 = arith.constant 0 : i32
    %c0_i32_0 = arith.constant 0 : i32
    %c0_i32_1 = arith.constant 0 : i32
    return %c0_i32, %c0_i32_0 : i32, i32
  }
  func.func @transform_2(%arg0: i32) -> (i32, i32) {
    %c0_i32 = arith.constant 0 : i32
    %c0_i32_0 = arith.constant 0 : i32
    %c0_i32_1 = arith.constant 0 : i32
    return %c0_i32, %c0_i32_0 : i32, i32
  }
  func.func @transform_3(%arg0: i32) -> (i32, i32) {
    %c0_i32 = arith.constant 0 : i32
    %c0_i32_0 = arith.constant 0 : i32
    %c0_i32_1 = arith.constant 0 : i32
    return %c0_i32, %c0_i32_0 : i32, i32
  }
  func.func @transform_4(%arg0: i32) -> (i32, i32) {
    %c0_i32 = arith.constant 0 : i32
    %c0_i32_0 = arith.constant 0 : i32
    %c0_i32_1 = arith.constant 0 : i32
    return %c0_i32, %c0_i32_0 : i32, i32
  }
  func.func @transform_5(%arg0: i32) -> (i32, i32, i32) {
    %c0_i32 = arith.constant 0 : i32
    %c0_i32_0 = arith.constant 0 : i32
    %c0_i32_1 = arith.constant 0 : i32
    return %arg0, %c0_i32, %c0_i32_0 : i32, i32, i32
  }
}

module attributes {stable_mosaic.version = 11 : i64} {
  func.func @_fc_kernel(%arg0: i32, %arg1: memref<8x28672xbf16, #tpu.memory_space<vmem>>, %arg2: memref<10x28672xbf16, #tpu.memory_space<vmem>>, %arg3: memref<1x10xf32, #tpu.memory_space<vmem>>, %arg4: memref<8x10xf32, #tpu.memory_space<vmem>>) attributes {dimension_semantics = [#tpu.dimension_semantics<arbitrary>], iteration_bounds = array<i64: 1>, scalar_prefetch = 0 : i64, scratch_operands = 0 : i64, tpu.core_type = #tpu.core_type<tc>, window_params = [{pipeline_mode = #tpu.pipeline_mode<synchronous>, transform_indices = @transform_0, window_bounds = array<i64: 8, 28672>}, {pipeline_mode = #tpu.pipeline_mode<synchronous>, transform_indices = @transform_1, window_bounds = array<i64: 10, 28672>}, {pipeline_mode = #tpu.pipeline_mode<synchronous>, transform_indices = @transform_2, window_bounds = array<i64: 1, 10>}, {pipeline_mode = #tpu.pipeline_mode<synchronous>, transform_indices = @transform_3, window_bounds = array<i64: 8, 10>}]} {
    %c0 = arith.constant 0 : index
    %c0_0 = arith.constant 0 : index
    %0 = vector.load %arg1[%c0, %c0_0] : memref<8x28672xbf16, #tpu.memory_space<vmem>>, vector<8x28672xbf16>
    %c0_1 = arith.constant 0 : index
    %c0_2 = arith.constant 0 : index
    %1 = vector.load %arg2[%c0_1, %c0_2] : memref<10x28672xbf16, #tpu.memory_space<vmem>>, vector<10x28672xbf16>
    %cst = arith.constant dense<0.000000e+00> : vector<8x10xf32>
    %2 = tpu.matmul %0, %1, %cst {dimension_numbers = #tpu.dot_dimension_numbers<[1], [1], [0], [0], [0, 0, 1, 0], [], []>} : vector<8x28672xbf16>, vector<10x28672xbf16>, vector<8x10xf32> -> vector<8x10xf32>
    %c0_3 = arith.constant 0 : index
    %c0_4 = arith.constant 0 : index
    %3 = vector.load %arg3[%c0_3, %c0_4] : memref<1x10xf32, #tpu.memory_space<vmem>>, vector<1x10xf32>
    %4 = vector.broadcast %3 : vector<1x10xf32> to vector<8x10xf32>
    %5 = arith.addf %2, %4 : vector<8x10xf32>
    %c0_5 = arith.constant 0 : index
    %c0_6 = arith.constant 0 : index
    %6 = vector.load %arg4[%c0_5, %c0_6] : memref<8x10xf32, #tpu.memory_space<vmem>>, vector<8x10xf32>
    tpu.vector_store %arg4[%c0_5, %c0_6], %5 {strides = array<i32>} : memref<8x10xf32, #tpu.memory_space<vmem>>, vector<8x10xf32>,
    return
  }
  func.func @transform_0(%arg0: i32) -> (i32, i32) {
    %c0_i32 = arith.constant 0 : i32
    %c0_i32_0 = arith.constant 0 : i32
    %c0_i32_1 = arith.constant 0 : i32
    return %c0_i32, %c0_i32_0 : i32, i32
  }
  func.func @transform_1(%arg0: i32) -> (i32, i32) {
    %c0_i32 = arith.constant 0 : i32
    %c0_i32_0 = arith.constant 0 : i32
    %c0_i32_1 = arith.constant 0 : i32
    return %c0_i32, %c0_i32_0 : i32, i32
  }
  func.func @transform_2(%arg0: i32) -> (i32, i32) {
    %c0_i32 = arith.constant 0 : i32
    %c0_i32_0 = arith.constant 0 : i32
    %c0_i32_1 = arith.constant 0 : i32
    return %c0_i32, %c0_i32_0 : i32, i32
  }
  func.func @transform_3(%arg0: i32) -> (i32, i32) {
    %c0_i32 = arith.constant 0 : i32
    %c0_i32_0 = arith.constant 0 : i32
    %c0_i32_1 = arith.constant 0 : i32
    return %c0_i32, %c0_i32_0 : i32, i32
  }
}

</mosaic_0001>

<bundles_post_ra>
// kernel: cnn_basic_forward.2
= control target key start
LH: loop header
LB: loop body
LE: loop exit
PB: predicated region body
PF: predicated region fallthrough
CT: control target
= control target key end

     0   :  { %s7576_s18 = smov 0   ;;  %s10746_s0 = inlined_call_operand.vmem [shape: bf16[8,27,968], index: 0, kind: input, shape index: {}]   ;;  %s10747_s1 = inlined_call_operand.vmem [shape: bf16[16,27], index: 1, kind: input, shape index: {}]   ;;  %s10748_s2 = inlined_call_operand.vmem [shape: f32[16,1], index: 2, kind: input, shape index: {}]   ;;  %s10749_s3 = inlined_call_operand.vmem [shape: bf16[32,144], index: 3, kind: input, shape index: {}]   ;;  %s10750_s4 = inlined_call_operand.vmem [shape: f32[32,1], index: 4, kind: input, shape index: {}]   ;;  %s10751_s5 = inlined_call_operand.vmem [shape: bf16[8,32,896], index: 5, kind: output, shape index: {}]  }
   0x1 LB: > { %s6713_s19 = sadd.s32 4294967295, %s7534_s18   ;;  %p6717_p0 = scmp.ge.s32.totalorder %s7534_s18, 1  ;;  %s7534_s18 = sphi %s7576_s18, %s15_s18  }
   0x2   : > { %p189_p1 = scmp.lt.s32.totalorder %s7534_s18, 3 }
   0x4   : > { %p190_p2 = pnand %p6717_p0, %p189_p1 }
   0x6   : > { %193 = sbr.rel (%p190_p2) target bundleno = 2131 (0x853), region = 40 }
   0xb   : > { %s6718_s20 = sshll.u32 %s6713_s19, 2  ;;  %vm345_vm0 = vcmask 1044480   ;;  %v10752_v0 = vmov 0   ;;  %v7590_v1 = vld [vmem:[%s10748_s2] sm:$0xff]  ;;  %v253_v2 = vld [vmem:[%s10748_s2 + $0x8] sm:$0xff]  ;;  %vm346_vm1 = vcmask 1045504  }
   0xc   : > { %p220_p3 = scmp.lt.s32.totalorder %s6718_s20, 7  ;;  %405 = vmatprep.mubr.bf16.mxu0 %v10752_v0  ;;  %448 = vmatprep.mubr.bf16.mxu1 %v10752_v0  ;;  %v7537_v3 = vmov 65535   ;;  %v7435_v38 = vld [vmem:[%s10747_s1] sm:$0xff]   ;;  %vm341_vm2 = vcmask 220160   ;;  %s7538_s6 = smov 64   ;;  %vm1502_vm3 = vcmask 130048  }
   0xd   : > { %7433 = vset.pattern.permute.xlu0 %v10752_v0  ;;  %7434 = vset.pattern.permute.xlu1 %v10752_v0  ;;  %v347_v4 = vsel %vm345_vm0, 4294967295, %v7537_v3  ;;  %s7539_s7 = smov 63   ;;  %s7540_s8 = smov 94   ;;  %vm643_vm4 = vcmask 1043456   ;;  %vm975_vm5 = vcmask 515072   ;;  %vm920_vm6 = vcmask 523264  }
   0xe   : > { %s11186_s20 = smov (!%p220_p3, %s6718_s20), 7  ;;  %256 = vperm.xlu0 %7433, %v7590_v1   ;;  %v7607_v7 = vsel %vm346_vm1, %v347_v4, 0  ;;  %s7541_s9 = smov 95   ;;  %vm865_vm7 = vcmask 769024   ;;  %vm810_vm8 = vcmask 777216   ;;  %vm755_vm9 = vcmask 785408  }
   0xf   : > { %s7309_s25 = sshll.u32 %s11186_s20, 7  ;;  %s7542_s10 = smov 96   ;;  %vm700_vm10 = vcmask 1031168   ;;  %vm645_vm11 = vcmask 1039360   ;;  %vm1030_vm12 = vcmask 506880  }
  0x10   : > { %s7603_s28 = scalar_lea.vmem %s10746_s0, %s7309_s25  ;;  %s7543_s11 = smov 126  }
  0x11   : > { %v244_v5 = vld [vmem:[%s7603_s28 + $0x40] sm:$0xff]  ;;  %v245_v8 = vld [vmem:[%s7603_s28 + $0x48] sm:$0xff]  ;;  %v246_v18 = vld [vmem:[%s7603_s28 + $0x50] sm:$0xff]  ;;  %s7544_s12 = smov 127   ;;  %s7545_s13 = smov 62  }
  0x12   : > { %v248_v6 = vld [vmem:[%s7603_s28 + $0x60] sm:$0x33]  ;;  %261 = vperm.xlu0 %7433, %v253_v2   ;;  %v249_v10 = vld [vmem:[%s7603_s28 + $0x68] sm:$0x33]  ;;  %v250_v22 = vld [vmem:[%s7603_s28 + $0x70] sm:$0x33] }
  0x13   : > { %v6733_v9 = vcombine.high %v244_v5, %v248_v6  ;;  %v6732_v11 = vcombine.low %v244_v5, %v248_v6  ;;  %v236_v12 = vld [vmem:[%s7603_s28] sm:$0xff]  ;;  %v6735_v14 = vcombine.high %v245_v8, %v249_v10  ;;  %v6734_v15 = vcombine.low %v245_v8, %v249_v10  ;;  %v237_v16 = vld [vmem:[%s7603_s28 + $0x8] sm:$0xff]  ;;  %v247_v23 = vld [vmem:[%s7603_s28 + $0x58] sm:$0xff]  ;;  %s7414_s21 = smul.u32 112, %s11186_s20 }
  0x14   : > { %v240_v13 = vld [vmem:[%s7603_s28 + $0x20] sm:$0xff]  ;;  %v241_v17 = vld [vmem:[%s7603_s28 + $0x28] sm:$0xff]  ;;  %v251_v24 = vld [vmem:[%s7603_s28 + $0x78] sm:$0x33]  ;;  %v6737_v28 = vcombine.high %v246_v18, %v250_v22  ;;  %v6736_v31 = vcombine.low %v246_v18, %v250_v22 }
  0x15   : > { %v353_v19 = vand.u32 %v6733_v9, %v7607_v7  ;;  %v350_v20 = vand.u32 %v6732_v11, %v7607_v7  ;;  %v6725_v21 = vcombine.high %v236_v12, %v240_v13  ;;  %v359_v25 = vand.u32 %v6735_v14, %v7607_v7  ;;  %v238_v36 = vld [vmem:[%s7603_s28 + $0x10] sm:$0xff]  ;;  %v239_v39 = vld [vmem:[%s7603_s28 + $0x18] sm:$0xff]  ;;  %s10505_s23 = scalar_lea.vmem %s10751_s5, %s7414_s21 }
  0x16   : > { %v356_v26 = vand.u32 %v6734_v15, %v7607_v7  ;;  %v6727_v27 = vcombine.high %v237_v16, %v241_v17  ;;  %v6739_v29 = vcombine.high %v247_v23, %v251_v24  ;;  %v6724_v30 = vcombine.low %v236_v12, %v240_v13  ;;  %v242_v37 = vld [vmem:[%s7603_s28 + $0x30] sm:$0xff]  ;;  %v243_v40 = vld [vmem:[%s7603_s28 + $0x38] sm:$0xff] }
  0x17   : > { %385 = vmatprep.subr.bf16.mxu0 %v353_v19  ;;  %428 = vmatprep.subr.bf16.mxu1 %v359_v25  ;;  %v6726_v32 = vcombine.low %v237_v16, %v241_v17  ;;  %v365_v33 = vand.u32 %v6737_v28, %v7607_v7  ;;  %v6738_v34 = vcombine.low %v247_v23, %v251_v24 }
  0x18   : > { %386 = vmatpush1.bf16.msra.mxu0 %v350_v20  ;;  %429 = vmatpush1.bf16.msra.mxu1 %v356_v26  ;;  %v371_v35 = vand.u32 %v6739_v29, %v7607_v7  ;;  %v362_v41 = vand.u32 %v6736_v31, %v7607_v7  ;;  %v6729_v43 = vcombine.high %v238_v36, %v242_v37 }
  0x19   : > { %387 = vmatprep.subr.bf16.mxu0 %v6725_v21  ;;  %430 = vmatprep.subr.bf16.mxu1 %v6727_v27  ;;  %v368_v42 = vand.u32 %v6738_v34, %v7607_v7  ;;  %v6731_v44 = vcombine.high %v239_v39, %v243_v40  ;;  %v6728_v45 = vcombine.low %v238_v36, %v242_v37 }
  0x1a   : > { %v6730_v46 = vcombine.low %v239_v39, %v243_v40 }
  0x1c   : > { %388 = vmatpush1.bf16.msra.mxu0 %v6724_v30  ;;  %431 = vmatpush1.bf16.msra.mxu1 %v6726_v32 }
  0x1d   : > { %471 = vmatprep.subr.bf16.mxu0 %v365_v33  ;;  %514 = vmatprep.subr.bf16.mxu1 %v371_v35 }
  0x1f   : > { %6740 = vmatmul.mubr.msk.bf16.vlgmr.msra.gmra.mxu0 %vm341_vm2, %v7435_v38  ;;  %6741 = vmatmul.mubr.msk.bf16.vlgmr.msra.gmra.mxu1 %vm341_vm2, %v7435_v38 }
  0x20   : > { %472 = vmatpush1.bf16.msra.mxu0 %v362_v41  ;;  %515 = vmatpush1.bf16.msra.mxu1 %v368_v42 }
  0x21   : > { %473 = vmatprep.subr.bf16.mxu0 %v6729_v43  ;;  %516 = vmatprep.subr.bf16.mxu1 %v6731_v44 }
  0x22   : > { %491 = vmatprep.mubr.bf16.mxu0 %v10752_v0  ;;  %534 = vmatprep.mubr.bf16.mxu1 %v10752_v0 }
  0x24   : > { %474 = vmatpush1.bf16.msra.mxu0 %v6728_v45  ;;  %517 = vmatpush1.bf16.msra.mxu1 %v6730_v46 }
  0x27   : > { %6742 = vmatmul.mubr.msk.bf16.vlgmr.msra.gmra.mxu0 %vm341_vm2, %v7435_v38  ;;  %6743 = vmatmul.mubr.msk.bf16.vlgmr.msra.gmra.mxu1 %vm341_vm2, %v7435_v38 }
  0x89   : > { %v257_v47 = vpop.permute.xlu0 %256 }
  0x8d   : > { %v7640_v55 = vpop.permute.xlu0 %261 }
  0xdf   : > { %v407_v48 = vpop.f32.mrf.mxu0  ;;  %v450_v50 = vpop.f32.mrf.mxu1 }
  0xe0   : > { %v408_v49 = vadd.f32 %v407_v48, %v257_v47  ;;  %v451_v52 = vadd.f32 %v450_v50, %v257_v47  ;;  %v7744_v48 = vld [vmem:[%s10749_s3 + $0x4] ss:$8 sps:$4 sm:$0xff]  }
  0xe1   : > { %v409_v51 = vpop.f32.mrf.mxu0  ;;  %v452_v54 = vpop.f32.mrf.mxu1  ;;  %6821 = vmatprep.mubr.msk.bf16.mxu0 %vm1502_vm3, %v7744_v48  ;;  %6823 = vmatprep.mubr.msk.bf16.mxu1 %vm1502_vm3, %v7744_v48 }
  0xe2   : > { %v410_v53 = vadd.f32 %v409_v51, %v257_v47  ;;  %v453_v56 = vadd.f32 %v452_v54, %v257_v47  ;;  %v545_v58 = vmax.f32 %v408_v49, 0.0  ;;  %v547_v2 = vmax.f32 %v451_v52, 0.0 }
  0xe3   : > { %v411_v57 = vpop.f32.mrf.mxu0  ;;  %v454_v61 = vpop.f32.mrf.mxu1 }
  0xe4   : > { %v546_v59 = vmax.f32 %v410_v53, 0.0  ;;  %v412_v60 = vadd.f32 %v411_v57, %v7640_v55  ;;  %v455_v62 = vadd.f32 %v454_v61, %v7640_v55  ;;  %v548_v4 = vmax.f32 %v453_v56, 0.0 }
  0xe5   : > { %v413_v63 = vpop.f32.mrf.mxu0  ;;  %v456_v6 = vpop.f32.mrf.mxu1 }
  0xe6   : > { %v7644_v3 = vpack.c.bf16 %v546_v59, %v545_v58  ;;  %v414_v5 = vadd.f32 %v413_v63, %v7640_v55  ;;  %v457_v8 = vadd.f32 %v456_v6, %v7640_v55  ;;  %v553_v10 = vmax.f32 %v412_v60, 0.0 }
  0xe7   : > { %v493_v9 = vpop.f32.mrf.mxu0  ;;  %v536_v13 = vpop.f32.mrf.mxu1  ;;  %v555_v14 = vmax.f32 %v455_v62, 0.0  ;;  %v7311_v18 = vpack.c.bf16 %v548_v4, %v547_v2 }
  0xe8   : > { %v554_v11 = vmax.f32 %v414_v5, 0.0  ;;  %v494_v12 = vadd.f32 %v493_v9, %v257_v47  ;;  %895 = vrot.lane.b32.xlu0 %v7644_v3, %s7538_s6  ;;  %950 = vrot.lane.b32.xlu1 %v7644_v3, %s7539_s7  ;;  %v556_v15 = vmax.f32 %v457_v8, 0.0  ;;  %v537_v16 = vadd.f32 %v536_v13, %v257_v47 }
  0xe9   : > { %v495_v17 = vpop.f32.mrf.mxu0  ;;  %v538_v21 = vpop.f32.mrf.mxu1  ;;  %v7660_v31 = vpack.c.bf16 %v553_v10, %v545_v58  ;;  %v7668_v39 = vpack.c.bf16 %v555_v14, %v547_v2 }
  0xea   : > { %v7314_v19 = vpack.c.bf16 %v554_v11, %v553_v10  ;;  %v496_v20 = vadd.f32 %v495_v17, %v257_v47  ;;  %v7652_v22 = vpack.c.bf16 %v556_v15, %v555_v14  ;;  %v549_v23 = vmax.f32 %v494_v12, 0.0 }
  0xeb   : > { %v551_v24 = vmax.f32 %v537_v16, 0.0  ;;  %v539_v25 = vadd.f32 %v538_v21, %v257_v47  ;;  %v497_v26 = vpop.f32.mrf.mxu0  ;;  %v540_v29 = vpop.f32.mrf.mxu1  ;;  %v7658_v30 = vpack.c.bf16 %v554_v11, %v546_v59  ;;  %v7663_v36 = vpack.c.bf16 %v556_v15, %v548_v4 }
  0xec   : > { %v550_v27 = vmax.f32 %v496_v20, 0.0  ;;  %v498_v28 = vadd.f32 %v497_v26, %v7640_v55  ;;  %840 = vrot.lane.b32.xlu0 %v7644_v3, %s7540_s8  ;;  %952 = vrot.lane.b32.xlu1 %v7311_v18, %s7539_s7  ;;  %v541_v34 = vadd.f32 %v540_v29, %v7640_v55 }
  0xed   : > { %v7313_v32 = vpack.c.bf16 %v551_v24, %v551_v24  ;;  %v552_v33 = vmax.f32 %v539_v25, 0.0  ;;  %v499_v35 = vpop.f32.mrf.mxu0  ;;  %v542_v46 = vpop.f32.mrf.mxu1 }
  0xee   : > { %v7665_v37 = vpack.c.bf16 %v550_v27, %v549_v23  ;;  %v500_v38 = vadd.f32 %v499_v35, %v7640_v55  ;;  %v7672_v41 = vmax.f32 %v541_v34, 0.0  ;;  %v557_v42 = vmax.f32 %v498_v28, 0.0 }
  0xef   : > { %609 = vst [vmem:[#allocation2 + $0x18] sm:$0xf] %v7313_v32  ;;  %v7670_v40 = vpack.c.bf16 %v552_v33, %v551_v24  ;;  %v543_v47 = vadd.f32 %v542_v46, %v7640_v55 }
  0xf0   : > { %608 = vst [vmem:[#allocation2 + $0x10] sm:$0xff] %v7665_v37  ;;  %v558_v43 = vmax.f32 %v500_v38, 0.0  ;;  %785 = vrot.lane.b32.xlu0 %v7644_v3, %s7541_s9  ;;  %897 = vrot.lane.b32.xlu1 %v7311_v18, %s7538_s6  ;;  %v7317_v44 = vpack.c.bf16 %v7672_v41, %v7672_v41  ;;  %v1869_v38 = vld [vmem:[%s10748_s2 + $0x8] sm:$0xff] }
  0xf1   : > { %v560_v49 = vmax.f32 %v543_v47, 0.0 }
  0xf2   : > { %v7316_v45 = vpack.c.bf16 %v558_v43, %v557_v42  ;;  %613 = vst [vmem:[#allocation2 + $0x34] sm:$0xf] %v7317_v44 }
  0xf3   : > { %v7319_v50 = vpack.c.bf16 %v560_v49, %v7672_v41 }
  0xf4   : > { %612 = vst [vmem:[#allocation2 + $0x2c] sm:$0xff] %v7316_v45  ;;  %730 = vrot.lane.b32.xlu0 %v7644_v3, %s7542_s10  ;;  %842 = vrot.lane.b32.xlu1 %v7311_v18, %s7540_s8 }
  0xf8   : > { %675 = vrot.lane.b32.xlu0 %v7644_v3, %s7543_s11  ;;  %787 = vrot.lane.b32.xlu1 %v7311_v18, %s7541_s9 }
  0xfc   : > { %619 = vrot.lane.b32.xlu0 %v7644_v3, %s7544_s12  ;;  %732 = vrot.lane.b32.xlu1 %v7311_v18, %s7542_s10 }
 0x100   : > { %1005 = vrot.lane.b32.xlu0 %v7644_v3, %s7545_s13  ;;  %677 = vrot.lane.b32.xlu1 %v7311_v18, %s7543_s11 }
 0x104   : > { %958 = vrot.lane.b32.xlu0 %v7314_v19, %s7539_s7  ;;  %621 = vrot.lane.b32.xlu1 %v7311_v18, %s7544_s12 }
 0x108   : > { %903 = vrot.lane.b32.xlu0 %v7314_v19, %s7538_s6  ;;  %1007 = vrot.lane.b32.xlu1 %v7311_v18, %s7545_s13 }
 0x10c   : > { %848 = vrot.lane.b32.xlu0 %v7314_v19, %s7540_s8  ;;  %960 = vrot.lane.b32.xlu1 %v7652_v22, %s7539_s7 }
 0x110   : > { %793 = vrot.lane.b32.xlu0 %v7314_v19, %s7541_s9  ;;  %905 = vrot.lane.b32.xlu1 %v7652_v22, %s7538_s6 }
 0x114   : > { %738 = vrot.lane.b32.xlu0 %v7314_v19, %s7542_s10  ;;  %850 = vrot.lane.b32.xlu1 %v7652_v22, %s7540_s8 }
 0x118   : > { %683 = vrot.lane.b32.xlu0 %v7314_v19, %s7543_s11  ;;  %795 = vrot.lane.b32.xlu1 %v7652_v22, %s7541_s9 }
 0x11c   : > { %627 = vrot.lane.b32.xlu0 %v7314_v19, %s7544_s12  ;;  %740 = vrot.lane.b32.xlu1 %v7652_v22, %s7542_s10 }
 0x120   : > { %1013 = vrot.lane.b32.xlu0 %v7314_v19, %s7545_s13  ;;  %685 = vrot.lane.b32.xlu1 %v7652_v22, %s7543_s11 }
 0x124   : > { %954 = vrot.lane.b32.xlu0 %v7665_v37, %s7539_s7  ;;  %629 = vrot.lane.b32.xlu1 %v7652_v22, %s7544_s12 }
 0x128   : > { %899 = vrot.lane.b32.xlu0 %v7665_v37, %s7538_s6  ;;  %1015 = vrot.lane.b32.xlu1 %v7652_v22, %s7545_s13 }
 0x12c   : > { %844 = vrot.lane.b32.xlu0 %v7665_v37, %s7540_s8  ;;  %962 = vrot.lane.b32.xlu1 %v7316_v45, %s7539_s7 }
 0x130   : > { %789 = vrot.lane.b32.xlu0 %v7665_v37, %s7541_s9  ;;  %907 = vrot.lane.b32.xlu1 %v7316_v45, %s7538_s6 }
 0x134   : > { %734 = vrot.lane.b32.xlu0 %v7665_v37, %s7542_s10  ;;  %852 = vrot.lane.b32.xlu1 %v7316_v45, %s7540_s8 }
 0x138   : > { %679 = vrot.lane.b32.xlu0 %v7665_v37, %s7543_s11  ;;  %797 = vrot.lane.b32.xlu1 %v7316_v45, %s7541_s9 }
 0x13c   : > { %623 = vrot.lane.b32.xlu0 %v7665_v37, %s7544_s12  ;;  %742 = vrot.lane.b32.xlu1 %v7316_v45, %s7542_s10 }
 0x140   : > { %956 = vrot.lane.b32.xlu0 %v7670_v40, %s7539_s7  ;;  %687 = vrot.lane.b32.xlu1 %v7316_v45, %s7543_s11 }
 0x144   : > { %1009 = vrot.lane.b32.xlu0 %v7665_v37, %s7545_s13  ;;  %631 = vrot.lane.b32.xlu1 %v7316_v45, %s7544_s12 }
 0x148   : > { %901 = vrot.lane.b32.xlu0 %v7670_v40, %s7538_s6  ;;  %964 = vrot.lane.b32.xlu1 %v7319_v50, %s7539_s7 }
 0x14c   : > { %846 = vrot.lane.b32.xlu0 %v7670_v40, %s7540_s8  ;;  %1017 = vrot.lane.b32.xlu1 %v7316_v45, %s7545_s13 }
 0x150   : > { %791 = vrot.lane.b32.xlu0 %v7670_v40, %s7541_s9  ;;  %909 = vrot.lane.b32.xlu1 %v7319_v50, %s7538_s6 }
 0x154   : > { %736 = vrot.lane.b32.xlu0 %v7670_v40, %s7542_s10  ;;  %854 = vrot.lane.b32.xlu1 %v7319_v50, %s7540_s8 }
 0x158   : > { %681 = vrot.lane.b32.xlu0 %v7670_v40, %s7543_s11  ;;  %799 = vrot.lane.b32.xlu1 %v7319_v50, %s7541_s9 }
 0x15a   : > { %v896_v51 = vpop.permute.xlu0 %895  ;;  %v951_v52 = vpop.permute.xlu1 %950 }
 0x15b   : > { %v966_v8 = vrot.slane %v951_v52, 4  ;;  %v911_v15 = vrot.slane %v896_v51, 4 }
 0x15c   : > { %625 = vrot.lane.b32.xlu0 %v7670_v40, %s7544_s12  ;;  %744 = vrot.lane.b32.xlu1 %v7319_v50, %s7542_s10 }
 0x15e   : > { %v7772_v53 = vpop.permute.xlu0 %840  ;;  %v7774_v54 = vpop.permute.xlu1 %952 }
 0x15f   : > { %v967_v6 = vrot.slane %v7774_v54, 4  ;;  %v856_v27 = vrot.slane %v7772_v53, 4 }
 0x160   : > { %1011 = vrot.lane.b32.xlu0 %v7670_v40, %s7545_s13  ;;  %689 = vrot.lane.b32.xlu1 %v7319_v50, %s7543_s11 }
 0x161   : > { %v974_v12 = vsel %vm643_vm4, %v966_v8, %v967_v6 }
 0x162   : > { %v7779_v55 = vpop.permute.xlu0 %785  ;;  %v7781_v56 = vpop.permute.xlu1 %897  ;;  %v976_v17 = vsel %vm975_vm5, %v951_v52, %v974_v12 }
 0x163   : > { %v912_v9 = vrot.slane %v7781_v56, 4  ;;  %v801_v44 = vrot.slane %v7779_v55, 4 }
 0x164   : > { %1872 = vperm.xlu0 %7433, %v7590_v1   ;;  %633 = vrot.lane.b32.xlu1 %v7319_v50, %s7544_s12 }
 0x165   : > { %v919_v18 = vsel %vm643_vm4, %v911_v15, %v912_v9 }
 0x166   : > { %v7785_v57 = vpop.permute.xlu0 %730  ;;  %v7787_v58 = vpop.permute.xlu1 %842  ;;  %v921_v29 = vsel %vm920_vm6, %v896_v51, %v919_v18 }
 0x167   : > { %v857_v19 = vrot.slane %v7787_v58, 4 }
 0x168   : > { %1019 = vrot.lane.b32.xlu1 %v7319_v50, %s7545_s13 }
 0x169   : > { %v864_v32 = vsel %vm643_vm4, %v856_v27, %v857_v19 }
 0x16a   : > { %v7790_v59 = vpop.permute.xlu0 %675  ;;  %v7792_v60 = vpop.permute.xlu1 %787  ;;  %v866_v46 = vsel %vm865_vm7, %v7772_v53, %v864_v32 }
 0x16b   : > { %v802_v33 = vrot.slane %v7792_v60, 4 }
 0x16c   : > { %1877 = vperm.xlu1 %7434, %v1869_v38  }
 0x16d   : > { %v809_v47 = vsel %vm643_vm4, %v801_v44, %v802_v33 }
 0x16e   : > { %v7794_v61 = vpop.permute.xlu0 %619  ;;  %v7796_v62 = vpop.permute.xlu1 %732 }
 0x16f   : > { %v747_v49 = vrot.slane %v7796_v62, 4 }
 0x172   : > { %v7798_v63 = vpop.permute.xlu0 %1005  ;;  %v7800_v2 = vpop.permute.xlu1 %677 }
 0x176   : > { %v959_v1 = vpop.permute.xlu0 %958  ;;  %v7802_v3 = vpop.permute.xlu1 %621 }
 0x177   : > { %v970_v13 = vrot.slane %v959_v1, 4  ;;  %v636_v32 = vrot.slane %v7802_v3, 4 }
 0x17a   : > { %v904_v4 = vpop.permute.xlu0 %903  ;;  %v7804_v5 = vpop.permute.xlu1 %1007 }
 0x17b   : > { %v915_v23 = vrot.slane %v904_v4, 4 }
 0x17e   : > { %v849_v10 = vpop.permute.xlu0 %848  ;;  %v7808_v11 = vpop.permute.xlu1 %960 }
 0x17f   : > { %v971_v14 = vrot.slane %v7808_v11, 4  ;;  %v860_v40 = vrot.slane %v849_v10, 4 }
 0x181   : > { %v982_v16 = vsel %vm643_vm4, %v970_v13, %v971_v14  ;;  %v746_v13 = vrot.slane %v7785_v57, 4 }
 0x182   : > { %v983_v20 = vsel %vm975_vm5, %v959_v1, %v982_v16  ;;  %v794_v21 = vpop.permute.xlu0 %793  ;;  %v7823_v22 = vpop.permute.xlu1 %905  ;;  %v692_v16 = vrot.slane %v7800_v2, 4 }
 0x183   : > { %v916_v24 = vrot.slane %v7823_v22, 4  ;;  %v6808_v25 = vcombine.high %v976_v17, %v983_v20  ;;  %v6807_v26 = vcombine.low %v976_v17, %v983_v20  ;;  %v805_v1 = vrot.slane %v794_v21, 4 }
 0x184   : > { %v754_v15 = vsel %vm643_vm4, %v746_v13, %v747_v49 }
 0x185   : > { %v927_v28 = vsel %vm643_vm4, %v915_v23, %v916_v24  ;;  %1509 = vmatprep.subr.bf16.mxu0 %v6808_v25 }
 0x186   : > { %v928_v34 = vsel %vm920_vm6, %v904_v4, %v927_v28  ;;  %v739_v35 = vpop.permute.xlu0 %738  ;;  %v7836_v37 = vpop.permute.xlu1 %850  ;;  %1510 = vmatpush1.bf16.msra.mxu0 %v6807_v26  ;;  %v691_v28 = vrot.slane %v7790_v59, 4 }
 0x187   : > { %v861_v41 = vrot.slane %v7836_v37, 4  ;;  %v6801_v42 = vcombine.high %v921_v29, %v928_v34  ;;  %v6800_v43 = vcombine.low %v921_v29, %v928_v34  ;;  %v750_v23 = vrot.slane %v739_v35, 4 }
 0x188   : > { %v699_v29 = vsel %vm643_vm4, %v691_v28, %v692_v16 }
 0x189   : > { %v872_v45 = vsel %vm643_vm4, %v860_v40, %v861_v41  ;;  %1511 = vmatprep.subr.bf16.mxu0 %v6801_v42 }
 0x18a   : > { %v873_v50 = vsel %vm865_vm7, %v849_v10, %v872_v45  ;;  %v684_v51 = vpop.permute.xlu0 %683  ;;  %v7853_v52 = vpop.permute.xlu1 %795  ;;  %1512 = vmatpush1.bf16.msra.mxu0 %v6800_v43  ;;  %v811_v10 = vsel %vm810_vm8, %v7779_v55, %v809_v47  ;;  %v701_v47 = vsel %vm700_vm10, %v7790_v59, %v699_v29 }
 0x18b   : > { %v806_v4 = vrot.slane %v7853_v52, 4  ;;  %v6794_v8 = vcombine.high %v866_v46, %v873_v50  ;;  %v6793_v12 = vcombine.low %v866_v46, %v873_v50  ;;  %v695_v42 = vrot.slane %v684_v51, 4 }
 0x18c   : > { %v635_v46 = vrot.slane %v7794_v61, 4 }
 0x18d   : > { %v817_v53 = vsel %vm643_vm4, %v805_v1, %v806_v4  ;;  %1513 = vmatprep.subr.bf16.mxu0 %v6794_v8 }
 0x18e   : > { %v818_v17 = vsel %vm810_vm8, %v794_v21, %v817_v53  ;;  %v628_v18 = vpop.permute.xlu0 %627  ;;  %v7867_v20 = vpop.permute.xlu1 %740  ;;  %1514 = vmatpush1.bf16.msra.mxu0 %v6793_v12  ;;  %v756_v21 = vsel %vm755_vm9, %v7785_v57, %v754_v15  ;;  %v1022_v15 = vrot.slane %v7804_v5, 4 }
 0x18f   : > { %v751_v25 = vrot.slane %v7867_v20, 4  ;;  %v6787_v26 = vcombine.high %v811_v10, %v818_v17  ;;  %v6786_v27 = vcombine.low %v811_v10, %v818_v17  ;;  %v639_v12 = vrot.slane %v628_v18, 4 }
 0x190   : > { %v1021_v17 = vrot.slane %v7798_v63, 4 }
 0x191   : > { %v762_v55 = vsel %vm643_vm4, %v750_v23, %v751_v25  ;;  %1515 = vmatprep.subr.bf16.mxu0 %v6787_v26 }
 0x192   : > { %v763_v34 = vsel %vm755_vm9, %v739_v35, %v762_v55  ;;  %v1014_v38 = vpop.permute.xlu0 %1013  ;;  %v7881_v40 = vpop.permute.xlu1 %685  ;;  %1516 = vmatpush1.bf16.msra.mxu0 %v6786_v27  ;;  %v644_v35 = vsel %vm643_vm4, %v635_v46, %v636_v32 }
 0x193   : > { %v696_v43 = vrot.slane %v7881_v40, 4  ;;  %v6780_v44 = vcombine.high %v756_v21, %v763_v34  ;;  %v6779_v45 = vcombine.low %v756_v21, %v763_v34  ;;  %v1025_v23 = vrot.slane %v1014_v38, 4 }
 0x195   : > { %v707_v57 = vsel %vm643_vm4, %v695_v42, %v696_v43  ;;  %1517 = vmatprep.subr.bf16.mxu0 %v6780_v44  ;;  %v1029_v42 = vsel %vm643_vm4, %v1021_v17, %v1022_v15 }
 0x196   : > { %v708_v50 = vsel %vm700_vm10, %v684_v51, %v707_v57  ;;  %v7894_v1 = vpop.permute.xlu0 %954  ;;  %v7896_v8 = vpop.permute.xlu1 %629  ;;  %1518 = vmatpush1.bf16.msra.mxu0 %v6779_v45  ;;  %v646_v51 = vsel %vm645_vm11, %v7794_v61, %v644_v35  ;;  %v1031_v35 = vsel %vm1030_vm12, %v7798_v63, %v1029_v42 }
 0x197   : > { %v640_v13 = vrot.slane %v7896_v8, 4  ;;  %v6773_v53 = vcombine.high %v701_v47, %v708_v50  ;;  %v6772_v10 = vcombine.low %v701_v47, %v708_v50  ;;  %v968_v55 = vrot.slane %v7894_v1, 4 }
 0x199   : > { %v652_v59 = vsel %vm643_vm4, %v639_v12, %v640_v13  ;;  %1519 = vmatprep.subr.bf16.mxu0 %v6773_v53  ;;  %v977_v57 = vsel %vm643_vm4, %v967_v6, %v968_v55 }
 0x19a   : > { %v653_v26 = vsel %vm645_vm11, %v628_v18, %v652_v59  ;;  %v7907_v27 = vpop.permute.xlu0 %899  ;;  %v7909_v28 = vpop.permute.xlu1 %1015  ;;  %1520 = vmatpush1.bf16.msra.mxu0 %v6772_v10  ;;  %v978_v12 = vsel %vm975_vm5, %v7774_v54, %v977_v57 }
 0x19b   : > { %v1026_v21 = vrot.slane %v7909_v28, 4  ;;  %v6766_v29 = vcombine.high %v646_v51, %v653_v26  ;;  %v6765_v34 = vcombine.low %v646_v51, %v653_v26  ;;  %v913_v18 = vrot.slane %v7907_v27, 4 }
 0x19d   : > { %v1037_v61 = vsel %vm643_vm4, %v1025_v23, %v1026_v21  ;;  %1521 = vmatprep.subr.bf16.mxu0 %v6766_v29  ;;  %v922_v6 = vsel %vm643_vm4, %v912_v9, %v913_v18 }
 0x19e   : > { %v1038_v44 = vsel %vm1030_vm12, %v1014_v38, %v1037_v61  ;;  %v7921_v45 = vpop.permute.xlu0 %844  ;;  %v7923_v46 = vpop.permute.xlu1 %962  ;;  %1522 = vmatpush1.bf16.msra.mxu0 %v6765_v34 }
 0x19f   : > { %v972_v47 = vrot.slane %v7923_v46, 4  ;;  %1523 = vmatprep.subr.bf16.mxu0 %v7658_v30  ;;  %v6815_v50 = vcombine.high %v1031_v35, %v1038_v44  ;;  %v6814_v17 = vcombine.low %v1031_v35, %v1038_v44 }
 0x1a1   : > { %v984_v38 = vsel %vm643_vm4, %v971_v14, %v972_v47  ;;  %v858_v14 = vrot.slane %v7921_v45, 4 }
 0x1a2   : > { %v985_v30 = vsel %vm975_vm5, %v7808_v11, %v984_v38  ;;  %v7948_v63 = vpop.permute.xlu0 %789  ;;  %v7950_v53 = vpop.permute.xlu1 %907  ;;  %1524 = vmatpush1.bf16.msra.mxu0 %v7660_v31  ;;  %v7963_v11 = vld [vmem:[%s10749_s3] ss:$8 sps:$4 sm:$0xff]   ;;  %v923_v31 = vsel %vm920_vm6, %v7781_v56, %v922_v6 }
 0x1a3   : > { %v917_v10 = vrot.slane %v7950_v53, 4  ;;  %1539 = vmatprep.subr.bf16.mxu0 %v6815_v50  ;;  %v6810_v54 = vcombine.high %v978_v12, %v985_v30  ;;  %v6809_v59 = vcombine.low %v978_v12, %v985_v30  ;;  %v803_v51 = vrot.slane %v7948_v63, 4 }
 0x1a4   : > { %v867_v56 = vsel %vm643_vm4, %v857_v19, %v858_v14 }
 0x1a5   : > { %v929_v9 = vsel %vm643_vm4, %v916_v24, %v917_v10  ;;  %1562 = vmatprep.subr.bf16.mxu1 %v6810_v54  ;;  %v7977_v24 = vld [vmem:[%s10749_s3 + $0x14] ss:$8 sps:$4 sm:$0xff]   ;;  %v868_v44 = vsel %vm865_vm7, %v7787_v58, %v867_v56  ;;  %v812_v19 = vsel %vm643_vm4, %v802_v33, %v803_v51 }
 0x1a6   : > { %v930_v23 = vsel %vm920_vm6, %v7823_v22, %v929_v9  ;;  %v7970_v26 = vpop.permute.xlu0 %734  ;;  %v7972_v29 = vpop.permute.xlu1 %852  ;;  %1563 = vmatpush1.bf16.msra.mxu1 %v6809_v59  ;;  %1540 = vmatpush2.bf16.msra.mxu0 %v6814_v17  ;;  %v813_v6 = vsel %vm810_vm8, %v7792_v60, %v812_v19 }
 0x1a7   : > { %v862_v34 = vrot.slane %v7972_v29, 4  ;;  %v6803_v22 = vcombine.high %v923_v31, %v930_v23  ;;  %v6802_v42 = vcombine.low %v923_v31, %v930_v23 }
 0x1a9   : > { %v874_v61 = vsel %vm643_vm4, %v861_v41, %v862_v34  ;;  %1564 = vmatprep.subr.bf16.mxu1 %v6803_v22  ;;  %1542 = vmatmul.mubr.bf16.vlgmr.msra.gmra.mxu0 %v7963_v11  ;;  %v748_v41 = vrot.slane %v7970_v26, 4 }
 0x1aa   : > { %v875_v57 = vsel %vm865_vm7, %v7836_v37, %v874_v61  ;;  %v8000_v35 = vpop.permute.xlu0 %679  ;;  %v8002_v38 = vpop.permute.xlu1 %797  ;;  %1565 = vmatpush1.bf16.msra.mxu1 %v6802_v42  ;;  %6822 = vmatprep.mubr.msk.bf16.mxu0 %vm1502_vm3, %v7977_v24  ;;  %v8016_v37 = vld [vmem:[%s10749_s3 + $0x10] ss:$8 sps:$4 sm:$0xff]  }
 0x1ab   : > { %v807_v58 = vrot.slane %v8002_v38, 4  ;;  %v6796_v50 = vcombine.high %v868_v44, %v875_v57  ;;  %v6795_v12 = vcombine.low %v868_v44, %v875_v57  ;;  %v693_v30 = vrot.slane %v8000_v35, 4 }
 0x1ad   : > { %v819_v33 = vsel %vm643_vm4, %v806_v4, %v807_v58  ;;  %1566 = vmatprep.subr.bf16.mxu1 %v6796_v50  ;;  %v757_v4 = vsel %vm643_vm4, %v747_v49, %v748_v41  ;;  %v702_v49 = vsel %vm643_vm4, %v692_v16, %v693_v30 }
 0x1ae   : > { %v820_v54 = vsel %vm810_vm8, %v7853_v52, %v819_v33  ;;  %v8023_v59 = vpop.permute.xlu0 %623  ;;  %v8025_v17 = vpop.permute.xlu1 %742  ;;  %1567 = vmatpush1.bf16.msra.mxu1 %v6795_v12  ;;  %v758_v23 = vsel %vm755_vm9, %v7796_v62, %v757_v4 }
 0x1af   : > { %v752_v9 = vrot.slane %v8025_v17, 4  ;;  %v6789_v31 = vcombine.high %v813_v6, %v820_v54  ;;  %v6788_v60 = vcombine.low %v813_v6, %v820_v54  ;;  %v637_v56 = vrot.slane %v8023_v59, 4 }
 0x1b1   : > { %v764_v52 = vsel %vm643_vm4, %v751_v25, %v752_v9  ;;  %1568 = vmatprep.subr.bf16.mxu1 %v6789_v31  ;;  %1552 = vmatmul.mubr.bf16.gmra.mxu0 %v8016_v37  ;;  %v647_v6 = vsel %vm643_vm4, %v636_v32, %v637_v56 }
 0x1b2   : > { %v765_v22 = vsel %vm755_vm9, %v7867_v20, %v764_v52  ;;  %v957_v42 = vpop.permute.xlu0 %956  ;;  %v8049_v61 = vpop.permute.xlu1 %687  ;;  %1569 = vmatpush1.bf16.msra.mxu1 %v6788_v60  ;;  %6825 = vmatprep.mubr.msk.bf16.mxu0 %vm1502_vm3, %v7744_v48  ;;  %v703_v20 = vsel %vm700_vm10, %v7800_v2, %v702_v49 }
 0x1b3   : > { %v969_v25 = vrot.slane %v957_v42, 4  ;;  %v697_v62 = vrot.slane %v8049_v61, 4  ;;  %v6782_v44 = vcombine.high %v758_v23, %v765_v22  ;;  %v6781_v19 = vcombine.low %v758_v23, %v765_v22 }
 0x1b5   : > { %v981_v57 = vsel %vm975_vm5, %v957_v42, %v969_v25  ;;  %v709_v16 = vsel %vm643_vm4, %v696_v43, %v697_v62  ;;  %1570 = vmatprep.subr.bf16.mxu1 %v6782_v44  ;;  %v979_v31 = vsel %vm643_vm4, %v968_v55, %v969_v25 }
 0x1b6   : > { %1000 = vst [vmem:[#allocation2 + $0x1a0] sm:$0xf] %v981_v57  ;;  %v710_v50 = vsel %vm700_vm10, %v7881_v40, %v709_v16  ;;  %v8064_v12 = vpop.permute.xlu0 %1009  ;;  %v8066_v33 = vpop.permute.xlu1 %631  ;;  %1571 = vmatpush1.bf16.msra.mxu1 %v6781_v19  ;;  %v648_v40 = vsel %vm645_vm11, %v7802_v3, %v647_v6  ;;  %v980_v25 = vsel %vm975_vm5, %v7894_v1, %v979_v31 }
 0x1b7   : > { %v641_v43 = vrot.slane %v8066_v33, 4  ;;  %v6775_v54 = vcombine.high %v703_v20, %v710_v50  ;;  %v6774_v4 = vcombine.low %v703_v20, %v710_v50  ;;  %v1023_v32 = vrot.slane %v8064_v12, 4 }
 0x1b9   : > { %v654_v2 = vsel %vm643_vm4, %v640_v13, %v641_v43  ;;  %1572 = vmatprep.subr.bf16.mxu1 %v6775_v54 }
 0x1ba   : > { %v655_v60 = vsel %vm645_vm11, %v7896_v8, %v654_v2  ;;  %v902_v52 = vpop.permute.xlu0 %901  ;;  %v965_v23 = vpop.permute.xlu1 %964  ;;  %1573 = vmatpush1.bf16.msra.mxu1 %v6774_v4  ;;  %v1032_v8 = vsel %vm643_vm4, %v1022_v15, %v1023_v32 }
 0x1bb   : > { %v914_v49 = vrot.slane %v902_v52, 4  ;;  %v973_v22 = vrot.slane %v965_v23, 4  ;;  %v6768_v42 = vcombine.high %v648_v40, %v655_v60  ;;  %v6767_v13 = vcombine.low %v648_v40, %v655_v60 }
 0x1bd   : > { %v926_v44 = vsel %vm920_vm6, %v902_v52, %v914_v49  ;;  %v986_v3 = vsel %vm643_vm4, %v972_v47, %v973_v22  ;;  %v988_v55 = vsel %vm975_vm5, %v965_v23, %v973_v22  ;;  %1574 = vmatprep.subr.bf16.mxu1 %v6768_v42  ;;  %v924_v54 = vsel %vm643_vm4, %v913_v18, %v914_v49 }
 0x1be   : > { %945 = vst [vmem:[#allocation2 + $0x168] sm:$0xf] %v926_v44  ;;  %v987_v19 = vsel %vm975_vm5, %v7923_v46, %v986_v3  ;;  %1004 = vst [vmem:[#allocation2 + $0x1bc] sm:$0xf] %v988_v55  ;;  %v847_v57 = vpop.permute.xlu0 %846  ;;  %v8101_v16 = vpop.permute.xlu1 %1017  ;;  %1575 = vmatpush1.bf16.msra.mxu1 %v6767_v13  ;;  %v1033_v46 = vsel %vm1030_vm12, %v7804_v5, %v1032_v8 }
 0x1bf   : > { %v859_v47 = vrot.slane %v847_v57, 4  ;;  %v1027_v20 = vrot.slane %v8101_v16, 4  ;;  %1576 = vmatprep.subr.bf16.mxu1 %v7663_v36  ;;  %v6812_v1 = vcombine.high %v980_v25, %v987_v19  ;;  %v6811_v50 = vcombine.low %v980_v25, %v987_v19 }
 0x1c1   : > { %v871_v6 = vsel %vm865_vm7, %v847_v57, %v859_v47  ;;  %v1039_v15 = vsel %vm643_vm4, %v1026_v21, %v1027_v20  ;;  %1615 = vmatprep.subr.bf16.mxu0 %v6812_v1 }
 0x1c2   : > { %890 = vst [vmem:[#allocation2 + $0x130] sm:$0xf] %v871_v6  ;;  %v1040_v36 = vsel %vm1030_vm12, %v7909_v28, %v1039_v15  ;;  %v792_v4 = vpop.permute.xlu0 %791  ;;  %v910_v2 = vpop.permute.xlu1 %909  ;;  %1577 = vmatpush1.bf16.msra.mxu1 %v7668_v39  ;;  %1616 = vmatpush1.bf16.msra.mxu0 %v6811_v50  ;;  %v925_v28 = vsel %vm920_vm6, %v7907_v27, %v924_v54 }
 0x1c3   : > { %v804_v40 = vrot.slane %v792_v4, 4  ;;  %v918_v31 = vrot.slane %v910_v2, 4  ;;  %v6817_v21 = vcombine.high %v1033_v46, %v1040_v36  ;;  %v6816_v60 = vcombine.low %v1033_v46, %v1040_v36 }
 0x1c4   : > { %v869_v39 = vsel %vm643_vm4, %v858_v14, %v859_v47 }
 0x1c5   : > { %v816_v52 = vsel %vm810_vm8, %v792_v4, %v804_v40  ;;  %v931_v5 = vsel %vm643_vm4, %v917_v10, %v918_v31  ;;  %v933_v18 = vsel %vm920_vm6, %v910_v2, %v918_v31  ;;  %1592 = vmatprep.subr.bf16.mxu1 %v6817_v21  ;;  %v7439_v3 = vld [vmem:[#allocation2 + $0x1a0] ss:$28 sps:$4 sm:$0xff]   ;;  %v814_v25 = vsel %vm643_vm4, %v803_v51, %v804_v40 }
 0x1c6   : > { %835 = vst [vmem:[#allocation2 + $0xf8] sm:$0xf] %v816_v52  ;;  %v932_v23 = vsel %vm920_vm6, %v7950_v53, %v931_v5  ;;  %949 = vst [vmem:[#allocation2 + $0x184] sm:$0xf] %v933_v18  ;;  %v737_v49 = vpop.permute.xlu0 %736  ;;  %v855_v22 = vpop.permute.xlu1 %854  ;;  %1593 = vmatpush2.bf16.msra.mxu1 %v6816_v60  ;;  %v870_v53 = vsel %vm865_vm7, %v7921_v45, %v869_v39  ;;  %v815_v15 = vsel %vm810_vm8, %v7948_v63, %v814_v25 }
 0x1c7   : > { %v749_v42 = vrot.slane %v737_v49, 4  ;;  %v863_v10 = vrot.slane %v855_v22, 4  ;;  %v6805_v13 = vcombine.high %v925_v28, %v932_v23  ;;  %1668 = vmatprep.subr.bf16.mxu1 %v10752_v0  ;;  %v6804_v44 = vcombine.low %v925_v28, %v932_v23 }
 0x1c9   : > { %v761_v27 = vsel %vm755_vm9, %v737_v49, %v749_v42  ;;  %v876_v14 = vsel %vm643_vm4, %v862_v34, %v863_v10  ;;  %v878_v55 = vsel %vm865_vm7, %v855_v22, %v863_v10  ;;  %1595 = vmatmul.mubr.bf16.vlgmr.msra.gmra.mxu1 %v7963_v11  ;;  %1617 = vmatprep.subr.bf16.mxu0 %v6805_v13 }
 0x1ca   : > { %780 = vst [vmem:[#allocation2 + $0xc0] sm:$0xf] %v761_v27  ;;  %v877_v8 = vsel %vm865_vm7, %v7972_v29, %v876_v14  ;;  %894 = vst [vmem:[#allocation2 + $0x14c] sm:$0xf] %v878_v55  ;;  %v682_v19 = vpop.permute.xlu0 %681  ;;  %v800_v57 = vpop.permute.xlu1 %799  ;;  %1669 = vmatpush1.bf16.msra.mxu1 %v7439_v3  ;;  %1618 = vmatpush1.bf16.msra.mxu0 %v6804_v44  ;;  %v759_v46 = vsel %vm643_vm4, %v748_v41, %v749_v42 }
 0x1cb   : > { %v694_v34 = vrot.slane %v682_v19, 4  ;;  %v808_v47 = vrot.slane %v800_v57, 4  ;;  %v6798_v1 = vcombine.high %v870_v53, %v877_v8  ;;  %1670 = vmatprep.subr.bf16.mxu1 %v10752_v0  ;;  %v6797_v45 = vcombine.low %v870_v53, %v877_v8  ;;  %6824 = vmatprep.mubr.msk.bf16.mxu1 %vm1502_vm3, %v7977_v24 }
 0x1cc   : > { %v760_v60 = vsel %vm755_vm9, %v7970_v26, %v759_v46 }
 0x1cd   : > { %v706_v51 = vsel %vm700_vm10, %v682_v19, %v694_v34  ;;  %v821_v29 = vsel %vm643_vm4, %v807_v58, %v808_v47  ;;  %v823_v50 = vsel %vm810_vm8, %v800_v57, %v808_v47  ;;  %1619 = vmatprep.subr.bf16.mxu0 %v6798_v1  ;;  %v7440_v6 = vld [vmem:[#allocation2 + $0x168] ss:$28 sps:$4 sm:$0xff]   ;;  %v704_v52 = vsel %vm643_vm4, %v693_v30, %v694_v34  ;;  %v7448_v47 = vld [vmem:[#allocation2 + $0x14] ss:$28 sps:$4 sm:$0xff]  }
 0x1ce   : > { %725 = vst [vmem:[#allocation2 + $0x88] sm:$0xf] %v706_v51  ;;  %v822_v54 = vsel %vm810_vm8, %v8002_v38, %v821_v29  ;;  %839 = vst [vmem:[#allocation2 + $0x114] sm:$0xf] %v823_v50  ;;  %v626_v36 = vpop.permute.xlu0 %625  ;;  %v745_v4 = vpop.permute.xlu1 %744  ;;  %1671 = vmatpush1.bf16.msra.mxu1 %v7440_v6  ;;  %1620 = vmatpush1.bf16.msra.mxu0 %v6797_v45  ;;  %v705_v42 = vsel %vm700_vm10, %v8000_v35, %v704_v52  ;;  %v6857_v19 = vld [vmem:[%s7603_s28 + $0xe0] sm:$0x33] }
 0x1cf   : > { %v638_v2 = vrot.slane %v626_v36, 4  ;;  %v753_v58 = vrot.slane %v745_v4, 4  ;;  %v6791_v40 = vcombine.high %v815_v15, %v822_v54  ;;  %v6790_v31 = vcombine.low %v815_v15, %v822_v54  ;;  %1672 = vmatprep.subr.bf16.mxu1 %v10752_v0  ;;  %v6854_v51 = vld [vmem:[%s7603_s28 + $0xc8] sm:$0xff] }
 0x1d0   : > { %v6858_v50 = vld [vmem:[%s7603_s28 + $0xe8] sm:$0x33] }
 0x1d1   : > { %v651_v63 = vsel %vm645_vm11, %v626_v36, %v638_v2  ;;  %v766_v41 = vsel %vm643_vm4, %v752_v9, %v753_v58  ;;  %v768_v21 = vsel %vm755_vm9, %v745_v4, %v753_v58  ;;  %1621 = vmatprep.subr.bf16.mxu0 %v6791_v40  ;;  %v7441_v38 = vld [vmem:[#allocation2 + $0x130] ss:$28 sps:$4 sm:$0xff]   ;;  %1605 = vmatmul.mubr.bf16.gmra.mxu1 %v8016_v37  ;;  %v7452_v36 = vld [vmem:[#allocation2 + $0x18] ss:$28 sps:$4 sm:$0xff]   ;;  %v6845_v4 = vld [vmem:[%s7603_s28 + $0x80] sm:$0xff] }
 0x1d2   : > { %670 = vst [vmem:[#allocation2 + $0x50] sm:$0xf] %v651_v63  ;;  %v767_v5 = vsel %vm755_vm9, %v8025_v17, %v766_v41  ;;  %784 = vst [vmem:[#allocation2 + $0xdc] sm:$0xf] %v768_v21  ;;  %v1012_v18 = vpop.permute.xlu0 %1011  ;;  %v690_v28 = vpop.permute.xlu1 %689  ;;  %1673 = vmatpush1.bf16.msra.mxu1 %v7441_v38  ;;  %1622 = vmatpush1.bf16.msra.mxu0 %v6790_v31  ;;  %v6873_v46 = vcombine.high %v6854_v51, %v6858_v50  ;;  %v6859_v58 = vld [vmem:[%s7603_s28 + $0xf0] sm:$0x33] }
 0x1d3   : > { %v1024_v9 = vrot.slane %v1012_v18, 4  ;;  %v698_v39 = vrot.slane %v690_v28, 4  ;;  %v6784_v23 = vcombine.high %v760_v60, %v767_v5  ;;  %v6783_v49 = vcombine.low %v760_v60, %v767_v5  ;;  %1674 = vmatprep.subr.bf16.mxu1 %v10752_v0  ;;  %6827 = vmatprep.mubr.msk.bf16.mxu1 %vm1502_vm3, %v7744_v48  ;;  %v6846_v41 = vld [vmem:[%s7603_s28 + $0x88] sm:$0xff]  ;;  %v6856_v5 = vld [vmem:[%s7603_s28 + $0xd8] sm:$0xff] }
 0x1d4   : > { %v649_v48 = vsel %vm643_vm4, %v637_v56, %v638_v2  ;;  %v6855_v2 = vld [vmem:[%s7603_s28 + $0xd0] sm:$0xff]  ;;  %v6872_v40 = vcombine.low %v6854_v51, %v6858_v50  ;;  %v1970_v63 = vand.u32 %v6873_v46, %v7607_v7  ;;  %v6850_v21 = vld [vmem:[%s7603_s28 + $0xa8] sm:$0xff] }
 0x1d5   : > { %v1036_v26 = vsel %vm1030_vm12, %v1012_v18, %v1024_v9  ;;  %v711_v30 = vsel %vm643_vm4, %v697_v62, %v698_v39  ;;  %v713_v17 = vsel %vm700_vm10, %v690_v28, %v698_v39  ;;  %1623 = vmatprep.subr.bf16.mxu0 %v6784_v23  ;;  %v7442_v22 = vld [vmem:[#allocation2 + $0xf8] ss:$28 sps:$4 sm:$0xff]   ;;  %v650_v56 = vsel %vm645_vm11, %v8023_v59, %v649_v48 }
 0x1d6   : > { %1055 = vst [vmem:[#allocation2 + $0x1d8] sm:$0xf] %v1036_v26  ;;  %v712_v10 = vsel %vm700_vm10, %v8049_v61, %v711_v30  ;;  %729 = vst [vmem:[#allocation2 + $0xa4] sm:$0xf] %v713_v17  ;;  %v634_v13 = vpop.permute.xlu1 %633  ;;  %1624 = vmatpush1.bf16.msra.mxu0 %v6783_v49  ;;  %1675 = vmatpush1.bf16.msra.mxu1 %v7442_v22  ;;  %v1034_v34 = vsel %vm643_vm4, %v1023_v32, %v1024_v9  ;;  %v6860_v18 = vld [vmem:[%s7603_s28 + $0xf8] sm:$0x33] }
 0x1d7   : > { %v642_v44 = vrot.slane %v634_v13, 4  ;;  %v6777_v62 = vcombine.high %v705_v42, %v712_v10  ;;  %v6776_v3 = vcombine.low %v705_v42, %v712_v10  ;;  %1676 = vmatprep.subr.bf16.mxu1 %v10752_v0  ;;  %v1035_v29 = vsel %vm1030_vm12, %v8064_v12, %v1034_v34  ;;  %v6849_v12 = vld [vmem:[%s7603_s28 + $0xa0] sm:$0xff]  ;;  %v6851_v22 = vld [vmem:[%s7603_s28 + $0xb0] sm:$0xff]  ;;  %v6848_v48 = vld [vmem:[%s7603_s28 + $0x98] sm:$0xff] }
 0x1d8   : > { %v6863_v60 = vcombine.high %v6845_v4, %v6849_v12  ;;  %v6875_v52 = vcombine.high %v6855_v2, %v6859_v58  ;;  %v1967_v28 = vand.u32 %v6872_v40, %v7607_v7  ;;  %v6862_v9 = vcombine.low %v6845_v4, %v6849_v12 }
 0x1d9   : > { %v656_v35 = vsel %vm643_vm4, %v641_v43, %v642_v44  ;;  %v658_v61 = vsel %vm645_vm11, %v634_v13, %v642_v44  ;;  %1625 = vmatprep.subr.bf16.mxu0 %v6777_v62  ;;  %v7443_v27 = vld [vmem:[#allocation2 + $0xc0] ss:$28 sps:$4 sm:$0xff]   ;;  %v6865_v39 = vcombine.high %v6846_v41, %v6850_v21  ;;  %v6877_v23 = vcombine.high %v6856_v5, %v6860_v18 }
 0x1da   : > { %v657_v14 = vsel %vm645_vm11, %v8066_v33, %v656_v35  ;;  %674 = vst [vmem:[#allocation2 + $0x6c] sm:$0xf] %v658_v61  ;;  %v1020_v55 = vpop.permute.xlu1 %1019  ;;  %1626 = vmatpush1.bf16.msra.mxu0 %v6776_v3  ;;  %1677 = vmatpush1.bf16.msra.mxu1 %v7443_v27  ;;  %v6853_v43 = vld [vmem:[%s7603_s28 + $0xc0] sm:$0xff]  ;;  %v1976_v49 = vand.u32 %v6875_v52, %v7607_v7  ;;  %v6852_v44 = vld [vmem:[%s7603_s28 + $0xb8] sm:$0xff] }
 0x1db   : > { %v1028_v53 = vrot.slane %v1020_v55, 4  ;;  %v6770_v25 = vcombine.high %v650_v56, %v657_v14  ;;  %v6769_v8 = vcombine.low %v650_v56, %v657_v14  ;;  %1678 = vmatprep.subr.bf16.mxu1 %v10752_v0  ;;  %v6871_v45 = vcombine.high %v6853_v43, %v6857_v19 }
 0x1dc   : > { %v6864_v26 = vcombine.low %v6846_v41, %v6850_v21  ;;  %v1982_v30 = vand.u32 %v6877_v23, %v7607_v7  ;;  %v6874_v17 = vcombine.low %v6855_v2, %v6859_v58  ;;  %v6876_v10 = vcombine.low %v6856_v5, %v6860_v18 }
 0x1dd   : > { %v1041_v57 = vsel %vm643_vm4, %v1027_v20, %v1028_v53  ;;  %v1043_v59 = vsel %vm1030_vm12, %v1020_v55, %v1028_v53  ;;  %1627 = vmatprep.subr.bf16.mxu0 %v6770_v25  ;;  %v7446_v33 = vld [vmem:[#allocation2 + $0x88] ss:$28 sps:$4 sm:$0xff]   ;;  %v7450_v20 = vld [vmem:[#allocation2 + $0x10] ss:$28 sps:$4 sm:$0xff]   ;;  %v1964_v15 = vand.u32 %v6871_v45, %v7607_v7  ;;  %v6868_v35 = vcombine.low %v6848_v48, %v6852_v44 }
 0x1de   : > { %1059 = vst [vmem:[#allocation2 + $0x1f4] sm:$0xf] %v1043_v59  ;;  %v1042_v1 = vsel %vm1030_vm12, %v8101_v16, %v1041_v57  ;;  %1628 = vmatpush1.bf16.msra.mxu0 %v6769_v8  ;;  %1679 = vmatpush1.bf16.msra.mxu1 %v7446_v33  ;;  %v6870_v16 = vcombine.low %v6853_v43, %v6857_v19 }
 0x1df   : > { %1629 = vmatprep.subr.bf16.mxu0 %v7448_v47  ;;  %1680 = vmatprep.subr.bf16.mxu1 %v10752_v0  ;;  %v6819_v6 = vcombine.high %v1035_v29, %v1042_v1  ;;  %v6818_v54 = vcombine.low %v1035_v29, %v1042_v1  ;;  %v1973_v42 = vand.u32 %v6874_v17, %v7607_v7  ;;  %v1873_v2 = vpop.permute.xlu0 %1872 }
 0x1e0   : > { %v1961_v31 = vand.u32 %v6870_v16, %v7607_v7  ;;  %v1979_v3 = vand.u32 %v6876_v10, %v7607_v7 }
 0x1e1   : > { %v7451_v32 = vld [vmem:[#allocation2 + $0x50] ss:$28 sps:$4 sm:$0xff]  }
 0x1e2   : > { %1630 = vmatpush1.bf16.msra.mxu0 %v7450_v20  ;;  %1681 = vmatpush1.bf16.msra.mxu1 %v7451_v32 }
 0x1e3   : > { %1645 = vmatprep.subr.bf16.mxu0 %v6819_v6  ;;  %1682 = vmatprep.subr.bf16.mxu1 %v10752_v0 }
 0x1e5   : > { %v7453_v38 = vld [vmem:[#allocation2 + $0x1d8] ss:$28 sps:$4 sm:$0xff]  }
 0x1e6   : > { %1646 = vmatpush2.bf16.msra.mxu0 %v6818_v54  ;;  %1683 = vmatpush1.bf16.msra.mxu1 %v7452_v36 }
 0x1e7   : > { %1698 = vmatprep.subr.bf16.mxu1 %v10752_v0  ;;  %1996 = vmatprep.subr.bf16.mxu0 %v1964_v15 }
 0x1e9   : > { %1648 = vmatmul.mubr.bf16.vlgmr.msra.gmra.mxu0 %v7963_v11 }
 0x1ea   : > { %1699 = vmatpush2.bf16.msra.mxu1 %v7453_v38  ;;  %1997 = vmatpush1.bf16.msra.mxu0 %v1961_v31 }
 0x1eb   : > { %2039 = vmatprep.subr.bf16.mxu1 %v1970_v63  ;;  %6826 = vmatprep.mubr.msk.bf16.mxu0 %vm1502_vm3, %v7977_v24 }
 0x1ec   : > { %1998 = vmatprep.subr.bf16.mxu0 %v6863_v60 }
 0x1ed   : > { %1701 = vmatmul.mubr.bf16.vlgmr.msra.gmra.mxu1 %v7963_v11  ;;  %v6847_v11 = vld [vmem:[%s7603_s28 + $0x90] sm:$0xff] }
 0x1ee   : > { %2040 = vmatpush1.bf16.msra.mxu1 %v1967_v28  ;;  %6828 = vmatprep.mubr.msk.bf16.mxu1 %vm1502_vm3, %v7977_v24  ;;  %v7454_v24 = vld [vmem:[%s10747_s1] sm:$0xff]   ;;  %v6867_v13 = vcombine.high %v6847_v11, %v6851_v22  ;;  %v6866_v62 = vcombine.low %v6847_v11, %v6851_v22 }
 0x1ef   : > { %2041 = vmatprep.subr.bf16.mxu1 %v6865_v39  ;;  %1999 = vmatpush1.bf16.msra.mxu0 %v6862_v9 }
 0x1f0   : > { %2082 = vmatprep.subr.bf16.mxu0 %v1976_v49 }
 0x1f1   : > { %1658 = vmatmul.mubr.bf16.gmra.mxu0 %v8016_v37 }
 0x1f2   : > { %2042 = vmatpush1.bf16.msra.mxu1 %v6864_v26  ;;  %2016 = vmatprep.mubr.bf16.mxu0 %v10752_v0 }
 0x1f3   : > { %2125 = vmatprep.subr.bf16.mxu1 %v1982_v30 }
 0x1f5   : > { %1709 = vmatmul.mubr.bf16.gmra.mxu1 %v8016_v37  ;;  %v6869_v37 = vcombine.high %v6848_v48, %v6852_v44 }
 0x1f6   : > { %2059 = vmatprep.mubr.bf16.mxu1 %v10752_v0 }
 0x1f9   : > { %6878 = vmatmul.mubr.msk.bf16.vlgmr.msra.gmra.mxu0 %vm341_vm2, %v7454_v24 }
 0x1fa   : > { %2083 = vmatpush1.bf16.msra.mxu0 %v1973_v42  ;;  %2102 = vmatprep.mubr.bf16.mxu0 %v10752_v0  ;;  %v8329_v42 = vpop.permute.xlu1 %1877 }
 0x1fb   : > { %2084 = vmatprep.subr.bf16.mxu0 %v6867_v13 }
 0x1fd   : > { %6879 = vmatmul.mubr.msk.bf16.vlgmr.msra.gmra.mxu1 %vm341_vm2, %v7454_v24 }
 0x1fe   : > { %2085 = vmatpush1.bf16.msra.mxu0 %v6866_v62  ;;  %2126 = vmatpush1.bf16.msra.mxu1 %v1979_v3 }
 0x1ff   : > { %2127 = vmatprep.subr.bf16.mxu1 %v6869_v37  ;;  %2145 = vmatprep.mubr.bf16.mxu1 %v10752_v0 }
 0x201   : > { %6880 = vmatmul.mubr.msk.bf16.vlgmr.msra.gmra.mxu0 %vm341_vm2, %v7454_v24 }
 0x202   : > { %2128 = vmatpush1.bf16.msra.mxu1 %v6868_v35 }
 0x205   : > { %6881 = vmatmul.mubr.msk.bf16.vlgmr.msra.gmra.mxu1 %vm341_vm2, %v7454_v24 }
 0x269   : > { %v8256_v61 = vpop.f32.mrf.mxu0 }
 0x26b   : > { %v8258_v27 = vpop.f32.mrf.mxu0 }
 0x26d   : > { %v8262_v14 = vpop.f32.mrf.mxu0 }
 0x26f   : > { %v8266_v53 = vpop.f32.mrf.mxu0 }
 0x270   : > { %10850 = vst [vmem:[#allocation3_spill] sm:$0xff] %v8266_v53 }
 0x271   : > { %v8270_v8 = vpop.f32.mrf.mxu0 }
 0x273   : > { %v8274_v19 = vpop.f32.mrf.mxu0 }
 0x275   : > { %v8278_v59 = vpop.f32.mrf.mxu0 }
 0x276   : > { %10853 = vst [vmem:[#allocation6_spill] sm:$0xff] %v8278_v59 }
 0x277   : > { %v8282_v34 = vpop.f32.mrf.mxu0 }
 0x278   : > { %10854 = vst [vmem:[#allocation7_spill] sm:$0xff] %v8282_v34 }
 0x289   : > { %v8260_v56 = vpop.f32.mrf.mxu1 }
 0x28b   : > { %v8264_v55 = vpop.f32.mrf.mxu1 }
 0x28d   : > { %v8268_v25 = vpop.f32.mrf.mxu1 }
 0x28e   : > { %10851 = vst [vmem:[#allocation4_spill] sm:$0xff] %v8268_v25 }
 0x28f   : > { %v8272_v43 = vpop.f32.mrf.mxu1 }
 0x290   : > { %10852 = vst [vmem:[#allocation5_spill] sm:$0xff] %v8272_v43 }
 0x291   : > { %v8276_v57 = vpop.f32.mrf.mxu1 }
 0x293   : > { %v8280_v33 = vpop.f32.mrf.mxu1 }
 0x295   : > { %v8284_v47 = vpop.f32.mrf.mxu1 }
 0x296   : > { %10855 = vst [vmem:[#allocation8_spill] sm:$0xff] %v8284_v47 }
 0x297   : > { %v8288_v20 = vpop.f32.mrf.mxu1 }
 0x298   : > { %10856 = vst [vmem:[#allocation9_spill] sm:$0xff] %v8288_v20 }
 0x2a9   : > { %v8286_v1 = vpop.f32.mrf.mxu0 }
 0x2ab   : > { %v8290_v45 = vpop.f32.mrf.mxu0 }
 0x2ad   : > { %v8292_v51 = vpop.f32.mrf.mxu0  ;;  %v8294_v29 = vpop.f32.mrf.mxu1 }
 0x2ae   : > { %10857 = vst [vmem:[#allocation10_spill] sm:$0xff] %v8292_v51 }
 0x2af   : > { %v8296_v32 = vpop.f32.mrf.mxu0  ;;  %v1704_v50 = vpop.f32.mrf.mxu1 }
 0x2b0   : > { %10858 = vst [vmem:[#allocation11_spill] sm:$0xff] %v8296_v32 }
 0x2b1   : > { %v8298_v6 = vpop.f32.mrf.mxu0  ;;  %v8300_v16 = vpop.f32.mrf.mxu1 }
 0x2b2   : > { %10859 = vst [vmem:[#allocation12_spill] sm:$0xff] %v8298_v6  ;;  %10860 = vst [vmem:[#allocation13_spill] sm:$0xff] %v8300_v16 }
 0x2b3   : > { %v8302_v15 = vpop.f32.mrf.mxu0  ;;  %v1707_v46 = vpop.f32.mrf.mxu1 }
 0x2b4   : > { %10861 = vst [vmem:[#allocation14_spill] sm:$0xff] %v8302_v15 }
 0x2b5   : > { %v8304_v54 = vpop.f32.mrf.mxu0  ;;  %v8306_v36 = vpop.f32.mrf.mxu1 }
 0x2b6   : > { %10862 = vst [vmem:[#allocation15_spill] sm:$0xff] %v8304_v54  ;;  %10863 = vst [vmem:[#allocation16_spill] sm:$0xff] %v8306_v36 }
 0x2b7   : > { %v8308_v4 = vpop.f32.mrf.mxu0  ;;  %v1712_v12 = vpop.f32.mrf.mxu1 }
 0x2b8   : > { %10864 = vst [vmem:[#allocation17_spill] sm:$0xff] %v8308_v4 }
 0x2b9   : > { %v8310_v58 = vpop.f32.mrf.mxu1  ;;  %v2018_v40 = vpop.f32.mrf.mxu0 }
 0x2ba   : > { %10865 = vst [vmem:[#allocation18_spill] sm:$0xff] %v8310_v58  ;;  %v8312_v31 = vadd.f32 %v2018_v40, %v1873_v2 }
 0x2bb   : > { %v1715_v63 = vpop.f32.mrf.mxu1  ;;  %v2020_v41 = vpop.f32.mrf.mxu0 }
 0x2bc   : > { %v8314_v21 = vadd.f32 %v2020_v41, %v1873_v2  ;;  %v10759_v52 = vmax.f32 %v8312_v31, 0.0 }
 0x2bd   : > { %v2061_v38 = vpop.f32.mrf.mxu1  ;;  %v2022_v60 = vpop.f32.mrf.mxu0 }
 0x2be   : > { %v10761_v5 = vmax.f32 %v8314_v21, 0.0  ;;  %v8318_v18 = vadd.f32 %v2061_v38, %v1873_v2 }
 0x2bf   : > { %v2024_v28 = vpop.f32.mrf.mxu0  ;;  %v2063_v9 = vpop.f32.mrf.mxu1 }
 0x2c0   : > { %v7336_v39 = vpack.c.bf16 %v10761_v5, %v10759_v52  ;;  %v8324_v23 = vadd.f32 %v2063_v9, %v1873_v2  ;;  %v10755_v30 = vmax.f32 %v8318_v18, 0.0 }
 0x2c1   : > { %v2065_v49 = vpop.f32.mrf.mxu1  ;;  %v2104_v26 = vpop.f32.mrf.mxu0 }
 0x2c2   : > { %2554 = vrot.lane.b32.xlu0 %v7336_v39, %s7539_s7  ;;  %v10757_v17 = vmax.f32 %v8324_v23, 0.0  ;;  %v2105_v11 = vadd.f32 %v2104_v26, %v1873_v2 }
 0x2c3   : > { %v2067_v22 = vpop.f32.mrf.mxu1  ;;  %v2106_v24 = vpop.f32.mrf.mxu0 }
 0x2c4   : > { %v7337_v10 = vpack.c.bf16 %v10757_v17, %v10755_v30  ;;  %v2107_v13 = vadd.f32 %v2106_v24, %v1873_v2  ;;  %v2160_v37 = vmax.f32 %v2105_v11, 0.0 }
 0x2c5   : > { %v2108_v48 = vpop.f32.mrf.mxu0  ;;  %v2147_v44 = vpop.f32.mrf.mxu1 }
 0x2c6   : > { %v2109_v62 = vadd.f32 %v2108_v48, %v8329_v42  ;;  %v2148_v3 = vadd.f32 %v2147_v44, %v1873_v2  ;;  %2500 = vrot.lane.b32.xlu0 %v7336_v39, %s7538_s6  ;;  %v2161_v35 = vmax.f32 %v2107_v13, 0.0  ;;  %2556 = vrot.lane.b32.xlu1 %v7337_v10, %s7539_s7 }
 0x2c7   : > { %v2110_v50 = vpop.f32.mrf.mxu0  ;;  %v2149_v46 = vpop.f32.mrf.mxu1 }
 0x2c8   : > { %v2168_v12 = vmax.f32 %v2109_v62, 0.0  ;;  %v2162_v40 = vmax.f32 %v2148_v3, 0.0  ;;  %v2111_v63 = vadd.f32 %v2110_v50, %v8329_v42  ;;  %v8339_v41 = vpack.c.bf16 %v2161_v35, %v2160_v37 }
 0x2c9   : > { %v2150_v38 = vadd.f32 %v2149_v46, %v1873_v2  ;;  %v2151_v9 = vpop.f32.mrf.mxu1  ;;  %v8361_v3 = vadd.f32 %v2022_v60, %v8329_v42  ;;  %v8364_v37 = vadd.f32 %v2024_v28, %v8329_v42  ;;  %v8371_v46 = vadd.f32 %v2067_v22, %v8329_v42 }
 0x2ca   : > { %v7339_v26 = vpack.c.bf16 %v2162_v40, %v2162_v40  ;;  %v2169_v24 = vmax.f32 %v2111_v63, 0.0  ;;  %v2152_v48 = vadd.f32 %v2151_v9, %v8329_v42  ;;  %2446 = vrot.lane.b32.xlu0 %v7336_v39, %s7540_s8  ;;  %2219 = vst [vmem:[#allocation2 + $0x10] sm:$0xff] %v8339_v41  ;;  %2502 = vrot.lane.b32.xlu1 %v7337_v10, %s7538_s6 }
 0x2cb   : > { %v2163_v11 = vmax.f32 %v2150_v38, 0.0  ;;  %v10758_v35 = vmax.f32 %v8361_v3, 0.0  ;;  %v10760_v50 = vmax.f32 %v8364_v37, 0.0  ;;  %v10756_v28 = vmax.f32 %v8371_v46, 0.0 }
 0x2cc   : > { %2220 = vst [vmem:[#allocation2 + $0x18] sm:$0xf] %v7339_v26  ;;  %v8345_v13 = vpack.c.bf16 %v2169_v24, %v2168_v12  ;;  %v8347_v44 = vmax.f32 %v2152_v48, 0.0  ;;  %v8375_v12 = vadd.f32 %v2065_v49, %v8329_v42  ;;  %v2153_v49 = vpop.f32.mrf.mxu1  ;;  %v3470_v48 = vld [vmem:[%s10748_s2] sm:$0xff] }
 0x2cd   : > { %v8349_v62 = vpack.c.bf16 %v2163_v11, %v2162_v40  ;;  %v7340_v60 = vpack.c.bf16 %v10760_v50, %v10758_v35  ;;  %v2154_v22 = vadd.f32 %v2153_v49, %v8329_v42 }
 0x2ce   : > { %2223 = vst [vmem:[#allocation2 + $0x2c] sm:$0xff] %v8345_v13  ;;  %v7343_v2 = vpack.c.bf16 %v8347_v44, %v8347_v44  ;;  %2392 = vrot.lane.b32.xlu0 %v7336_v39, %s7541_s9  ;;  %2448 = vrot.lane.b32.xlu1 %v7337_v10, %s7540_s8  ;;  %v10754_v40 = vmax.f32 %v8375_v12, 0.0 }
 0x2cf   : > { %v2171_v63 = vmax.f32 %v2154_v22, 0.0 }
 0x2d0   : > { %2224 = vst [vmem:[#allocation2 + $0x34] sm:$0xf] %v7343_v2 }
 0x2d1   : > { %v7345_v42 = vpack.c.bf16 %v2171_v63, %v8347_v44 }
 0x2d2   : > { %2338 = vrot.lane.b32.xlu0 %v7336_v39, %s7542_s10  ;;  %2394 = vrot.lane.b32.xlu1 %v7337_v10, %s7541_s9 }
 0x2d6   : > { %2284 = vrot.lane.b32.xlu0 %v7336_v39, %s7543_s11  ;;  %2340 = vrot.lane.b32.xlu1 %v7337_v10, %s7542_s10 }
 0x2da   : > { %2230 = vrot.lane.b32.xlu0 %v7336_v39, %s7544_s12  ;;  %2286 = vrot.lane.b32.xlu1 %v7337_v10, %s7543_s11 }
 0x2de   : > { %2608 = vrot.lane.b32.xlu0 %v7336_v39, %s7545_s13  ;;  %2232 = vrot.lane.b32.xlu1 %v7337_v10, %s7544_s12  ;;  %v7341_v39 = vpack.c.bf16 %v10756_v28, %v10754_v40 }
 0x2e2   : > { %2562 = vrot.lane.b32.xlu0 %v7340_v60, %s7539_s7  ;;  %2610 = vrot.lane.b32.xlu1 %v7337_v10, %s7545_s13  ;;  %v8438_v10 = vld [vmem:[%s10749_s3 + $0x4] ss:$8 sps:$4 sm:$0xff]  }
 0x2e3   : > { %6959 = vmatprep.mubr.msk.bf16.mxu0 %vm1502_vm3, %v8438_v10  ;;  %6961 = vmatprep.mubr.msk.bf16.mxu1 %vm1502_vm3, %v8438_v10 }
 0x2e6   : > { %2508 = vrot.lane.b32.xlu0 %v7340_v60, %s7538_s6  ;;  %2564 = vrot.lane.b32.xlu1 %v7341_v39, %s7539_s7 }
 0x2ea   : > { %2454 = vrot.lane.b32.xlu0 %v7340_v60, %s7540_s8  ;;  %2566 = vrot.lane.b32.xlu1 %v8345_v13, %s7539_s7 }
 0x2ee   : > { %2400 = vrot.lane.b32.xlu0 %v7340_v60, %s7541_s9  ;;  %2510 = vrot.lane.b32.xlu1 %v7341_v39, %s7538_s6 }
 0x2f2   : > { %2346 = vrot.lane.b32.xlu0 %v7340_v60, %s7542_s10  ;;  %2512 = vrot.lane.b32.xlu1 %v8345_v13, %s7538_s6 }
 0x2f6   : > { %2292 = vrot.lane.b32.xlu0 %v7340_v60, %s7543_s11  ;;  %2456 = vrot.lane.b32.xlu1 %v7341_v39, %s7540_s8 }
 0x2fa   : > { %2238 = vrot.lane.b32.xlu0 %v7340_v60, %s7544_s12  ;;  %2458 = vrot.lane.b32.xlu1 %v8345_v13, %s7540_s8 }
 0x2fe   : > { %2558 = vrot.lane.b32.xlu0 %v8339_v41, %s7539_s7  ;;  %2402 = vrot.lane.b32.xlu1 %v7341_v39, %s7541_s9 }
 0x302   : > { %2504 = vrot.lane.b32.xlu0 %v8339_v41, %s7538_s6  ;;  %2404 = vrot.lane.b32.xlu1 %v8345_v13, %s7541_s9 }
 0x306   : > { %2450 = vrot.lane.b32.xlu0 %v8339_v41, %s7540_s8  ;;  %2348 = vrot.lane.b32.xlu1 %v7341_v39, %s7542_s10 }
 0x30a   : > { %2396 = vrot.lane.b32.xlu0 %v8339_v41, %s7541_s9  ;;  %2350 = vrot.lane.b32.xlu1 %v8345_v13, %s7542_s10 }
 0x30e   : > { %2342 = vrot.lane.b32.xlu0 %v8339_v41, %s7542_s10  ;;  %2294 = vrot.lane.b32.xlu1 %v7341_v39, %s7543_s11 }
 0x312   : > { %2288 = vrot.lane.b32.xlu0 %v8339_v41, %s7543_s11  ;;  %2296 = vrot.lane.b32.xlu1 %v8345_v13, %s7543_s11 }
 0x316   : > { %2234 = vrot.lane.b32.xlu0 %v8339_v41, %s7544_s12  ;;  %2240 = vrot.lane.b32.xlu1 %v7341_v39, %s7544_s12 }
 0x31a   : > { %2616 = vrot.lane.b32.xlu0 %v7340_v60, %s7545_s13  ;;  %2242 = vrot.lane.b32.xlu1 %v8345_v13, %s7544_s12 }
 0x31e   : > { %2612 = vrot.lane.b32.xlu0 %v8339_v41, %s7545_s13  ;;  %2618 = vrot.lane.b32.xlu1 %v7341_v39, %s7545_s13 }
 0x322   : > { %2560 = vrot.lane.b32.xlu0 %v8349_v62, %s7539_s7  ;;  %2620 = vrot.lane.b32.xlu1 %v8345_v13, %s7545_s13 }
 0x326   : > { %2506 = vrot.lane.b32.xlu0 %v8349_v62, %s7538_s6  ;;  %2568 = vrot.lane.b32.xlu1 %v7345_v42, %s7539_s7 }
 0x32a   : > { %2452 = vrot.lane.b32.xlu0 %v8349_v62, %s7540_s8  ;;  %2514 = vrot.lane.b32.xlu1 %v7345_v42, %s7538_s6 }
 0x32e   : > { %2398 = vrot.lane.b32.xlu0 %v8349_v62, %s7541_s9  ;;  %2460 = vrot.lane.b32.xlu1 %v7345_v42, %s7540_s8 }
 0x332   : > { %2344 = vrot.lane.b32.xlu0 %v8349_v62, %s7542_s10  ;;  %2406 = vrot.lane.b32.xlu1 %v7345_v42, %s7541_s9 }
 0x334   : > { %v2555_v41 = vpop.permute.xlu0 %2554 }
 0x335   : > { %v2570_v30 = vrot.slane %v2555_v41, 4 }
 0x336   : > { %2290 = vrot.lane.b32.xlu0 %v8349_v62, %s7543_s11  ;;  %2352 = vrot.lane.b32.xlu1 %v7345_v42, %s7542_s10 }
 0x338   : > { %v2501_v38 = vpop.permute.xlu0 %2500  ;;  %v8465_v9 = vpop.permute.xlu1 %2556 }
 0x339   : > { %v10762_v40 = vrot.slane %v8465_v9, 4  ;;  %v2516_v59 = vrot.slane %v2501_v38, 4 }
 0x33a   : > { %2236 = vrot.lane.b32.xlu0 %v8349_v62, %s7544_s12  ;;  %2298 = vrot.lane.b32.xlu1 %v7345_v42, %s7543_s11 }
 0x33b   : > { %v2578_v17 = vsel %vm643_vm4, %v2570_v30, %v10762_v40 }
 0x33c   : > { %v8470_v26 = vpop.permute.xlu0 %2446  ;;  %v8472_v24 = vpop.permute.xlu1 %2502  ;;  %v2579_v58 = vsel %vm975_vm5, %v2555_v41, %v2578_v17 }
 0x33d   : > { %v10763_v20 = vrot.slane %v8472_v24, 4  ;;  %v2462_v6 = vrot.slane %v8470_v26, 4 }
 0x33e   : > { %2614 = vrot.lane.b32.xlu0 %v8349_v62, %s7545_s13  ;;  %2244 = vrot.lane.b32.xlu1 %v7345_v42, %s7544_s12  ;;  %v7511_v62 = vld [vmem:[%s10748_s2 + $0x8] sm:$0xff] }
 0x33f   : > { %v2524_v30 = vsel %vm643_vm4, %v2516_v59, %v10763_v20 }
 0x340   : > { %v8480_v11 = vpop.permute.xlu0 %2392  ;;  %v8482_v13 = vpop.permute.xlu1 %2448  ;;  %v2525_v41 = vsel %vm920_vm6, %v2501_v38, %v2524_v30 }
 0x342   : > { %3474 = vperm.xlu0 %7433, %v3470_v48   ;;  %2622 = vrot.lane.b32.xlu1 %v7345_v42, %s7545_s13 }
 0x344   : > { %v8485_v44 = vpop.permute.xlu0 %2338  ;;  %v8487_v2 = vpop.permute.xlu1 %2394 }
 0x345   : > { %v2354_v53 = vrot.slane %v8485_v44, 4 }
 0x346   : > { %3479 = vperm.xlu1 %7434, %v7511_v62  }
 0x348   : > { %v8492_v60 = vpop.permute.xlu0 %2284  ;;  %v8494_v39 = vpop.permute.xlu1 %2340 }
 0x34c   : > { %v8496_v49 = vpop.permute.xlu0 %2230  ;;  %v8498_v22 = vpop.permute.xlu1 %2286 }
 0x350   : > { %v8500_v63 = vpop.permute.xlu0 %2608  ;;  %v8502_v42 = vpop.permute.xlu1 %2232 }
 0x354   : > { %v2563_v48 = vpop.permute.xlu0 %2562  ;;  %v8504_v0 = vpop.permute.xlu1 %2610 }
 0x355   : > { %v2574_v35 = vrot.slane %v2563_v48, 4 }
 0x358   : > { %v2509_v28 = vpop.permute.xlu0 %2508  ;;  %v2565_v62 = vpop.permute.xlu1 %2564 }
 0x359   : > { %v2575_v52 = vrot.slane %v2565_v62, 4 }
 0x35b   : > { %v2585_v50 = vsel %vm643_vm4, %v2574_v35, %v2575_v52  ;;  %v2520_v35 = vrot.slane %v2509_v28, 4 }
 0x35c   : > { %v2455_v5 = vpop.permute.xlu0 %2454  ;;  %v2586_v4 = vsel %vm975_vm5, %v2563_v48, %v2585_v50  ;;  %v8513_v54 = vpop.permute.xlu1 %2566 }
 0x35d   : > { %v6946_v47 = vcombine.high %v2579_v58, %v2586_v4  ;;  %v6945_v34 = vcombine.low %v2579_v58, %v2586_v4  ;;  %v2466_v30 = vrot.slane %v2455_v5, 4 }
 0x35f   : > { %3110 = vmatprep.subr.bf16.mxu0 %v6946_v47  ;;  %v10764_v47 = vrot.slane %v8482_v13, 4 }
 0x360   : > { %v2401_v36 = vpop.permute.xlu0 %2400  ;;  %v2511_v15 = vpop.permute.xlu1 %2510  ;;  %3111 = vmatpush1.bf16.msra.mxu0 %v6945_v34 }
 0x361   : > { %v2521_v40 = vrot.slane %v2511_v15, 4  ;;  %v2470_v38 = vsel %vm643_vm4, %v2462_v6, %v10764_v47  ;;  %v2408_v6 = vrot.slane %v8480_v11, 4 }
 0x363   : > { %v2531_v17 = vsel %vm643_vm4, %v2520_v35, %v2521_v40  ;;  %v10766_v35 = vrot.slane %v8487_v2, 4 }
 0x364   : > { %v8520_v50 = vpop.permute.xlu0 %2346  ;;  %v2532_v48 = vsel %vm920_vm6, %v2509_v28, %v2531_v17  ;;  %v8524_v4 = vpop.permute.xlu1 %2512  ;;  %v10765_v17 = vrot.slane %v8513_v54, 4 }
 0x365   : > { %v6939_v58 = vcombine.high %v2525_v41, %v2532_v48  ;;  %v6938_v34 = vcombine.low %v2525_v41, %v2532_v48  ;;  %v2416_v51 = vsel %vm643_vm4, %v2408_v6, %v10766_v35  ;;  %v10768_v43 = vrot.slane %v8524_v4, 4 }
 0x367   : > { %3112 = vmatprep.subr.bf16.mxu0 %v6939_v58  ;;  %v2471_v58 = vsel %vm865_vm7, %v8470_v26, %v2470_v38  ;;  %v2412_v38 = vrot.slane %v2401_v36, 4 }
 0x368   : > { %v8528_v16 = vpop.permute.xlu0 %2292  ;;  %v8530_v59 = vpop.permute.xlu1 %2456  ;;  %3113 = vmatpush1.bf16.msra.mxu0 %v6938_v34 }
 0x369   : > { %v2467_v28 = vrot.slane %v8530_v59, 4 }
 0x36b   : > { %v2477_v41 = vsel %vm643_vm4, %v2466_v30, %v2467_v28  ;;  %v2587_v30 = vsel %vm643_vm4, %v2575_v52, %v10765_v17  ;;  %v10866_v52 = vrot.slane %v8465_v9, 4 }
 0x36c   : > { %v8539_v48 = vpop.permute.xlu0 %2238  ;;  %v2478_v34 = vsel %vm865_vm7, %v2455_v5, %v2477_v41  ;;  %v8544_v20 = vpop.permute.xlu1 %2458  ;;  %v2588_v6 = vsel %vm975_vm5, %v2565_v62, %v2587_v30 }
 0x36d   : > { %v6932_v47 = vcombine.high %v2471_v58, %v2478_v34  ;;  %v6931_v32 = vcombine.low %v2471_v58, %v2478_v34  ;;  %v2417_v58 = vsel %vm810_vm8, %v8480_v11, %v2416_v51 }
 0x36f   : > { %3114 = vmatprep.subr.bf16.mxu0 %v6932_v47  ;;  %v2533_v47 = vsel %vm643_vm4, %v2521_v40, %v10768_v43 }
 0x370   : > { %v8554_v25 = vpop.permute.xlu0 %2558  ;;  %v2403_v5 = vpop.permute.xlu1 %2402  ;;  %3115 = vmatpush1.bf16.msra.mxu0 %v6931_v32 }
 0x371   : > { %v10767_v26 = vrot.slane %v8554_v25, 4  ;;  %v2413_v41 = vrot.slane %v2403_v5, 4 }
 0x373   : > { %v2580_v17 = vsel %vm643_vm4, %v10866_v52, %v10767_v26  ;;  %v2423_v35 = vsel %vm643_vm4, %v2412_v38, %v2413_v41  ;;  %v10867_v38 = vrot.slane %v8472_v24, 4 }
 0x374   : > { %v2581_v51 = vsel %vm975_vm5, %v8465_v9, %v2580_v17  ;;  %v8573_v11 = vpop.permute.xlu0 %2504  ;;  %v2424_v62 = vsel %vm810_vm8, %v2401_v36, %v2423_v35  ;;  %v8576_v30 = vpop.permute.xlu1 %2404  ;;  %v10868_v17 = vrot.slane %v8494_v39, 4  ;;  %v2534_v35 = vsel %vm920_vm6, %v2511_v15, %v2533_v47 }
 0x375   : > { %v2518_v34 = vrot.slane %v8573_v11, 4  ;;  %v6948_v52 = vcombine.high %v2581_v51, %v2588_v6  ;;  %v6947_v26 = vcombine.low %v2581_v51, %v2588_v6  ;;  %v6925_v40 = vcombine.high %v2417_v58, %v2424_v62 }
 0x376   : > { %v6924_v43 = vcombine.low %v2417_v58, %v2424_v62  ;;  %v2362_v36 = vsel %vm643_vm4, %v2354_v53, %v10868_v17  ;;  %v10769_v32 = vrot.slane %v8576_v30, 4  ;;  %v10869_v58 = vrot.slane %v8544_v20, 4 }
 0x377   : > { %v2526_v9 = vsel %vm643_vm4, %v10867_v38, %v2518_v34  ;;  %3163 = vmatprep.subr.bf16.mxu1 %v6948_v52  ;;  %3116 = vmatprep.subr.bf16.mxu0 %v6925_v40  ;;  %v2358_v15 = vrot.slane %v8520_v50, 4 }
 0x378   : > { %v2527_v6 = vsel %vm920_vm6, %v8472_v24, %v2526_v9  ;;  %v8592_v51 = vpop.permute.xlu0 %2450  ;;  %3164 = vmatpush1.bf16.msra.mxu1 %v6947_v26  ;;  %v2479_v62 = vsel %vm643_vm4, %v2467_v28, %v10869_v58  ;;  %v2349_v52 = vpop.permute.xlu1 %2348  ;;  %3117 = vmatpush1.bf16.msra.mxu0 %v6924_v43  ;;  %v2363_v24 = vsel %vm755_vm9, %v8485_v44, %v2362_v36  ;;  %v2301_v9 = vrot.slane %v8498_v22, 4 }
 0x379   : > { %v2464_v38 = vrot.slane %v8592_v51, 4  ;;  %v6941_v53 = vcombine.high %v2527_v6, %v2534_v35  ;;  %v6940_v17 = vcombine.low %v2527_v6, %v2534_v35  ;;  %v2359_v47 = vrot.slane %v2349_v52, 4 }
 0x37a   : > { %v10870_v26 = vrot.slane %v8482_v13, 4  ;;  %v2480_v43 = vsel %vm865_vm7, %v8530_v59, %v2479_v62  ;;  %v2425_v40 = vsel %vm643_vm4, %v2413_v41, %v10769_v32 }
 0x37b   : > { %3165 = vmatprep.subr.bf16.mxu1 %v6941_v53  ;;  %v2369_v35 = vsel %vm643_vm4, %v2358_v15, %v2359_v47 }
 0x37c   : > { %v2472_v28 = vsel %vm643_vm4, %v10870_v26, %v2464_v38  ;;  %v8615_v36 = vpop.permute.xlu0 %2396  ;;  %3166 = vmatpush1.bf16.msra.mxu1 %v6940_v17  ;;  %v2370_v6 = vsel %vm755_vm9, %v8520_v50, %v2369_v35  ;;  %v8619_v58 = vpop.permute.xlu1 %2350  ;;  %v2300_v26 = vrot.slane %v8492_v60, 4 }
 0x37d   : > { %v2473_v44 = vsel %vm865_vm7, %v8482_v13, %v2472_v28  ;;  %v2410_v53 = vrot.slane %v8615_v36, 4  ;;  %v10770_v41 = vrot.slane %v8619_v58, 4  ;;  %v6918_v15 = vcombine.high %v2363_v24, %v2370_v6 }
 0x37e   : > { %v6934_v59 = vcombine.high %v2473_v44, %v2480_v43  ;;  %v6933_v62 = vcombine.low %v2473_v44, %v2480_v43  ;;  %v6917_v32 = vcombine.low %v2363_v24, %v2370_v6  ;;  %v10871_v13 = vrot.slane %v8487_v2, 4 }
 0x37f   : > { %v2308_v50 = vsel %vm643_vm4, %v2300_v26, %v2301_v9  ;;  %v2426_v28 = vsel %vm810_vm8, %v2403_v5, %v2425_v40  ;;  %3118 = vmatprep.subr.bf16.mxu0 %v6918_v15  ;;  %v2371_v24 = vsel %vm643_vm4, %v2359_v47, %v10770_v41  ;;  %v2304_v26 = vrot.slane %v8528_v16, 4 }
 0x380   : > { %v2418_v17 = vsel %vm643_vm4, %v10871_v13, %v2410_v53  ;;  %3167 = vmatprep.subr.bf16.mxu1 %v6934_v59  ;;  %v8633_v35 = vpop.permute.xlu0 %2342  ;;  %v2295_v44 = vpop.permute.xlu1 %2294  ;;  %3119 = vmatpush1.bf16.msra.mxu0 %v6917_v32  ;;  %v10872_v40 = vrot.slane %v8494_v39, 4  ;;  %v2247_v47 = vrot.slane %v8502_v42, 4  ;;  %v2372_v15 = vsel %vm755_vm9, %v2349_v52, %v2371_v24 }
 0x381   : > { %v2419_v43 = vsel %vm810_vm8, %v8487_v2, %v2418_v17  ;;  %3168 = vmatpush1.bf16.msra.mxu1 %v6933_v62  ;;  %v2356_v6 = vrot.slane %v8633_v35, 4  ;;  %v2305_v5 = vrot.slane %v2295_v44, 4  ;;  %v2309_v2 = vsel %vm700_vm10, %v8492_v60, %v2308_v50 }
 0x382   : > { %v6927_v59 = vcombine.high %v2419_v43, %v2426_v28  ;;  %v6926_v13 = vcombine.low %v2419_v43, %v2426_v28 }
 0x383   : > { %v2364_v62 = vsel %vm643_vm4, %v10872_v40, %v2356_v6  ;;  %v2315_v32 = vsel %vm643_vm4, %v2304_v26, %v2305_v5  ;;  %v2246_v26 = vrot.slane %v8496_v49, 4 }
 0x384   : > { %3169 = vmatprep.subr.bf16.mxu1 %v6927_v59  ;;  %v2365_v17 = vsel %vm755_vm9, %v8494_v39, %v2364_v62  ;;  %v8652_v28 = vpop.permute.xlu0 %2288  ;;  %v2316_v60 = vsel %vm700_vm10, %v8528_v16, %v2315_v32  ;;  %v8656_v50 = vpop.permute.xlu1 %2296 }
 0x385   : > { %3170 = vmatpush1.bf16.msra.mxu1 %v6926_v13  ;;  %v2302_v43 = vrot.slane %v8652_v28, 4  ;;  %v6920_v59 = vcombine.high %v2365_v17, %v2372_v15  ;;  %v6919_v40 = vcombine.low %v2365_v17, %v2372_v15  ;;  %v10771_v41 = vrot.slane %v8656_v50, 4 }
 0x386   : > { %v6911_v52 = vcombine.high %v2309_v2, %v2316_v60  ;;  %v6910_v24 = vcombine.low %v2309_v2, %v2316_v60  ;;  %v2254_v2 = vsel %vm643_vm4, %v2246_v26, %v2247_v47  ;;  %v2250_v15 = vrot.slane %v8539_v48, 4 }
 0x387   : > { %v2310_v39 = vsel %vm643_vm4, %v2301_v9, %v2302_v43  ;;  %3171 = vmatprep.subr.bf16.mxu1 %v6920_v59  ;;  %v2317_v16 = vsel %vm643_vm4, %v2305_v5, %v10771_v41 }
 0x388   : > { %v2311_v13 = vsel %vm700_vm10, %v8498_v22, %v2310_v39  ;;  %v8669_v62 = vpop.permute.xlu0 %2234  ;;  %3120 = vmatprep.subr.bf16.mxu0 %v6911_v52  ;;  %v2318_v32 = vsel %vm700_vm10, %v2295_v44, %v2317_v16  ;;  %v2241_v17 = vpop.permute.xlu1 %2240  ;;  %v2625_v52 = vrot.slane %v8504_v0, 4 }
 0x389   : > { %3172 = vmatpush1.bf16.msra.mxu1 %v6919_v40  ;;  %3121 = vmatpush1.bf16.msra.mxu0 %v6910_v24  ;;  %v2251_v9 = vrot.slane %v2241_v17, 4  ;;  %v10772_v60 = vrot.slane %v8669_v62, 4  ;;  %v6913_v59 = vcombine.high %v2311_v13, %v2318_v32  ;;  %v6912_v5 = vcombine.low %v2311_v13, %v2318_v32 }
 0x38a   : > { %v2255_v40 = vsel %vm645_vm11, %v8496_v49, %v2254_v2 }
 0x38b   : > { %v2261_v41 = vsel %vm643_vm4, %v2250_v15, %v2251_v9  ;;  %3173 = vmatprep.subr.bf16.mxu1 %v6913_v59  ;;  %v2256_v24 = vsel %vm643_vm4, %v2247_v47, %v10772_v60  ;;  %v2624_v15 = vrot.slane %v8500_v63, 4 }
 0x38c   : > { %v2617_v22 = vpop.permute.xlu0 %2616  ;;  %v2262_v26 = vsel %vm645_vm11, %v8539_v48, %v2261_v41  ;;  %v8681_v44 = vpop.permute.xlu1 %2242  ;;  %v10873_v48 = vmax.f32 %v8314_v21, 0.0  ;;  %v10874_v41 = vmax.f32 %v8364_v37, 0.0  ;;  %v2257_v59 = vsel %vm645_vm11, %v8502_v42, %v2256_v24 }
 0x38d   : > { %3174 = vmatpush1.bf16.msra.mxu1 %v6912_v5  ;;  %v10773_v39 = vrot.slane %v8681_v44, 4  ;;  %v6904_v16 = vcombine.high %v2255_v40, %v2262_v26  ;;  %v6903_v13 = vcombine.low %v2255_v40, %v2262_v26  ;;  %v2632_v47 = vsel %vm643_vm4, %v2624_v15, %v2625_v52 }
 0x38e   : > { %v7516_v32 = vpack.c.bf16 %v10874_v41, %v10873_v48  ;;  %v2628_v40 = vrot.slane %v2617_v22, 4  ;;  %v10875_v21 = vmax.f32 %v8312_v31, 0.0  ;;  %v10876_v37 = vmax.f32 %v8361_v3, 0.0 }
 0x38f   : > { %v2263_v49 = vsel %vm643_vm4, %v2251_v9, %v10773_v39  ;;  %3122 = vmatprep.subr.bf16.mxu0 %v6904_v16  ;;  %v10877_v42 = vmax.f32 %v8324_v23, 0.0 }
 0x390   : > { %v8691_v2 = vpop.permute.xlu0 %2612  ;;  %v2264_v5 = vsel %vm645_vm11, %v2241_v17, %v2263_v49  ;;  %v2619_v26 = vpop.permute.xlu1 %2618  ;;  %3123 = vmatpush1.bf16.msra.mxu0 %v6903_v13  ;;  %v7517_v48 = vpack.c.bf16 %v10876_v37, %v10875_v21  ;;  %v10878_v17 = vmax.f32 %v8371_v46, 0.0  ;;  %v2633_v13 = vsel %vm1030_vm12, %v8500_v63, %v2632_v47 }
 0x391   : > { %v2629_v60 = vrot.slane %v2619_v26, 4  ;;  %v2626_v9 = vrot.slane %v8691_v2, 4  ;;  %3124 = vmatprep.subr.bf16.mxu0 %v7516_v32  ;;  %v6906_v16 = vcombine.high %v2257_v59, %v2264_v5  ;;  %v6905_v39 = vcombine.low %v2257_v59, %v2264_v5 }
 0x392   : > { %v7518_v24 = vpack.c.bf16 %v10878_v17, %v10877_v42  ;;  %v10879_v63 = vmax.f32 %v8318_v18, 0.0  ;;  %v10881_v37 = vrot.slane %v8554_v25, 4 }
 0x393   : > { %v2639_v15 = vsel %vm643_vm4, %v2628_v40, %v2629_v60  ;;  %3175 = vmatprep.subr.bf16.mxu1 %v6906_v16  ;;  %v2634_v3 = vsel %vm643_vm4, %v2625_v52, %v2626_v9  ;;  %v8731_v52 = vld [vmem:[%s10749_s3] ss:$8 sps:$4 sm:$0xff]  }
 0x394   : > { %v2561_v41 = vpop.permute.xlu0 %2560  ;;  %v2640_v49 = vsel %vm1030_vm12, %v2617_v22, %v2639_v15  ;;  %v8714_v32 = vpop.permute.xlu1 %2620  ;;  %3176 = vmatpush1.bf16.msra.mxu1 %v6905_v39  ;;  %3125 = vmatpush1.bf16.msra.mxu0 %v7517_v48  ;;  %v10880_v22 = vmax.f32 %v8375_v12, 0.0  ;;  %v2635_v16 = vsel %vm1030_vm12, %v8504_v0, %v2634_v3 }
 0x395   : > { %v2573_v31 = vrot.slane %v2561_v41, 4  ;;  %v2630_v59 = vrot.slane %v8714_v32, 4  ;;  %3177 = vmatprep.subr.bf16.mxu1 %v7518_v24  ;;  %v6953_v23 = vcombine.high %v2633_v13, %v2640_v49  ;;  %v6952_v46 = vcombine.low %v2633_v13, %v2640_v49 }
 0x396   : > { %v7519_v47 = vpack.c.bf16 %v10880_v22, %v10879_v63  ;;  %v10883_v22 = vmov 0  }
 0x397   : > { %v2584_v5 = vsel %vm975_vm5, %v2561_v41, %v2573_v31  ;;  %v2641_v39 = vsel %vm643_vm4, %v2629_v60, %v2630_v59  ;;  %3140 = vmatprep.subr.bf16.mxu0 %v6953_v23  ;;  %v8739_v60 = vld [vmem:[%s10749_s3 + $0x14] ss:$8 sps:$4 sm:$0xff]   ;;  %v2582_v48 = vsel %vm643_vm4, %v10881_v37, %v2573_v31 }
 0x398   : > { %2603 = vst [vmem:[#allocation2 + $0x1a0] sm:$0xf] %v2584_v5  ;;  %v2507_v40 = vpop.permute.xlu0 %2506  ;;  %v2642_v18 = vsel %vm1030_vm12, %v2619_v26, %v2641_v39  ;;  %v2569_v21 = vpop.permute.xlu1 %2568  ;;  %3178 = vmatpush1.bf16.msra.mxu1 %v7519_v47  ;;  %3141 = vmatpush2.bf16.msra.mxu0 %v6952_v46  ;;  %v10882_v26 = vrot.slane %v8513_v54, 4  ;;  %v2583_v49 = vsel %vm975_vm5, %v8554_v25, %v2582_v48 }
 0x399   : > { %v2519_v12 = vrot.slane %v2507_v40, 4  ;;  %v2577_v15 = vrot.slane %v2569_v21, 4  ;;  %v6955_v41 = vcombine.high %v2635_v16, %v2642_v18  ;;  %v6954_v42 = vcombine.low %v2635_v16, %v2642_v18 }
 0x39b   : > { %v2530_v0 = vsel %vm920_vm6, %v2507_v40, %v2519_v12  ;;  %v2589_v17 = vsel %vm643_vm4, %v10882_v26, %v2577_v15  ;;  %v2591_v24 = vsel %vm975_vm5, %v2569_v21, %v2577_v15  ;;  %3143 = vmatmul.mubr.bf16.vlgmr.msra.gmra.mxu0 %v8731_v52  ;;  %3193 = vmatprep.subr.bf16.mxu1 %v6955_v41 }
 0x39c   : > { %2549 = vst [vmem:[#allocation2 + $0x168] sm:$0xf] %v2530_v0  ;;  %v2453_v13 = vpop.permute.xlu0 %2452  ;;  %v2590_v31 = vsel %vm975_vm5, %v8513_v54, %v2589_v17  ;;  %2607 = vst [vmem:[#allocation2 + $0x1bc] sm:$0xf] %v2591_v24  ;;  %v2515_v3 = vpop.permute.xlu1 %2514  ;;  %3194 = vmatpush2.bf16.msra.mxu1 %v6954_v42  ;;  %6960 = vmatprep.mubr.msk.bf16.mxu0 %vm1502_vm3, %v8739_v60  ;;  %v2528_v46 = vsel %vm643_vm4, %v2518_v34, %v2519_v12  ;;  %v10884_v54 = vrot.slane %v8524_v4, 4 }
 0x39d   : > { %v2465_v23 = vrot.slane %v2453_v13, 4  ;;  %v2523_v5 = vrot.slane %v2515_v3, 4  ;;  %v6950_v63 = vcombine.high %v2583_v49, %v2590_v31  ;;  %3269 = vmatprep.subr.bf16.mxu1 %v10883_v22  ;;  %v6949_v47 = vcombine.low %v2583_v49, %v2590_v31  ;;  %v8769_v34 = vld [vmem:[%s10749_s3 + $0x10] ss:$8 sps:$4 sm:$0xff]  }
 0x39e   : > { %v2529_v18 = vsel %vm920_vm6, %v8573_v11, %v2528_v46  ;;  %v10885_v11 = vrot.slane %v8544_v20, 4 }
 0x39f   : > { %v2476_v25 = vsel %vm865_vm7, %v2453_v13, %v2465_v23  ;;  %v2535_v39 = vsel %vm643_vm4, %v10884_v54, %v2523_v5  ;;  %v2537_v40 = vsel %vm920_vm6, %v2515_v3, %v2523_v5  ;;  %3196 = vmatmul.mubr.bf16.vlgmr.msra.gmra.mxu1 %v8731_v52  ;;  %3216 = vmatprep.subr.bf16.mxu0 %v6950_v63 }
 0x3a0   : > { %2495 = vst [vmem:[#allocation2 + $0x130] sm:$0xf] %v2476_v25  ;;  %v2399_v16 = vpop.permute.xlu0 %2398  ;;  %v2536_v21 = vsel %vm920_vm6, %v8524_v4, %v2535_v39  ;;  %2553 = vst [vmem:[#allocation2 + $0x184] sm:$0xf] %v2537_v40  ;;  %v2461_v12 = vpop.permute.xlu1 %2460  ;;  %3217 = vmatpush1.bf16.msra.mxu0 %v6949_v47  ;;  %6962 = vmatprep.mubr.msk.bf16.mxu1 %vm1502_vm3, %v8739_v60  ;;  %v2474_v48 = vsel %vm643_vm4, %v2464_v38, %v2465_v23 }
 0x3a1   : > { %v2411_v37 = vrot.slane %v2399_v16, 4  ;;  %v2469_v15 = vrot.slane %v2461_v12, 4  ;;  %v6943_v41 = vcombine.high %v2529_v18, %v2536_v21  ;;  %v6942_v42 = vcombine.low %v2529_v18, %v2536_v21 }
 0x3a2   : > { %v2475_v38 = vsel %vm865_vm7, %v8592_v51, %v2474_v48 }
 0x3a3   : > { %v2422_v0 = vsel %vm810_vm8, %v2399_v16, %v2411_v37  ;;  %v2481_v4 = vsel %vm643_vm4, %v10885_v11, %v2469_v15  ;;  %v2483_v26 = vsel %vm865_vm7, %v2461_v12, %v2469_v15  ;;  %v7458_v24 = vld [vmem:[#allocation2 + $0x1a0] ss:$28 sps:$4 sm:$0xff]   ;;  %3218 = vmatprep.subr.bf16.mxu0 %v6943_v41  ;;  %3153 = vmatmul.mubr.bf16.gmra.mxu0 %v8769_v34 }
 0x3a4   : > { %2441 = vst [vmem:[#allocation2 + $0xf8] sm:$0xf] %v2422_v0  ;;  %v2345_v17 = vpop.permute.xlu0 %2344  ;;  %v2482_v13 = vsel %vm865_vm7, %v8544_v20, %v2481_v4  ;;  %2499 = vst [vmem:[#allocation2 + $0x14c] sm:$0xf] %v2483_v26  ;;  %v2407_v49 = vpop.permute.xlu1 %2406  ;;  %3219 = vmatpush1.bf16.msra.mxu0 %v6942_v42  ;;  %6963 = vmatprep.mubr.msk.bf16.mxu0 %vm1502_vm3, %v8438_v10  ;;  %v2420_v3 = vsel %vm643_vm4, %v2410_v53, %v2411_v37  ;;  %v10886_v20 = vrot.slane %v8576_v30, 4 }
 0x3a5   : > { %v2357_v31 = vrot.slane %v2345_v17, 4  ;;  %v2415_v23 = vrot.slane %v2407_v49, 4  ;;  %3270 = vmatpush1.bf16.msra.mxu1 %v7458_v24  ;;  %v6936_v46 = vcombine.high %v2475_v38, %v2482_v13  ;;  %v6935_v5 = vcombine.low %v2475_v38, %v2482_v13 }
 0x3a6   : > { %3271 = vmatprep.subr.bf16.mxu1 %v10883_v22  ;;  %v2421_v53 = vsel %vm810_vm8, %v8615_v36, %v2420_v3 }
 0x3a7   : > { %v2368_v51 = vsel %vm755_vm9, %v2345_v17, %v2357_v31  ;;  %v2427_v63 = vsel %vm643_vm4, %v10886_v20, %v2415_v23  ;;  %v2429_v47 = vsel %vm810_vm8, %v2407_v49, %v2415_v23  ;;  %v7459_v54 = vld [vmem:[#allocation2 + $0x168] ss:$28 sps:$4 sm:$0xff]   ;;  %3220 = vmatprep.subr.bf16.mxu0 %v6936_v46  ;;  %3206 = vmatmul.mubr.bf16.gmra.mxu1 %v8769_v34 }
 0x3a8   : > { %2387 = vst [vmem:[#allocation2 + $0xc0] sm:$0xf] %v2368_v51  ;;  %v2291_v25 = vpop.permute.xlu0 %2290  ;;  %v2428_v39 = vsel %vm810_vm8, %v8576_v30, %v2427_v63  ;;  %2445 = vst [vmem:[#allocation2 + $0x114] sm:$0xf] %v2429_v47  ;;  %v2353_v40 = vpop.permute.xlu1 %2352  ;;  %3221 = vmatpush1.bf16.msra.mxu0 %v6935_v5  ;;  %6965 = vmatprep.mubr.msk.bf16.mxu1 %vm1502_vm3, %v8438_v10  ;;  %v2366_v18 = vsel %vm643_vm4, %v2356_v6, %v2357_v31  ;;  %v10887_v30 = vrot.slane %v8619_v58, 4 }
 0x3a9   : > { %v2303_v16 = vrot.slane %v2291_v25, 4  ;;  %v2361_v21 = vrot.slane %v2353_v40, 4  ;;  %3272 = vmatpush1.bf16.msra.mxu1 %v7459_v54  ;;  %v6929_v12 = vcombine.high %v2421_v53, %v2428_v39  ;;  %v6928_v37 = vcombine.low %v2421_v53, %v2428_v39 }
 0x3aa   : > { %3273 = vmatprep.subr.bf16.mxu1 %v10883_v22  ;;  %v2367_v6 = vsel %vm755_vm9, %v8633_v35, %v2366_v18  ;;  %v10888_v35 = vrot.slane %v8656_v50, 4  ;;  %v10889_v5 = vrot.slane %v8669_v62, 4 }
 0x3ab   : > { %v2314_v36 = vsel %vm700_vm10, %v2291_v25, %v2303_v16  ;;  %v2373_v48 = vsel %vm643_vm4, %v10887_v30, %v2361_v21  ;;  %v2375_v15 = vsel %vm755_vm9, %v2353_v40, %v2361_v21  ;;  %v7460_v41 = vld [vmem:[#allocation2 + $0x130] ss:$28 sps:$4 sm:$0xff]   ;;  %3222 = vmatprep.subr.bf16.mxu0 %v6929_v12  ;;  %v2312_v4 = vsel %vm643_vm4, %v2302_v43, %v2303_v16 }
 0x3ac   : > { %2333 = vst [vmem:[#allocation2 + $0x88] sm:$0xf] %v2314_v36  ;;  %v2237_v10 = vpop.permute.xlu0 %2236  ;;  %v2374_v42 = vsel %vm755_vm9, %v8619_v58, %v2373_v48  ;;  %2391 = vst [vmem:[#allocation2 + $0xdc] sm:$0xf] %v2375_v15  ;;  %v2299_v0 = vpop.permute.xlu1 %2298  ;;  %3223 = vmatpush1.bf16.msra.mxu0 %v6928_v37  ;;  %v2313_v43 = vsel %vm700_vm10, %v8652_v28, %v2312_v4  ;;  %v10890_v28 = vrot.slane %v8681_v44, 4  ;;  %v7007_v37 = vld [vmem:[%s7603_s28 + $0x140] sm:$0xff] }
 0x3ad   : > { %v2249_v11 = vrot.slane %v2237_v10, 4  ;;  %v2307_v26 = vrot.slane %v2299_v0, 4  ;;  %3274 = vmatpush1.bf16.msra.mxu1 %v7460_v41  ;;  %v6922_v17 = vcombine.high %v2367_v6, %v2374_v42  ;;  %v6921_v24 = vcombine.low %v2367_v6, %v2374_v42  ;;  %v7011_v36 = vld [vmem:[%s7603_s28 + $0x160] sm:$0x33]  ;;  %v7468_v15 = vld [vmem:[#allocation2 + $0x14] ss:$28 sps:$4 sm:$0xff]  }
 0x3ae   : > { %3275 = vmatprep.subr.bf16.mxu1 %v10883_v22  ;;  %v7025_v41 = vcombine.high %v7007_v37, %v7011_v36  ;;  %v7008_v6 = vld [vmem:[%s7603_s28 + $0x148] sm:$0xff] }
 0x3af   : > { %v2260_v38 = vsel %vm645_vm11, %v2237_v10, %v2249_v11  ;;  %v2319_v58 = vsel %vm643_vm4, %v10888_v35, %v2307_v26  ;;  %v2321_v13 = vsel %vm700_vm10, %v2299_v0, %v2307_v26  ;;  %v7461_v31 = vld [vmem:[#allocation2 + $0xf8] ss:$28 sps:$4 sm:$0xff]   ;;  %3224 = vmatprep.subr.bf16.mxu0 %v6922_v17  ;;  %v2258_v51 = vsel %vm643_vm4, %v10889_v5, %v2249_v11  ;;  %v7012_v11 = vld [vmem:[%s7603_s28 + $0x168] sm:$0x33] }
 0x3b0   : > { %2279 = vst [vmem:[#allocation2 + $0x50] sm:$0xf] %v2260_v38  ;;  %v2615_v49 = vpop.permute.xlu0 %2614  ;;  %v2320_v3 = vsel %vm700_vm10, %v8656_v50, %v2319_v58  ;;  %2337 = vst [vmem:[#allocation2 + $0xa4] sm:$0xf] %v2321_v13  ;;  %v2245_v23 = vpop.permute.xlu1 %2244  ;;  %3225 = vmatpush1.bf16.msra.mxu0 %v6921_v24  ;;  %v2259_v39 = vsel %vm645_vm11, %v8669_v62, %v2258_v51  ;;  %v3566_v4 = vand.u32 %v7025_v41, %v7607_v7  ;;  %v6999_v24 = vld [vmem:[%s7603_s28 + $0x100] sm:$0xff]  ;;  %v7009_v35 = vld [vmem:[%s7603_s28 + $0x150] sm:$0xff] }
 0x3b1   : > { %v2627_v46 = vrot.slane %v2615_v49, 4  ;;  %v2253_v20 = vrot.slane %v2245_v23, 4  ;;  %3276 = vmatpush1.bf16.msra.mxu1 %v7461_v31  ;;  %v6915_v63 = vcombine.high %v2313_v43, %v2320_v3  ;;  %v6914_v47 = vcombine.low %v2313_v43, %v2320_v3  ;;  %v7003_v38 = vld [vmem:[%s7603_s28 + $0x120] sm:$0xff]  ;;  %v7013_v58 = vld [vmem:[%s7603_s28 + $0x170] sm:$0x33]  ;;  %v7000_v3 = vld [vmem:[%s7603_s28 + $0x108] sm:$0xff] }
 0x3b2   : > { %3277 = vmatprep.subr.bf16.mxu1 %v10883_v22  ;;  %v7027_v17 = vcombine.high %v7008_v6, %v7012_v11  ;;  %v7017_v31 = vcombine.high %v6999_v24, %v7003_v38  ;;  %v7010_v51 = vld [vmem:[%s7603_s28 + $0x158] sm:$0xff] }
 0x3b3   : > { %v2638_v25 = vsel %vm1030_vm12, %v2615_v49, %v2627_v46  ;;  %v2265_v50 = vsel %vm643_vm4, %v10890_v28, %v2253_v20  ;;  %v2267_v54 = vsel %vm645_vm11, %v2245_v23, %v2253_v20  ;;  %v7462_v53 = vld [vmem:[#allocation2 + $0xc0] ss:$28 sps:$4 sm:$0xff]   ;;  %3226 = vmatprep.subr.bf16.mxu0 %v6915_v63  ;;  %v2636_v30 = vsel %vm643_vm4, %v2626_v9, %v2627_v46  ;;  %v7004_v23 = vld [vmem:[%s7603_s28 + $0x128] sm:$0xff] }
 0x3b4   : > { %2657 = vst [vmem:[#allocation2 + $0x1d8] sm:$0xf] %v2638_v25  ;;  %v2266_v40 = vsel %vm645_vm11, %v8681_v44, %v2265_v50  ;;  %2283 = vst [vmem:[#allocation2 + $0x6c] sm:$0xf] %v2267_v54  ;;  %v2623_v16 = vpop.permute.xlu1 %2622  ;;  %3227 = vmatpush1.bf16.msra.mxu0 %v6914_v47  ;;  %v2637_v9 = vsel %vm1030_vm12, %v8691_v2, %v2636_v30  ;;  %v7471_v2 = vld [vmem:[#allocation2 + $0x18] ss:$28 sps:$4 sm:$0xff]   ;;  %v7026_v49 = vcombine.low %v7008_v6, %v7012_v11 }
 0x3b5   : > { %v2631_v18 = vrot.slane %v2623_v16, 4  ;;  %3278 = vmatpush1.bf16.msra.mxu1 %v7462_v53  ;;  %v6908_v21 = vcombine.high %v2259_v39, %v2266_v40  ;;  %v6907_v12 = vcombine.low %v2259_v39, %v2266_v40  ;;  %v3572_v43 = vand.u32 %v7027_v17, %v7607_v7  ;;  %v7014_v20 = vld [vmem:[%s7603_s28 + $0x178] sm:$0x33]  ;;  %v7005_v40 = vld [vmem:[%s7603_s28 + $0x130] sm:$0xff] }
 0x3b6   : > { %3279 = vmatprep.subr.bf16.mxu1 %v10883_v22  ;;  %v7029_v46 = vcombine.high %v7009_v35, %v7013_v58  ;;  %v7016_v63 = vcombine.low %v6999_v24, %v7003_v38  ;;  %v3569_v47 = vand.u32 %v7026_v49, %v7607_v7  ;;  %v7019_v25 = vcombine.high %v7000_v3, %v7004_v23 }
 0x3b7   : > { %v2643_v62 = vsel %vm643_vm4, %v2630_v59, %v2631_v18  ;;  %v2645_v44 = vsel %vm1030_vm12, %v2623_v16, %v2631_v18  ;;  %v7465_v48 = vld [vmem:[#allocation2 + $0x88] ss:$28 sps:$4 sm:$0xff]   ;;  %3228 = vmatprep.subr.bf16.mxu0 %v6908_v21  ;;  %v7470_v59 = vld [vmem:[#allocation2 + $0x10] ss:$28 sps:$4 sm:$0xff]   ;;  %v7031_v50 = vcombine.high %v7010_v51, %v7014_v20  ;;  %v7018_v54 = vcombine.low %v7000_v3, %v7004_v23 }
 0x3b8   : > { %v2644_v10 = vsel %vm1030_vm12, %v8714_v32, %v2643_v62  ;;  %2661 = vst [vmem:[#allocation2 + $0x1f4] sm:$0xf] %v2645_v44  ;;  %3229 = vmatpush1.bf16.msra.mxu0 %v6907_v12  ;;  %v7024_v32 = vcombine.low %v7007_v37, %v7011_v36  ;;  %v3578_v28 = vand.u32 %v7029_v46, %v7607_v7  ;;  %v7002_v12 = vld [vmem:[%s7603_s28 + $0x118] sm:$0xff] }
 0x3b9   : > { %3280 = vmatpush1.bf16.msra.mxu1 %v7465_v48  ;;  %3230 = vmatprep.subr.bf16.mxu0 %v7468_v15  ;;  %v6957_v0 = vcombine.high %v2637_v9, %v2644_v10  ;;  %v6956_v26 = vcombine.low %v2637_v9, %v2644_v10  ;;  %v3584_v53 = vand.u32 %v7031_v50, %v7607_v7  ;;  %v7006_v37 = vld [vmem:[%s7603_s28 + $0x138] sm:$0xff] }
 0x3ba   : > { %3281 = vmatprep.subr.bf16.mxu1 %v10883_v22  ;;  %v3563_v13 = vand.u32 %v7024_v32, %v7607_v7  ;;  %v7028_v39 = vcombine.low %v7009_v35, %v7013_v58  ;;  %v7030_v18 = vcombine.low %v7010_v51, %v7014_v20  ;;  %v7023_v62 = vcombine.high %v7002_v12, %v7006_v37 }
 0x3bb   : > { %v7467_v42 = vld [vmem:[#allocation2 + $0x50] ss:$28 sps:$4 sm:$0xff]  }
 0x3bc   : > { %3231 = vmatpush1.bf16.msra.mxu0 %v7470_v59  ;;  %v3575_v16 = vand.u32 %v7028_v39, %v7607_v7  ;;  %v3581_v30 = vand.u32 %v7030_v18, %v7607_v7 }
 0x3bd   : > { %3282 = vmatpush1.bf16.msra.mxu1 %v7467_v42  ;;  %3246 = vmatprep.subr.bf16.mxu0 %v6957_v0 }
 0x3be   : > { %3283 = vmatprep.subr.bf16.mxu1 %v10883_v22 }
 0x3bf   : > { %v7472_v5 = vld [vmem:[#allocation2 + $0x1d8] ss:$28 sps:$4 sm:$0xff]  }
 0x3c0   : > { %3247 = vmatpush2.bf16.msra.mxu0 %v6956_v26 }
 0x3c1   : > { %3284 = vmatpush1.bf16.msra.mxu1 %v7471_v2  ;;  %3598 = vmatprep.subr.bf16.mxu0 %v3566_v4  ;;  %v8961_v39 = vpop.permute.xlu1 %3479 }
 0x3c2   : > { %3299 = vmatprep.subr.bf16.mxu1 %v10883_v22 }
 0x3c3   : > { %3249 = vmatmul.mubr.bf16.vlgmr.msra.gmra.mxu0 %v8731_v52 }
 0x3c4   : > { %3599 = vmatpush1.bf16.msra.mxu0 %v3563_v13  ;;  %6964 = vmatprep.mubr.msk.bf16.mxu0 %vm1502_vm3, %v8739_v60 }
 0x3c5   : > { %3300 = vmatpush2.bf16.msra.mxu1 %v7472_v5  ;;  %3600 = vmatprep.subr.bf16.mxu0 %v7017_v31 }
 0x3c6   : > { %3641 = vmatprep.subr.bf16.mxu1 %v3572_v43 }
 0x3c8   : > { %3302 = vmatmul.mubr.bf16.vlgmr.msra.gmra.mxu1 %v8731_v52  ;;  %3601 = vmatpush1.bf16.msra.mxu0 %v7016_v63  ;;  %v7001_v52 = vld [vmem:[%s7603_s28 + $0x110] sm:$0xff]  ;;  %v3475_v63 = vpop.permute.xlu0 %3474 }
 0x3c9   : > { %3642 = vmatpush1.bf16.msra.mxu1 %v3569_v47  ;;  %6966 = vmatprep.mubr.msk.bf16.mxu1 %vm1502_vm3, %v8739_v60  ;;  %v7473_v60 = vld [vmem:[%s10747_s1] sm:$0xff]   ;;  %v7021_v21 = vcombine.high %v7001_v52, %v7005_v40  ;;  %v7020_v36 = vcombine.low %v7001_v52, %v7005_v40 }
 0x3ca   : > { %3643 = vmatprep.subr.bf16.mxu1 %v7019_v25  ;;  %3684 = vmatprep.subr.bf16.mxu0 %v3578_v28 }
 0x3cb   : > { %3259 = vmatmul.mubr.bf16.gmra.mxu0 %v8769_v34 }
 0x3cc   : > { %3618 = vmatprep.mubr.bf16.mxu0 %v10883_v22 }
 0x3cd   : > { %3644 = vmatpush1.bf16.msra.mxu1 %v7018_v54 }
 0x3ce   : > { %3727 = vmatprep.subr.bf16.mxu1 %v3584_v53 }
 0x3d0   : > { %3310 = vmatmul.mubr.bf16.gmra.mxu1 %v8769_v34  ;;  %v7022_v34 = vcombine.low %v7002_v12, %v7006_v37 }
 0x3d1   : > { %3661 = vmatprep.mubr.bf16.mxu1 %v10883_v22 }
 0x3d3   : > { %7032 = vmatmul.mubr.msk.bf16.vlgmr.msra.gmra.mxu0 %vm341_vm2, %v7473_v60 }
 0x3d4   : > { %3685 = vmatpush1.bf16.msra.mxu0 %v3575_v16  ;;  %3704 = vmatprep.mubr.bf16.mxu0 %v10883_v22 }
 0x3d5   : > { %3686 = vmatprep.subr.bf16.mxu0 %v7021_v21 }
 0x3d8   : > { %7033 = vmatmul.mubr.msk.bf16.vlgmr.msra.gmra.mxu1 %vm341_vm2, %v7473_v60  ;;  %3687 = vmatpush1.bf16.msra.mxu0 %v7020_v36 }
 0x3d9   : > { %3728 = vmatpush1.bf16.msra.mxu1 %v3581_v30  ;;  %3747 = vmatprep.mubr.bf16.mxu1 %v10883_v22 }
 0x3da   : > { %3729 = vmatprep.subr.bf16.mxu1 %v7023_v62 }
 0x3db   : > { %7034 = vmatmul.mubr.msk.bf16.vlgmr.msra.gmra.mxu0 %vm341_vm2, %v7473_v60 }
 0x3dd   : > { %3730 = vmatpush1.bf16.msra.mxu1 %v7022_v34 }
 0x3e0   : > { %7035 = vmatmul.mubr.msk.bf16.vlgmr.msra.gmra.mxu1 %vm341_vm2, %v7473_v60 }
 0x45b   : > { %v8905_v44 = vpop.f32.mrf.mxu0 }
 0x45d   : > { %v8907_v48 = vpop.f32.mrf.mxu0 }
 0x45f   : > { %v8909_v15 = vpop.f32.mrf.mxu1  ;;  %v8911_v10 = vpop.f32.mrf.mxu0 }
 0x460   : > { %10891 = vst [vmem:[#allocation19_spill] sm:$0xff] %v8909_v15  ;;  %10892 = vst [vmem:[#allocation20_spill] sm:$0xff] %v8911_v10 }
 0x461   : > { %v8913_v41 = vpop.f32.mrf.mxu1  ;;  %v8915_v9 = vpop.f32.mrf.mxu0 }
 0x462   : > { %10893 = vst [vmem:[#allocation21_spill] sm:$0xff] %v8913_v41  ;;  %10894 = vst [vmem:[#allocation22_spill] sm:$0xff] %v8915_v9 }
 0x463   : > { %v8917_v59 = vpop.f32.mrf.mxu0  ;;  %v8919_v6 = vpop.f32.mrf.mxu1 }
 0x464   : > { %10895 = vst [vmem:[#allocation23_spill] sm:$0xff] %v8917_v59  ;;  %10896 = vst [vmem:[#allocation24_spill] sm:$0xff] %v8919_v6 }
 0x465   : > { %v8921_v42 = vpop.f32.mrf.mxu0  ;;  %v8923_v0 = vpop.f32.mrf.mxu1 }
 0x466   : > { %10897 = vst [vmem:[#allocation25_spill] sm:$0xff] %v8921_v42  ;;  %10898 = vst [vmem:[#allocation26_spill] sm:$0xff] %v8923_v0 }
 0x467   : > { %v8925_v11 = vpop.f32.mrf.mxu1  ;;  %v8927_v32 = vpop.f32.mrf.mxu0 }
 0x468   : > { %10899 = vst [vmem:[#allocation27_spill] sm:$0xff] %v8925_v11  ;;  %10900 = vst [vmem:[#allocation28_spill] sm:$0xff] %v8927_v32 }
 0x469   : > { %v8929_v4 = vpop.f32.mrf.mxu1  ;;  %v8931_v2 = vpop.f32.mrf.mxu0 }
 0x46a   : > { %10901 = vst [vmem:[#allocation29_spill] sm:$0xff] %v8929_v4  ;;  %10902 = vst [vmem:[#allocation30_spill] sm:$0xff] %v8931_v2 }
 0x46b   : > { %v8933_v26 = vpop.f32.mrf.mxu1 }
 0x46c   : > { %10903 = vst [vmem:[#allocation31_spill] sm:$0xff] %v8933_v26 }
 0x46d   : > { %v8939_v38 = vpop.f32.mrf.mxu1 }
 0x46e   : > { %10906 = vst [vmem:[#allocation34_spill] sm:$0xff] %v8939_v38 }
 0x483   : > { %v8935_v17 = vpop.f32.mrf.mxu0 }
 0x484   : > { %10904 = vst [vmem:[#allocation32_spill] sm:$0xff] %v8935_v17 }
 0x485   : > { %v8937_v24 = vpop.f32.mrf.mxu0 }
 0x486   : > { %10905 = vst [vmem:[#allocation33_spill] sm:$0xff] %v8937_v24 }
 0x487   : > { %v8941_v35 = vpop.f32.mrf.mxu0 }
 0x488   : > { %10907 = vst [vmem:[#allocation35_spill] sm:$0xff] %v8941_v35  ;;  %v8943_v58 = vpop.f32.mrf.mxu1 }
 0x489   : > { %10908 = vst [vmem:[#allocation36_spill] sm:$0xff] %v8943_v58  ;;  %v8945_v13 = vpop.f32.mrf.mxu0 }
 0x48a   : > { %10909 = vst [vmem:[#allocation37_spill] sm:$0xff] %v8945_v13  ;;  %v3305_v49 = vpop.f32.mrf.mxu1 }
 0x48b   : > { %v8947_v31 = vpop.f32.mrf.mxu0 }
 0x48c   : > { %10910 = vst [vmem:[#allocation38_spill] sm:$0xff] %v8947_v31  ;;  %v8949_v43 = vpop.f32.mrf.mxu1 }
 0x48d   : > { %10911 = vst [vmem:[#allocation39_spill] sm:$0xff] %v8949_v43  ;;  %v8951_v3 = vpop.f32.mrf.mxu0 }
 0x48e   : > { %10912 = vst [vmem:[#allocation40_spill] sm:$0xff] %v8951_v3  ;;  %v3308_v23 = vpop.f32.mrf.mxu1 }
 0x48f   : > { %v8953_v46 = vpop.f32.mrf.mxu0 }
 0x490   : > { %10913 = vst [vmem:[#allocation41_spill] sm:$0xff] %v8953_v46  ;;  %v8955_v5 = vpop.f32.mrf.mxu1 }
 0x491   : > { %10914 = vst [vmem:[#allocation42_spill] sm:$0xff] %v8955_v5  ;;  %v8957_v51 = vpop.f32.mrf.mxu0 }
 0x492   : > { %10915 = vst [vmem:[#allocation43_spill] sm:$0xff] %v8957_v51  ;;  %v3313_v20 = vpop.f32.mrf.mxu1 }
 0x493   : > { %v3620_v47 = vpop.f32.mrf.mxu0 }
 0x494   : > { %v8959_v25 = vpop.f32.mrf.mxu1  ;;  %v3621_v28 = vadd.f32 %v3620_v47, %v3475_v63 }
 0x495   : > { %10916 = vst [vmem:[#allocation44_spill] sm:$0xff] %v8959_v25  ;;  %v3622_v50 = vpop.f32.mrf.mxu0 }
 0x496   : > { %v3316_v54 = vpop.f32.mrf.mxu1  ;;  %v3623_v53 = vadd.f32 %v3622_v50, %v3475_v63  ;;  %v3758_v40 = vmax.f32 %v3621_v28, 0.0 }
 0x497   : > { %v3624_v52 = vpop.f32.mrf.mxu0 }
 0x498   : > { %v3663_v60 = vpop.f32.mrf.mxu1  ;;  %v3759_v16 = vmax.f32 %v3623_v53, 0.0  ;;  %v3625_v18 = vadd.f32 %v3624_v52, %v8961_v39 }
 0x499   : > { %v3664_v21 = vadd.f32 %v3663_v60, %v3475_v63  ;;  %v3626_v12 = vpop.f32.mrf.mxu0 }
 0x49a   : > { %v8964_v37 = vpack.c.bf16 %v3759_v16, %v3758_v40  ;;  %v3665_v36 = vpop.f32.mrf.mxu1  ;;  %v3627_v30 = vadd.f32 %v3626_v12, %v8961_v39  ;;  %v3766_v49 = vmax.f32 %v3625_v18, 0.0 }
 0x49b   : > { %v3666_v62 = vadd.f32 %v3665_v36, %v3475_v63  ;;  %v3706_v34 = vpop.f32.mrf.mxu0  ;;  %v3760_v28 = vmax.f32 %v3664_v21, 0.0 }
 0x49c   : > { %v3667_v23 = vpop.f32.mrf.mxu1  ;;  %v3767_v20 = vmax.f32 %v3627_v30, 0.0  ;;  %v3707_v47 = vadd.f32 %v3706_v34, %v3475_v63  ;;  %4156 = vrot.lane.b32.xlu0 %v8964_v37, %s7539_s7 }
 0x49d   : > { %v3761_v50 = vmax.f32 %v3666_v62, 0.0  ;;  %v3668_v54 = vadd.f32 %v3667_v23, %v8961_v39  ;;  %v3708_v53 = vpop.f32.mrf.mxu0  ;;  %v8978_v62 = vpack.c.bf16 %v3766_v49, %v3758_v40 }
 0x49e   : > { %v8970_v52 = vpack.c.bf16 %v3767_v20, %v3766_v49  ;;  %v3669_v60 = vpop.f32.mrf.mxu1  ;;  %v3709_v25 = vadd.f32 %v3708_v53, %v3475_v63  ;;  %v3762_v36 = vmax.f32 %v3707_v47, 0.0  ;;  %v8976_v21 = vpack.c.bf16 %v3767_v20, %v3759_v16 }
 0x49f   : > { %v7363_v51 = vpack.c.bf16 %v3761_v50, %v3760_v28  ;;  %v3670_v12 = vadd.f32 %v3669_v60, %v8961_v39  ;;  %v3710_v18 = vpop.f32.mrf.mxu0  ;;  %v3768_v23 = vmax.f32 %v3668_v54, 0.0 }
 0x4a0   : > { %v3749_v46 = vpop.f32.mrf.mxu1  ;;  %v3763_v30 = vmax.f32 %v3709_v25, 0.0  ;;  %v3711_v34 = vadd.f32 %v3710_v18, %v8961_v39  ;;  %4102 = vrot.lane.b32.xlu0 %v8964_v37, %s7538_s6 }
 0x4a1   : > { %v3769_v38 = vmax.f32 %v3670_v12, 0.0  ;;  %v3750_v26 = vadd.f32 %v3749_v46, %v3475_v63  ;;  %4158 = vrot.lane.b32.xlu1 %v7363_v51, %s7539_s7  ;;  %v3712_v53 = vpop.f32.mrf.mxu0 }
 0x4a2   : > { %v8981_v60 = vpack.c.bf16 %v3763_v30, %v3762_v36  ;;  %v3751_v47 = vpop.f32.mrf.mxu1  ;;  %v3713_v25 = vadd.f32 %v3712_v53, %v8961_v39  ;;  %v3770_v16 = vmax.f32 %v3711_v34, 0.0  ;;  %v8991_v30 = vpack.c.bf16 %v3768_v23, %v3760_v28  ;;  %v5072_v53 = vld [vmem:[%s10748_s2] sm:$0xff] }
 0x4a3   : > { %v7367_v2 = vpack.c.bf16 %v3769_v38, %v3768_v23  ;;  %v3764_v18 = vmax.f32 %v3750_v26, 0.0  ;;  %v3752_v32 = vadd.f32 %v3751_v47, %v3475_v63  ;;  %v8989_v12 = vpack.c.bf16 %v3769_v38, %v3761_v50  ;;  %v9059_v38 = vld [vmem:[%s10749_s3 + $0x4] ss:$8 sps:$4 sm:$0xff]  }
 0x4a4   : > { %3821 = vst [vmem:[#allocation2 + $0x10] sm:$0xff] %v8981_v60  ;;  %v3753_v20 = vpop.f32.mrf.mxu1  ;;  %v3771_v40 = vmax.f32 %v3713_v25, 0.0  ;;  %4048 = vrot.lane.b32.xlu0 %v8964_v37, %s7540_s8  ;;  %7113 = vmatprep.mubr.msk.bf16.mxu0 %vm1502_vm3, %v9059_v38  ;;  %v5073_v25 = vld [vmem:[%s10748_s2 + $0x8] sm:$0xff] }
 0x4a5   : > { %v7365_v46 = vpack.c.bf16 %v3764_v18, %v3764_v18  ;;  %v3765_v49 = vmax.f32 %v3752_v32, 0.0  ;;  %v3754_v54 = vadd.f32 %v3753_v20, %v8961_v39  ;;  %4104 = vrot.lane.b32.xlu1 %v7363_v51, %s7538_s6  ;;  %7115 = vmatprep.mubr.msk.bf16.mxu1 %vm1502_vm3, %v9059_v38 }
 0x4a6   : > { %v7368_v36 = vpack.c.bf16 %v3771_v40, %v3770_v16  ;;  %v3755_v32 = vpop.f32.mrf.mxu1 }
 0x4a7   : > { %3822 = vst [vmem:[#allocation2 + $0x18] sm:$0xf] %v7365_v46  ;;  %v8993_v26 = vpack.c.bf16 %v3765_v49, %v3764_v18  ;;  %v3772_v63 = vmax.f32 %v3754_v54, 0.0 }
 0x4a8   : > { %3825 = vst [vmem:[#allocation2 + $0x2c] sm:$0xff] %v7368_v36  ;;  %3994 = vrot.lane.b32.xlu0 %v8964_v37, %s7541_s9 }
 0x4a9   : > { %v7369_v34 = vpack.c.bf16 %v3772_v63, %v3772_v63  ;;  %4050 = vrot.lane.b32.xlu1 %v7363_v51, %s7540_s8 }
 0x4ab   : > { %3826 = vst [vmem:[#allocation2 + $0x34] sm:$0xf] %v7369_v34 }
 0x4ac   : > { %3940 = vrot.lane.b32.xlu0 %v8964_v37, %s7542_s10 }
 0x4ad   : > { %3996 = vrot.lane.b32.xlu1 %v7363_v51, %s7541_s9 }
 0x4b0   : > { %3886 = vrot.lane.b32.xlu0 %v8964_v37, %s7543_s11 }
 0x4b1   : > { %3942 = vrot.lane.b32.xlu1 %v7363_v51, %s7542_s10 }
 0x4b4   : > { %3832 = vrot.lane.b32.xlu0 %v8964_v37, %s7544_s12 }
 0x4b5   : > { %3888 = vrot.lane.b32.xlu1 %v7363_v51, %s7543_s11 }
 0x4b8   : > { %4210 = vrot.lane.b32.xlu0 %v8964_v37, %s7545_s13 }
 0x4b9   : > { %3834 = vrot.lane.b32.xlu1 %v7363_v51, %s7544_s12 }
 0x4bc   : > { %4164 = vrot.lane.b32.xlu0 %v8970_v52, %s7539_s7 }
 0x4bd   : > { %4212 = vrot.lane.b32.xlu1 %v7363_v51, %s7545_s13 }
 0x4c0   : > { %4110 = vrot.lane.b32.xlu0 %v8970_v52, %s7538_s6 }
 0x4c1   : > { %4166 = vrot.lane.b32.xlu1 %v7367_v2, %s7539_s7 }
 0x4c4   : > { %4056 = vrot.lane.b32.xlu0 %v8970_v52, %s7540_s8 }
 0x4c5   : > { %4112 = vrot.lane.b32.xlu1 %v7367_v2, %s7538_s6 }
 0x4c8   : > { %4002 = vrot.lane.b32.xlu0 %v8970_v52, %s7541_s9 }
 0x4c9   : > { %4058 = vrot.lane.b32.xlu1 %v7367_v2, %s7540_s8 }
 0x4cc   : > { %3948 = vrot.lane.b32.xlu0 %v8970_v52, %s7542_s10 }
 0x4cd   : > { %4004 = vrot.lane.b32.xlu1 %v7367_v2, %s7541_s9 }
 0x4d0   : > { %3894 = vrot.lane.b32.xlu0 %v8970_v52, %s7543_s11 }
 0x4d1   : > { %3950 = vrot.lane.b32.xlu1 %v7367_v2, %s7542_s10 }
 0x4d4   : > { %3840 = vrot.lane.b32.xlu0 %v8970_v52, %s7544_s12 }
 0x4d5   : > { %3896 = vrot.lane.b32.xlu1 %v7367_v2, %s7543_s11 }
 0x4d8   : > { %4218 = vrot.lane.b32.xlu0 %v8970_v52, %s7545_s13 }
 0x4d9   : > { %3842 = vrot.lane.b32.xlu1 %v7367_v2, %s7544_s12 }
 0x4dc   : > { %4160 = vrot.lane.b32.xlu0 %v8981_v60, %s7539_s7 }
 0x4dd   : > { %4220 = vrot.lane.b32.xlu1 %v7367_v2, %s7545_s13  ;;  %v3756_v2 = vadd.f32 %v3755_v32, %v8961_v39 }
 0x4df   : > { %v3773_v51 = vmax.f32 %v3756_v2, 0.0 }
 0x4e0   : > { %4106 = vrot.lane.b32.xlu0 %v8981_v60, %s7538_s6 }
 0x4e1   : > { %4168 = vrot.lane.b32.xlu1 %v7368_v36, %s7539_s7  ;;  %v7371_v39 = vpack.c.bf16 %v3773_v51, %v3772_v63 }
 0x4e4   : > { %4052 = vrot.lane.b32.xlu0 %v8981_v60, %s7540_s8 }
 0x4e5   : > { %4114 = vrot.lane.b32.xlu1 %v7368_v36, %s7538_s6 }
 0x4e8   : > { %3998 = vrot.lane.b32.xlu0 %v8981_v60, %s7541_s9 }
 0x4e9   : > { %4060 = vrot.lane.b32.xlu1 %v7368_v36, %s7540_s8 }
 0x4ec   : > { %3944 = vrot.lane.b32.xlu0 %v8981_v60, %s7542_s10 }
 0x4ed   : > { %4006 = vrot.lane.b32.xlu1 %v7368_v36, %s7541_s9 }
 0x4f0   : > { %3890 = vrot.lane.b32.xlu0 %v8981_v60, %s7543_s11 }
 0x4f1   : > { %3952 = vrot.lane.b32.xlu1 %v7368_v36, %s7542_s10 }
 0x4f4   : > { %3836 = vrot.lane.b32.xlu0 %v8981_v60, %s7544_s12 }
 0x4f5   : > { %3898 = vrot.lane.b32.xlu1 %v7368_v36, %s7543_s11 }
 0x4f8   : > { %4162 = vrot.lane.b32.xlu0 %v8993_v26, %s7539_s7 }
 0x4f9   : > { %3844 = vrot.lane.b32.xlu1 %v7368_v36, %s7544_s12 }
 0x4fc   : > { %4214 = vrot.lane.b32.xlu0 %v8981_v60, %s7545_s13 }
 0x4fd   : > { %4170 = vrot.lane.b32.xlu1 %v7371_v39, %s7539_s7 }
 0x500   : > { %4108 = vrot.lane.b32.xlu0 %v8993_v26, %s7538_s6 }
 0x501   : > { %4222 = vrot.lane.b32.xlu1 %v7368_v36, %s7545_s13 }
 0x504   : > { %4054 = vrot.lane.b32.xlu0 %v8993_v26, %s7540_s8 }
 0x505   : > { %4116 = vrot.lane.b32.xlu1 %v7371_v39, %s7538_s6 }
 0x508   : > { %4000 = vrot.lane.b32.xlu0 %v8993_v26, %s7541_s9 }
 0x509   : > { %4062 = vrot.lane.b32.xlu1 %v7371_v39, %s7540_s8 }
 0x50c   : > { %3946 = vrot.lane.b32.xlu0 %v8993_v26, %s7542_s10 }
 0x50d   : > { %4008 = vrot.lane.b32.xlu1 %v7371_v39, %s7541_s9 }
 0x50e   : > { %v4157_v37 = vpop.permute.xlu0 %4156 }
 0x50f   : > { %v4172_v32 = vrot.slane %v4157_v37, 4 }
 0x510   : > { %3892 = vrot.lane.b32.xlu0 %v8993_v26, %s7543_s11 }
 0x511   : > { %3954 = vrot.lane.b32.xlu1 %v7371_v39, %s7542_s10 }
 0x512   : > { %v4103_v28 = vpop.permute.xlu0 %4102 }
 0x513   : > { %v9086_v50 = vpop.permute.xlu1 %4158  ;;  %v4118_v3 = vrot.slane %v4103_v28, 4 }
 0x514   : > { %3838 = vrot.lane.b32.xlu0 %v8993_v26, %s7544_s12  ;;  %v10774_v34 = vrot.slane %v9086_v50, 4 }
 0x515   : > { %3900 = vrot.lane.b32.xlu1 %v7371_v39, %s7543_s11 }
 0x516   : > { %v4049_v52 = vpop.permute.xlu0 %4048 }
 0x517   : > { %v9091_v23 = vpop.permute.xlu1 %4104  ;;  %v4064_v6 = vrot.slane %v4049_v52, 4 }
 0x518   : > { %4216 = vrot.lane.b32.xlu0 %v8993_v26, %s7545_s13  ;;  %v10775_v51 = vrot.slane %v9091_v23, 4 }
 0x519   : > { %3846 = vrot.lane.b32.xlu1 %v7371_v39, %s7544_s12 }
 0x51a   : > { %v9099_v60 = vpop.permute.xlu0 %3994  ;;  %v4126_v42 = vsel %vm643_vm4, %v4118_v3, %v10775_v51 }
 0x51b   : > { %v9101_v47 = vpop.permute.xlu1 %4050  ;;  %v4127_v3 = vsel %vm920_vm6, %v4103_v28, %v4126_v42 }
 0x51c   : > { %5076 = vperm.xlu0 %7433, %v5072_v53   ;;  %v4180_v53 = vsel %vm643_vm4, %v4172_v32, %v10774_v34  ;;  %v10777_v59 = vrot.slane %v9101_v47, 4 }
 0x51d   : > { %4224 = vrot.lane.b32.xlu1 %v7371_v39, %s7545_s13  ;;  %v4181_v11 = vsel %vm975_vm5, %v4157_v37, %v4180_v53 }
 0x51e   : > { %v9107_v18 = vpop.permute.xlu0 %3940 }
 0x51f   : > { %v9109_v16 = vpop.permute.xlu1 %3996 }
 0x521   : > { %5081 = vperm.xlu1 %7434, %v5073_v25  }
 0x522   : > { %v9111_v20 = vpop.permute.xlu0 %3886 }
 0x523   : > { %v9113_v40 = vpop.permute.xlu1 %3942 }
 0x526   : > { %v9115_v46 = vpop.permute.xlu0 %3832 }
 0x527   : > { %v9117_v49 = vpop.permute.xlu1 %3888 }
 0x52a   : > { %v9119_v54 = vpop.permute.xlu0 %4210 }
 0x52b   : > { %v9121_v36 = vpop.permute.xlu1 %3834 }
 0x52e   : > { %v4165_v26 = vpop.permute.xlu0 %4164 }
 0x52f   : > { %v9123_v63 = vpop.permute.xlu1 %4212  ;;  %v4176_v5 = vrot.slane %v4165_v26, 4 }
 0x532   : > { %v4111_v2 = vpop.permute.xlu0 %4110 }
 0x533   : > { %v9127_v39 = vpop.permute.xlu1 %4166  ;;  %v4122_v13 = vrot.slane %v4111_v2, 4 }
 0x534   : > { %v10776_v25 = vrot.slane %v9127_v39, 4 }
 0x536   : > { %v4187_v31 = vsel %vm643_vm4, %v4176_v5, %v10776_v25  ;;  %v4057_v4 = vpop.permute.xlu0 %4056 }
 0x537   : > { %v4188_v43 = vsel %vm975_vm5, %v4165_v26, %v4187_v31  ;;  %v9142_v32 = vpop.permute.xlu1 %4112  ;;  %v4072_v31 = vsel %vm643_vm4, %v4064_v6, %v10777_v59  ;;  %v10779_v26 = vrot.slane %v9109_v16, 4 }
 0x538   : > { %v10778_v34 = vrot.slane %v9142_v32, 4  ;;  %v7100_v35 = vcombine.high %v4181_v11, %v4188_v43  ;;  %v7099_v0 = vcombine.low %v4181_v11, %v4188_v43  ;;  %v4068_v43 = vrot.slane %v4057_v4, 4 }
 0x539   : > { %v4073_v6 = vsel %vm865_vm7, %v4049_v52, %v4072_v31 }
 0x53a   : > { %v4133_v5 = vsel %vm643_vm4, %v4122_v13, %v10778_v34  ;;  %v4003_v37 = vpop.permute.xlu0 %4002  ;;  %4712 = vmatprep.subr.bf16.mxu0 %v7100_v35  ;;  %v4010_v35 = vrot.slane %v9099_v60, 4 }
 0x53b   : > { %v4134_v53 = vsel %vm920_vm6, %v4111_v2, %v4133_v5  ;;  %v9154_v51 = vpop.permute.xlu1 %4058  ;;  %4713 = vmatpush1.bf16.msra.mxu0 %v7099_v0  ;;  %v10781_v0 = vrot.slane %v9113_v40, 4 }
 0x53c   : > { %v10784_v11 = vrot.slane %v9154_v51, 4  ;;  %v7093_v25 = vcombine.high %v4127_v3, %v4134_v53  ;;  %v7092_v13 = vcombine.low %v4127_v3, %v4134_v53  ;;  %v4018_v2 = vsel %vm643_vm4, %v4010_v35, %v10779_v26 }
 0x53d   : > { %v4014_v53 = vrot.slane %v4003_v37, 4  ;;  %v4019_v35 = vsel %vm810_vm8, %v9099_v60, %v4018_v2 }
 0x53e   : > { %v4079_v42 = vsel %vm643_vm4, %v4068_v43, %v10784_v11  ;;  %v3949_v28 = vpop.permute.xlu0 %3948  ;;  %4714 = vmatprep.subr.bf16.mxu0 %v7093_v25  ;;  %v3956_v25 = vrot.slane %v9107_v18, 4 }
 0x53f   : > { %v4080_v5 = vsel %vm865_vm7, %v4057_v4, %v4079_v42  ;;  %v9167_v59 = vpop.permute.xlu1 %4004  ;;  %4715 = vmatpush1.bf16.msra.mxu0 %v7092_v13  ;;  %v10783_v13 = vrot.slane %v9117_v49, 4  ;;  %v3960_v26 = vrot.slane %v3949_v28, 4 }
 0x540   : > { %v10780_v3 = vrot.slane %v9167_v59, 4  ;;  %v7086_v34 = vcombine.high %v4073_v6, %v4080_v5  ;;  %v7085_v43 = vcombine.low %v4073_v6, %v4080_v5  ;;  %v3964_v4 = vsel %vm643_vm4, %v3956_v25, %v10781_v0 }
 0x541   : > { %v3965_v25 = vsel %vm755_vm9, %v9107_v18, %v3964_v4 }
 0x542   : > { %v4025_v52 = vsel %vm643_vm4, %v4014_v53, %v10780_v3  ;;  %v3895_v31 = vpop.permute.xlu0 %3894  ;;  %4716 = vmatprep.subr.bf16.mxu0 %v7086_v34  ;;  %v3902_v34 = vrot.slane %v9111_v20, 4 }
 0x543   : > { %v4026_v42 = vsel %vm810_vm8, %v4003_v37, %v4025_v52  ;;  %v9181_v6 = vpop.permute.xlu1 %3950  ;;  %4717 = vmatpush1.bf16.msra.mxu0 %v7085_v43  ;;  %v10785_v43 = vrot.slane %v9121_v36, 4  ;;  %v3906_v0 = vrot.slane %v3895_v31, 4 }
 0x544   : > { %v10782_v5 = vrot.slane %v9181_v6, 4  ;;  %v7079_v53 = vcombine.high %v4019_v35, %v4026_v42  ;;  %v7078_v3 = vcombine.low %v4019_v35, %v4026_v42  ;;  %v3910_v37 = vsel %vm643_vm4, %v3902_v34, %v10783_v13 }
 0x545   : > { %v3911_v34 = vsel %vm700_vm10, %v9111_v20, %v3910_v37 }
 0x546   : > { %v3971_v60 = vsel %vm643_vm4, %v3960_v26, %v10782_v5  ;;  %v3841_v2 = vpop.permute.xlu0 %3840  ;;  %4718 = vmatprep.subr.bf16.mxu0 %v7079_v53  ;;  %v3848_v53 = vrot.slane %v9115_v46, 4 }
 0x547   : > { %v3972_v52 = vsel %vm755_vm9, %v3949_v28, %v3971_v60  ;;  %v9195_v35 = vpop.permute.xlu1 %3896  ;;  %4719 = vmatpush1.bf16.msra.mxu0 %v7078_v3 }
 0x548   : > { %v3907_v42 = vrot.slane %v9195_v35, 4  ;;  %v7072_v26 = vcombine.high %v3965_v25, %v3972_v52  ;;  %v7071_v5 = vcombine.low %v3965_v25, %v3972_v52  ;;  %v3856_v28 = vsel %vm643_vm4, %v3848_v53, %v10785_v43 }
 0x549   : > { %v3852_v52 = vrot.slane %v3841_v2, 4 }
 0x54a   : > { %v3917_v18 = vsel %vm643_vm4, %v3906_v0, %v3907_v42  ;;  %v4219_v4 = vpop.permute.xlu0 %4218  ;;  %4720 = vmatprep.subr.bf16.mxu0 %v7072_v26  ;;  %v10787_v0 = vrot.slane %v9123_v63, 4  ;;  %v4226_v26 = vrot.slane %v9119_v54, 4 }
 0x54b   : > { %v3918_v3 = vsel %vm700_vm10, %v3895_v31, %v3917_v18  ;;  %v9208_v60 = vpop.permute.xlu1 %3842  ;;  %4721 = vmatpush1.bf16.msra.mxu0 %v7071_v5  ;;  %v3857_v31 = vsel %vm645_vm11, %v9115_v46, %v3856_v28  ;;  %v4230_v18 = vrot.slane %v4219_v4, 4 }
 0x54c   : > { %v3853_v25 = vrot.slane %v9208_v60, 4  ;;  %v7065_v13 = vcombine.high %v3911_v34, %v3918_v3  ;;  %v7064_v11 = vcombine.low %v3911_v34, %v3918_v3 }
 0x54e   : > { %v3863_v20 = vsel %vm643_vm4, %v3852_v52, %v3853_v25  ;;  %v9215_v37 = vpop.permute.xlu0 %4160  ;;  %4722 = vmatprep.subr.bf16.mxu0 %v7065_v13  ;;  %v4234_v13 = vsel %vm643_vm4, %v4226_v26, %v10787_v0  ;;  %v10917_v26 = vrot.slane %v9086_v50, 4 }
 0x54f   : > { %v3864_v5 = vsel %vm645_vm11, %v3841_v2, %v3863_v20  ;;  %v9221_v53 = vpop.permute.xlu1 %4220  ;;  %4723 = vmatpush1.bf16.msra.mxu0 %v7064_v11  ;;  %v10789_v3 = vrot.slane %v9215_v37, 4 }
 0x550   : > { %v10786_v34 = vrot.slane %v9221_v53, 4  ;;  %v7058_v43 = vcombine.high %v3857_v31, %v3864_v5  ;;  %v7057_v52 = vcombine.low %v3857_v31, %v3864_v5 }
 0x551   : > { %v4182_v5 = vsel %vm643_vm4, %v10917_v26, %v10789_v3 }
 0x552   : > { %v4241_v46 = vsel %vm643_vm4, %v4230_v18, %v10786_v34  ;;  %v9231_v28 = vpop.permute.xlu0 %4106  ;;  %4724 = vmatprep.subr.bf16.mxu0 %v7058_v43  ;;  %v4235_v43 = vsel %vm1030_vm12, %v9119_v54, %v4234_v13  ;;  %v4183_v26 = vsel %vm975_vm5, %v9086_v50, %v4182_v5  ;;  %v10920_v50 = vrot.slane %v9142_v32, 4 }
 0x553   : > { %v4242_v2 = vsel %vm1030_vm12, %v4219_v4, %v4241_v46  ;;  %v9234_v11 = vpop.permute.xlu1 %4168  ;;  %v10795_v20 = vrot.slane %v9231_v28, 4  ;;  %4725 = vmatpush1.bf16.msra.mxu0 %v7057_v52  ;;  %v10918_v4 = vrot.slane %v9127_v39, 4 }
 0x554   : > { %v10788_v31 = vrot.slane %v9234_v11, 4  ;;  %4726 = vmatprep.subr.bf16.mxu0 %v8976_v21  ;;  %v7107_v46 = vcombine.high %v4235_v43, %v4242_v2  ;;  %v10919_v21 = vrot.slane %v9091_v23, 4 }
 0x556   : > { %v4189_v18 = vsel %vm643_vm4, %v10918_v4, %v10788_v31  ;;  %v9251_v52 = vpop.permute.xlu0 %4052  ;;  %v4128_v54 = vsel %vm643_vm4, %v10919_v21, %v10795_v20 }
 0x557   : > { %v4190_v34 = vsel %vm975_vm5, %v9127_v39, %v4189_v18  ;;  %v9257_v0 = vpop.permute.xlu1 %4114  ;;  %4727 = vmatpush1.bf16.msra.mxu0 %v8978_v62  ;;  %v10794_v4 = vrot.slane %v9251_v52, 4  ;;  %v7106_v18 = vcombine.low %v4235_v43, %v4242_v2  ;;  %v9277_v62 = vld [vmem:[%s10749_s3] ss:$8 sps:$4 sm:$0xff]  }
 0x558   : > { %v10790_v13 = vrot.slane %v9257_v0, 4  ;;  %4742 = vmatprep.subr.bf16.mxu0 %v7107_v46  ;;  %v7102_v31 = vcombine.high %v4183_v26, %v4190_v34  ;;  %v7101_v39 = vcombine.low %v4183_v26, %v4190_v34  ;;  %v4129_v34 = vsel %vm920_vm6, %v9091_v23, %v4128_v54 }
 0x55a   : > { %v4135_v5 = vsel %vm643_vm4, %v10920_v50, %v10790_v13  ;;  %v9272_v3 = vpop.permute.xlu0 %3998  ;;  %4765 = vmatprep.subr.bf16.mxu1 %v7102_v31  ;;  %v9289_v31 = vld [vmem:[%s10749_s3 + $0x14] ss:$8 sps:$4 sm:$0xff]  }
 0x55b   : > { %v4136_v46 = vsel %vm920_vm6, %v9142_v32, %v4135_v5  ;;  %v9283_v2 = vpop.permute.xlu1 %4060  ;;  %v10792_v43 = vrot.slane %v9272_v3, 4  ;;  %4766 = vmatpush1.bf16.msra.mxu1 %v7101_v39  ;;  %4743 = vmatpush2.bf16.msra.mxu0 %v7106_v18  ;;  %v10921_v32 = vrot.slane %v9101_v47, 4  ;;  %v10922_v39 = vrot.slane %v9154_v51, 4 }
 0x55c   : > { %v10791_v26 = vrot.slane %v9283_v2, 4  ;;  %v7095_v23 = vcombine.high %v4129_v34, %v4136_v46  ;;  %v7094_v54 = vcombine.low %v4129_v34, %v4136_v46  ;;  %v10923_v46 = vrot.slane %v9109_v16, 4 }
 0x55d   : > { %v4074_v21 = vsel %vm643_vm4, %v10921_v32, %v10794_v4 }
 0x55e   : > { %v4081_v18 = vsel %vm643_vm4, %v10922_v39, %v10791_v26  ;;  %v9302_v50 = vpop.permute.xlu0 %3944  ;;  %4767 = vmatprep.subr.bf16.mxu1 %v7095_v23  ;;  %4745 = vmatmul.mubr.bf16.vlgmr.msra.gmra.mxu0 %v9277_v62  ;;  %v4075_v13 = vsel %vm865_vm7, %v9101_v47, %v4074_v21  ;;  %v4020_v34 = vsel %vm643_vm4, %v10923_v46, %v10792_v43  ;;  %v10924_v47 = vrot.slane %v9167_v59, 4 }
 0x55f   : > { %v4082_v5 = vsel %vm865_vm7, %v9154_v51, %v4081_v18  ;;  %v9309_v32 = vpop.permute.xlu1 %4006  ;;  %4768 = vmatpush1.bf16.msra.mxu1 %v7094_v54  ;;  %7114 = vmatprep.mubr.msk.bf16.mxu0 %vm1502_vm3, %v9289_v31  ;;  %v10799_v39 = vrot.slane %v9302_v50, 4  ;;  %v9330_v54 = vld [vmem:[%s10749_s3 + $0x10] ss:$8 sps:$4 sm:$0xff]  }
 0x560   : > { %v10793_v23 = vrot.slane %v9309_v32, 4  ;;  %v7088_v51 = vcombine.high %v4075_v13, %v4082_v5  ;;  %v7087_v18 = vcombine.low %v4075_v13, %v4082_v5  ;;  %v4021_v13 = vsel %vm810_vm8, %v9109_v16, %v4020_v34 }
 0x562   : > { %v4027_v21 = vsel %vm643_vm4, %v10924_v47, %v10793_v23  ;;  %v9325_v26 = vpop.permute.xlu0 %3890  ;;  %4769 = vmatprep.subr.bf16.mxu1 %v7088_v51  ;;  %v10925_v51 = vrot.slane %v9113_v40, 4 }
 0x563   : > { %v4028_v46 = vsel %vm810_vm8, %v9167_v59, %v4027_v21  ;;  %v9336_v5 = vpop.permute.xlu1 %3952  ;;  %v10796_v43 = vrot.slane %v9325_v26, 4  ;;  %4770 = vmatpush1.bf16.msra.mxu1 %v7087_v18  ;;  %v10926_v59 = vrot.slane %v9181_v6, 4 }
 0x564   : > { %v10797_v47 = vrot.slane %v9336_v5, 4  ;;  %v3966_v23 = vsel %vm643_vm4, %v10925_v51, %v10799_v39  ;;  %v7081_v4 = vcombine.high %v4021_v13, %v4028_v46  ;;  %v7080_v20 = vcombine.low %v4021_v13, %v4028_v46 }
 0x565   : > { %v3967_v21 = vsel %vm755_vm9, %v9113_v40, %v3966_v23  ;;  %v10927_v46 = vrot.slane %v9117_v49, 4 }
 0x566   : > { %v3973_v16 = vsel %vm643_vm4, %v10926_v59, %v10797_v47  ;;  %v9350_v34 = vpop.permute.xlu0 %3836  ;;  %4771 = vmatprep.subr.bf16.mxu1 %v7081_v4  ;;  %4755 = vmatmul.mubr.bf16.gmra.mxu0 %v9330_v54 }
 0x567   : > { %v3974_v18 = vsel %vm755_vm9, %v9181_v6, %v3973_v16  ;;  %v9357_v51 = vpop.permute.xlu1 %3898  ;;  %v3912_v13 = vsel %vm643_vm4, %v10927_v46, %v10796_v43  ;;  %4772 = vmatpush1.bf16.msra.mxu1 %v7080_v20  ;;  %7117 = vmatprep.mubr.msk.bf16.mxu0 %vm1502_vm3, %v9059_v38  ;;  %v3850_v59 = vrot.slane %v9350_v34, 4 }
 0x568   : > { %v10798_v4 = vrot.slane %v9357_v51, 4  ;;  %v7074_v6 = vcombine.high %v3967_v21, %v3974_v18  ;;  %v7073_v16 = vcombine.low %v3967_v21, %v3974_v18  ;;  %v3913_v46 = vsel %vm700_vm10, %v9117_v49, %v3912_v13 }
 0x569   : > { %v10928_v21 = vrot.slane %v9121_v36, 4 }
 0x56a   : > { %v3919_v40 = vsel %vm643_vm4, %v3907_v42, %v10798_v4  ;;  %v4163_v23 = vpop.permute.xlu0 %4162  ;;  %4773 = vmatprep.subr.bf16.mxu1 %v7074_v6 }
 0x56b   : > { %v3920_v20 = vsel %vm700_vm10, %v9195_v35, %v3919_v40  ;;  %v9377_v43 = vpop.permute.xlu1 %3844  ;;  %v4175_v47 = vrot.slane %v4163_v23, 4  ;;  %4774 = vmatpush1.bf16.msra.mxu1 %v7073_v16  ;;  %v3858_v42 = vsel %vm643_vm4, %v10928_v21, %v3850_v59 }
 0x56c   : > { %v10800_v18 = vrot.slane %v9377_v43, 4  ;;  %v7067_v4 = vcombine.high %v3913_v46, %v3920_v20  ;;  %v7066_v6 = vcombine.low %v3913_v46, %v3920_v20  ;;  %v3859_v16 = vsel %vm645_vm11, %v9121_v36, %v3858_v42 }
 0x56d   : > { %v4186_v39 = vsel %vm975_vm5, %v4163_v23, %v4175_v47  ;;  %v10929_v20 = vrot.slane %v9215_v37, 4 }
 0x56e   : > { %v3865_v49 = vsel %vm643_vm4, %v3853_v25, %v10800_v18  ;;  %4205 = vst [vmem:[#allocation2 + $0x1a0] sm:$0xf] %v4186_v39  ;;  %v9391_v35 = vpop.permute.xlu0 %4214  ;;  %4775 = vmatprep.subr.bf16.mxu1 %v7067_v4  ;;  %v10930_v18 = vrot.slane %v9234_v11, 4 }
 0x56f   : > { %v3866_v13 = vsel %vm645_vm11, %v9208_v60, %v3865_v49  ;;  %v4171_v40 = vpop.permute.xlu1 %4170  ;;  %v4184_v23 = vsel %vm643_vm4, %v10929_v20, %v4175_v47  ;;  %4776 = vmatpush1.bf16.msra.mxu1 %v7066_v6  ;;  %v4228_v21 = vrot.slane %v9391_v35, 4 }
 0x570   : > { %v4179_v46 = vrot.slane %v4171_v40, 4  ;;  %v7060_v25 = vcombine.high %v3859_v16, %v3866_v13  ;;  %v7059_v39 = vcombine.low %v3859_v16, %v3866_v13  ;;  %v4185_v47 = vsel %vm975_vm5, %v9215_v37, %v4184_v23 }
 0x571   : > { %v10932_v37 = vrot.slane %v9221_v53, 4 }
 0x572   : > { %v4191_v4 = vsel %vm643_vm4, %v10930_v18, %v4179_v46  ;;  %v4193_v60 = vsel %vm975_vm5, %v4171_v40, %v4179_v46  ;;  %v4109_v49 = vpop.permute.xlu0 %4108  ;;  %4777 = vmatprep.subr.bf16.mxu1 %v7060_v25  ;;  %v10931_v18 = vrot.slane %v9123_v63, 4 }
 0x573   : > { %v4192_v36 = vsel %vm975_vm5, %v9234_v11, %v4191_v4  ;;  %4209 = vst [vmem:[#allocation2 + $0x1bc] sm:$0xf] %v4193_v60  ;;  %v9409_v42 = vpop.permute.xlu1 %4222  ;;  %v4121_v6 = vrot.slane %v4109_v49, 4  ;;  %4778 = vmatpush1.bf16.msra.mxu1 %v7059_v39 }
 0x574   : > { %v4232_v13 = vrot.slane %v9409_v42, 4  ;;  %v4236_v16 = vsel %vm643_vm4, %v10931_v18, %v4228_v21  ;;  %4779 = vmatprep.subr.bf16.mxu1 %v8989_v12  ;;  %v7104_v40 = vcombine.high %v4185_v47, %v4192_v36  ;;  %v7103_v11 = vcombine.low %v4185_v47, %v4192_v36 }
 0x575   : > { %v4132_v20 = vsel %vm920_vm6, %v4109_v49, %v4121_v6  ;;  %v4237_v39 = vsel %vm1030_vm12, %v9123_v63, %v4236_v16  ;;  %v10933_v49 = vrot.slane %v9231_v28, 4 }
 0x576   : > { %v4243_v23 = vsel %vm643_vm4, %v10932_v37, %v4232_v13  ;;  %4151 = vst [vmem:[#allocation2 + $0x168] sm:$0xf] %v4132_v20  ;;  %v4055_v46 = vpop.permute.xlu0 %4054  ;;  %4818 = vmatprep.subr.bf16.mxu0 %v7104_v40  ;;  %v10934_v20 = vrot.slane %v9257_v0, 4 }
 0x577   : > { %v4244_v25 = vsel %vm1030_vm12, %v9221_v53, %v4243_v23  ;;  %v4117_v12 = vpop.permute.xlu1 %4116  ;;  %v4067_v4 = vrot.slane %v4055_v46, 4  ;;  %4780 = vmatpush1.bf16.msra.mxu1 %v8991_v30  ;;  %4819 = vmatpush1.bf16.msra.mxu0 %v7103_v11  ;;  %v4130_v36 = vsel %vm643_vm4, %v10933_v49, %v4121_v6 }
 0x578   : > { %v4125_v60 = vrot.slane %v4117_v12, 4  ;;  %v7109_v47 = vcombine.high %v4237_v39, %v4244_v25  ;;  %v7108_v18 = vcombine.low %v4237_v39, %v4244_v25  ;;  %v4131_v6 = vsel %vm920_vm6, %v9231_v28, %v4130_v36 }
 0x579   : > { %v4078_v40 = vsel %vm865_vm7, %v4055_v46, %v4067_v4  ;;  %v10935_v46 = vrot.slane %v9251_v52, 4 }
 0x57a   : > { %v4137_v53 = vsel %vm643_vm4, %v10934_v20, %v4125_v60  ;;  %v4139_v63 = vsel %vm920_vm6, %v4117_v12, %v4125_v60  ;;  %4097 = vst [vmem:[#allocation2 + $0x130] sm:$0xf] %v4078_v40  ;;  %v4001_v16 = vpop.permute.xlu0 %4000  ;;  %4795 = vmatprep.subr.bf16.mxu1 %v7109_v47  ;;  %v7477_v49 = vld [vmem:[#allocation2 + $0x1a0] ss:$28 sps:$4 sm:$0xff]  }
 0x57b   : > { %v4138_v30 = vsel %vm920_vm6, %v9257_v0, %v4137_v53  ;;  %4155 = vst [vmem:[#allocation2 + $0x184] sm:$0xf] %v4139_v63  ;;  %v4063_v11 = vpop.permute.xlu1 %4062  ;;  %v4013_v37 = vrot.slane %v4001_v16, 4  ;;  %4796 = vmatpush2.bf16.msra.mxu1 %v7108_v18  ;;  %v4076_v25 = vsel %vm643_vm4, %v10935_v46, %v4067_v4  ;;  %v10936_v0 = vrot.slane %v9283_v2, 4 }
 0x57c   : > { %v4071_v23 = vrot.slane %v4063_v11, 4  ;;  %v7097_v39 = vcombine.high %v4131_v6, %v4138_v30  ;;  %4871 = vmatprep.subr.bf16.mxu1 %v10883_v22  ;;  %v7096_v12 = vcombine.low %v4131_v6, %v4138_v30  ;;  %v4077_v18 = vsel %vm865_vm7, %v9251_v52, %v4076_v25 }
 0x57d   : > { %v4024_v60 = vsel %vm810_vm8, %v4001_v16, %v4013_v37  ;;  %v10937_v63 = vrot.slane %v9272_v3, 4  ;;  %v10938_v52 = vrot.slane %v9309_v32, 4 }
 0x57e   : > { %v4083_v47 = vsel %vm643_vm4, %v10936_v0, %v4071_v23  ;;  %v4085_v28 = vsel %vm865_vm7, %v4063_v11, %v4071_v23  ;;  %4043 = vst [vmem:[#allocation2 + $0xf8] sm:$0xf] %v4024_v60  ;;  %v3947_v36 = vpop.permute.xlu0 %3946  ;;  %4798 = vmatmul.mubr.bf16.vlgmr.msra.gmra.mxu1 %v9277_v62  ;;  %4820 = vmatprep.subr.bf16.mxu0 %v7097_v39  ;;  %v10939_v0 = vrot.slane %v9302_v50, 4 }
 0x57f   : > { %v4084_v4 = vsel %vm865_vm7, %v9283_v2, %v4083_v47  ;;  %4101 = vst [vmem:[#allocation2 + $0x14c] sm:$0xf] %v4085_v28  ;;  %v4009_v40 = vpop.permute.xlu1 %4008  ;;  %v3959_v20 = vrot.slane %v3947_v36, 4  ;;  %4872 = vmatpush1.bf16.msra.mxu1 %v7477_v49  ;;  %4821 = vmatpush1.bf16.msra.mxu0 %v7096_v12  ;;  %v4022_v16 = vsel %vm643_vm4, %v10937_v63, %v4013_v37 }
 0x580   : > { %v4017_v53 = vrot.slane %v4009_v40, 4  ;;  %v7090_v30 = vcombine.high %v4077_v18, %v4084_v4  ;;  %4873 = vmatprep.subr.bf16.mxu1 %v10883_v22  ;;  %v7089_v6 = vcombine.low %v4077_v18, %v4084_v4  ;;  %7116 = vmatprep.mubr.msk.bf16.mxu1 %vm1502_vm3, %v9289_v31  ;;  %v4023_v39 = vsel %vm810_vm8, %v9272_v3, %v4022_v16 }
 0x581   : > { %v3970_v2 = vsel %vm755_vm9, %v3947_v36, %v3959_v20  ;;  %v3968_v47 = vsel %vm643_vm4, %v10939_v0, %v3959_v20 }
 0x582   : > { %v4029_v11 = vsel %vm643_vm4, %v10938_v52, %v4017_v53  ;;  %v4031_v23 = vsel %vm810_vm8, %v4009_v40, %v4017_v53  ;;  %3989 = vst [vmem:[#allocation2 + $0xc0] sm:$0xf] %v3970_v2  ;;  %v3893_v46 = vpop.permute.xlu0 %3892  ;;  %4822 = vmatprep.subr.bf16.mxu0 %v7090_v30  ;;  %v7478_v25 = vld [vmem:[#allocation2 + $0x168] ss:$28 sps:$4 sm:$0xff]   ;;  %v3969_v63 = vsel %vm755_vm9, %v9302_v50, %v3968_v47  ;;  %v10941_v2 = vrot.slane %v9325_v26, 4 }
 0x583   : > { %v4030_v37 = vsel %vm810_vm8, %v9309_v32, %v4029_v11  ;;  %4047 = vst [vmem:[#allocation2 + $0x114] sm:$0xf] %v4031_v23  ;;  %v3955_v12 = vpop.permute.xlu1 %3954  ;;  %v3905_v60 = vrot.slane %v3893_v46, 4  ;;  %4823 = vmatpush1.bf16.msra.mxu0 %v7089_v6  ;;  %4874 = vmatpush1.bf16.msra.mxu1 %v7478_v25  ;;  %v10940_v32 = vrot.slane %v9336_v5, 4  ;;  %v10942_v50 = vrot.slane %v9357_v51, 4 }
 0x584   : > { %v3963_v49 = vrot.slane %v3955_v12, 4  ;;  %v7083_v28 = vcombine.high %v4023_v39, %v4030_v37  ;;  %v7082_v36 = vcombine.low %v4023_v39, %v4030_v37  ;;  %4875 = vmatprep.subr.bf16.mxu1 %v10883_v22 }
 0x585   : > { %v3916_v4 = vsel %vm700_vm10, %v3893_v46, %v3905_v60  ;;  %v3914_v52 = vsel %vm643_vm4, %v10941_v2, %v3905_v60 }
 0x586   : > { %v3975_v18 = vsel %vm643_vm4, %v10940_v32, %v3963_v49  ;;  %v3977_v3 = vsel %vm755_vm9, %v3955_v12, %v3963_v49  ;;  %3935 = vst [vmem:[#allocation2 + $0x88] sm:$0xf] %v3916_v4  ;;  %v3839_v40 = vpop.permute.xlu0 %3838  ;;  %4824 = vmatprep.subr.bf16.mxu0 %v7083_v28  ;;  %v7479_v53 = vld [vmem:[#allocation2 + $0x130] ss:$28 sps:$4 sm:$0xff]   ;;  %4808 = vmatmul.mubr.bf16.gmra.mxu1 %v9330_v54 }
 0x587   : > { %v3976_v20 = vsel %vm755_vm9, %v9336_v5, %v3975_v18  ;;  %3993 = vst [vmem:[#allocation2 + $0xdc] sm:$0xf] %v3977_v3  ;;  %v3901_v16 = vpop.permute.xlu1 %3900  ;;  %v3851_v30 = vrot.slane %v3839_v40, 4  ;;  %4825 = vmatpush1.bf16.msra.mxu0 %v7082_v36  ;;  %7119 = vmatprep.mubr.msk.bf16.mxu1 %vm1502_vm3, %v9059_v38  ;;  %v3915_v12 = vsel %vm700_vm10, %v9325_v26, %v3914_v52  ;;  %v7485_v52 = vld [vmem:[#allocation2 + $0x14] ss:$28 sps:$4 sm:$0xff]  }
 0x588   : > { %v3909_v6 = vrot.slane %v3901_v16, 4  ;;  %4876 = vmatpush1.bf16.msra.mxu1 %v7479_v53  ;;  %v7076_v11 = vcombine.high %v3969_v63, %v3976_v20  ;;  %v7075_v23 = vcombine.low %v3969_v63, %v3976_v20 }
 0x589   : > { %v3862_v5 = vsel %vm645_vm11, %v3839_v40, %v3851_v30  ;;  %4877 = vmatprep.subr.bf16.mxu1 %v10883_v22  ;;  %v3860_v47 = vsel %vm643_vm4, %v3850_v59, %v3851_v30  ;;  %v7165_v30 = vld [vmem:[%s7603_s28 + $0x1e0] sm:$0x33] }
 0x58a   : > { %v3921_v46 = vsel %vm643_vm4, %v10942_v50, %v3909_v6  ;;  %v3923_v25 = vsel %vm700_vm10, %v3901_v16, %v3909_v6  ;;  %3881 = vst [vmem:[#allocation2 + $0x50] sm:$0xf] %v3862_v5  ;;  %v4217_v38 = vpop.permute.xlu0 %4216  ;;  %4826 = vmatprep.subr.bf16.mxu0 %v7076_v11  ;;  %v7480_v37 = vld [vmem:[#allocation2 + $0xf8] ss:$28 sps:$4 sm:$0xff]   ;;  %v3861_v3 = vsel %vm645_vm11, %v9350_v34, %v3860_v47  ;;  %v7161_v16 = vld [vmem:[%s7603_s28 + $0x1c0] sm:$0xff]  ;;  %v7162_v5 = vld [vmem:[%s7603_s28 + $0x1c8] sm:$0xff] }
 0x58b   : > { %v3922_v39 = vsel %vm700_vm10, %v9357_v51, %v3921_v46  ;;  %3939 = vst [vmem:[#allocation2 + $0xa4] sm:$0xf] %v3923_v25  ;;  %v3847_v60 = vpop.permute.xlu1 %3846  ;;  %v4229_v49 = vrot.slane %v4217_v38, 4  ;;  %4827 = vmatpush1.bf16.msra.mxu0 %v7075_v23  ;;  %v10943_v51 = vrot.slane %v9377_v43, 4  ;;  %v7179_v23 = vcombine.high %v7161_v16, %v7165_v30  ;;  %v7166_v25 = vld [vmem:[%s7603_s28 + $0x1e8] sm:$0x33] }
 0x58c   : > { %v3855_v0 = vrot.slane %v3847_v60, 4  ;;  %4878 = vmatpush1.bf16.msra.mxu1 %v7480_v37  ;;  %v7069_v28 = vcombine.high %v3915_v12, %v3922_v39  ;;  %v7068_v36 = vcombine.low %v3915_v12, %v3922_v39  ;;  %v7490_v37 = vld [vmem:[#allocation2 + $0x18] ss:$28 sps:$4 sm:$0xff]   ;;  %v7181_v39 = vcombine.high %v7162_v5, %v7166_v25  ;;  %v7153_v12 = vld [vmem:[%s7603_s28 + $0x180] sm:$0xff] }
 0x58d   : > { %v4240_v4 = vsel %vm1030_vm12, %v4217_v38, %v4229_v49  ;;  %4879 = vmatprep.subr.bf16.mxu1 %v10883_v22  ;;  %v4238_v34 = vsel %vm643_vm4, %v4228_v21, %v4229_v49  ;;  %v7488_v21 = vld [vmem:[#allocation2 + $0x10] ss:$28 sps:$4 sm:$0xff]   ;;  %v5168_v38 = vand.u32 %v7179_v23, %v7607_v7  ;;  %v7156_v23 = vld [vmem:[%s7603_s28 + $0x198] sm:$0xff] }
 0x58e   : > { %v3867_v26 = vsel %vm643_vm4, %v10943_v51, %v3855_v0  ;;  %v3869_v32 = vsel %vm645_vm11, %v3847_v60, %v3855_v0  ;;  %4259 = vst [vmem:[#allocation2 + $0x1d8] sm:$0xf] %v4240_v4  ;;  %4828 = vmatprep.subr.bf16.mxu0 %v7069_v28  ;;  %v7481_v18 = vld [vmem:[#allocation2 + $0xc0] ss:$28 sps:$4 sm:$0xff]   ;;  %v7163_v49 = vld [vmem:[%s7603_s28 + $0x1d0] sm:$0xff]  ;;  %v7180_v28 = vcombine.low %v7162_v5, %v7166_v25  ;;  %v7154_v51 = vld [vmem:[%s7603_s28 + $0x188] sm:$0xff] }
 0x58f   : > { %v3868_v59 = vsel %vm645_vm11, %v9377_v43, %v3867_v26  ;;  %3885 = vst [vmem:[#allocation2 + $0x6c] sm:$0xf] %v3869_v32  ;;  %v4225_v40 = vpop.permute.xlu1 %4224  ;;  %4829 = vmatpush1.bf16.msra.mxu0 %v7068_v36  ;;  %v7157_v60 = vld [vmem:[%s7603_s28 + $0x1a0] sm:$0xff]  ;;  %v7167_v0 = vld [vmem:[%s7603_s28 + $0x1f0] sm:$0x33]  ;;  %v5174_v4 = vand.u32 %v7181_v39, %v7607_v7  ;;  %v7158_v26 = vld [vmem:[%s7603_s28 + $0x1a8] sm:$0xff] }
 0x590   : > { %v4233_v53 = vrot.slane %v4225_v40, 4  ;;  %4880 = vmatpush1.bf16.msra.mxu1 %v7481_v18  ;;  %v7062_v20 = vcombine.high %v3861_v3, %v3868_v59  ;;  %v7061_v63 = vcombine.low %v3861_v3, %v3868_v59  ;;  %v7171_v36 = vcombine.high %v7153_v12, %v7157_v60  ;;  %v7164_v59 = vld [vmem:[%s7603_s28 + $0x1d8] sm:$0xff] }
 0x591   : > { %4881 = vmatprep.subr.bf16.mxu1 %v10883_v22  ;;  %v7183_v32 = vcombine.high %v7163_v49, %v7167_v0  ;;  %v7168_v3 = vld [vmem:[%s7603_s28 + $0x1f8] sm:$0x33] }
 0x592   : > { %v4245_v6 = vsel %vm643_vm4, %v4232_v13, %v4233_v53  ;;  %v4247_v43 = vsel %vm1030_vm12, %v4225_v40, %v4233_v53  ;;  %4830 = vmatprep.subr.bf16.mxu0 %v7062_v20  ;;  %v7482_v2 = vld [vmem:[#allocation2 + $0x88] ss:$28 sps:$4 sm:$0xff]   ;;  %v4239_v13 = vsel %vm1030_vm12, %v9391_v35, %v4238_v34  ;;  %v7170_v40 = vcombine.low %v7153_v12, %v7157_v60  ;;  %v7155_v34 = vld [vmem:[%s7603_s28 + $0x190] sm:$0xff] }
 0x593   : > { %v4246_v11 = vsel %vm1030_vm12, %v9409_v42, %v4245_v6  ;;  %4263 = vst [vmem:[#allocation2 + $0x1f4] sm:$0xf] %v4247_v43  ;;  %4831 = vmatpush1.bf16.msra.mxu0 %v7061_v63  ;;  %v7178_v42 = vcombine.low %v7161_v16, %v7165_v30  ;;  %v5171_v53 = vand.u32 %v7180_v28, %v7607_v7 }
 0x594   : > { %4882 = vmatpush1.bf16.msra.mxu1 %v7482_v2  ;;  %4832 = vmatprep.subr.bf16.mxu0 %v7485_v52  ;;  %v7111_v46 = vcombine.high %v4239_v13, %v4246_v11  ;;  %v7110_v35 = vcombine.low %v4239_v13, %v4246_v11  ;;  %v7173_v20 = vcombine.high %v7154_v51, %v7158_v26  ;;  %v7160_v13 = vld [vmem:[%s7603_s28 + $0x1b8] sm:$0xff] }
 0x595   : > { %4883 = vmatprep.subr.bf16.mxu1 %v10883_v22  ;;  %v5165_v47 = vand.u32 %v7178_v42, %v7607_v7  ;;  %v5180_v63 = vand.u32 %v7183_v32, %v7607_v7  ;;  %v7185_v16 = vcombine.high %v7164_v59, %v7168_v3  ;;  %v7172_v30 = vcombine.low %v7154_v51, %v7158_v26 }
 0x596   : > { %v7489_v50 = vld [vmem:[#allocation2 + $0x50] ss:$28 sps:$4 sm:$0xff]   ;;  %v7182_v43 = vcombine.low %v7163_v49, %v7167_v0  ;;  %v7184_v11 = vcombine.low %v7164_v59, %v7168_v3 }
 0x597   : > { %4833 = vmatpush1.bf16.msra.mxu0 %v7488_v21  ;;  %v5186_v6 = vand.u32 %v7185_v16, %v7607_v7 }
 0x598   : > { %4884 = vmatpush1.bf16.msra.mxu1 %v7489_v50  ;;  %4848 = vmatprep.subr.bf16.mxu0 %v7111_v46  ;;  %v5177_v2 = vand.u32 %v7182_v43, %v7607_v7  ;;  %v5183_v5 = vand.u32 %v7184_v11, %v7607_v7  ;;  %v7177_v50 = vcombine.high %v7156_v23, %v7160_v13 }
 0x599   : > { %4885 = vmatprep.subr.bf16.mxu1 %v10883_v22 }
 0x59a   : > { %v7491_v18 = vld [vmem:[#allocation2 + $0x1d8] ss:$28 sps:$4 sm:$0xff]  }
 0x59b   : > { %4849 = vmatpush2.bf16.msra.mxu0 %v7110_v35 }
 0x59c   : > { %4886 = vmatpush1.bf16.msra.mxu1 %v7490_v37  ;;  %5200 = vmatprep.subr.bf16.mxu0 %v5168_v38 }
 0x59d   : > { %4901 = vmatprep.subr.bf16.mxu1 %v10883_v22 }
 0x59e   : > { %4851 = vmatmul.mubr.bf16.vlgmr.msra.gmra.mxu0 %v9277_v62 }
 0x59f   : > { %5201 = vmatpush1.bf16.msra.mxu0 %v5165_v47  ;;  %7118 = vmatprep.mubr.msk.bf16.mxu0 %vm1502_vm3, %v9289_v31 }
 0x5a0   : > { %4902 = vmatpush2.bf16.msra.mxu1 %v7491_v18  ;;  %5202 = vmatprep.subr.bf16.mxu0 %v7171_v36 }
 0x5a1   : > { %5243 = vmatprep.subr.bf16.mxu1 %v5174_v4 }
 0x5a3   : > { %4904 = vmatmul.mubr.bf16.vlgmr.msra.gmra.mxu1 %v9277_v62  ;;  %5203 = vmatpush1.bf16.msra.mxu0 %v7170_v40  ;;  %v7159_v62 = vld [vmem:[%s7603_s28 + $0x1b0] sm:$0xff] }
 0x5a4   : > { %5244 = vmatpush1.bf16.msra.mxu1 %v5171_v53  ;;  %7120 = vmatprep.mubr.msk.bf16.mxu1 %vm1502_vm3, %v9289_v31  ;;  %v7492_v31 = vld [vmem:[%s10747_s1] sm:$0xff]   ;;  %v7175_v52 = vcombine.high %v7155_v34, %v7159_v62  ;;  %v7174_v21 = vcombine.low %v7155_v34, %v7159_v62  ;;  %v5077_v34 = vpop.permute.xlu0 %5076 }
 0x5a5   : > { %5245 = vmatprep.subr.bf16.mxu1 %v7173_v20  ;;  %5286 = vmatprep.subr.bf16.mxu0 %v5180_v63 }
 0x5a6   : > { %4861 = vmatmul.mubr.bf16.gmra.mxu0 %v9330_v54 }
 0x5a7   : > { %5220 = vmatprep.mubr.bf16.mxu0 %v10883_v22 }
 0x5a8   : > { %5246 = vmatpush1.bf16.msra.mxu1 %v7172_v30 }
 0x5a9   : > { %5329 = vmatprep.subr.bf16.mxu1 %v5186_v6 }
 0x5ab   : > { %4912 = vmatmul.mubr.bf16.gmra.mxu1 %v9330_v54  ;;  %v7176_v54 = vcombine.low %v7156_v23, %v7160_v13  ;;  %v9630_v13 = vpop.permute.xlu1 %5081 }
 0x5ac   : > { %5263 = vmatprep.mubr.bf16.mxu1 %v10883_v22 }
 0x5ae   : > { %7186 = vmatmul.mubr.msk.bf16.vlgmr.msra.gmra.mxu0 %vm341_vm2, %v7492_v31 }
 0x5af   : > { %5287 = vmatpush1.bf16.msra.mxu0 %v5177_v2  ;;  %5306 = vmatprep.mubr.bf16.mxu0 %v10883_v22 }
 0x5b0   : > { %5288 = vmatprep.subr.bf16.mxu0 %v7175_v52 }
 0x5b3   : > { %7187 = vmatmul.mubr.msk.bf16.vlgmr.msra.gmra.mxu1 %vm341_vm2, %v7492_v31  ;;  %5289 = vmatpush1.bf16.msra.mxu0 %v7174_v21 }
 0x5b4   : > { %5330 = vmatpush1.bf16.msra.mxu1 %v5183_v5  ;;  %5349 = vmatprep.mubr.bf16.mxu1 %v10883_v22 }
 0x5b5   : > { %5331 = vmatprep.subr.bf16.mxu1 %v7177_v50 }
 0x5b6   : > { %7188 = vmatmul.mubr.msk.bf16.vlgmr.msra.gmra.mxu0 %vm341_vm2, %v7492_v31 }
 0x5b8   : > { %5332 = vmatpush1.bf16.msra.mxu1 %v7176_v54 }
 0x5bb   : > { %7189 = vmatmul.mubr.msk.bf16.vlgmr.msra.gmra.mxu1 %vm341_vm2, %v7492_v31 }
 0x61e   : > { %v9570_v46 = vpop.f32.mrf.mxu0 }
 0x61f   : > { %10944 = vst [vmem:[#allocation45_spill] sm:$0xff] %v9570_v46 }
 0x620   : > { %v9572_v25 = vpop.f32.mrf.mxu0 }
 0x621   : > { %10945 = vst [vmem:[#allocation46_spill] sm:$0xff] %v9572_v25 }
 0x622   : > { %v9576_v7 = vpop.f32.mrf.mxu0 }
 0x623   : > { %10947 = vst [vmem:[#allocation48_spill] sm:$0xff] %v9576_v7 }
 0x624   : > { %v9580_v35 = vpop.f32.mrf.mxu0 }
 0x625   : > { %10949 = vst [vmem:[#allocation50_spill] sm:$0xff] %v9580_v35 }
 0x626   : > { %v9582_v37 = vpop.f32.mrf.mxu0 }
 0x627   : > { %10950 = vst [vmem:[#allocation51_spill] sm:$0xff] %v9582_v37 }
 0x628   : > { %v9586_v12 = vpop.f32.mrf.mxu0 }
 0x629   : > { %10952 = vst [vmem:[#allocation53_spill] sm:$0xff] %v9586_v12 }
 0x62a   : > { %v9592_v0 = vpop.f32.mrf.mxu0 }
 0x62b   : > { %10955 = vst [vmem:[#allocation56_spill] sm:$0xff] %v9592_v0 }
 0x62c   : > { %v9596_v28 = vpop.f32.mrf.mxu0 }
 0x62d   : > { %10957 = vst [vmem:[#allocation58_spill] sm:$0xff] %v9596_v28 }
 0x63e   : > { %v9574_v42 = vpop.f32.mrf.mxu1 }
 0x63f   : > { %10946 = vst [vmem:[#allocation47_spill] sm:$0xff] %v9574_v42 }
 0x640   : > { %v9578_v38 = vpop.f32.mrf.mxu1 }
 0x641   : > { %10948 = vst [vmem:[#allocation49_spill] sm:$0xff] %v9578_v38 }
 0x642   : > { %v9584_v39 = vpop.f32.mrf.mxu1 }
 0x643   : > { %10951 = vst [vmem:[#allocation52_spill] sm:$0xff] %v9584_v39 }
 0x644   : > { %v9588_v60 = vpop.f32.mrf.mxu1 }
 0x645   : > { %10953 = vst [vmem:[#allocation54_spill] sm:$0xff] %v9588_v60 }
 0x646   : > { %v9590_v49 = vpop.f32.mrf.mxu1 }
 0x647   : > { %10954 = vst [vmem:[#allocation55_spill] sm:$0xff] %v9590_v49 }
 0x648   : > { %v9594_v47 = vpop.f32.mrf.mxu1 }
 0x649   : > { %10956 = vst [vmem:[#allocation57_spill] sm:$0xff] %v9594_v47 }
 0x64a   : > { %v9598_v36 = vpop.f32.mrf.mxu1 }
 0x64b   : > { %10958 = vst [vmem:[#allocation59_spill] sm:$0xff] %v9598_v36 }
 0x64c   : > { %v9604_v26 = vpop.f32.mrf.mxu1 }
 0x64d   : > { %10961 = vst [vmem:[#allocation62_spill] sm:$0xff] %v9604_v26 }
 0x65e   : > { %v9600_v4 = vpop.f32.mrf.mxu0 }
 0x65f   : > { %10959 = vst [vmem:[#allocation60_spill] sm:$0xff] %v9600_v4 }
 0x660   : > { %v9602_v51 = vpop.f32.mrf.mxu0 }
 0x661   : > { %10960 = vst [vmem:[#allocation61_spill] sm:$0xff] %v9602_v51 }
 0x662   : > { %v9606_v32 = vpop.f32.mrf.mxu0 }
 0x663   : > { %10962 = vst [vmem:[#allocation63_spill] sm:$0xff] %v9606_v32  ;;  %v9608_v18 = vpop.f32.mrf.mxu1 }
 0x664   : > { %10963 = vst [vmem:[#allocation64_spill] sm:$0xff] %v9608_v18  ;;  %v9610_v59 = vpop.f32.mrf.mxu0 }
 0x665   : > { %10964 = vst [vmem:[#allocation65_spill] sm:$0xff] %v9610_v59  ;;  %v4907_v3 = vpop.f32.mrf.mxu1 }
 0x666   : > { %v9612_v40 = vpop.f32.mrf.mxu0 }
 0x667   : > { %10965 = vst [vmem:[#allocation66_spill] sm:$0xff] %v9612_v40  ;;  %v9614_v53 = vpop.f32.mrf.mxu1 }
 0x668   : > { %10966 = vst [vmem:[#allocation67_spill] sm:$0xff] %v9614_v53  ;;  %v9616_v20 = vpop.f32.mrf.mxu0 }
 0x669   : > { %10967 = vst [vmem:[#allocation68_spill] sm:$0xff] %v9616_v20  ;;  %v4910_v63 = vpop.f32.mrf.mxu1 }
 0x66a   : > { %v9618_v16 = vpop.f32.mrf.mxu0 }
 0x66b   : > { %10968 = vst [vmem:[#allocation69_spill] sm:$0xff] %v9618_v16  ;;  %v9620_v30 = vpop.f32.mrf.mxu1 }
 0x66c   : > { %10969 = vst [vmem:[#allocation70_spill] sm:$0xff] %v9620_v30  ;;  %v9622_v6 = vpop.f32.mrf.mxu0 }
 0x66d   : > { %10970 = vst [vmem:[#allocation71_spill] sm:$0xff] %v9622_v6  ;;  %v4915_v43 = vpop.f32.mrf.mxu1 }
 0x66e   : > { %v5222_v62 = vpop.f32.mrf.mxu0 }
 0x66f   : > { %v9624_v31 = vpop.f32.mrf.mxu1  ;;  %v9626_v2 = vadd.f32 %v5222_v62, %v5077_v34 }
 0x670   : > { %10971 = vst [vmem:[#allocation72_spill] sm:$0xff] %v9624_v31  ;;  %v5224_v52 = vpop.f32.mrf.mxu0 }
 0x671   : > { %v4918_v11 = vpop.f32.mrf.mxu1  ;;  %v9628_v23 = vadd.f32 %v5224_v52, %v5077_v34  ;;  %v10801_v5 = vmax.f32 %v9626_v2, 0.0 }
 0x672   : > { %v5226_v21 = vpop.f32.mrf.mxu0 }
 0x673   : > { %v10802_v50 = vmax.f32 %v9628_v23, 0.0  ;;  %v9635_v54 = vadd.f32 %v5226_v21, %v9630_v13  ;;  %v5265_v3 = vpop.f32.mrf.mxu1 }
 0x674   : > { %v9637_v63 = vadd.f32 %v5265_v3, %v5077_v34  ;;  %v5228_v43 = vpop.f32.mrf.mxu0 }
 0x675   : > { %v7388_v62 = vpack.c.bf16 %v10802_v50, %v10801_v5  ;;  %v9644_v52 = vadd.f32 %v5228_v43, %v9630_v13  ;;  %v5267_v11 = vpop.f32.mrf.mxu1  ;;  %v10803_v53 = vmax.f32 %v9635_v54, 0.0 }
 0x676   : > { %v9646_v31 = vadd.f32 %v5267_v11, %v5077_v34  ;;  %v5308_v30 = vpop.f32.mrf.mxu0  ;;  %v10805_v6 = vmax.f32 %v9637_v63, 0.0 }
 0x677   : > { %v10804_v21 = vmax.f32 %v9644_v52, 0.0  ;;  %v5269_v18 = vpop.f32.mrf.mxu1  ;;  %v5309_v3 = vadd.f32 %v5308_v30, %v5077_v34  ;;  %5758 = vrot.lane.b32.xlu0 %v7388_v62, %s7539_s7 }
 0x678   : > { %v10806_v16 = vmax.f32 %v9646_v31, 0.0  ;;  %v9654_v5 = vadd.f32 %v5269_v18, %v9630_v13  ;;  %v5310_v43 = vpop.f32.mrf.mxu0 }
 0x679   : > { %v9660_v11 = vpack.c.bf16 %v10804_v21, %v10803_v53  ;;  %v5271_v50 = vpop.f32.mrf.mxu1  ;;  %v5311_v26 = vadd.f32 %v5310_v43, %v5077_v34  ;;  %v5364_v18 = vmax.f32 %v5309_v3, 0.0 }
 0x67a   : > { %v7389_v30 = vpack.c.bf16 %v10806_v16, %v10805_v6  ;;  %v9667_v36 = vadd.f32 %v5271_v50, %v9630_v13  ;;  %v5312_v28 = vpop.f32.mrf.mxu0  ;;  %v10807_v53 = vmax.f32 %v9654_v5, 0.0 }
 0x67b   : > { %v5365_v0 = vmax.f32 %v5311_v26, 0.0  ;;  %v5313_v20 = vadd.f32 %v5312_v28, %v9630_v13  ;;  %v5351_v40 = vpop.f32.mrf.mxu1  ;;  %5704 = vrot.lane.b32.xlu0 %v7388_v62, %s7538_s6 }
 0x67c   : > { %v10808_v43 = vmax.f32 %v9667_v36, 0.0  ;;  %v5352_v21 = vadd.f32 %v5351_v40, %v5077_v34  ;;  %5760 = vrot.lane.b32.xlu1 %v7389_v30, %s7539_s7  ;;  %v5314_v47 = vpop.f32.mrf.mxu0 }
 0x67d   : > { %v9674_v6 = vpack.c.bf16 %v5365_v0, %v5364_v18  ;;  %v5315_v50 = vadd.f32 %v5314_v47, %v9630_v13  ;;  %v5353_v16 = vpop.f32.mrf.mxu1  ;;  %v5372_v49 = vmax.f32 %v5313_v20, 0.0 }
 0x67e   : > { %v9681_v28 = vpack.c.bf16 %v10808_v43, %v10807_v53  ;;  %v5366_v26 = vmax.f32 %v5352_v21, 0.0  ;;  %v5354_v3 = vadd.f32 %v5353_v16, %v5077_v34  ;;  %v1139_v43 = vld [vmem:[%s10750_s4 + $0x18] sm:$0xff] }
 0x67f   : > { %5423 = vst [vmem:[#allocation2 + $0x10] sm:$0xff] %v9674_v6  ;;  %v5373_v40 = vmax.f32 %v5315_v50, 0.0  ;;  %v5355_v12 = vpop.f32.mrf.mxu1  ;;  %5650 = vrot.lane.b32.xlu0 %v7388_v62, %s7540_s8 }
 0x680   : > { %v7391_v0 = vpack.c.bf16 %v5366_v26, %v5366_v26  ;;  %v5367_v18 = vmax.f32 %v5354_v3, 0.0  ;;  %v5356_v47 = vadd.f32 %v5355_v12, %v9630_v13  ;;  %5706 = vrot.lane.b32.xlu1 %v7389_v30, %s7538_s6 }
 0x681   : > { %v7394_v37 = vpack.c.bf16 %v5373_v40, %v5372_v49  ;;  %v5357_v12 = vpop.f32.mrf.mxu1  ;;  %v9753_v49 = vld [vmem:[%s10749_s3 + $0x4] ss:$8 sps:$4 sm:$0xff]  }
 0x682   : > { %5424 = vst [vmem:[#allocation2 + $0x18] sm:$0xf] %v7391_v0  ;;  %v9687_v59 = vpack.c.bf16 %v5367_v18, %v5366_v26  ;;  %v5374_v53 = vmax.f32 %v5356_v47, 0.0  ;;  %7267 = vmatprep.mubr.msk.bf16.mxu0 %vm1502_vm3, %v9753_v49  ;;  %7269 = vmatprep.mubr.msk.bf16.mxu1 %vm1502_vm3, %v9753_v49  ;;  %v5358_v20 = vadd.f32 %v5357_v12, %v9630_v13  ;;  %v1136_v40 = vld [vmem:[%s10750_s4] sm:$0xff] }
 0x683   : > { %5427 = vst [vmem:[#allocation2 + $0x2c] sm:$0xff] %v7394_v37  ;;  %5596 = vrot.lane.b32.xlu0 %v7388_v62, %s7541_s9 }
 0x684   : > { %v7395_v16 = vpack.c.bf16 %v5374_v53, %v5374_v53  ;;  %5652 = vrot.lane.b32.xlu1 %v7389_v30, %s7540_s8  ;;  %v5375_v34 = vmax.f32 %v5358_v20, 0.0 }
 0x686   : > { %5428 = vst [vmem:[#allocation2 + $0x34] sm:$0xf] %v7395_v16 }
 0x687   : > { %5542 = vrot.lane.b32.xlu0 %v7388_v62, %s7542_s10 }
 0x688   : > { %5598 = vrot.lane.b32.xlu1 %v7389_v30, %s7541_s9 }
 0x68b   : > { %5488 = vrot.lane.b32.xlu0 %v7388_v62, %s7543_s11 }
 0x68c   : > { %5544 = vrot.lane.b32.xlu1 %v7389_v30, %s7542_s10 }
 0x68f   : > { %5434 = vrot.lane.b32.xlu0 %v7388_v62, %s7544_s12 }
 0x690   : > { %5490 = vrot.lane.b32.xlu1 %v7389_v30, %s7543_s11 }
 0x693   : > { %5812 = vrot.lane.b32.xlu0 %v7388_v62, %s7545_s13  ;;  %v7397_v62 = vpack.c.bf16 %v5375_v34, %v5374_v53 }
 0x694   : > { %5436 = vrot.lane.b32.xlu1 %v7389_v30, %s7544_s12 }
 0x697   : > { %5766 = vrot.lane.b32.xlu0 %v9660_v11, %s7539_s7 }
 0x698   : > { %5814 = vrot.lane.b32.xlu1 %v7389_v30, %s7545_s13 }
 0x69b   : > { %5712 = vrot.lane.b32.xlu0 %v9660_v11, %s7538_s6 }
 0x69c   : > { %5768 = vrot.lane.b32.xlu1 %v9681_v28, %s7539_s7 }
 0x69f   : > { %5658 = vrot.lane.b32.xlu0 %v9660_v11, %s7540_s8 }
 0x6a0   : > { %5770 = vrot.lane.b32.xlu1 %v7394_v37, %s7539_s7 }
 0x6a3   : > { %5604 = vrot.lane.b32.xlu0 %v9660_v11, %s7541_s9 }
 0x6a4   : > { %5714 = vrot.lane.b32.xlu1 %v9681_v28, %s7538_s6 }
 0x6a7   : > { %5550 = vrot.lane.b32.xlu0 %v9660_v11, %s7542_s10 }
 0x6a8   : > { %5716 = vrot.lane.b32.xlu1 %v7394_v37, %s7538_s6 }
 0x6ab   : > { %5496 = vrot.lane.b32.xlu0 %v9660_v11, %s7543_s11 }
 0x6ac   : > { %5660 = vrot.lane.b32.xlu1 %v9681_v28, %s7540_s8 }
 0x6af   : > { %5442 = vrot.lane.b32.xlu0 %v9660_v11, %s7544_s12 }
 0x6b0   : > { %5662 = vrot.lane.b32.xlu1 %v7394_v37, %s7540_s8 }
 0x6b3   : > { %5762 = vrot.lane.b32.xlu0 %v9674_v6, %s7539_s7 }
 0x6b4   : > { %5606 = vrot.lane.b32.xlu1 %v9681_v28, %s7541_s9 }
 0x6b7   : > { %5708 = vrot.lane.b32.xlu0 %v9674_v6, %s7538_s6 }
 0x6b8   : > { %5608 = vrot.lane.b32.xlu1 %v7394_v37, %s7541_s9 }
 0x6bb   : > { %5654 = vrot.lane.b32.xlu0 %v9674_v6, %s7540_s8 }
 0x6bc   : > { %5552 = vrot.lane.b32.xlu1 %v9681_v28, %s7542_s10 }
 0x6bf   : > { %5600 = vrot.lane.b32.xlu0 %v9674_v6, %s7541_s9 }
 0x6c0   : > { %5554 = vrot.lane.b32.xlu1 %v7394_v37, %s7542_s10 }
 0x6c3   : > { %5546 = vrot.lane.b32.xlu0 %v9674_v6, %s7542_s10 }
 0x6c4   : > { %5498 = vrot.lane.b32.xlu1 %v9681_v28, %s7543_s11 }
 0x6c7   : > { %5492 = vrot.lane.b32.xlu0 %v9674_v6, %s7543_s11 }
 0x6c8   : > { %5500 = vrot.lane.b32.xlu1 %v7394_v37, %s7543_s11 }
 0x6cb   : > { %5438 = vrot.lane.b32.xlu0 %v9674_v6, %s7544_s12 }
 0x6cc   : > { %5444 = vrot.lane.b32.xlu1 %v9681_v28, %s7544_s12 }
 0x6cf   : > { %5820 = vrot.lane.b32.xlu0 %v9660_v11, %s7545_s13 }
 0x6d0   : > { %5446 = vrot.lane.b32.xlu1 %v7394_v37, %s7544_s12 }
 0x6d3   : > { %5816 = vrot.lane.b32.xlu0 %v9674_v6, %s7545_s13 }
 0x6d4   : > { %5822 = vrot.lane.b32.xlu1 %v9681_v28, %s7545_s13 }
 0x6d7   : > { %5764 = vrot.lane.b32.xlu0 %v9687_v59, %s7539_s7 }
 0x6d8   : > { %5824 = vrot.lane.b32.xlu1 %v7394_v37, %s7545_s13 }
 0x6db   : > { %5710 = vrot.lane.b32.xlu0 %v9687_v59, %s7538_s6 }
 0x6dc   : > { %5772 = vrot.lane.b32.xlu1 %v7397_v62, %s7539_s7 }
 0x6df   : > { %5656 = vrot.lane.b32.xlu0 %v9687_v59, %s7540_s8 }
 0x6e0   : > { %5718 = vrot.lane.b32.xlu1 %v7397_v62, %s7538_s6 }
 0x6e3   : > { %5602 = vrot.lane.b32.xlu0 %v9687_v59, %s7541_s9 }
 0x6e4   : > { %5664 = vrot.lane.b32.xlu1 %v7397_v62, %s7540_s8 }
 0x6e7   : > { %5548 = vrot.lane.b32.xlu0 %v9687_v59, %s7542_s10 }
 0x6e8   : > { %5610 = vrot.lane.b32.xlu1 %v7397_v62, %s7541_s9 }
 0x6e9   : > { %v5759_v37 = vpop.permute.xlu0 %5758 }
 0x6ea   : > { %v5774_v13 = vrot.slane %v5759_v37, 4 }
 0x6eb   : > { %5494 = vrot.lane.b32.xlu0 %v9687_v59, %s7543_s11 }
 0x6ec   : > { %5556 = vrot.lane.b32.xlu1 %v7397_v62, %s7542_s10 }
 0x6ed   : > { %v5705_v53 = vpop.permute.xlu0 %5704 }
 0x6ee   : > { %v9783_v6 = vpop.permute.xlu1 %5760  ;;  %v5720_v26 = vrot.slane %v5705_v53, 4 }
 0x6ef   : > { %v10811_v21 = vrot.slane %v9783_v6, 4  ;;  %5440 = vrot.lane.b32.xlu0 %v9687_v59, %s7544_s12  ;;  %v10972_v24 = vrot.slane %v9783_v6, 4 }
 0x6f0   : > { %5502 = vrot.lane.b32.xlu1 %v7397_v62, %s7543_s11 }
 0x6f1   : > { %v5782_v11 = vsel %vm643_vm4, %v5774_v13, %v10811_v21  ;;  %v5651_v30 = vpop.permute.xlu0 %5650 }
 0x6f2   : > { %v9793_v50 = vsel %vm975_vm5, %v5759_v37, %v5782_v11  ;;  %v9795_v28 = vpop.permute.xlu1 %5706  ;;  %v5666_v12 = vrot.slane %v5651_v30, 4 }
 0x6f3   : > { %v10810_v3 = vrot.slane %v9795_v28, 4  ;;  %5818 = vrot.lane.b32.xlu0 %v9687_v59, %s7545_s13  ;;  %v1138_v59 = vld [vmem:[%s10750_s4 + $0x10] sm:$0xff] }
 0x6f4   : > { %5448 = vrot.lane.b32.xlu1 %v7397_v62, %s7544_s12 }
 0x6f5   : > { %v5728_v0 = vsel %vm643_vm4, %v5720_v26, %v10810_v3  ;;  %v5597_v18 = vpop.permute.xlu0 %5596 }
 0x6f6   : > { %v9808_v47 = vsel %vm920_vm6, %v5705_v53, %v5728_v0  ;;  %v9810_v16 = vpop.permute.xlu1 %5652  ;;  %v1137_v53 = vld [vmem:[%s10750_s4 + $0x8] sm:$0xff]  ;;  %v5612_v26 = vrot.slane %v5597_v18, 4 }
 0x6f7   : > { %v10809_v20 = vrot.slane %v9810_v16, 4  ;;  %1142 = vperm.xlu0 %7433, %v1136_v40  }
 0x6f8   : > { %5826 = vrot.lane.b32.xlu1 %v7397_v62, %s7545_s13 }
 0x6f9   : > { %v5674_v34 = vsel %vm643_vm4, %v5666_v12, %v10809_v20  ;;  %v5543_v37 = vpop.permute.xlu0 %5542 }
 0x6fa   : > { %v9824_v13 = vsel %vm865_vm7, %v5651_v30, %v5674_v34  ;;  %v9826_v11 = vpop.permute.xlu1 %5598  ;;  %v5558_v34 = vrot.slane %v5543_v37, 4 }
 0x6fb   : > { %v10812_v62 = vrot.slane %v9826_v11, 4  ;;  %1152 = vperm.xlu0 %7433, %v1138_v59  }
 0x6fc   : > { %1147 = vperm.xlu1 %7434, %v1137_v53  }
 0x6fd   : > { %v5620_v0 = vsel %vm643_vm4, %v5612_v26, %v10812_v62  ;;  %v5489_v12 = vpop.permute.xlu0 %5488 }
 0x6fe   : > { %v9836_v20 = vsel %vm810_vm8, %v5597_v18, %v5620_v0  ;;  %v9838_v30 = vpop.permute.xlu1 %5544  ;;  %v5504_v60 = vrot.slane %v5489_v12, 4 }
 0x6ff   : > { %v10813_v3 = vrot.slane %v9838_v30, 4  ;;  %2744 = vperm.xlu0 %7433, %v1136_v40  }
 0x700   : > { %1157 = vperm.xlu1 %7434, %v1139_v43  }
 0x701   : > { %v5566_v21 = vsel %vm643_vm4, %v5558_v34, %v10813_v3  ;;  %v5435_v26 = vpop.permute.xlu0 %5434 }
 0x702   : > { %v9845_v62 = vsel %vm755_vm9, %v5543_v37, %v5566_v21  ;;  %v9847_v32 = vpop.permute.xlu1 %5490  ;;  %v5450_v3 = vrot.slane %v5435_v26, 4 }
 0x703   : > { %v10814_v18 = vrot.slane %v9847_v32, 4  ;;  %2754 = vperm.xlu0 %7433, %v1138_v59  }
 0x704   : > { %2749 = vperm.xlu1 %7434, %v1137_v53  }
 0x705   : > { %v5512_v0 = vsel %vm643_vm4, %v5504_v60, %v10814_v18  ;;  %v5813_v39 = vpop.permute.xlu0 %5812 }
 0x706   : > { %v9854_v35 = vsel %vm700_vm10, %v5489_v12, %v5512_v0  ;;  %v9856_v34 = vpop.permute.xlu1 %5436  ;;  %v5828_v18 = vrot.slane %v5813_v39, 4 }
 0x707   : > { %v10815_v21 = vrot.slane %v9856_v34, 4  ;;  %4346 = vperm.xlu0 %7433, %v1136_v40  }
 0x708   : > { %2759 = vperm.xlu1 %7434, %v1139_v43  }
 0x709   : > { %v5458_v37 = vsel %vm643_vm4, %v5450_v3, %v10815_v21  ;;  %v5767_v7 = vpop.permute.xlu0 %5766 }
 0x70a   : > { %v9863_v51 = vsel %vm645_vm11, %v5435_v26, %v5458_v37  ;;  %v9865_v60 = vpop.permute.xlu1 %5814  ;;  %v5778_v21 = vrot.slane %v5767_v7, 4 }
 0x70b   : > { %v10816_v12 = vrot.slane %v9865_v60, 4  ;;  %4356 = vperm.xlu0 %7433, %v1138_v59  }
 0x70c   : > { %4351 = vperm.xlu1 %7434, %v1137_v53  }
 0x70d   : > { %v5836_v0 = vsel %vm643_vm4, %v5828_v18, %v10816_v12  ;;  %v5713_v4 = vpop.permute.xlu0 %5712 }
 0x70e   : > { %v9872_v38 = vsel %vm1030_vm12, %v5813_v39, %v5836_v0  ;;  %v5769_v3 = vpop.permute.xlu1 %5768 }
 0x70f   : > { %v5779_v42 = vrot.slane %v5769_v3, 4  ;;  %5948 = vperm.xlu0 %7433, %v1136_v40  }
 0x710   : > { %4361 = vperm.xlu1 %7434, %v1139_v43  }
 0x711   : > { %v5789_v26 = vsel %vm643_vm4, %v5778_v21, %v5779_v42  ;;  %v5659_v37 = vpop.permute.xlu0 %5658 }
 0x712   : > { %v5790_v25 = vsel %vm975_vm5, %v5767_v7, %v5789_v26  ;;  %v9876_v46 = vpop.permute.xlu1 %5770  ;;  %v5724_v7 = vrot.slane %v5713_v4, 4 }
 0x713   : > { %v10817_v9 = vrot.slane %v9876_v46, 4  ;;  %5958 = vperm.xlu0 %7433, %v1138_v59   ;;  %v7253_v18 = vcombine.low %v9793_v50, %v5790_v25  ;;  %v7254_v39 = vcombine.high %v9793_v50, %v5790_v25 }
 0x714   : > { %5953 = vperm.xlu1 %7434, %v1137_v53  }
 0x715   : > { %v5791_v40 = vsel %vm643_vm4, %v5779_v42, %v10817_v9  ;;  %v5605_v0 = vpop.permute.xlu0 %5604  ;;  %6314 = vmatprep.subr.bf16.mxu0 %v7254_v39 }
 0x716   : > { %v5792_v21 = vsel %vm975_vm5, %v5769_v3, %v5791_v40  ;;  %v5715_v12 = vpop.permute.xlu1 %5714  ;;  %6315 = vmatpush1.bf16.msra.mxu0 %v7253_v18 }
 0x717   : > { %v5725_v26 = vrot.slane %v5715_v12, 4 }
 0x718   : > { %5963 = vperm.xlu1 %7434, %v1139_v43  }
 0x719   : > { %v5735_v59 = vsel %vm643_vm4, %v5724_v7, %v5725_v26  ;;  %v9886_v10 = vpop.permute.xlu0 %5550 }
 0x71a   : > { %v5736_v25 = vsel %vm920_vm6, %v5713_v4, %v5735_v59  ;;  %v9889_v50 = vpop.permute.xlu1 %5716  ;;  %v5670_v4 = vrot.slane %v5659_v37, 4 }
 0x71b   : > { %v10818_v53 = vrot.slane %v9889_v50, 4  ;;  %v7246_v42 = vcombine.low %v9808_v47, %v5736_v25  ;;  %v7247_v39 = vcombine.high %v9808_v47, %v5736_v25 }
 0x71d   : > { %v5737_v3 = vsel %vm643_vm4, %v5725_v26, %v10818_v53  ;;  %v9897_v18 = vpop.permute.xlu0 %5496  ;;  %6316 = vmatprep.subr.bf16.mxu0 %v7247_v39 }
 0x71e   : > { %v5738_v43 = vsel %vm920_vm6, %v5715_v12, %v5737_v3  ;;  %v5661_v40 = vpop.permute.xlu1 %5660  ;;  %6317 = vmatpush1.bf16.msra.mxu0 %v7246_v42 }
 0x71f   : > { %v5671_v7 = vrot.slane %v5661_v40, 4 }
 0x721   : > { %v5681_v59 = vsel %vm643_vm4, %v5670_v4, %v5671_v7  ;;  %v9901_v9 = vpop.permute.xlu0 %5442 }
 0x722   : > { %v5682_v58 = vsel %vm865_vm7, %v5659_v37, %v5681_v59  ;;  %v9904_v47 = vpop.permute.xlu1 %5662  ;;  %v5616_v59 = vrot.slane %v5605_v0, 4 }
 0x723   : > { %v10819_v25 = vrot.slane %v9904_v47, 4  ;;  %v7239_v26 = vcombine.low %v9824_v13, %v5682_v58  ;;  %v7240_v39 = vcombine.high %v9824_v13, %v5682_v58 }
 0x725   : > { %v5683_v12 = vsel %vm643_vm4, %v5671_v7, %v10819_v25  ;;  %v9912_v42 = vpop.permute.xlu0 %5762  ;;  %6318 = vmatprep.subr.bf16.mxu0 %v7240_v39 }
 0x726   : > { %v5684_v3 = vsel %vm865_vm7, %v5661_v40, %v5683_v12  ;;  %v5607_v4 = vpop.permute.xlu1 %5606  ;;  %v5776_v37 = vrot.slane %v9912_v42, 4  ;;  %6319 = vmatpush1.bf16.msra.mxu0 %v7239_v26 }
 0x727   : > { %v5617_v53 = vrot.slane %v5607_v4, 4 }
 0x728   : > { %v5784_v58 = vsel %vm643_vm4, %v10972_v24, %v5776_v37 }
 0x729   : > { %v5627_v13 = vsel %vm643_vm4, %v5616_v59, %v5617_v53  ;;  %v5785_v7 = vsel %vm975_vm5, %v9783_v6, %v5784_v58  ;;  %v9924_v39 = vpop.permute.xlu0 %5708  ;;  %v10973_v6 = vrot.slane %v9795_v28, 4 }
 0x72a   : > { %v5628_v40 = vsel %vm810_vm8, %v5605_v0, %v5627_v13  ;;  %v9927_v12 = vpop.permute.xlu1 %5608  ;;  %v10820_v26 = vrot.slane %v9924_v39, 4  ;;  %v7255_v25 = vcombine.low %v5785_v7, %v5792_v21  ;;  %v7256_v17 = vcombine.high %v5785_v7, %v5792_v21 }
 0x72b   : > { %v10821_v41 = vrot.slane %v9927_v12, 4  ;;  %v7232_v15 = vcombine.low %v9836_v20, %v5628_v40  ;;  %v7233_v24 = vcombine.high %v9836_v20, %v5628_v40 }
 0x72c   : > { %v5730_v59 = vsel %vm643_vm4, %v10973_v6, %v10820_v26  ;;  %6367 = vmatprep.subr.bf16.mxu1 %v7256_v17  ;;  %v5562_v17 = vrot.slane %v9886_v10, 4 }
 0x72d   : > { %v5629_v0 = vsel %vm643_vm4, %v5617_v53, %v10821_v41  ;;  %v5731_v21 = vsel %vm920_vm6, %v9795_v28, %v5730_v59  ;;  %v9943_v58 = vpop.permute.xlu0 %5654  ;;  %6320 = vmatprep.subr.bf16.mxu0 %v7233_v24  ;;  %6368 = vmatpush1.bf16.msra.mxu1 %v7255_v25  ;;  %v10974_v53 = vrot.slane %v9810_v16, 4 }
 0x72e   : > { %v5630_v20 = vsel %vm810_vm8, %v5607_v4, %v5629_v0  ;;  %v5553_v13 = vpop.permute.xlu1 %5552  ;;  %v5668_v7 = vrot.slane %v9943_v58, 4  ;;  %6321 = vmatpush1.bf16.msra.mxu0 %v7232_v15  ;;  %v7248_v40 = vcombine.low %v5731_v21, %v5738_v43  ;;  %v7249_v6 = vcombine.high %v5731_v21, %v5738_v43 }
 0x72f   : > { %v5563_v26 = vrot.slane %v5553_v13, 4 }
 0x730   : > { %v5676_v28 = vsel %vm643_vm4, %v10974_v53, %v5668_v7  ;;  %6369 = vmatprep.subr.bf16.mxu1 %v7249_v6 }
 0x731   : > { %v5573_v25 = vsel %vm643_vm4, %v5562_v17, %v5563_v26  ;;  %v5677_v4 = vsel %vm865_vm7, %v9810_v16, %v5676_v28  ;;  %v9956_v24 = vpop.permute.xlu0 %5600  ;;  %6370 = vmatpush1.bf16.msra.mxu1 %v7248_v40  ;;  %v10975_v16 = vrot.slane %v9826_v11, 4 }
 0x732   : > { %v5574_v15 = vsel %vm755_vm9, %v9886_v10, %v5573_v25  ;;  %v9960_v43 = vpop.permute.xlu1 %5554  ;;  %v5614_v59 = vrot.slane %v9956_v24, 4  ;;  %v7241_v0 = vcombine.low %v5677_v4, %v5684_v3  ;;  %v7242_v21 = vcombine.high %v5677_v4, %v5684_v3 }
 0x733   : > { %v10822_v53 = vrot.slane %v9960_v43, 4  ;;  %v7225_v6 = vcombine.low %v9845_v62, %v5574_v15  ;;  %v7226_v17 = vcombine.high %v9845_v62, %v5574_v15 }
 0x734   : > { %v5622_v40 = vsel %vm643_vm4, %v10975_v16, %v5614_v59  ;;  %6371 = vmatprep.subr.bf16.mxu1 %v7242_v21  ;;  %v5508_v21 = vrot.slane %v9897_v18, 4 }
 0x735   : > { %v5575_v10 = vsel %vm643_vm4, %v5563_v26, %v10822_v53  ;;  %v5623_v3 = vsel %vm810_vm8, %v9826_v11, %v5622_v40  ;;  %v9976_v28 = vpop.permute.xlu0 %5546  ;;  %6322 = vmatprep.subr.bf16.mxu0 %v7226_v17  ;;  %6372 = vmatpush1.bf16.msra.mxu1 %v7241_v0  ;;  %v10976_v26 = vrot.slane %v9838_v30, 4 }
 0x736   : > { %v5576_v62 = vsel %vm755_vm9, %v5553_v13, %v5575_v10  ;;  %v5499_v25 = vpop.permute.xlu1 %5498  ;;  %v5560_v4 = vrot.slane %v9976_v28, 4  ;;  %6323 = vmatpush1.bf16.msra.mxu0 %v7225_v6  ;;  %v7234_v15 = vcombine.low %v5623_v3, %v5630_v20  ;;  %v7235_v16 = vcombine.high %v5623_v3, %v5630_v20 }
 0x737   : > { %v5509_v41 = vrot.slane %v5499_v25, 4 }
 0x738   : > { %v5568_v11 = vsel %vm643_vm4, %v10976_v26, %v5560_v4  ;;  %6373 = vmatprep.subr.bf16.mxu1 %v7235_v16 }
 0x739   : > { %v5519_v0 = vsel %vm643_vm4, %v5508_v21, %v5509_v41  ;;  %v5569_v13 = vsel %vm755_vm9, %v9838_v30, %v5568_v11  ;;  %v9989_v17 = vpop.permute.xlu0 %5492  ;;  %6374 = vmatpush1.bf16.msra.mxu1 %v7234_v15  ;;  %v10977_v30 = vrot.slane %v9847_v32, 4 }
 0x73a   : > { %v5520_v20 = vsel %vm700_vm10, %v9897_v18, %v5519_v0  ;;  %v9993_v6 = vpop.permute.xlu1 %5500  ;;  %v5506_v40 = vrot.slane %v9989_v17, 4  ;;  %v7227_v10 = vcombine.low %v5569_v13, %v5576_v62  ;;  %v7228_v3 = vcombine.high %v5569_v13, %v5576_v62 }
 0x73b   : > { %v10823_v26 = vrot.slane %v9993_v6, 4  ;;  %v7218_v16 = vcombine.low %v9854_v35, %v5520_v20  ;;  %v7219_v21 = vcombine.high %v9854_v35, %v5520_v20  ;;  %v5454_v20 = vrot.slane %v9901_v9, 4 }
 0x73c   : > { %v5514_v15 = vsel %vm643_vm4, %v10977_v30, %v5506_v40  ;;  %6375 = vmatprep.subr.bf16.mxu1 %v7228_v3 }
 0x73d   : > { %v5521_v18 = vsel %vm643_vm4, %v5509_v41, %v10823_v26  ;;  %v5515_v62 = vsel %vm700_vm10, %v9847_v32, %v5514_v15  ;;  %v10009_v11 = vpop.permute.xlu0 %5438  ;;  %6324 = vmatprep.subr.bf16.mxu0 %v7219_v21  ;;  %6376 = vmatpush1.bf16.msra.mxu1 %v7227_v10  ;;  %v10978_v41 = vrot.slane %v9856_v34, 4 }
 0x73e   : > { %v5522_v35 = vsel %vm700_vm10, %v5499_v25, %v5521_v18  ;;  %v5445_v0 = vpop.permute.xlu1 %5444  ;;  %v10824_v13 = vrot.slane %v10009_v11, 4  ;;  %6325 = vmatpush1.bf16.msra.mxu0 %v7218_v16 }
 0x73f   : > { %v5455_v3 = vrot.slane %v5445_v0, 4  ;;  %v7220_v30 = vcombine.low %v5515_v62, %v5522_v35  ;;  %v7221_v53 = vcombine.high %v5515_v62, %v5522_v35 }
 0x740   : > { %v5460_v32 = vsel %vm643_vm4, %v10978_v41, %v10824_v13 }
 0x741   : > { %v5465_v21 = vsel %vm643_vm4, %v5454_v20, %v5455_v3  ;;  %v5461_v25 = vsel %vm645_vm11, %v9856_v34, %v5460_v32  ;;  %v5821_v10 = vpop.permute.xlu0 %5820  ;;  %6377 = vmatprep.subr.bf16.mxu1 %v7221_v53  ;;  %v10979_v34 = vmax.f32 %v9628_v23, 0.0 }
 0x742   : > { %v5466_v16 = vsel %vm645_vm11, %v9901_v9, %v5465_v21  ;;  %v10024_v15 = vpop.permute.xlu1 %5446  ;;  %6378 = vmatpush1.bf16.msra.mxu1 %v7220_v30  ;;  %v10980_v9 = vmax.f32 %v9644_v52, 0.0  ;;  %v5832_v26 = vrot.slane %v5821_v10, 4  ;;  %v10982_v52 = vmax.f32 %v9626_v2, 0.0 }
 0x743   : > { %v5456_v18 = vrot.slane %v10024_v15, 4  ;;  %v7211_v62 = vcombine.low %v9863_v51, %v5466_v16  ;;  %v7212_v35 = vcombine.high %v9863_v51, %v5466_v16 }
 0x744   : > { %v7524_v53 = vpack.c.bf16 %v10980_v9, %v10979_v34  ;;  %v10985_v9 = vmax.f32 %v9667_v36, 0.0 }
 0x745   : > { %v5467_v20 = vsel %vm643_vm4, %v5455_v3, %v5456_v18  ;;  %v10032_v41 = vpop.permute.xlu0 %5816  ;;  %6326 = vmatprep.subr.bf16.mxu0 %v7212_v35  ;;  %v10981_v3 = vrot.slane %v9865_v60, 4  ;;  %v10983_v35 = vmax.f32 %v9635_v54, 0.0 }
 0x746   : > { %v5468_v30 = vsel %vm645_vm11, %v5445_v0, %v5467_v20  ;;  %v5823_v32 = vpop.permute.xlu1 %5822  ;;  %v5830_v21 = vrot.slane %v10032_v41, 4  ;;  %6327 = vmatpush1.bf16.msra.mxu0 %v7211_v62 }
 0x747   : > { %v5833_v51 = vrot.slane %v5823_v32, 4  ;;  %6328 = vmatprep.subr.bf16.mxu0 %v7524_v53  ;;  %v7213_v16 = vcombine.low %v5461_v25, %v5468_v30  ;;  %v7214_v13 = vcombine.high %v5461_v25, %v5468_v30  ;;  %v7525_v0 = vpack.c.bf16 %v10983_v35, %v10982_v52 }
 0x748   : > { %v5838_v23 = vsel %vm643_vm4, %v10981_v3, %v5830_v21  ;;  %v10984_v25 = vmax.f32 %v9646_v31, 0.0 }
 0x749   : > { %v5843_v20 = vsel %vm643_vm4, %v5832_v26, %v5833_v51  ;;  %v5839_v62 = vsel %vm1030_vm12, %v9865_v60, %v5838_v23  ;;  %v5765_v34 = vpop.permute.xlu0 %5764  ;;  %6379 = vmatprep.subr.bf16.mxu1 %v7214_v13  ;;  %v10986_v13 = vmax.f32 %v9637_v63, 0.0 }
 0x74a   : > { %v7526_v53 = vpack.c.bf16 %v10985_v9, %v10984_v25  ;;  %v5844_v30 = vsel %vm1030_vm12, %v5821_v10, %v5843_v20  ;;  %v10057_v3 = vpop.permute.xlu1 %5824  ;;  %v5777_v2 = vrot.slane %v5765_v34, 4  ;;  %6380 = vmatpush1.bf16.msra.mxu1 %v7213_v16  ;;  %6329 = vmatpush1.bf16.msra.mxu0 %v7525_v0  ;;  %v10987_v10 = vmax.f32 %v9654_v5, 0.0 }
 0x74b   : > { %v5834_v54 = vrot.slane %v10057_v3, 4  ;;  %v7260_v26 = vcombine.low %v9872_v38, %v5844_v30  ;;  %v7261_v60 = vcombine.high %v9872_v38, %v5844_v30 }
 0x74c   : > { %6381 = vmatprep.subr.bf16.mxu1 %v7526_v53  ;;  %v5786_v31 = vsel %vm643_vm4, %v5776_v37, %v5777_v2  ;;  %v5788_v36 = vsel %vm975_vm5, %v5765_v34, %v5777_v2  ;;  %v7527_v23 = vpack.c.bf16 %v10987_v10, %v10986_v13  ;;  %v10078_v37 = vld [vmem:[%s10749_s3] ss:$8 sps:$4 sm:$0xff]   ;;  %v10988_v34 = vrot.slane %v9924_v39, 4 }
 0x74d   : > { %v5845_v16 = vsel %vm643_vm4, %v5833_v51, %v5834_v54  ;;  %v5787_v52 = vsel %vm975_vm5, %v9912_v42, %v5786_v31  ;;  %5807 = vst [vmem:[#allocation2 + $0x1a0] sm:$0xf] %v5788_v36  ;;  %v5711_v38 = vpop.permute.xlu0 %5710  ;;  %6344 = vmatprep.subr.bf16.mxu0 %v7261_v60  ;;  %v10084_v51 = vld [vmem:[%s10749_s3 + $0x14] ss:$8 sps:$4 sm:$0xff]  }
 0x74e   : > { %v5846_v63 = vsel %vm1030_vm12, %v5823_v32, %v5845_v16  ;;  %v5773_v35 = vpop.permute.xlu1 %5772  ;;  %v5723_v5 = vrot.slane %v5711_v38, 4  ;;  %6382 = vmatpush1.bf16.msra.mxu1 %v7527_v23  ;;  %6345 = vmatpush2.bf16.msra.mxu0 %v7260_v26  ;;  %v10989_v32 = vrot.slane %v9876_v46, 4 }
 0x74f   : > { %v5781_v42 = vrot.slane %v5773_v35, 4  ;;  %v7262_v0 = vcombine.low %v5839_v62, %v5846_v63  ;;  %v7263_v20 = vcombine.high %v5839_v62, %v5846_v63 }
 0x750   : > { %v5732_v25 = vsel %vm643_vm4, %v10988_v34, %v5723_v5  ;;  %v5734_v9 = vsel %vm920_vm6, %v5711_v38, %v5723_v5 }
 0x751   : > { %v5793_v53 = vsel %vm643_vm4, %v10989_v32, %v5781_v42  ;;  %v5795_v30 = vsel %vm975_vm5, %v5773_v35, %v5781_v42  ;;  %v5733_v2 = vsel %vm920_vm6, %v9924_v39, %v5732_v25  ;;  %5753 = vst [vmem:[#allocation2 + $0x168] sm:$0xf] %v5734_v9  ;;  %v5657_v26 = vpop.permute.xlu0 %5656  ;;  %6347 = vmatmul.mubr.bf16.vlgmr.msra.gmra.mxu0 %v10078_v37  ;;  %v10991_v9 = vrot.slane %v9904_v47, 4 }
 0x752   : > { %6397 = vmatprep.subr.bf16.mxu1 %v7263_v20  ;;  %v5794_v62 = vsel %vm975_vm5, %v9876_v46, %v5793_v53  ;;  %5811 = vst [vmem:[#allocation2 + $0x1bc] sm:$0xf] %v5795_v30  ;;  %v5719_v60 = vpop.permute.xlu1 %5718  ;;  %v5669_v31 = vrot.slane %v5657_v26, 4  ;;  %7268 = vmatprep.mubr.msk.bf16.mxu0 %vm1502_vm3, %v10084_v51  ;;  %v10990_v46 = vrot.slane %v9889_v50, 4 }
 0x753   : > { %6398 = vmatpush2.bf16.msra.mxu1 %v7262_v0  ;;  %v5727_v36 = vrot.slane %v5719_v60, 4  ;;  %v7257_v13 = vcombine.low %v5787_v52, %v5794_v62  ;;  %v7258_v10 = vcombine.high %v5787_v52, %v5794_v62 }
 0x754   : > { %6473 = vmatprep.subr.bf16.mxu1 %v10883_v22  ;;  %v5678_v39 = vsel %vm643_vm4, %v5668_v7, %v5669_v31  ;;  %v5680_v23 = vsel %vm865_vm7, %v5657_v26, %v5669_v31  ;;  %v10116_v7 = vld [vmem:[%s10749_s3 + $0x10] ss:$8 sps:$4 sm:$0xff]  }
 0x755   : > { %v5739_v16 = vsel %vm643_vm4, %v10990_v46, %v5727_v36  ;;  %v5741_v38 = vsel %vm920_vm6, %v5719_v60, %v5727_v36  ;;  %v5679_v63 = vsel %vm865_vm7, %v9943_v58, %v5678_v39  ;;  %5699 = vst [vmem:[#allocation2 + $0x130] sm:$0xf] %v5680_v23  ;;  %v5603_v35 = vpop.permute.xlu0 %5602  ;;  %6420 = vmatprep.subr.bf16.mxu0 %v7258_v10 }
 0x756   : > { %6400 = vmatmul.mubr.bf16.vlgmr.msra.gmra.mxu1 %v10078_v37  ;;  %v5740_v52 = vsel %vm920_vm6, %v9889_v50, %v5739_v16  ;;  %5757 = vst [vmem:[#allocation2 + $0x184] sm:$0xf] %v5741_v38  ;;  %v5665_v5 = vpop.permute.xlu1 %5664  ;;  %v5615_v42 = vrot.slane %v5603_v35, 4  ;;  %6421 = vmatpush1.bf16.msra.mxu0 %v7257_v13 }
 0x757   : > { %7270 = vmatprep.mubr.msk.bf16.mxu1 %vm1502_vm3, %v10084_v51  ;;  %v5673_v58 = vrot.slane %v5665_v5, 4  ;;  %v7250_v0 = vcombine.low %v5733_v2, %v5740_v52  ;;  %v7251_v20 = vcombine.high %v5733_v2, %v5740_v52 }
 0x758   : > { %v5624_v34 = vsel %vm643_vm4, %v5614_v59, %v5615_v42  ;;  %v5626_v25 = vsel %vm810_vm8, %v5603_v35, %v5615_v42 }
 0x759   : > { %v5685_v50 = vsel %vm643_vm4, %v10991_v9, %v5673_v58  ;;  %v5687_v32 = vsel %vm865_vm7, %v5665_v5, %v5673_v58  ;;  %v5625_v53 = vsel %vm810_vm8, %v9956_v24, %v5624_v34  ;;  %5645 = vst [vmem:[#allocation2 + $0xf8] sm:$0xf] %v5626_v25  ;;  %v5549_v30 = vpop.permute.xlu0 %5548  ;;  %v7496_v26 = vld [vmem:[#allocation2 + $0x1a0] ss:$28 sps:$4 sm:$0xff]   ;;  %6357 = vmatmul.mubr.bf16.gmra.mxu0 %v10116_v7 }
 0x75a   : > { %6422 = vmatprep.subr.bf16.mxu0 %v7251_v20  ;;  %v5686_v59 = vsel %vm865_vm7, %v9904_v47, %v5685_v50  ;;  %5703 = vst [vmem:[#allocation2 + $0x14c] sm:$0xf] %v5687_v32  ;;  %v5611_v2 = vpop.permute.xlu1 %5610  ;;  %v5561_v62 = vrot.slane %v5549_v30, 4  ;;  %7271 = vmatprep.mubr.msk.bf16.mxu0 %vm1502_vm3, %v9753_v49  ;;  %v10992_v47 = vrot.slane %v9927_v12, 4 }
 0x75b   : > { %6423 = vmatpush1.bf16.msra.mxu0 %v7250_v0  ;;  %v5619_v60 = vrot.slane %v5611_v2, 4  ;;  %6474 = vmatpush1.bf16.msra.mxu1 %v7496_v26  ;;  %v7243_v31 = vcombine.low %v5679_v63, %v5686_v59  ;;  %v7244_v24 = vcombine.high %v5679_v63, %v5686_v59  ;;  %v10995_v59 = vrot.slane %v9993_v6, 4 }
 0x75c   : > { %v5570_v36 = vsel %vm643_vm4, %v5560_v4, %v5561_v62  ;;  %v5572_v13 = vsel %vm755_vm9, %v5549_v30, %v5561_v62  ;;  %6475 = vmatprep.subr.bf16.mxu1 %v10883_v22  ;;  %v10994_v30 = vrot.slane %v10009_v11, 4 }
 0x75d   : > { %v5631_v10 = vsel %vm643_vm4, %v10992_v47, %v5619_v60  ;;  %v5633_v39 = vsel %vm810_vm8, %v5611_v2, %v5619_v60  ;;  %v5571_v23 = vsel %vm755_vm9, %v9976_v28, %v5570_v36  ;;  %5591 = vst [vmem:[#allocation2 + $0xc0] sm:$0xf] %v5572_v13  ;;  %v5495_v46 = vpop.permute.xlu0 %5494  ;;  %v7500_v16 = vld [vmem:[#allocation2 + $0x168] ss:$28 sps:$4 sm:$0xff]   ;;  %6424 = vmatprep.subr.bf16.mxu0 %v7244_v24 }
 0x75e   : > { %6410 = vmatmul.mubr.bf16.gmra.mxu1 %v10116_v7  ;;  %v5632_v4 = vsel %vm810_vm8, %v9927_v12, %v5631_v10  ;;  %5649 = vst [vmem:[#allocation2 + $0x114] sm:$0xf] %v5633_v39  ;;  %v5557_v38 = vpop.permute.xlu1 %5556  ;;  %v5507_v63 = vrot.slane %v5495_v46, 4  ;;  %v10993_v12 = vrot.slane %v9960_v43, 4 }
 0x75f   : > { %6425 = vmatpush1.bf16.msra.mxu0 %v7243_v31  ;;  %7273 = vmatprep.mubr.msk.bf16.mxu1 %vm1502_vm3, %v9753_v49  ;;  %v5565_v35 = vrot.slane %v5557_v38, 4  ;;  %v7236_v52 = vcombine.low %v5625_v53, %v5632_v4  ;;  %v7237_v28 = vcombine.high %v5625_v53, %v5632_v4 }
 0x760   : > { %6476 = vmatpush1.bf16.msra.mxu1 %v7500_v16  ;;  %v5516_v5 = vsel %vm643_vm4, %v5506_v40, %v5507_v63  ;;  %v5518_v42 = vsel %vm700_vm10, %v5495_v46, %v5507_v63 }
 0x761   : > { %6477 = vmatprep.subr.bf16.mxu1 %v10883_v22  ;;  %v5577_v58 = vsel %vm643_vm4, %v10993_v12, %v5565_v35  ;;  %v5579_v0 = vsel %vm755_vm9, %v5557_v38, %v5565_v35  ;;  %v5517_v49 = vsel %vm700_vm10, %v9989_v17, %v5516_v5  ;;  %5537 = vst [vmem:[#allocation2 + $0x88] sm:$0xf] %v5518_v42  ;;  %v5441_v20 = vpop.permute.xlu0 %5440  ;;  %v7501_v34 = vld [vmem:[#allocation2 + $0x130] ss:$28 sps:$4 sm:$0xff]  }
 0x762   : > { %6426 = vmatprep.subr.bf16.mxu0 %v7237_v28  ;;  %v5578_v40 = vsel %vm755_vm9, %v9960_v43, %v5577_v58  ;;  %5595 = vst [vmem:[#allocation2 + $0xdc] sm:$0xf] %v5579_v0  ;;  %v5503_v25 = vpop.permute.xlu1 %5502  ;;  %v5453_v9 = vrot.slane %v5441_v20, 4  ;;  %v7508_v5 = vld [vmem:[#allocation2 + $0x14] ss:$28 sps:$4 sm:$0xff]  }
 0x763   : > { %6427 = vmatpush1.bf16.msra.mxu0 %v7236_v52  ;;  %v5511_v50 = vrot.slane %v5503_v25, 4  ;;  %v7229_v32 = vcombine.low %v5571_v23, %v5578_v40  ;;  %v7230_v53 = vcombine.high %v5571_v23, %v5578_v40  ;;  %v7506_v42 = vld [vmem:[#allocation2 + $0x10] ss:$28 sps:$4 sm:$0xff]  }
 0x764   : > { %6478 = vmatpush1.bf16.msra.mxu1 %v7501_v34  ;;  %v5462_v26 = vsel %vm643_vm4, %v10994_v30, %v5453_v9  ;;  %v5464_v17 = vsel %vm645_vm11, %v5441_v20, %v5453_v9 }
 0x765   : > { %6479 = vmatprep.subr.bf16.mxu1 %v10883_v22  ;;  %v5523_v43 = vsel %vm643_vm4, %v10995_v59, %v5511_v50  ;;  %v5525_v2 = vsel %vm700_vm10, %v5503_v25, %v5511_v50  ;;  %v5463_v62 = vsel %vm645_vm11, %v10009_v11, %v5462_v26  ;;  %5483 = vst [vmem:[#allocation2 + $0x50] sm:$0xf] %v5464_v17  ;;  %v5819_v60 = vpop.permute.xlu0 %5818  ;;  %v7502_v31 = vld [vmem:[#allocation2 + $0xf8] ss:$28 sps:$4 sm:$0xff]  }
 0x766   : > { %6428 = vmatprep.subr.bf16.mxu0 %v7230_v53  ;;  %v5524_v24 = vsel %vm700_vm10, %v9993_v6, %v5523_v43  ;;  %5541 = vst [vmem:[#allocation2 + $0xa4] sm:$0xf] %v5525_v2  ;;  %v5449_v36 = vpop.permute.xlu1 %5448  ;;  %v5831_v13 = vrot.slane %v5819_v60, 4  ;;  %v10998_v2 = vld [vmem:[#allocation3_spill] sm:$0xff] }
 0x767   : > { %6429 = vmatpush1.bf16.msra.mxu0 %v7229_v32  ;;  %v5457_v47 = vrot.slane %v5449_v36, 4  ;;  %v7222_v10 = vcombine.low %v5517_v49, %v5524_v24  ;;  %v7223_v39 = vcombine.high %v5517_v49, %v5524_v24 }
 0x768   : > { %6480 = vmatpush1.bf16.msra.mxu1 %v7502_v31  ;;  %v5840_v23 = vsel %vm643_vm4, %v5830_v21, %v5831_v13  ;;  %v5842_v11 = vsel %vm1030_vm12, %v5819_v60, %v5831_v13  ;;  %v10999_v60 = vld [vmem:[#allocation4_spill] sm:$0xff]  ;;  %v11005_v13 = vld [vmem:[#allocation13_spill] sm:$0xff] }
 0x769   : > { %6481 = vmatprep.subr.bf16.mxu1 %v10883_v22  ;;  %v5469_v6 = vsel %vm643_vm4, %v5456_v18, %v5457_v47  ;;  %v5471_v46 = vsel %vm645_vm11, %v5449_v36, %v5457_v47  ;;  %v5841_v16 = vsel %vm1030_vm12, %v10032_v41, %v5840_v23  ;;  %5861 = vst [vmem:[#allocation2 + $0x1d8] sm:$0xf] %v5842_v11  ;;  %v7503_v4 = vld [vmem:[#allocation2 + $0xc0] ss:$28 sps:$4 sm:$0xff]  }
 0x76a   : > { %6430 = vmatprep.subr.bf16.mxu0 %v7223_v39  ;;  %v5470_v38 = vsel %vm645_vm11, %v10024_v15, %v5469_v6  ;;  %5487 = vst [vmem:[#allocation2 + $0x6c] sm:$0xf] %v5471_v46  ;;  %v5827_v21 = vpop.permute.xlu1 %5826  ;;  %v11007_v47 = vld [vmem:[#allocation12_spill] sm:$0xff] }
 0x76b   : > { %6431 = vmatpush1.bf16.msra.mxu0 %v7222_v10  ;;  %v5835_v63 = vrot.slane %v5827_v21, 4  ;;  %v7215_v35 = vcombine.low %v5463_v62, %v5470_v38  ;;  %v7216_v52 = vcombine.high %v5463_v62, %v5470_v38 }
 0x76c   : > { %6482 = vmatpush1.bf16.msra.mxu1 %v7503_v4  ;;  %v11009_v4 = vld [vmem:[#allocation14_spill] sm:$0xff] }
 0x76d   : > { %6483 = vmatprep.subr.bf16.mxu1 %v10883_v22  ;;  %v5847_v18 = vsel %vm643_vm4, %v5834_v54, %v5835_v63  ;;  %v5849_v41 = vsel %vm1030_vm12, %v5827_v21, %v5835_v63  ;;  %v7504_v28 = vld [vmem:[#allocation2 + $0x88] ss:$28 sps:$4 sm:$0xff]   ;;  %6432 = vmatprep.subr.bf16.mxu0 %v7216_v52  ;;  %v11041_v52 = vld [vmem:[#allocation23_spill] sm:$0xff] }
 0x76e   : > { %v5848_v15 = vsel %vm1030_vm12, %v10057_v3, %v5847_v18  ;;  %5865 = vst [vmem:[#allocation2 + $0x1f4] sm:$0xf] %v5849_v41  ;;  %v11011_v21 = vld [vmem:[#allocation16_spill] sm:$0xff]  ;;  %v11035_v41 = vld [vmem:[#allocation35_spill] sm:$0xff] }
 0x76f   : > { %6433 = vmatpush1.bf16.msra.mxu0 %v7215_v35  ;;  %v7264_v0 = vcombine.low %v5841_v16, %v5848_v15  ;;  %v7265_v54 = vcombine.high %v5841_v16, %v5848_v15 }
 0x770   : > { %6484 = vmatpush1.bf16.msra.mxu1 %v7504_v28  ;;  %6434 = vmatprep.subr.bf16.mxu0 %v7508_v5  ;;  %v11034_v28 = vld [vmem:[#allocation26_spill] sm:$0xff] }
 0x771   : > { %6485 = vmatprep.subr.bf16.mxu1 %v10883_v22  ;;  %v7505_v12 = vld [vmem:[#allocation2 + $0x50] ss:$28 sps:$4 sm:$0xff]  }
 0x772   : > { %v1143_v58 = vpop.permute.xlu0 %1142 }
 0x773   : > { %6435 = vmatpush1.bf16.msra.mxu0 %v7506_v42  ;;  %v10201_v49 = vadd.f32 %v8256_v61, %v1143_v58  ;;  %v10204_v20 = vadd.f32 %v8258_v27, %v1143_v58  ;;  %v10207_v3 = vadd.f32 %v8260_v56, %v1143_v58  ;;  %v10210_v34 = vadd.f32 %v8264_v55, %v1143_v58  ;;  %v7509_v61 = vld [vmem:[#allocation2 + $0x18] ss:$28 sps:$4 sm:$0xff]   ;;  %v11025_v42 = vld [vmem:[#allocation32_spill] sm:$0xff]  ;;  %v11044_v55 = vld [vmem:[#allocation29_spill] sm:$0xff] }
 0x774   : > { %6486 = vmatpush1.bf16.msra.mxu1 %v7505_v12  ;;  %v10213_v40 = vadd.f32 %v8286_v1, %v1143_v58  ;;  %v10216_v25 = vadd.f32 %v8290_v45, %v1143_v58  ;;  %v10219_v9 = vadd.f32 %v8294_v29, %v1143_v58  ;;  %6450 = vmatprep.subr.bf16.mxu0 %v7265_v54  ;;  %v11013_v12 = vld [vmem:[#allocation6_spill] sm:$0xff]  ;;  %v11058_v27 = vld [vmem:[#allocation43_spill] sm:$0xff] }
 0x775   : > { %6487 = vmatprep.subr.bf16.mxu1 %v10883_v22  ;;  %v7510_v39 = vld [vmem:[#allocation2 + $0x1d8] ss:$28 sps:$4 sm:$0xff]  }
 0x776   : > { %10996 = vst [vmem:[#allocation73_spill] sm:$0xff] %v10213_v40  ;;  %10997 = vst [vmem:[#allocation74_spill] sm:$0xff] %v10216_v25  ;;  %v1153_v32 = vpop.permute.xlu0 %1152 }
 0x777   : > { %6451 = vmatpush2.bf16.msra.mxu0 %v7264_v0  ;;  %v1148_v53 = vpop.permute.xlu1 %1147  ;;  %v10230_v30 = vadd.f32 %v8270_v8, %v1153_v32  ;;  %v10233_v26 = vadd.f32 %v8274_v19, %v1153_v32  ;;  %v10236_v17 = vadd.f32 %v8276_v57, %v1153_v32  ;;  %v10239_v59 = vadd.f32 %v8280_v33, %v1153_v32  ;;  %v11000_v8 = vld [vmem:[#allocation5_spill] sm:$0xff]  ;;  %v11001_v19 = vld [vmem:[#allocation10_spill] sm:$0xff]  ;;  %v11003_v33 = vld [vmem:[#allocation11_spill] sm:$0xff] }
 0x778   : > { %6488 = vmatpush1.bf16.msra.mxu1 %v7509_v61  ;;  %v10242_v43 = vadd.f32 %v8262_v14, %v1148_v53  ;;  %v10245_v62 = vadd.f32 %v10998_v2, %v1148_v53  ;;  %v10248_v31 = vadd.f32 %v10999_v60, %v1148_v53  ;;  %v10251_v24 = vadd.f32 %v11000_v8, %v1148_v53  ;;  %v11014_v0 = vld [vmem:[#allocation7_spill] sm:$0xff]  ;;  %v11015_v61 = vld [vmem:[#allocation8_spill] sm:$0xff] }
 0x779   : > { %6503 = vmatprep.subr.bf16.mxu1 %v10883_v22  ;;  %v10255_v57 = vadd.f32 %v11001_v19, %v1148_v53  ;;  %v10258_v36 = vadd.f32 %v11003_v33, %v1148_v53  ;;  %v10261_v14 = vadd.f32 %v11005_v13, %v1148_v53  ;;  %v10264_v10 = vadd.f32 %v11007_v47, %v1153_v32  ;;  %v11016_v53 = vld [vmem:[#allocation9_spill] sm:$0xff]  ;;  %v11017_v60 = vld [vmem:[#allocation15_spill] sm:$0xff]  ;;  %v11021_v13 = vld [vmem:[#allocation18_spill] sm:$0xff] }
 0x77a   : > { %6453 = vmatmul.mubr.bf16.vlgmr.msra.gmra.mxu0 %v10078_v37  ;;  %v10276_v38 = vadd.f32 %v11009_v4, %v1153_v32  ;;  %v10279_v63 = vadd.f32 %v11011_v21, %v1153_v32  ;;  %v2745_v5 = vpop.permute.xlu0 %2744  ;;  %v11019_v19 = vld [vmem:[#allocation17_spill] sm:$0xff]  ;;  %v11039_v22 = vld [vmem:[#allocation39_spill] sm:$0xff] }
 0x77b   : > { %11002 = vst [vmem:[#allocation3_spill] sm:$0xff] %v10255_v57  ;;  %11004 = vst [vmem:[#allocation4_spill] sm:$0xff] %v10258_v36  ;;  %7272 = vmatprep.mubr.msk.bf16.mxu0 %vm1502_vm3, %v10084_v51  ;;  %v1158_v35 = vpop.permute.xlu1 %1157  ;;  %v10312_v21 = vadd.f32 %v8905_v44, %v2745_v5  ;;  %v11024_v44 = vld [vmem:[#allocation21_spill] sm:$0xff]  ;;  %v10330_v15 = vadd.f32 %v11025_v42, %v2745_v5 }
 0x77c   : > { %11006 = vst [vmem:[#allocation5_spill] sm:$0xff] %v10261_v14  ;;  %11008 = vst [vmem:[#allocation10_spill] sm:$0xff] %v10264_v10  ;;  %6504 = vmatpush2.bf16.msra.mxu1 %v7510_v39  ;;  %v10288_v58 = vadd.f32 %v11013_v12, %v1158_v35  ;;  %v10291_v54 = vadd.f32 %v11014_v0, %v1158_v35  ;;  %v10294_v32 = vadd.f32 %v11015_v61, %v1158_v35  ;;  %v11032_v61 = vld [vmem:[#allocation22_spill] sm:$0xff]  ;;  %v11037_v39 = vld [vmem:[#allocation37_spill] sm:$0xff] }
 0x77d   : > { %11010 = vst [vmem:[#allocation11_spill] sm:$0xff] %v10276_v38  ;;  %11012 = vst [vmem:[#allocation13_spill] sm:$0xff] %v10279_v63  ;;  %v10297_v2 = vadd.f32 %v11016_v53, %v1158_v35  ;;  %v10300_v8 = vadd.f32 %v11017_v60, %v1158_v35  ;;  %v10303_v33 = vadd.f32 %v11019_v19, %v1158_v35  ;;  %v11023_v60 = vld [vmem:[#allocation19_spill] sm:$0xff]  ;;  %v11081_v14 = vld [vmem:[#allocation53_spill] sm:$0xff] }
 0x77e   : > { %v10307_v47 = vadd.f32 %v11021_v13, %v1158_v35  ;;  %v10321_v53 = vadd.f32 %v8907_v48, %v2745_v5  ;;  %v10324_v19 = vadd.f32 %v11023_v60, %v2745_v5  ;;  %v10327_v13 = vadd.f32 %v11024_v44, %v2745_v5  ;;  %11026 = vst [vmem:[#allocation6_spill] sm:$0xff] %v10330_v15  ;;  %v11031_v35 = vld [vmem:[#allocation20_spill] sm:$0xff]  ;;  %v2755_v29 = vpop.permute.xlu0 %2754  ;;  %v11043_v44 = vld [vmem:[#allocation27_spill] sm:$0xff]  ;;  %v11053_v48 = vld [vmem:[#allocation30_spill] sm:$0xff] }
 0x77f   : > { %11018 = vst [vmem:[#allocation12_spill] sm:$0xff] %v10300_v8  ;;  %11020 = vst [vmem:[#allocation14_spill] sm:$0xff] %v10303_v33  ;;  %6506 = vmatmul.mubr.bf16.vlgmr.msra.gmra.mxu1 %v10078_v37  ;;  %v2750_v12 = vpop.permute.xlu1 %2749  ;;  %v11029_v37 = vld [vmem:[#allocation36_spill] sm:$0xff]  ;;  %v10380_v50 = vadd.f32 %v11043_v44, %v2755_v29  ;;  %v10383_v18 = vadd.f32 %v11044_v55, %v2755_v29  ;;  %v11062_v60 = vld [vmem:[#allocation45_spill] sm:$0xff] }
 0x780   : > { %11022 = vst [vmem:[#allocation16_spill] sm:$0xff] %v10307_v47  ;;  %7274 = vmatprep.mubr.msk.bf16.mxu1 %vm1502_vm3, %v10084_v51  ;;  %v11027_v51 = vld [vmem:[#allocation33_spill] sm:$0xff]  ;;  %v10337_v46 = vadd.f32 %v11029_v37, %v2745_v5  ;;  %v10341_v45 = vadd.f32 %v11031_v35, %v2750_v12  ;;  %v10349_v0 = vadd.f32 %v11032_v61, %v2750_v12  ;;  %v11051_v44 = vld [vmem:[#allocation28_spill] sm:$0xff]  ;;  %v11089_v15 = vld [vmem:[#allocation58_spill] sm:$0xff] }
 0x781   : > { %v10334_v16 = vadd.f32 %v11027_v51, %v2745_v5  ;;  %v11033_v5 = vld [vmem:[#allocation24_spill] sm:$0xff]  ;;  %v10355_v35 = vadd.f32 %v11034_v28, %v2750_v12  ;;  %v10358_v4 = vadd.f32 %v11035_v41, %v2750_v12  ;;  %v10361_v6 = vadd.f32 %v11037_v39, %v2750_v12  ;;  %v11056_v41 = vld [vmem:[#allocation41_spill] sm:$0xff] }
 0x782   : > { %6463 = vmatmul.mubr.bf16.gmra.mxu0 %v10116_v7  ;;  %11030 = vst [vmem:[#allocation8_spill] sm:$0xff] %v10337_v46  ;;  %v10352_v37 = vadd.f32 %v11033_v5, %v2750_v12  ;;  %v10364_v1 = vadd.f32 %v11039_v22, %v2750_v12  ;;  %v10371_v28 = vadd.f32 %v11041_v52, %v2755_v29  ;;  %v11042_v22 = vld [vmem:[#allocation25_spill] sm:$0xff]  ;;  %v11045_v5 = vld [vmem:[#allocation38_spill] sm:$0xff]  ;;  %v11047_v52 = vld [vmem:[#allocation40_spill] sm:$0xff]  ;;  %v10400_v55 = vpop.permute.xlu0 %4346 }
 0x783   : > { %11028 = vst [vmem:[#allocation7_spill] sm:$0xff] %v10334_v16  ;;  %11036 = vst [vmem:[#allocation9_spill] sm:$0xff] %v10358_v4  ;;  %v2760_v42 = vpop.permute.xlu1 %2759  ;;  %v10377_v12 = vadd.f32 %v11042_v22, %v2755_v29  ;;  %v10386_v61 = vadd.f32 %v11045_v5, %v2755_v29  ;;  %v10389_v51 = vadd.f32 %v11047_v52, %v2755_v29  ;;  %v11055_v22 = vld [vmem:[#allocation34_spill] sm:$0xff]  ;;  %v11060_v5 = vld [vmem:[#allocation44_spill] sm:$0xff] }
 0x784   : > { %11038 = vst [vmem:[#allocation15_spill] sm:$0xff] %v10361_v6  ;;  %11040 = vst [vmem:[#allocation17_spill] sm:$0xff] %v10364_v1  ;;  %v10398_v23 = vadd.f32 %v11051_v44, %v2760_v42  ;;  %v10412_v56 = vadd.f32 %v11055_v22, %v2760_v42  ;;  %v10415_v44 = vadd.f32 %v11056_v41, %v2760_v42  ;;  %v11065_v52 = vld [vmem:[#allocation47_spill] sm:$0xff]  ;;  %v11069_v22 = vld [vmem:[#allocation61_spill] sm:$0xff] }
 0x785   : > { %11046 = vst [vmem:[#allocation18_spill] sm:$0xff] %v10386_v61  ;;  %11048 = vst [vmem:[#allocation19_spill] sm:$0xff] %v10389_v51  ;;  %v10418_v33 = vadd.f32 %v11058_v27, %v2760_v42  ;;  %v10421_v8 = vadd.f32 %v11060_v5, %v2760_v42  ;;  %v10445_v41 = vadd.f32 %v11069_v22, %v10400_v55  ;;  %v11071_v27 = vld [vmem:[#allocation48_spill] sm:$0xff] }
 0x786   : > { %11052 = vst [vmem:[#allocation32_spill] sm:$0xff] %v10400_v55  ;;  %11057 = vst [vmem:[#allocation33_spill] sm:$0xff] %v10415_v44  ;;  %v11074_v22 = vld [vmem:[#allocation52_spill] sm:$0xff] }
 0x787   : > { %6514 = vmatmul.mubr.bf16.gmra.mxu1 %v10116_v7  ;;  %v11049_v7 = vld [vmem:[#allocation42_spill] sm:$0xff]  ;;  %11059 = vst [vmem:[#allocation36_spill] sm:$0xff] %v10418_v33  ;;  %11061 = vst [vmem:[#allocation20_spill] sm:$0xff] %v10421_v8  ;;  %v10427_v47 = vpop.permute.xlu1 %4351  ;;  %v4800_v8 = vadd.f32 %v11065_v52, %v10400_v55  ;;  %v10451_v52 = vpop.permute.xlu0 %4356 }
 0x788   : > { %v10392_v11 = vadd.f32 %v11049_v7, %v2755_v29  ;;  %v10406_v29 = vadd.f32 %v11053_v48, %v2760_v42  ;;  %v11054_v7 = vld [vmem:[#allocation31_spill] sm:$0xff]  ;;  %11063 = vst [vmem:[#allocation22_spill] sm:$0xff] %v10427_v47  ;;  %v11066_v48 = vld [vmem:[#allocation49_spill] sm:$0xff]  ;;  %11070 = vst [vmem:[#allocation26_spill] sm:$0xff] %v10445_v41  ;;  %v4751_v33 = vadd.f32 %v11071_v27, %v10427_v47 }
 0x789   : > { %v10409_v39 = vadd.f32 %v11054_v7, %v2760_v42  ;;  %v4747_v7 = vadd.f32 %v11062_v60, %v10400_v55  ;;  %v11064_v42 = vld [vmem:[#allocation46_spill] sm:$0xff]  ;;  %v4802_v61 = vadd.f32 %v11066_v48, %v10400_v55  ;;  %v11067_v60 = vld [vmem:[#allocation60_spill] sm:$0xff]  ;;  %11073 = vst [vmem:[#allocation35_spill] sm:$0xff] %v10451_v52  ;;  %v4922_v48 = vmax.f32 %v4800_v8, 0.0  ;;  %v11076_v27 = vld [vmem:[#allocation63_spill] sm:$0xff] }
 0x78a   : > { %11050 = vst [vmem:[#allocation21_spill] sm:$0xff] %v10392_v11  ;;  %v4749_v5 = vadd.f32 %v11064_v42, %v10400_v55  ;;  %v10441_v38 = vadd.f32 %v11067_v60, %v10400_v55  ;;  %v11072_v42 = vld [vmem:[#allocation50_spill] sm:$0xff]  ;;  %v4804_v6 = vadd.f32 %v11074_v22, %v10427_v47  ;;  %v10461_v36 = vadd.f32 %v11076_v27, %v10427_v47 }
 0x78b   : > { %v4920_v51 = vmax.f32 %v4747_v7, 0.0  ;;  %v4753_v44 = vadd.f32 %v11072_v42, %v10427_v47  ;;  %v4923_v11 = vmax.f32 %v4802_v61, 0.0  ;;  %v11075_v7 = vld [vmem:[#allocation54_spill] sm:$0xff]  ;;  %v11078_v42 = vld [vmem:[#allocation65_spill] sm:$0xff]  ;;  %v4927_v8 = vmax.f32 %v4751_v33, 0.0  ;;  %v10469_v63 = vpop.permute.xlu1 %4361 }
 0x78c   : > { %11068 = vst [vmem:[#allocation24_spill] sm:$0xff] %v10441_v38  ;;  %v4921_v10 = vmax.f32 %v4749_v5, 0.0  ;;  %v4806_v4 = vadd.f32 %v11075_v7, %v10427_v47  ;;  %11077 = vst [vmem:[#allocation37_spill] sm:$0xff] %v10461_v36  ;;  %v10465_v57 = vadd.f32 %v11078_v42, %v10427_v47  ;;  %v11080_v5 = vld [vmem:[#allocation51_spill] sm:$0xff]  ;;  %v4929_v22 = vmax.f32 %v4804_v6, 0.0  ;;  %v11083_v33 = vld [vmem:[#allocation57_spill] sm:$0xff] }
 0x78d   : > { %v4928_v61 = vmax.f32 %v4753_v44, 0.0  ;;  %v4757_v60 = vadd.f32 %v11080_v5, %v10451_v52  ;;  %v4759_v27 = vadd.f32 %v11081_v14, %v10451_v52  ;;  %v11082_v42 = vld [vmem:[#allocation55_spill] sm:$0xff]  ;;  %v4812_v44 = vadd.f32 %v11083_v33, %v10451_v52  ;;  %v11084_v5 = vld [vmem:[#allocation66_spill] sm:$0xff]  ;;  %v11086_v6 = vld [vmem:[#allocation68_spill] sm:$0xff] }
 0x78e   : > { %11079 = vst [vmem:[#allocation39_spill] sm:$0xff] %v10465_v57  ;;  %v4930_v1 = vmax.f32 %v4806_v4, 0.0  ;;  %v4810_v47 = vadd.f32 %v11082_v42, %v10451_v52  ;;  %v10482_v38 = vadd.f32 %v11084_v5, %v10451_v52  ;;  %v10486_v4 = vadd.f32 %v11086_v6, %v10451_v52  ;;  %v11088_v14 = vld [vmem:[#allocation56_spill] sm:$0xff]  ;;  %v11090_v5 = vld [vmem:[#allocation59_spill] sm:$0xff]  ;;  %v11091_v6 = vld [vmem:[#allocation62_spill] sm:$0xff] }
 0x78f   : > { %v4934_v7 = vmax.f32 %v4757_v60, 0.0  ;;  %v4935_v36 = vmax.f32 %v4759_v27, 0.0  ;;  %v4761_v16 = vadd.f32 %v11088_v14, %v10469_v63  ;;  %v4937_v57 = vmax.f32 %v4812_v44, 0.0  ;;  %v11092_v60 = vld [vmem:[#allocation69_spill] sm:$0xff] }
 0x790   : > { %11085 = vst [vmem:[#allocation23_spill] sm:$0xff] %v10482_v38  ;;  %11087 = vst [vmem:[#allocation25_spill] sm:$0xff] %v10486_v4  ;;  %v4936_v41 = vmax.f32 %v4810_v47, 0.0  ;;  %v4763_v33 = vadd.f32 %v11089_v15, %v10469_v63  ;;  %v4814_v40 = vadd.f32 %v11090_v5, %v10469_v63  ;;  %v4816_v52 = vadd.f32 %v11091_v6, %v10469_v63  ;;  %v11093_v47 = vld [vmem:[#allocation71_spill] sm:$0xff] }
 0x791   : > { %v10500_v27 = vadd.f32 %v11092_v60, %v10469_v63  ;;  %v10509_v15 = vadd.f32 %v11093_v47, %v10469_v63  ;;  %v4941_v44 = vmax.f32 %v4761_v16, 0.0  ;;  %v11094_v5 = vmax.f32 %v10201_v49, 0.0 }
 0x792   : > { %v4942_v14 = vmax.f32 %v4763_v33, 0.0  ;;  %v11095_v6 = vmax.f32 %v10204_v20, 0.0  ;;  %v4943_v25 = vmax.f32 %v4814_v40, 0.0  ;;  %v4944_v42 = vmax.f32 %v4816_v52, 0.0 }
 0x793   : > { %v4945_v4 = vmax.f32 %v10500_v27, 0.0  ;;  %v11096_v38 = vmax.f32 %v10312_v21, 0.0  ;;  %v11097_v55 = vmax.f32 %v10321_v53, 0.0  ;;  %v4946_v47 = vmax.f32 %v10509_v15, 0.0  ;;  %v10694_v15 = vpop.permute.xlu1 %5953 }
 0x794   : > { %v7320_v60 = vpack.c.bf16 %v11095_v6, %v11094_v5  ;;  %v7372_v49 = vpack.c.bf16 %v4921_v10, %v4920_v51  ;;  %v11098_v20 = vmax.f32 %v10242_v43, 0.0  ;;  %v11099_v16 = vmax.f32 %v10245_v62, 0.0 }
 0x795   : > { %v7346_v46 = vpack.c.bf16 %v11097_v55, %v11096_v38  ;;  %v11100_v40 = vmax.f32 %v10341_v45, 0.0  ;;  %v11101_v52 = vmax.f32 %v10349_v0, 0.0  ;;  %v7376_v21 = vpack.c.bf16 %v4928_v61, %v4927_v8 }
 0x796   : > { %1833 = vst [vmem:[%s10505_s23] sm:$0xff] %v7320_v60  ;;  %v7324_v33 = vpack.c.bf16 %v11099_v16, %v11098_v20  ;;  %v11102_v38 = vmax.f32 %v10207_v3, 0.0  ;;  %v11103_v53 = vmax.f32 %v10210_v34, 0.0  ;;  %v11104_v10 = vmax.f32 %v10324_v19, 0.0  ;;  %7137 = vst [vmem:[%s10505_s23 + $0xe0] sm:$0xff] %v7372_v49  ;;  %v11128_v49 = vld [vmem:[#allocation32_spill] sm:$0xff]  ;;  %v11130_v16 = vld [vmem:[#allocation73_spill] sm:$0xff] }
 0x797   : > { %v7350_v5 = vpack.c.bf16 %v11101_v52, %v11100_v40  ;;  %6983 = vst [vmem:[%s10505_s23 + $0x70] sm:$0xff] %v7346_v46  ;;  %v11105_v43 = vmax.f32 %v10327_v13, 0.0  ;;  %v7373_v51 = vpack.c.bf16 %v4923_v11, %v4922_v48  ;;  %v11106_v45 = vmax.f32 %v10230_v30, 0.0  ;;  %7141 = vst [vmem:[%s10505_s23 + $0xfc] sm:$0xff] %v7376_v21  ;;  %v11129_v20 = vld [vmem:[#allocation64_spill] sm:$0xff]  ;;  %v11136_v52 = vld [vmem:[#allocation7_spill] sm:$0xff] }
 0x798   : > { %v7321_v55 = vpack.c.bf16 %v11103_v53, %v11102_v38  ;;  %1837 = vst [vmem:[%s10505_s23 + $0x1c] sm:$0xff] %v7324_v33  ;;  %v11107_v46 = vmax.f32 %v10233_v26, 0.0  ;;  %v11108_v34 = vmax.f32 %v10371_v28, 0.0  ;;  %v11109_v0 = vmax.f32 %v10377_v12, 0.0  ;;  %v11132_v33 = vld [vmem:[#allocation74_spill] sm:$0xff]  ;;  %v11138_v38 = vld [vmem:[#allocation24_spill] sm:$0xff] }
 0x799   : > { %v7347_v62 = vpack.c.bf16 %v11105_v43, %v11104_v10  ;;  %v7380_v19 = vpack.c.bf16 %v4935_v36, %v4934_v7  ;;  %v11110_v13 = vmax.f32 %v10248_v31, 0.0  ;;  %v11111_v61 = vmax.f32 %v10251_v24, 0.0  ;;  %6987 = vst [vmem:[%s10505_s23 + $0x8c] sm:$0xff] %v7350_v5  ;;  %7138 = vst [vmem:[%s10505_s23 + $0xe8] sm:$0xff] %v7373_v51 }
 0x79a   : > { %v7328_v3 = vpack.c.bf16 %v11107_v46, %v11106_v45  ;;  %v7354_v8 = vpack.c.bf16 %v11109_v0, %v11108_v34  ;;  %1834 = vst [vmem:[%s10505_s23 + $0x8] sm:$0xff] %v7321_v55  ;;  %v11112_v30 = vmax.f32 %v10352_v37, 0.0  ;;  %v11113_v26 = vmax.f32 %v10355_v35, 0.0  ;;  %v11140_v55 = vld [vmem:[#allocation26_spill] sm:$0xff]  ;;  %v11143_v45 = vld [vmem:[#allocation17_spill] sm:$0xff]  ;;  %v11145_v34 = vld [vmem:[#allocation67_spill] sm:$0xff] }
 0x79b   : > { %v7325_v11 = vpack.c.bf16 %v11111_v61, %v11110_v13  ;;  %v7377_v48 = vpack.c.bf16 %v4930_v1, %v4929_v22  ;;  %v11114_v12 = vmax.f32 %v10288_v58, 0.0  ;;  %v11115_v36 = vmax.f32 %v10291_v54, 0.0  ;;  %6984 = vst [vmem:[%s10505_s23 + $0x78] sm:$0xff] %v7347_v62  ;;  %7145 = vst [vmem:[%s10505_s23 + $0x118] sm:$0xff] %v7380_v19  ;;  %v11142_v62 = vld [vmem:[#allocation5_spill] sm:$0xff]  ;;  %v11146_v13 = vld [vmem:[#allocation3_spill] sm:$0xff] }
 0x79c   : > { %v7351_v28 = vpack.c.bf16 %v11113_v26, %v11112_v30  ;;  %v11116_v24 = vmax.f32 %v10398_v23, 0.0  ;;  %v11117_v7 = vmax.f32 %v10406_v29, 0.0  ;;  %1841 = vst [vmem:[%s10505_s23 + $0x38] sm:$0xff] %v7328_v3  ;;  %v7384_v37 = vpack.c.bf16 %v4942_v14, %v4941_v44  ;;  %6991 = vst [vmem:[%s10505_s23 + $0xa8] sm:$0xff] %v7354_v8  ;;  %v11144_v3 = vld [vmem:[#allocation22_spill] sm:$0xff] }
 0x79d   : > { %v7332_v31 = vpack.c.bf16 %v11115_v36, %v11114_v12  ;;  %1838 = vst [vmem:[%s10505_s23 + $0x24] sm:$0xff] %v7325_v11  ;;  %v11118_v1 = vmax.f32 %v10236_v17, 0.0  ;;  %v11119_v58 = vmax.f32 %v10239_v59, 0.0  ;;  %v11120_v35 = vmax.f32 %v10380_v50, 0.0  ;;  %7142 = vst [vmem:[%s10505_s23 + $0x104] sm:$0xff] %v7377_v48  ;;  %v11148_v11 = vld [vmem:[#allocation4_spill] sm:$0xff] }
 0x79e   : > { %v7358_v6 = vpack.c.bf16 %v11117_v7, %v11116_v24  ;;  %v11121_v23 = vmax.f32 %v10383_v18, 0.0  ;;  %v7381_v22 = vpack.c.bf16 %v4937_v57, %v4936_v41  ;;  %6988 = vst [vmem:[%s10505_s23 + $0x94] sm:$0xff] %v7351_v28  ;;  %v11122_v44 = vmax.f32 %v10294_v32, 0.0  ;;  %v11127_v32 = vld [vmem:[#allocation8_spill] sm:$0xff]  ;;  %7149 = vst [vmem:[%s10505_s23 + $0x134] sm:$0xff] %v7384_v37  ;;  %v11150_v28 = vld [vmem:[#allocation9_spill] sm:$0xff] }
 0x79f   : > { %v7329_v54 = vpack.c.bf16 %v11119_v58, %v11118_v1  ;;  %1845 = vst [vmem:[%s10505_s23 + $0x54] sm:$0xff] %v7332_v31  ;;  %v11123_v17 = vmax.f32 %v10297_v2, 0.0  ;;  %v11124_v14 = vmax.f32 %v10409_v39, 0.0  ;;  %v11125_v50 = vmax.f32 %v10412_v56, 0.0  ;;  %v11152_v12 = vld [vmem:[#allocation15_spill] sm:$0xff]  ;;  %v11154_v37 = vld [vmem:[#allocation37_spill] sm:$0xff] }
 0x7a0   : > { %v7355_v29 = vpack.c.bf16 %v11121_v23, %v11120_v35  ;;  %v7385_v60 = vpack.c.bf16 %v4944_v42, %v4943_v25  ;;  %v11126_v57 = vmax.f32 %v10219_v9, 0.0  ;;  %6995 = vst [vmem:[%s10505_s23 + $0xc4] sm:$0xff] %v7358_v6  ;;  %v3324_v2 = vmax.f32 %v11127_v32, 0.0  ;;  %v11134_v9 = vld [vmem:[#allocation6_spill] sm:$0xff]  ;;  %7146 = vst [vmem:[%s10505_s23 + $0x120] sm:$0xff] %v7381_v22  ;;  %v11156_v58 = vld [vmem:[#allocation39_spill] sm:$0xff] }
 0x7a1   : > { %v7333_v59 = vpack.c.bf16 %v11123_v17, %v11122_v44  ;;  %v7359_v18 = vpack.c.bf16 %v11125_v50, %v11124_v14  ;;  %1842 = vst [vmem:[%s10505_s23 + $0x40] sm:$0xff] %v7329_v54  ;;  %v4906_v39 = vadd.f32 %v11129_v20, %v11128_v49  ;;  %v11131_v56 = vmax.f32 %v11130_v16, 0.0  ;;  %v11159_v44 = vld [vmem:[#allocation21_spill] sm:$0xff]  ;;  %v11161_v14 = vld [vmem:[#allocation70_spill] sm:$0xff] }
 0x7a2   : > { %v7323_v41 = vpack.c.bf16 %v11126_v57, %v11126_v57  ;;  %v11133_v25 = vmax.f32 %v11132_v33, 0.0  ;;  %v11135_v40 = vmax.f32 %v11134_v9, 0.0  ;;  %v11137_v5 = vmax.f32 %v11136_v52, 0.0  ;;  %6992 = vst [vmem:[%s10505_s23 + $0xb0] sm:$0xff] %v7355_v29  ;;  %7150 = vst [vmem:[%s10505_s23 + $0x13c] sm:$0xff] %v7385_v60  ;;  %v11158_v29 = vld [vmem:[#allocation13_spill] sm:$0xff] }
 0x7a3   : > { %1846 = vst [vmem:[%s10505_s23 + $0x5c] sm:$0xff] %v7333_v59  ;;  %v11139_v53 = vmax.f32 %v11138_v38, 0.0  ;;  %v11141_v10 = vmax.f32 %v11140_v55, 0.0  ;;  %v1730_v51 = vmax.f32 %v11142_v62, 0.0  ;;  %v3331_v46 = vmax.f32 %v11143_v45, 0.0  ;;  %6996 = vst [vmem:[%s10505_s23 + $0xcc] sm:$0xff] %v7359_v18 }
 0x7a4   : > { %v7322_v42 = vpack.c.bf16 %v11133_v25, %v11131_v56  ;;  %v7348_v21 = vpack.c.bf16 %v11137_v5, %v11135_v40  ;;  %1836 = vst [vmem:[%s10505_s23 + $0x18] sm:$0xf] %v7323_v41  ;;  %v4909_v0 = vadd.f32 %v11145_v34, %v11144_v3  ;;  %v7349_v8 = vpack.c.bf16 %v3324_v2, %v3324_v2  ;;  %v11160_v59 = vld [vmem:[#allocation35_spill] sm:$0xff]  ;;  %v11162_v60 = vld [vmem:[#allocation10_spill] sm:$0xff]  ;;  %v11174_v38 = vld [vmem:[#allocation16_spill] sm:$0xff] }
 0x7a5   : > { %v7374_v43 = vpack.c.bf16 %v11141_v10, %v11139_v53  ;;  %v4926_v19 = vmax.f32 %v4906_v39, 0.0  ;;  %v11147_v61 = vmax.f32 %v11146_v13, 0.0  ;;  %v11149_v30 = vmax.f32 %v11148_v11, 0.0  ;;  %v11164_v41 = vld [vmem:[#allocation11_spill] sm:$0xff]  ;;  %v11166_v49 = vld [vmem:[#allocation18_spill] sm:$0xff]  ;;  %v11175_v55 = vld [vmem:[#allocation20_spill] sm:$0xff] }
 0x7a6   : > { %1835 = vst [vmem:[%s10505_s23 + $0x10] sm:$0xff] %v7322_v42  ;;  %v11151_v48 = vmax.f32 %v11150_v28, 0.0  ;;  %v11153_v36 = vmax.f32 %v11152_v12, 0.0  ;;  %6985 = vst [vmem:[%s10505_s23 + $0x80] sm:$0xff] %v7348_v21  ;;  %v7327_v24 = vpack.c.bf16 %v1730_v51, %v1730_v51  ;;  %v7353_v7 = vpack.c.bf16 %v3331_v46, %v3331_v46  ;;  %v11168_v39 = vld [vmem:[#allocation19_spill] sm:$0xff]  ;;  %v11172_v42 = vld [vmem:[#allocation25_spill] sm:$0xff]  ;;  %v10691_v12 = vpop.permute.xlu0 %5948 }
 0x7a7   : > { %v7326_v26 = vpack.c.bf16 %v11149_v30, %v11147_v61  ;;  %v4933_v6 = vmax.f32 %v4909_v0, 0.0  ;;  %v11155_v1 = vmax.f32 %v11154_v37, 0.0  ;;  %v11157_v54 = vmax.f32 %v11156_v58, 0.0  ;;  %6986 = vst [vmem:[%s10505_s23 + $0x88] sm:$0xf] %v7349_v8  ;;  %7139 = vst [vmem:[%s10505_s23 + $0xf0] sm:$0xff] %v7374_v43 }
 0x7a8   : > { %v7352_v31 = vpack.c.bf16 %v11153_v36, %v11151_v48  ;;  %v7375_v23 = vpack.c.bf16 %v4926_v19, %v4926_v19  ;;  %v1737_v22 = vmax.f32 %v11158_v29, 0.0  ;;  %v3338_v17 = vmax.f32 %v11159_v44, 0.0  ;;  %1840 = vst [vmem:[%s10505_s23 + $0x34] sm:$0xf] %v7327_v24  ;;  %v11170_v33 = vld [vmem:[#allocation23_spill] sm:$0xff]  ;;  %v11176_v43 = vld [vmem:[#allocation72_spill] sm:$0xff] }
 0x7a9   : > { %v7378_v35 = vpack.c.bf16 %v11157_v54, %v11155_v1  ;;  %1839 = vst [vmem:[%s10505_s23 + $0x2c] sm:$0xff] %v7326_v26  ;;  %v4914_v50 = vadd.f32 %v11161_v14, %v11160_v59  ;;  %v7379_v18 = vpack.c.bf16 %v4933_v6, %v4933_v6  ;;  %v11163_v57 = vmax.f32 %v11162_v60, 0.0  ;;  %6990 = vst [vmem:[%s10505_s23 + $0xa4] sm:$0xf] %v7353_v7  ;;  %v11177_v51 = vld [vmem:[#allocation12_spill] sm:$0xff]  ;;  %v11179_v46 = vld [vmem:[#allocation14_spill] sm:$0xff] }
 0x7aa   : > { %6989 = vst [vmem:[%s10505_s23 + $0x9c] sm:$0xff] %v7352_v31  ;;  %v11165_v32 = vmax.f32 %v11164_v41, 0.0  ;;  %v11167_v20 = vmax.f32 %v11166_v49, 0.0  ;;  %v11169_v16 = vmax.f32 %v11168_v39, 0.0  ;;  %v11171_v25 = vmax.f32 %v11170_v33, 0.0  ;;  %v11181_v0 = vld [vmem:[#allocation33_spill] sm:$0xff] }
 0x7ab   : > { %v11173_v9 = vmax.f32 %v11172_v42, 0.0  ;;  %7140 = vst [vmem:[%s10505_s23 + $0xf8] sm:$0xf] %v7375_v23  ;;  %7143 = vst [vmem:[%s10505_s23 + $0x10c] sm:$0xff] %v7378_v35  ;;  %v7331_v52 = vpack.c.bf16 %v1737_v22, %v1737_v22  ;;  %v7357_v5 = vpack.c.bf16 %v3338_v17, %v3338_v17  ;;  %v4940_v21 = vmax.f32 %v4914_v50, 0.0  ;;  %v11183_v19 = vld [vmem:[#allocation36_spill] sm:$0xff]  ;;  %v10699_v35 = vpop.permute.xlu0 %5958 }
 0x7ac   : > { %v7330_v2 = vpack.c.bf16 %v11165_v32, %v11163_v57  ;;  %v7356_v56 = vpack.c.bf16 %v11169_v16, %v11167_v20  ;;  %v1744_v53 = vmax.f32 %v11174_v38, 0.0  ;;  %7144 = vst [vmem:[%s10505_s23 + $0x114] sm:$0xf] %v7379_v18  ;;  %v3345_v10 = vmax.f32 %v11175_v55, 0.0 }
 0x7ad   : > { %v7382_v40 = vpack.c.bf16 %v11173_v9, %v11171_v25  ;;  %v4917_v62 = vadd.f32 %v11176_v43, %v10469_v63  ;;  %v11178_v45 = vmax.f32 %v11177_v51, 0.0  ;;  %v11180_v3 = vmax.f32 %v11179_v46, 0.0  ;;  %1844 = vst [vmem:[%s10505_s23 + $0x50] sm:$0xf] %v7331_v52  ;;  %6994 = vst [vmem:[%s10505_s23 + $0xc0] sm:$0xf] %v7357_v5 }
 0x7ae   : > { %1843 = vst [vmem:[%s10505_s23 + $0x48] sm:$0xff] %v7330_v2  ;;  %v11182_v8 = vmax.f32 %v11181_v0, 0.0  ;;  %v11184_v13 = vmax.f32 %v11183_v19, 0.0  ;;  %v7383_v11 = vpack.c.bf16 %v4940_v21, %v4940_v21  ;;  %6993 = vst [vmem:[%s10505_s23 + $0xb8] sm:$0xff] %v7356_v56  ;;  %v7335_v30 = vpack.c.bf16 %v1744_v53, %v1744_v53  ;;  %v10706_v2 = vpop.permute.xlu1 %5963 }
 0x7af   : > { %v7334_v34 = vpack.c.bf16 %v11180_v3, %v11178_v45  ;;  %v7386_v63 = vpack.c.bf16 %v4946_v47, %v4945_v4  ;;  %7147 = vst [vmem:[%s10505_s23 + $0x128] sm:$0xff] %v7382_v40  ;;  %v7361_v26 = vpack.c.bf16 %v3345_v10, %v3345_v10  ;;  %v4947_v28 = vmax.f32 %v4917_v62, 0.0 }
 0x7b0   : > { %v7360_v61 = vpack.c.bf16 %v11184_v13, %v11182_v8  ;;  %7148 = vst [vmem:[%s10505_s23 + $0x130] sm:$0xf] %v7383_v11  ;;  %1848 = vst [vmem:[%s10505_s23 + $0x6c] sm:$0xf] %v7335_v30 }
 0x7b1   : > { %1847 = vst [vmem:[%s10505_s23 + $0x64] sm:$0xff] %v7334_v34  ;;  %6998 = vst [vmem:[%s10505_s23 + $0xdc] sm:$0xf] %v7361_v26  ;;  %v7387_v48 = vpack.c.bf16 %v4947_v28, %v4947_v28 }
 0x7b2   : > { %6997 = vst [vmem:[%s10505_s23 + $0xd4] sm:$0xff] %v7360_v61  ;;  %7151 = vst [vmem:[%s10505_s23 + $0x144] sm:$0xff] %v7386_v63 }
 0x7b3   : > { %7152 = vst [vmem:[%s10505_s23 + $0x14c] sm:$0xf] %v7387_v48 }
 0x811   : > { %v6348_v36 = vpop.f32.mrf.mxu0 }
 0x812   : > { %v6349_v27 = vadd.f32 %v6348_v36, %v10691_v12 }
 0x813   : > { %v6350_v31 = vpop.f32.mrf.mxu0 }
 0x814   : > { %v6351_v4 = vadd.f32 %v6350_v31, %v10691_v12  ;;  %v6522_v7 = vmax.f32 %v6349_v27, 0.0 }
 0x815   : > { %v6352_v47 = vpop.f32.mrf.mxu0 }
 0x816   : > { %v6401_v24 = vpop.f32.mrf.mxu1  ;;  %v6523_v6 = vmax.f32 %v6351_v4, 0.0  ;;  %v6353_v37 = vadd.f32 %v6352_v47, %v10694_v15 }
 0x817   : > { %v6402_v1 = vadd.f32 %v6401_v24, %v10691_v12  ;;  %v6354_v58 = vpop.f32.mrf.mxu0 }
 0x818   : > { %v6403_v54 = vpop.f32.mrf.mxu1  ;;  %v7398_v23 = vpack.c.bf16 %v6523_v6, %v6522_v7  ;;  %v6355_v29 = vadd.f32 %v6354_v58, %v10694_v15  ;;  %v6529_v59 = vmax.f32 %v6353_v37, 0.0 }
 0x819   : > { %v6404_v22 = vadd.f32 %v6403_v54, %v10691_v12  ;;  %v6358_v44 = vpop.f32.mrf.mxu0  ;;  %v6524_v18 = vmax.f32 %v6402_v1, 0.0 }
 0x81a   : > { %v6405_v17 = vpop.f32.mrf.mxu1  ;;  %7291 = vst [vmem:[%s10505_s23 + $0x150] sm:$0xff] %v7398_v23  ;;  %v6530_v14 = vmax.f32 %v6355_v29, 0.0  ;;  %v6359_v50 = vadd.f32 %v6358_v44, %v10699_v35 }
 0x81b   : > { %v6525_v60 = vmax.f32 %v6404_v22, 0.0  ;;  %v6406_v57 = vadd.f32 %v6405_v17, %v10694_v15  ;;  %v6360_v41 = vpop.f32.mrf.mxu0 }
 0x81c   : > { %v6407_v32 = vpop.f32.mrf.mxu1  ;;  %v7402_v49 = vpack.c.bf16 %v6530_v14, %v6529_v59  ;;  %v6361_v20 = vadd.f32 %v6360_v41, %v10699_v35  ;;  %v6536_v25 = vmax.f32 %v6359_v50, 0.0 }
 0x81d   : > { %v7399_v39 = vpack.c.bf16 %v6525_v60, %v6524_v18  ;;  %v6408_v16 = vadd.f32 %v6407_v32, %v10694_v15  ;;  %v6362_v56 = vpop.f32.mrf.mxu0  ;;  %v6531_v40 = vmax.f32 %v6406_v57, 0.0 }
 0x81e   : > { %v6411_v33 = vpop.f32.mrf.mxu1  ;;  %7295 = vst [vmem:[%s10505_s23 + $0x16c] sm:$0xff] %v7402_v49  ;;  %v6537_v42 = vmax.f32 %v6361_v20, 0.0  ;;  %v6363_v9 = vadd.f32 %v6362_v56, %v10706_v2 }
 0x81f   : > { %7292 = vst [vmem:[%s10505_s23 + $0x158] sm:$0xff] %v7399_v39  ;;  %v6532_v52 = vmax.f32 %v6408_v16, 0.0  ;;  %v6412_v5 = vadd.f32 %v6411_v33, %v10699_v35  ;;  %v6364_v21 = vpop.f32.mrf.mxu0 }
 0x820   : > { %v6413_v38 = vpop.f32.mrf.mxu1  ;;  %v7406_v53 = vpack.c.bf16 %v6537_v42, %v6536_v25  ;;  %v6365_v55 = vadd.f32 %v6364_v21, %v10706_v2  ;;  %v6543_v51 = vmax.f32 %v6363_v9, 0.0 }
 0x821   : > { %v7403_v10 = vpack.c.bf16 %v6532_v52, %v6531_v40  ;;  %v6414_v43 = vadd.f32 %v6413_v38, %v10699_v35  ;;  %v6538_v3 = vmax.f32 %v6412_v5, 0.0 }
 0x822   : > { %v6415_v62 = vpop.f32.mrf.mxu1  ;;  %7299 = vst [vmem:[%s10505_s23 + $0x188] sm:$0xff] %v7406_v53  ;;  %v6544_v45 = vmax.f32 %v6365_v55, 0.0 }
 0x823   : > { %v6416_v46 = vadd.f32 %v6415_v62, %v10706_v2  ;;  %7296 = vst [vmem:[%s10505_s23 + $0x174] sm:$0xff] %v7403_v10  ;;  %v6539_v34 = vmax.f32 %v6414_v43, 0.0 }
 0x824   : > { %v6417_v0 = vpop.f32.mrf.mxu1  ;;  %v7410_v8 = vpack.c.bf16 %v6544_v45, %v6543_v51 }
 0x825   : > { %v6418_v19 = vadd.f32 %v6417_v0, %v10706_v2  ;;  %v7407_v13 = vpack.c.bf16 %v6539_v34, %v6538_v3  ;;  %v6545_v61 = vmax.f32 %v6416_v46, 0.0 }
 0x826   : > { %7303 = vst [vmem:[%s10505_s23 + $0x1a4] sm:$0xff] %v7410_v8 }
 0x827   : > { %v6546_v11 = vmax.f32 %v6418_v19, 0.0  ;;  %7300 = vst [vmem:[%s10505_s23 + $0x190] sm:$0xff] %v7407_v13 }
 0x829   : > { %v7411_v30 = vpack.c.bf16 %v6546_v11, %v6545_v61 }
 0x82b   : > { %7304 = vst [vmem:[%s10505_s23 + $0x1ac] sm:$0xff] %v7411_v30 }
 0x83a   : > { %v6454_v63 = vpop.f32.mrf.mxu0 }
 0x83b   : > { %v6455_v26 = vadd.f32 %v6454_v63, %v10691_v12 }
 0x83c   : > { %v6456_v28 = vpop.f32.mrf.mxu0 }
 0x83d   : > { %v6457_v48 = vadd.f32 %v6456_v28, %v10691_v12  ;;  %v6526_v27 = vmax.f32 %v6455_v26, 0.0 }
 0x83e   : > { %v6458_v36 = vpop.f32.mrf.mxu0 }
 0x83f   : > { %v6507_v31 = vpop.f32.mrf.mxu1  ;;  %v6527_v4 = vmax.f32 %v6457_v48, 0.0  ;;  %v6459_v47 = vadd.f32 %v6458_v36, %v10694_v15 }
 0x840   : > { %v6508_v24 = vadd.f32 %v6507_v31, %v10691_v12  ;;  %v6460_v7 = vpop.f32.mrf.mxu0 }
 0x841   : > { %v7400_v6 = vpack.c.bf16 %v6527_v4, %v6526_v27  ;;  %v6509_v37 = vpop.f32.mrf.mxu1  ;;  %v6461_v1 = vadd.f32 %v6460_v7, %v10694_v15  ;;  %v6533_v23 = vmax.f32 %v6459_v47, 0.0 }
 0x842   : > { %v6528_v58 = vmax.f32 %v6508_v24, 0.0  ;;  %v6464_v54 = vpop.f32.mrf.mxu0 }
 0x843   : > { %7293 = vst [vmem:[%s10505_s23 + $0x160] sm:$0xff] %v7400_v6  ;;  %v6510_v29 = vpop.f32.mrf.mxu1  ;;  %v6534_v22 = vmax.f32 %v6461_v1, 0.0  ;;  %v6465_v44 = vadd.f32 %v6464_v54, %v10699_v35 }
 0x844   : > { %v7401_v17 = vpack.c.bf16 %v6528_v58, %v6528_v58  ;;  %v6511_v59 = vadd.f32 %v6510_v29, %v10694_v15  ;;  %v6466_v14 = vpop.f32.mrf.mxu0 }
 0x845   : > { %v7404_v12 = vpack.c.bf16 %v6534_v22, %v6533_v23  ;;  %v6512_v50 = vpop.f32.mrf.mxu1  ;;  %v6467_v18 = vadd.f32 %v6466_v14, %v10699_v35  ;;  %v6540_v41 = vmax.f32 %v6465_v44, 0.0 }
 0x846   : > { %7294 = vst [vmem:[%s10505_s23 + $0x168] sm:$0xf] %v7401_v17  ;;  %v6535_v60 = vmax.f32 %v6511_v59, 0.0  ;;  %v6468_v57 = vpop.f32.mrf.mxu0 }
 0x847   : > { %7297 = vst [vmem:[%s10505_s23 + $0x17c] sm:$0xff] %v7404_v12  ;;  %v6515_v32 = vpop.f32.mrf.mxu1  ;;  %v6541_v49 = vmax.f32 %v6467_v18, 0.0  ;;  %v6469_v20 = vadd.f32 %v6468_v57, %v10706_v2 }
 0x848   : > { %v7405_v39 = vpack.c.bf16 %v6535_v60, %v6535_v60  ;;  %v6516_v15 = vadd.f32 %v6515_v32, %v10699_v35  ;;  %v6470_v16 = vpop.f32.mrf.mxu0 }
 0x849   : > { %v7408_v56 = vpack.c.bf16 %v6541_v49, %v6540_v41  ;;  %v6517_v33 = vpop.f32.mrf.mxu1  ;;  %v6471_v25 = vadd.f32 %v6470_v16, %v10706_v2  ;;  %v6547_v9 = vmax.f32 %v6469_v20, 0.0 }
 0x84a   : > { %7298 = vst [vmem:[%s10505_s23 + $0x184] sm:$0xf] %v7405_v39  ;;  %v6542_v42 = vmax.f32 %v6516_v15, 0.0 }
 0x84b   : > { %7301 = vst [vmem:[%s10505_s23 + $0x198] sm:$0xff] %v7408_v56  ;;  %v6518_v40 = vpop.f32.mrf.mxu1  ;;  %v6548_v52 = vmax.f32 %v6471_v25, 0.0 }
 0x84c   : > { %v7409_v5 = vpack.c.bf16 %v6542_v42, %v6542_v42  ;;  %v6519_v21 = vadd.f32 %v6518_v40, %v10706_v2 }
 0x84d   : > { %v7412_v38 = vpack.c.bf16 %v6548_v52, %v6547_v9  ;;  %v6520_v53 = vpop.f32.mrf.mxu1 }
 0x84e   : > { %7302 = vst [vmem:[%s10505_s23 + $0x1a0] sm:$0xf] %v7409_v5  ;;  %v6549_v35 = vmax.f32 %v6519_v21, 0.0 }
 0x84f   : > { %7305 = vst [vmem:[%s10505_s23 + $0x1b4] sm:$0xff] %v7412_v38 }
 0x850   : > { %v7413_v55 = vpack.c.bf16 %v6549_v35, %v6549_v35 }
 0x852   : > { %7306 = vst [vmem:[%s10505_s23 + $0x1bc] sm:$0xf] %v7413_v55 }
 0x853 PF: > { %s15_s18 = sadd.s32 1, %s7534_s18  }
 0x854   : > { %p12_p4 = scmp.ge.s32.totalorder %s15_s18, 4  }
 0x856   :  { %14 = sbr.rel (!%p12_p4) target bundleno = 1 (0x1), region = 76 }

// kernel: cnn_basic_forward.3
= control target key start
LH: loop header
LB: loop body
LE: loop exit
PB: predicated region body
PF: predicated region fallthrough
CT: control target
= control target key end

     0   :  { %s8490_s0 = inlined_call_operand.vmem [shape: bf16[8,28672], index: 0, kind: input, shape index: {}]   ;;  %s8491_s1 = inlined_call_operand.vmem [shape: bf16[10,28672], index: 1, kind: input, shape index: {}]   ;;  %s8492_s2 = inlined_call_operand.vmem [shape: f32[1,10], index: 2, kind: input, shape index: {}]   ;;  %s8493_s3 = inlined_call_operand.hbm [shape: f32[8,10], index: 3, kind: output, shape index: {}]  }
   0x1   :  { %v128_v0 = vld [vmem:[%s8491_s1] sm:$0xff]  ;;  %v129_v2 = vld [vmem:[%s8491_s1 + $0x8] sm:$0xff]  ;;  %v130_v11 = vld [vmem:[%s8491_s1 + $0x10] sm:$0xff] }
   0x2   :  { %v240_v1 = vld [vmem:[%s8491_s1 + $0x380] sm:$0x11]  ;;  %v241_v4 = vld [vmem:[%s8491_s1 + $0x388] sm:$0x11]  ;;  %v242_v12 = vld [vmem:[%s8491_s1 + $0x390] sm:$0x11] }
   0x3   :  { %v6985_v3 = vcombine.high %v128_v0, %v240_v1  ;;  %v6984_v5 = vcombine.low %v128_v0, %v240_v1  ;;  %v16_v6 = vld [vmem:[%s8490_s0] sm:$0xff]  ;;  %v17_v7 = vld [vmem:[%s8490_s0 + $0x8] sm:$0xff]  ;;  %v6987_v8 = vcombine.high %v129_v2, %v241_v4  ;;  %v6986_v9 = vcombine.low %v129_v2, %v241_v4  ;;  %v131_v13 = vld [vmem:[%s8491_s1 + $0x18] sm:$0xff] }
   0x4   :  { %v6761_v10 = vcombine.high %v16_v6, %v16_v6  ;;  %v6763_v14 = vcombine.high %v17_v7, %v17_v7  ;;  %v6989_v15 = vcombine.high %v130_v11, %v242_v12  ;;  %v243_v16 = vld [vmem:[%s8491_s1 + $0x398] sm:$0x11]  ;;  %v18_v18 = vld [vmem:[%s8490_s0 + $0x10] sm:$0xff]  ;;  %v6760_v19 = vcombine.low %v16_v6, %v16_v6  ;;  %v132_v21 = vld [vmem:[%s8491_s1 + $0x20] sm:$0xff] }
   0x5   :  { %2277 = vmatprep.subr.bf16.mxu0 %v6985_v3  ;;  %2317 = vmatprep.subr.bf16.mxu1 %v6987_v8  ;;  %v6991_v17 = vcombine.high %v131_v13, %v243_v16  ;;  %v19_v20 = vld [vmem:[%s8490_s0 + $0x18] sm:$0xff]  ;;  %v244_v22 = vld [vmem:[%s8491_s1 + $0x3a0] sm:$0x11]  ;;  %v6762_v23 = vcombine.low %v17_v7, %v17_v7  ;;  %v6988_v24 = vcombine.low %v130_v11, %v242_v12  ;;  %v133_v25 = vld [vmem:[%s8491_s1 + $0x28] sm:$0xff] }
   0x6   :  { %2278 = vmatpush1.bf16.xpose.msra.mxu0 %v6984_v5  ;;  %2318 = vmatpush1.bf16.xpose.msra.mxu1 %v6986_v9  ;;  %v245_v26 = vld [vmem:[%s8491_s1 + $0x3a8] sm:$0x11]  ;;  %v6990_v27 = vcombine.low %v131_v13, %v243_v16  ;;  %v6765_v28 = vcombine.high %v18_v18, %v18_v18  ;;  %v6767_v29 = vcombine.high %v19_v20, %v19_v20  ;;  %v20_v32 = vld [vmem:[%s8490_s0 + $0x20] sm:$0xff]  ;;  %v134_v35 = vld [vmem:[%s8491_s1 + $0x30] sm:$0xff] }
   0x7   :  { %2295 = vmatprep.mubr.bf16.mxu0 %v6761_v10  ;;  %2335 = vmatprep.mubr.bf16.mxu1 %v6763_v14  ;;  %v6993_v30 = vcombine.high %v132_v21, %v244_v22  ;;  %v6995_v31 = vcombine.high %v133_v25, %v245_v26  ;;  %v6764_v33 = vcombine.low %v18_v18, %v18_v18  ;;  %v21_v34 = vld [vmem:[%s8490_s0 + $0x28] sm:$0xff]  ;;  %v246_v36 = vld [vmem:[%s8491_s1 + $0x3b0] sm:$0x11]  ;;  %v135_v39 = vld [vmem:[%s8491_s1 + $0x38] sm:$0xff] }
   0x8   :  { %2357 = vmatprep.subr.bf16.mxu0 %v6989_v15  ;;  %2397 = vmatprep.subr.bf16.mxu1 %v6991_v17  ;;  %v6766_v37 = vcombine.low %v19_v20, %v19_v20  ;;  %v6992_v38 = vcombine.low %v132_v21, %v244_v22  ;;  %v247_v40 = vld [vmem:[%s8491_s1 + $0x3b8] sm:$0x11]  ;;  %v6994_v41 = vcombine.low %v133_v25, %v245_v26  ;;  %v22_v46 = vld [vmem:[%s8490_s0 + $0x30] sm:$0xff]  ;;  %v136_v49 = vld [vmem:[%s8491_s1 + $0x40] sm:$0xff] }
   0x9   :  { %v6769_v42 = vcombine.high %v20_v32, %v20_v32  ;;  %v6771_v43 = vcombine.high %v21_v34, %v21_v34  ;;  %v6997_v44 = vcombine.high %v134_v35, %v246_v36  ;;  %v6999_v45 = vcombine.high %v135_v39, %v247_v40  ;;  %v23_v48 = vld [vmem:[%s8490_s0 + $0x38] sm:$0xff]  ;;  %v248_v50 = vld [vmem:[%s8491_s1 + $0x3c0] sm:$0x11]  ;;  %v137_v53 = vld [vmem:[%s8491_s1 + $0x48] sm:$0xff] }
   0xa   :  { %v6768_v47 = vcombine.low %v20_v32, %v20_v32  ;;  %v6770_v51 = vcombine.low %v21_v34, %v21_v34  ;;  %v6996_v52 = vcombine.low %v134_v35, %v246_v36  ;;  %v249_v54 = vld [vmem:[%s8491_s1 + $0x3c8] sm:$0x11]  ;;  %v6998_v55 = vcombine.low %v135_v39, %v247_v40  ;;  %v24_v60 = vld [vmem:[%s8490_s0 + $0x40] sm:$0xff]  ;;  %v138_v63 = vld [vmem:[%s8491_s1 + $0x50] sm:$0xff] }
   0xb   :  { %v6773_v56 = vcombine.high %v22_v46, %v22_v46  ;;  %v6775_v57 = vcombine.high %v23_v48, %v23_v48  ;;  %v7001_v58 = vcombine.high %v136_v49, %v248_v50  ;;  %v7003_v59 = vcombine.high %v137_v53, %v249_v54  ;;  %v25_v62 = vld [vmem:[%s8490_s0 + $0x48] sm:$0xff]  ;;  %v250_v0 = vld [vmem:[%s8491_s1 + $0x3d0] sm:$0x11]  ;;  %v139_v3 = vld [vmem:[%s8491_s1 + $0x58] sm:$0xff] }
   0xc   :  { %v6772_v61 = vcombine.low %v22_v46, %v22_v46  ;;  %v6774_v1 = vcombine.low %v23_v48, %v23_v48  ;;  %v7000_v2 = vcombine.low %v136_v49, %v248_v50  ;;  %v251_v4 = vld [vmem:[%s8491_s1 + $0x3d8] sm:$0x11]  ;;  %v7002_v5 = vcombine.low %v137_v53, %v249_v54  ;;  %v26_v10 = vld [vmem:[%s8490_s0 + $0x50] sm:$0xff]  ;;  %v140_v13 = vld [vmem:[%s8491_s1 + $0x60] sm:$0xff] }
   0xd   :  { %2296 = vmatmul.mubr.bf16.vlgmr.msra.gmra.mxu0 %v6760_v19  ;;  %2336 = vmatmul.mubr.bf16.vlgmr.msra.gmra.mxu1 %v6762_v23  ;;  %v6777_v6 = vcombine.high %v24_v60, %v24_v60  ;;  %v6779_v7 = vcombine.high %v25_v62, %v25_v62  ;;  %v7005_v8 = vcombine.high %v138_v63, %v250_v0  ;;  %v27_v12 = vld [vmem:[%s8490_s0 + $0x58] sm:$0xff]  ;;  %v252_v14 = vld [vmem:[%s8491_s1 + $0x3e0] sm:$0x11]  ;;  %v141_v17 = vld [vmem:[%s8491_s1 + $0x68] sm:$0xff] }
   0xe   :  { %2358 = vmatpush1.bf16.xpose.msra.mxu0 %v6988_v24  ;;  %2398 = vmatpush1.bf16.xpose.msra.mxu1 %v6990_v27  ;;  %v7007_v9 = vcombine.high %v139_v3, %v251_v4  ;;  %v6776_v11 = vcombine.low %v24_v60, %v24_v60  ;;  %v6778_v15 = vcombine.low %v25_v62, %v25_v62  ;;  %v253_v18 = vld [vmem:[%s8491_s1 + $0x3e8] sm:$0x11] }
   0xf   :  { %2375 = vmatprep.mubr.bf16.mxu0 %v6765_v28  ;;  %2415 = vmatprep.mubr.bf16.mxu1 %v6767_v29  ;;  %v7004_v16 = vcombine.low %v138_v63, %v250_v0  ;;  %v7006_v19 = vcombine.low %v139_v3, %v251_v4  ;;  %v6781_v20 = vcombine.high %v26_v10, %v26_v10 }
  0x10   :  { %2437 = vmatprep.subr.bf16.mxu0 %v6993_v30  ;;  %2477 = vmatprep.subr.bf16.mxu1 %v6995_v31  ;;  %v6783_v21 = vcombine.high %v27_v12, %v27_v12  ;;  %v7009_v22 = vcombine.high %v140_v13, %v252_v14  ;;  %v7011_v23 = vcombine.high %v141_v17, %v253_v18 }
  0x15   :  { %2376 = vmatmul.mubr.bf16.vlgmr.msra.gmra.mxu0 %v6764_v33  ;;  %2416 = vmatmul.mubr.bf16.vlgmr.msra.gmra.mxu1 %v6766_v37 }
  0x16   :  { %2438 = vmatpush1.bf16.xpose.msra.mxu0 %v6992_v38  ;;  %2478 = vmatpush1.bf16.xpose.msra.mxu1 %v6994_v41 }
  0x17   :  { %2455 = vmatprep.mubr.bf16.mxu0 %v6769_v42  ;;  %2495 = vmatprep.mubr.bf16.mxu1 %v6771_v43 }
  0x18   :  { %2517 = vmatprep.subr.bf16.mxu0 %v6997_v44  ;;  %2557 = vmatprep.subr.bf16.mxu1 %v6999_v45 }
  0x1d   :  { %2456 = vmatmul.mubr.bf16.vlgmr.msra.gmra.mxu0 %v6768_v47  ;;  %2496 = vmatmul.mubr.bf16.vlgmr.msra.gmra.mxu1 %v6770_v51 }
  0x1e   :  { %2518 = vmatpush1.bf16.xpose.msra.mxu0 %v6996_v52  ;;  %2558 = vmatpush1.bf16.xpose.msra.mxu1 %v6998_v55 }
  0x1f   :  { %2535 = vmatprep.mubr.bf16.mxu0 %v6773_v56  ;;  %2575 = vmatprep.mubr.bf16.mxu1 %v6775_v57 }
  0x20   :  { %2597 = vmatprep.subr.bf16.mxu0 %v7001_v58  ;;  %2637 = vmatprep.subr.bf16.mxu1 %v7003_v59 }
  0x25   :  { %2536 = vmatmul.mubr.bf16.vlgmr.msra.gmra.mxu0 %v6772_v61  ;;  %2576 = vmatmul.mubr.bf16.vlgmr.msra.gmra.mxu1 %v6774_v1 }
  0x26   :  { %2598 = vmatpush1.bf16.xpose.msra.mxu0 %v7000_v2  ;;  %2638 = vmatpush1.bf16.xpose.msra.mxu1 %v7002_v5 }
  0x27   :  { %2615 = vmatprep.mubr.bf16.mxu0 %v6777_v6  ;;  %2655 = vmatprep.mubr.bf16.mxu1 %v6779_v7 }
  0x28   :  { %2677 = vmatprep.subr.bf16.mxu0 %v7005_v8  ;;  %2717 = vmatprep.subr.bf16.mxu1 %v7007_v9 }
  0x2d   :  { %2616 = vmatmul.mubr.bf16.vlgmr.msra.gmra.mxu0 %v6776_v11 }
  0x2e   :  { %8 = vsyncpa [#allocation3], 0  ;;  %2656 = vmatmul.mubr.bf16.vlgmr.msra.gmra.mxu1 %v6778_v15  ;;  %2678 = vmatpush1.bf16.xpose.msra.mxu0 %v7004_v16  ;;  %v28_v24 = vld [vmem:[%s8490_s0 + $0x60] sm:$0xff]  ;;  %v6780_v25 = vcombine.low %v26_v10, %v26_v10  ;;  %v29_v26 = vld [vmem:[%s8490_s0 + $0x68] sm:$0xff]  ;;  %v6782_v29 = vcombine.low %v27_v12, %v27_v12  ;;  %v7008_v30 = vcombine.low %v140_v13, %v252_v14  ;;  %vm6743_vm0 = vcmask 80896  }
  0x2f   :  { %2718 = vmatpush1.bf16.xpose.msra.mxu1 %v7006_v19  ;;  %2695 = vmatprep.mubr.bf16.mxu0 %v6781_v20  ;;  %v142_v27 = vld [vmem:[%s8491_s1 + $0x70] sm:$0xff]  ;;  %v143_v31 = vld [vmem:[%s8491_s1 + $0x78] sm:$0xff]  ;;  %v7010_v33 = vcombine.low %v141_v17, %v253_v18  ;;  %v6785_v34 = vcombine.high %v28_v24, %v28_v24  ;;  %v6787_v35 = vcombine.high %v29_v26, %v29_v26  ;;  %v144_v41 = vld [vmem:[%s8491_s1 + $0x80] sm:$0xff] }
  0x30   :  { %2735 = vmatprep.mubr.bf16.mxu1 %v6783_v21  ;;  %2757 = vmatprep.subr.bf16.mxu0 %v7009_v22  ;;  %v254_v28 = vld [vmem:[%s8491_s1 + $0x3f0] sm:$0x11]  ;;  %v255_v32 = vld [vmem:[%s8491_s1 + $0x3f8] sm:$0x11]  ;;  %v6784_v39 = vcombine.low %v28_v24, %v28_v24  ;;  %v256_v42 = vld [vmem:[%s8491_s1 + $0x400] sm:$0x11]  ;;  %v6786_v43 = vcombine.low %v29_v26, %v29_v26 }
  0x31   :  { %2797 = vmatprep.subr.bf16.mxu1 %v7011_v23  ;;  %v7013_v36 = vcombine.high %v142_v27, %v254_v28  ;;  %v7015_v37 = vcombine.high %v143_v31, %v255_v32  ;;  %v30_v38 = vld [vmem:[%s8490_s0 + $0x70] sm:$0xff]  ;;  %v31_v40 = vld [vmem:[%s8490_s0 + $0x78] sm:$0xff]  ;;  %v7012_v44 = vcombine.low %v142_v27, %v254_v28  ;;  %v145_v45 = vld [vmem:[%s8491_s1 + $0x88] sm:$0xff]  ;;  %v7014_v47 = vcombine.low %v143_v31, %v255_v32 }
  0x32   :  { %v257_v46 = vld [vmem:[%s8491_s1 + $0x408] sm:$0x11]  ;;  %v6789_v48 = vcombine.high %v30_v38, %v30_v38  ;;  %v6791_v49 = vcombine.high %v31_v40, %v31_v40  ;;  %v7017_v50 = vcombine.high %v144_v41, %v256_v42  ;;  %v32_v52 = vld [vmem:[%s8490_s0 + $0x80] sm:$0xff]  ;;  %v6788_v53 = vcombine.low %v30_v38, %v30_v38  ;;  %v146_v55 = vld [vmem:[%s8491_s1 + $0x90] sm:$0xff] }
  0x33   :  { %v7019_v51 = vcombine.high %v145_v45, %v257_v46  ;;  %v33_v54 = vld [vmem:[%s8490_s0 + $0x88] sm:$0xff]  ;;  %v258_v56 = vld [vmem:[%s8491_s1 + $0x410] sm:$0x11]  ;;  %v6790_v57 = vcombine.low %v31_v40, %v31_v40  ;;  %v7016_v58 = vcombine.low %v144_v41, %v256_v42  ;;  %v147_v59 = vld [vmem:[%s8491_s1 + $0x98] sm:$0xff]  ;;  %v7018_v61 = vcombine.low %v145_v45, %v257_v46 }
  0x34   :  { %v259_v60 = vld [vmem:[%s8491_s1 + $0x418] sm:$0x11]  ;;  %v6793_v62 = vcombine.high %v32_v52, %v32_v52  ;;  %v6795_v63 = vcombine.high %v33_v54, %v33_v54  ;;  %v7021_v0 = vcombine.high %v146_v55, %v258_v56  ;;  %v34_v2 = vld [vmem:[%s8490_s0 + $0x90] sm:$0xff]  ;;  %v6792_v3 = vcombine.low %v32_v52, %v32_v52  ;;  %v148_v5 = vld [vmem:[%s8491_s1 + $0xa0] sm:$0xff] }
  0x35   :  { %2696 = vmatmul.mubr.bf16.vlgmr.msra.gmra.mxu0 %v6780_v25  ;;  %v7023_v1 = vcombine.high %v147_v59, %v259_v60  ;;  %v35_v4 = vld [vmem:[%s8490_s0 + $0x98] sm:$0xff]  ;;  %v260_v6 = vld [vmem:[%s8491_s1 + $0x420] sm:$0x11]  ;;  %v6794_v7 = vcombine.low %v33_v54, %v33_v54  ;;  %v7020_v8 = vcombine.low %v146_v55, %v258_v56  ;;  %v149_v9 = vld [vmem:[%s8491_s1 + $0xa8] sm:$0xff]  ;;  %v7022_v11 = vcombine.low %v147_v59, %v259_v60 }
  0x36   :  { %2736 = vmatmul.mubr.bf16.vlgmr.msra.gmra.mxu1 %v6782_v29  ;;  %2758 = vmatpush1.bf16.xpose.msra.mxu0 %v7008_v30  ;;  %v261_v10 = vld [vmem:[%s8491_s1 + $0x428] sm:$0x11]  ;;  %v6797_v12 = vcombine.high %v34_v2, %v34_v2  ;;  %v6799_v13 = vcombine.high %v35_v4, %v35_v4  ;;  %v7025_v14 = vcombine.high %v148_v5, %v260_v6  ;;  %v36_v16 = vld [vmem:[%s8490_s0 + $0xa0] sm:$0xff]  ;;  %v150_v19 = vld [vmem:[%s8491_s1 + $0xb0] sm:$0xff] }
  0x37   :  { %2798 = vmatpush1.bf16.xpose.msra.mxu1 %v7010_v33  ;;  %2775 = vmatprep.mubr.bf16.mxu0 %v6785_v34  ;;  %v7027_v15 = vcombine.high %v149_v9, %v261_v10  ;;  %v6796_v17 = vcombine.low %v34_v2, %v34_v2  ;;  %v37_v18 = vld [vmem:[%s8490_s0 + $0xa8] sm:$0xff]  ;;  %v262_v20 = vld [vmem:[%s8491_s1 + $0x430] sm:$0x11]  ;;  %v6798_v21 = vcombine.low %v35_v4, %v35_v4  ;;  %v151_v23 = vld [vmem:[%s8491_s1 + $0xb8] sm:$0xff] }
  0x38   :  { %2815 = vmatprep.mubr.bf16.mxu1 %v6787_v35  ;;  %2837 = vmatprep.subr.bf16.mxu0 %v7013_v36  ;;  %v7024_v22 = vcombine.low %v148_v5, %v260_v6  ;;  %v263_v24 = vld [vmem:[%s8491_s1 + $0x438] sm:$0x11]  ;;  %v7026_v25 = vcombine.low %v149_v9, %v261_v10  ;;  %v6801_v26 = vcombine.high %v36_v16, %v36_v16  ;;  %v38_v30 = vld [vmem:[%s8490_s0 + $0xb0] sm:$0xff]  ;;  %v152_v33 = vld [vmem:[%s8491_s1 + $0xc0] sm:$0xff] }
  0x39   :  { %2877 = vmatprep.subr.bf16.mxu1 %v7015_v37  ;;  %v6803_v27 = vcombine.high %v37_v18, %v37_v18  ;;  %v7029_v28 = vcombine.high %v150_v19, %v262_v20  ;;  %v7031_v29 = vcombine.high %v151_v23, %v263_v24  ;;  %v6800_v31 = vcombine.low %v36_v16, %v36_v16  ;;  %v39_v32 = vld [vmem:[%s8490_s0 + $0xb8] sm:$0xff]  ;;  %v264_v34 = vld [vmem:[%s8491_s1 + $0x440] sm:$0x11]  ;;  %v153_v37 = vld [vmem:[%s8491_s1 + $0xc8] sm:$0xff] }
  0x3a   :  { %v6802_v35 = vcombine.low %v37_v18, %v37_v18  ;;  %v7028_v36 = vcombine.low %v150_v19, %v262_v20  ;;  %v265_v38 = vld [vmem:[%s8491_s1 + $0x448] sm:$0x11]  ;;  %v6805_v40 = vcombine.high %v38_v30, %v38_v30  ;;  %v6807_v41 = vcombine.high %v39_v32, %v39_v32  ;;  %v267_v52 = vld [vmem:[%s8491_s1 + $0x458] sm:$0x11] }
  0x3b   :  { %v7033_v42 = vcombine.high %v152_v33, %v264_v34  ;;  %v6804_v45 = vcombine.low %v38_v30, %v38_v30  ;;  %v41_v46 = vld [vmem:[%s8490_s0 + $0xc8] sm:$0xff]  ;;  %v43_v60 = vld [vmem:[%s8490_s0 + $0xd8] sm:$0xff] }
  0x3c   :  { %v6811_v55 = vcombine.high %v41_v46, %v41_v46  ;;  %v269_v2 = vld [vmem:[%s8491_s1 + $0x468] sm:$0x11]  ;;  %v6815_v5 = vcombine.high %v43_v60, %v43_v60  ;;  %v271_v16 = vld [vmem:[%s8491_s1 + $0x478] sm:$0x11] }
  0x3d   :  { %2776 = vmatmul.mubr.bf16.vlgmr.msra.gmra.mxu0 %v6784_v39  ;;  %v7030_v39 = vcombine.low %v151_v23, %v263_v24  ;;  %v45_v10 = vld [vmem:[%s8490_s0 + $0xe8] sm:$0xff]  ;;  %v47_v24 = vld [vmem:[%s8490_s0 + $0xf8] sm:$0xff] }
  0x3e   :  { %2816 = vmatmul.mubr.bf16.vlgmr.msra.gmra.mxu1 %v6786_v43  ;;  %2838 = vmatpush1.bf16.xpose.msra.mxu0 %v7012_v44  ;;  %v7035_v43 = vcombine.high %v153_v37, %v265_v38  ;;  %v40_v44 = vld [vmem:[%s8490_s0 + $0xc0] sm:$0xff]  ;;  %v6819_v19 = vcombine.high %v45_v10, %v45_v10  ;;  %v273_v30 = vld [vmem:[%s8491_s1 + $0x488] sm:$0x11] }
  0x3f   :  { %2878 = vmatpush1.bf16.xpose.msra.mxu1 %v7014_v47  ;;  %2855 = vmatprep.mubr.bf16.mxu0 %v6789_v48  ;;  %v154_v47 = vld [vmem:[%s8491_s1 + $0xd0] sm:$0xff]  ;;  %v6809_v54 = vcombine.high %v40_v44, %v40_v44  ;;  %v6808_v59 = vcombine.low %v40_v44, %v40_v44  ;;  %v275_v44 = vld [vmem:[%s8491_s1 + $0x498] sm:$0x11] }
  0x40   :  { %2895 = vmatprep.mubr.bf16.mxu1 %v6791_v49  ;;  %2917 = vmatprep.subr.bf16.mxu0 %v7017_v50  ;;  %v266_v48 = vld [vmem:[%s8491_s1 + $0x450] sm:$0x11]  ;;  %v6806_v49 = vcombine.low %v39_v32, %v39_v32  ;;  %v7032_v50 = vcombine.low %v152_v33, %v264_v34  ;;  %v6823_v33 = vcombine.high %v47_v24, %v47_v24 }
  0x41   :  { %2957 = vmatprep.subr.bf16.mxu1 %v7019_v51  ;;  %v155_v51 = vld [vmem:[%s8491_s1 + $0xd8] sm:$0xff]  ;;  %v7037_v56 = vcombine.high %v154_v47, %v266_v48 }
  0x45   :  { %2856 = vmatmul.mubr.bf16.vlgmr.msra.gmra.mxu0 %v6788_v53  ;;  %v7034_v53 = vcombine.low %v153_v37, %v265_v38  ;;  %v49_v38 = vld [vmem:[%s8490_s0 + $0x108] sm:$0xff] }
  0x46   :  { %2896 = vmatmul.mubr.bf16.vlgmr.msra.gmra.mxu1 %v6790_v57  ;;  %2918 = vmatpush1.bf16.xpose.msra.mxu0 %v7016_v58  ;;  %v7039_v57 = vcombine.high %v155_v51, %v267_v52  ;;  %v42_v58 = vld [vmem:[%s8490_s0 + $0xd0] sm:$0xff] }
  0x47   :  { %2958 = vmatpush1.bf16.xpose.msra.mxu1 %v7018_v61  ;;  %2935 = vmatprep.mubr.bf16.mxu0 %v6793_v62  ;;  %v156_v61 = vld [vmem:[%s8491_s1 + $0xe0] sm:$0xff]  ;;  %v6813_v4 = vcombine.high %v42_v58, %v42_v58  ;;  %v6812_v9 = vcombine.low %v42_v58, %v42_v58  ;;  %v277_v58 = vld [vmem:[%s8491_s1 + $0x4a8] sm:$0x11] }
  0x48   :  { %2975 = vmatprep.mubr.bf16.mxu1 %v6795_v63  ;;  %2997 = vmatprep.subr.bf16.mxu0 %v7021_v0  ;;  %v268_v62 = vld [vmem:[%s8491_s1 + $0x460] sm:$0x11]  ;;  %v6810_v63 = vcombine.low %v41_v46, %v41_v46  ;;  %v7036_v0 = vcombine.low %v154_v47, %v266_v48  ;;  %v6827_v47 = vcombine.high %v49_v38, %v49_v38 }
  0x49   :  { %3037 = vmatprep.subr.bf16.mxu1 %v7023_v1  ;;  %v157_v1 = vld [vmem:[%s8491_s1 + $0xe8] sm:$0xff]  ;;  %v7041_v6 = vcombine.high %v156_v61, %v268_v62 }
  0x4d   :  { %2936 = vmatmul.mubr.bf16.vlgmr.msra.gmra.mxu0 %v6792_v3  ;;  %v7038_v3 = vcombine.low %v155_v51, %v267_v52  ;;  %v51_v52 = vld [vmem:[%s8490_s0 + $0x118] sm:$0xff] }
  0x4e   :  { %2976 = vmatmul.mubr.bf16.vlgmr.msra.gmra.mxu1 %v6794_v7  ;;  %2998 = vmatpush1.bf16.xpose.msra.mxu0 %v7020_v8  ;;  %v7043_v7 = vcombine.high %v157_v1, %v269_v2  ;;  %v44_v8 = vld [vmem:[%s8490_s0 + $0xe0] sm:$0xff] }
  0x4f   :  { %3038 = vmatpush1.bf16.xpose.msra.mxu1 %v7022_v11  ;;  %3015 = vmatprep.mubr.bf16.mxu0 %v6797_v12  ;;  %v158_v11 = vld [vmem:[%s8491_s1 + $0xf0] sm:$0xff]  ;;  %v6817_v18 = vcombine.high %v44_v8, %v44_v8  ;;  %v6816_v23 = vcombine.low %v44_v8, %v44_v8  ;;  %v279_v8 = vld [vmem:[%s8491_s1 + $0x4b8] sm:$0x11] }
  0x50   :  { %3055 = vmatprep.mubr.bf16.mxu1 %v6799_v13  ;;  %3077 = vmatprep.subr.bf16.mxu0 %v7025_v14  ;;  %v270_v12 = vld [vmem:[%s8491_s1 + $0x470] sm:$0x11]  ;;  %v6814_v13 = vcombine.low %v43_v60, %v43_v60  ;;  %v7040_v14 = vcombine.low %v156_v61, %v268_v62  ;;  %v6831_v61 = vcombine.high %v51_v52, %v51_v52 }
  0x51   :  { %3117 = vmatprep.subr.bf16.mxu1 %v7027_v15  ;;  %v159_v15 = vld [vmem:[%s8491_s1 + $0xf8] sm:$0xff]  ;;  %v7045_v20 = vcombine.high %v158_v11, %v270_v12 }
  0x55   :  { %3016 = vmatmul.mubr.bf16.vlgmr.msra.gmra.mxu0 %v6796_v17  ;;  %v7042_v17 = vcombine.low %v157_v1, %v269_v2  ;;  %v53_v2 = vld [vmem:[%s8490_s0 + $0x128] sm:$0xff] }
  0x56   :  { %3056 = vmatmul.mubr.bf16.vlgmr.msra.gmra.mxu1 %v6798_v21  ;;  %3078 = vmatpush1.bf16.xpose.msra.mxu0 %v7024_v22  ;;  %v7047_v21 = vcombine.high %v159_v15, %v271_v16  ;;  %v46_v22 = vld [vmem:[%s8490_s0 + $0xf0] sm:$0xff] }
  0x57   :  { %3118 = vmatpush1.bf16.xpose.msra.mxu1 %v7026_v25  ;;  %3095 = vmatprep.mubr.bf16.mxu0 %v6801_v26  ;;  %v160_v25 = vld [vmem:[%s8491_s1 + $0x100] sm:$0xff]  ;;  %v6821_v32 = vcombine.high %v46_v22, %v46_v22  ;;  %v6820_v37 = vcombine.low %v46_v22, %v46_v22  ;;  %v281_v22 = vld [vmem:[%s8491_s1 + $0x4c8] sm:$0x11] }
  0x58   :  { %3135 = vmatprep.mubr.bf16.mxu1 %v6803_v27  ;;  %3157 = vmatprep.subr.bf16.mxu0 %v7029_v28  ;;  %v272_v26 = vld [vmem:[%s8491_s1 + $0x480] sm:$0x11]  ;;  %v6818_v27 = vcombine.low %v45_v10, %v45_v10  ;;  %v7044_v28 = vcombine.low %v158_v11, %v270_v12  ;;  %v6835_v11 = vcombine.high %v53_v2, %v53_v2 }
  0x59   :  { %3197 = vmatprep.subr.bf16.mxu1 %v7031_v29  ;;  %v161_v29 = vld [vmem:[%s8491_s1 + $0x108] sm:$0xff]  ;;  %v7049_v34 = vcombine.high %v160_v25, %v272_v26 }
  0x5d   :  { %3096 = vmatmul.mubr.bf16.vlgmr.msra.gmra.mxu0 %v6800_v31  ;;  %v7046_v31 = vcombine.low %v159_v15, %v271_v16  ;;  %v55_v16 = vld [vmem:[%s8490_s0 + $0x138] sm:$0xff] }
  0x5e   :  { %3136 = vmatmul.mubr.bf16.vlgmr.msra.gmra.mxu1 %v6802_v35  ;;  %3158 = vmatpush1.bf16.xpose.msra.mxu0 %v7028_v36  ;;  %v7051_v35 = vcombine.high %v161_v29, %v273_v30  ;;  %v48_v36 = vld [vmem:[%s8490_s0 + $0x100] sm:$0xff] }
  0x5f   :  { %3198 = vmatpush1.bf16.xpose.msra.mxu1 %v7030_v39  ;;  %3175 = vmatprep.mubr.bf16.mxu0 %v6805_v40  ;;  %v162_v39 = vld [vmem:[%s8491_s1 + $0x110] sm:$0xff]  ;;  %v6825_v46 = vcombine.high %v48_v36, %v48_v36  ;;  %v6824_v51 = vcombine.low %v48_v36, %v48_v36  ;;  %v283_v36 = vld [vmem:[%s8491_s1 + $0x4d8] sm:$0x11] }
  0x60   :  { %3215 = vmatprep.mubr.bf16.mxu1 %v6807_v41  ;;  %3237 = vmatprep.subr.bf16.mxu0 %v7033_v42  ;;  %v274_v40 = vld [vmem:[%s8491_s1 + $0x490] sm:$0x11]  ;;  %v6822_v41 = vcombine.low %v47_v24, %v47_v24  ;;  %v7048_v42 = vcombine.low %v160_v25, %v272_v26  ;;  %v6839_v25 = vcombine.high %v55_v16, %v55_v16 }
  0x61   :  { %3277 = vmatprep.subr.bf16.mxu1 %v7035_v43  ;;  %v163_v43 = vld [vmem:[%s8491_s1 + $0x118] sm:$0xff]  ;;  %v7053_v48 = vcombine.high %v162_v39, %v274_v40 }
  0x65   :  { %3176 = vmatmul.mubr.bf16.vlgmr.msra.gmra.mxu0 %v6804_v45  ;;  %v7050_v45 = vcombine.low %v161_v29, %v273_v30  ;;  %v57_v30 = vld [vmem:[%s8490_s0 + $0x148] sm:$0xff] }
  0x66   :  { %3216 = vmatmul.mubr.bf16.vlgmr.msra.gmra.mxu1 %v6806_v49  ;;  %3238 = vmatpush1.bf16.xpose.msra.mxu0 %v7032_v50  ;;  %v7055_v49 = vcombine.high %v163_v43, %v275_v44  ;;  %v50_v50 = vld [vmem:[%s8490_s0 + $0x110] sm:$0xff] }
  0x67   :  { %3278 = vmatpush1.bf16.xpose.msra.mxu1 %v7034_v53  ;;  %3255 = vmatprep.mubr.bf16.mxu0 %v6809_v54  ;;  %v164_v53 = vld [vmem:[%s8491_s1 + $0x120] sm:$0xff]  ;;  %v6829_v60 = vcombine.high %v50_v50, %v50_v50  ;;  %v6828_v1 = vcombine.low %v50_v50, %v50_v50  ;;  %v285_v50 = vld [vmem:[%s8491_s1 + $0x4e8] sm:$0x11] }
  0x68   :  { %3295 = vmatprep.mubr.bf16.mxu1 %v6811_v55  ;;  %3317 = vmatprep.subr.bf16.mxu0 %v7037_v56  ;;  %v276_v54 = vld [vmem:[%s8491_s1 + $0x4a0] sm:$0x11]  ;;  %v6826_v55 = vcombine.low %v49_v38, %v49_v38  ;;  %v7052_v56 = vcombine.low %v162_v39, %v274_v40  ;;  %v6843_v39 = vcombine.high %v57_v30, %v57_v30 }
  0x69   :  { %3357 = vmatprep.subr.bf16.mxu1 %v7039_v57  ;;  %v165_v57 = vld [vmem:[%s8491_s1 + $0x128] sm:$0xff]  ;;  %v7057_v62 = vcombine.high %v164_v53, %v276_v54 }
  0x6d   :  { %3256 = vmatmul.mubr.bf16.vlgmr.msra.gmra.mxu0 %v6808_v59  ;;  %v7054_v59 = vcombine.low %v163_v43, %v275_v44  ;;  %v59_v44 = vld [vmem:[%s8490_s0 + $0x158] sm:$0xff] }
  0x6e   :  { %3296 = vmatmul.mubr.bf16.vlgmr.msra.gmra.mxu1 %v6810_v63  ;;  %3318 = vmatpush1.bf16.xpose.msra.mxu0 %v7036_v0  ;;  %v7059_v63 = vcombine.high %v165_v57, %v277_v58  ;;  %v52_v0 = vld [vmem:[%s8490_s0 + $0x120] sm:$0xff] }
  0x6f   :  { %3358 = vmatpush1.bf16.xpose.msra.mxu1 %v7038_v3  ;;  %3335 = vmatprep.mubr.bf16.mxu0 %v6813_v4  ;;  %v166_v3 = vld [vmem:[%s8491_s1 + $0x130] sm:$0xff]  ;;  %v6833_v10 = vcombine.high %v52_v0, %v52_v0  ;;  %v6832_v15 = vcombine.low %v52_v0, %v52_v0  ;;  %v287_v0 = vld [vmem:[%s8491_s1 + $0x4f8] sm:$0x11] }
  0x70   :  { %3375 = vmatprep.mubr.bf16.mxu1 %v6815_v5  ;;  %3397 = vmatprep.subr.bf16.mxu0 %v7041_v6  ;;  %v278_v4 = vld [vmem:[%s8491_s1 + $0x4b0] sm:$0x11]  ;;  %v6830_v5 = vcombine.low %v51_v52, %v51_v52  ;;  %v7056_v6 = vcombine.low %v164_v53, %v276_v54  ;;  %v6847_v53 = vcombine.high %v59_v44, %v59_v44 }
  0x71   :  { %3437 = vmatprep.subr.bf16.mxu1 %v7043_v7  ;;  %v167_v7 = vld [vmem:[%s8491_s1 + $0x138] sm:$0xff]  ;;  %v7061_v12 = vcombine.high %v166_v3, %v278_v4 }
  0x75   :  { %3336 = vmatmul.mubr.bf16.vlgmr.msra.gmra.mxu0 %v6812_v9  ;;  %v7058_v9 = vcombine.low %v165_v57, %v277_v58  ;;  %v61_v58 = vld [vmem:[%s8490_s0 + $0x168] sm:$0xff] }
  0x76   :  { %3376 = vmatmul.mubr.bf16.vlgmr.msra.gmra.mxu1 %v6814_v13  ;;  %3398 = vmatpush1.bf16.xpose.msra.mxu0 %v7040_v14  ;;  %v7063_v13 = vcombine.high %v167_v7, %v279_v8  ;;  %v54_v14 = vld [vmem:[%s8490_s0 + $0x130] sm:$0xff] }
  0x77   :  { %3438 = vmatpush1.bf16.xpose.msra.mxu1 %v7042_v17  ;;  %3415 = vmatprep.mubr.bf16.mxu0 %v6817_v18  ;;  %v168_v17 = vld [vmem:[%s8491_s1 + $0x140] sm:$0xff]  ;;  %v6837_v24 = vcombine.high %v54_v14, %v54_v14  ;;  %v6836_v29 = vcombine.low %v54_v14, %v54_v14  ;;  %v289_v14 = vld [vmem:[%s8491_s1 + $0x508] sm:$0x11] }
  0x78   :  { %3455 = vmatprep.mubr.bf16.mxu1 %v6819_v19  ;;  %3477 = vmatprep.subr.bf16.mxu0 %v7045_v20  ;;  %v280_v18 = vld [vmem:[%s8491_s1 + $0x4c0] sm:$0x11]  ;;  %v6834_v19 = vcombine.low %v53_v2, %v53_v2  ;;  %v7060_v20 = vcombine.low %v166_v3, %v278_v4  ;;  %v6851_v3 = vcombine.high %v61_v58, %v61_v58 }
  0x79   :  { %3517 = vmatprep.subr.bf16.mxu1 %v7047_v21  ;;  %v169_v21 = vld [vmem:[%s8491_s1 + $0x148] sm:$0xff]  ;;  %v7065_v26 = vcombine.high %v168_v17, %v280_v18 }
  0x7d   :  { %3416 = vmatmul.mubr.bf16.vlgmr.msra.gmra.mxu0 %v6816_v23  ;;  %v7062_v23 = vcombine.low %v167_v7, %v279_v8  ;;  %v63_v8 = vld [vmem:[%s8490_s0 + $0x178] sm:$0xff] }
  0x7e   :  { %3456 = vmatmul.mubr.bf16.vlgmr.msra.gmra.mxu1 %v6818_v27  ;;  %3478 = vmatpush1.bf16.xpose.msra.mxu0 %v7044_v28  ;;  %v7067_v27 = vcombine.high %v169_v21, %v281_v22  ;;  %v56_v28 = vld [vmem:[%s8490_s0 + $0x140] sm:$0xff] }
  0x7f   :  { %3518 = vmatpush1.bf16.xpose.msra.mxu1 %v7046_v31  ;;  %3495 = vmatprep.mubr.bf16.mxu0 %v6821_v32  ;;  %v170_v31 = vld [vmem:[%s8491_s1 + $0x150] sm:$0xff]  ;;  %v6841_v38 = vcombine.high %v56_v28, %v56_v28  ;;  %v6840_v43 = vcombine.low %v56_v28, %v56_v28  ;;  %v291_v28 = vld [vmem:[%s8491_s1 + $0x518] sm:$0x11] }
  0x80   :  { %3535 = vmatprep.mubr.bf16.mxu1 %v6823_v33  ;;  %3557 = vmatprep.subr.bf16.mxu0 %v7049_v34  ;;  %v282_v32 = vld [vmem:[%s8491_s1 + $0x4d0] sm:$0x11]  ;;  %v6838_v33 = vcombine.low %v55_v16, %v55_v16  ;;  %v7064_v34 = vcombine.low %v168_v17, %v280_v18  ;;  %v6855_v17 = vcombine.high %v63_v8, %v63_v8 }
  0x81   :  { %3597 = vmatprep.subr.bf16.mxu1 %v7051_v35  ;;  %v171_v35 = vld [vmem:[%s8491_s1 + $0x158] sm:$0xff]  ;;  %v7069_v40 = vcombine.high %v170_v31, %v282_v32 }
  0x85   :  { %3496 = vmatmul.mubr.bf16.vlgmr.msra.gmra.mxu0 %v6820_v37  ;;  %v7066_v37 = vcombine.low %v169_v21, %v281_v22  ;;  %v65_v22 = vld [vmem:[%s8490_s0 + $0x188] sm:$0xff] }
  0x86   :  { %3536 = vmatmul.mubr.bf16.vlgmr.msra.gmra.mxu1 %v6822_v41  ;;  %3558 = vmatpush1.bf16.xpose.msra.mxu0 %v7048_v42  ;;  %v7071_v41 = vcombine.high %v171_v35, %v283_v36  ;;  %v58_v42 = vld [vmem:[%s8490_s0 + $0x150] sm:$0xff] }
  0x87   :  { %3598 = vmatpush1.bf16.xpose.msra.mxu1 %v7050_v45  ;;  %3575 = vmatprep.mubr.bf16.mxu0 %v6825_v46  ;;  %v172_v45 = vld [vmem:[%s8491_s1 + $0x160] sm:$0xff]  ;;  %v6845_v52 = vcombine.high %v58_v42, %v58_v42  ;;  %v6844_v57 = vcombine.low %v58_v42, %v58_v42  ;;  %v293_v42 = vld [vmem:[%s8491_s1 + $0x528] sm:$0x11] }
  0x88   :  { %3615 = vmatprep.mubr.bf16.mxu1 %v6827_v47  ;;  %3637 = vmatprep.subr.bf16.mxu0 %v7053_v48  ;;  %v284_v46 = vld [vmem:[%s8491_s1 + $0x4e0] sm:$0x11]  ;;  %v6842_v47 = vcombine.low %v57_v30, %v57_v30  ;;  %v7068_v48 = vcombine.low %v170_v31, %v282_v32  ;;  %v6859_v31 = vcombine.high %v65_v22, %v65_v22 }
  0x89   :  { %3677 = vmatprep.subr.bf16.mxu1 %v7055_v49  ;;  %v173_v49 = vld [vmem:[%s8491_s1 + $0x168] sm:$0xff]  ;;  %v7073_v54 = vcombine.high %v172_v45, %v284_v46 }
  0x8d   :  { %3576 = vmatmul.mubr.bf16.vlgmr.msra.gmra.mxu0 %v6824_v51  ;;  %v7070_v51 = vcombine.low %v171_v35, %v283_v36  ;;  %v67_v36 = vld [vmem:[%s8490_s0 + $0x198] sm:$0xff] }
  0x8e   :  { %3616 = vmatmul.mubr.bf16.vlgmr.msra.gmra.mxu1 %v6826_v55  ;;  %3638 = vmatpush1.bf16.xpose.msra.mxu0 %v7052_v56  ;;  %v7075_v55 = vcombine.high %v173_v49, %v285_v50  ;;  %v60_v56 = vld [vmem:[%s8490_s0 + $0x160] sm:$0xff] }
  0x8f   :  { %3678 = vmatpush1.bf16.xpose.msra.mxu1 %v7054_v59  ;;  %3655 = vmatprep.mubr.bf16.mxu0 %v6829_v60  ;;  %v174_v59 = vld [vmem:[%s8491_s1 + $0x170] sm:$0xff]  ;;  %v6849_v2 = vcombine.high %v60_v56, %v60_v56  ;;  %v6848_v7 = vcombine.low %v60_v56, %v60_v56 }
  0x90   :  { %3695 = vmatprep.mubr.bf16.mxu1 %v6831_v61  ;;  %3717 = vmatprep.subr.bf16.mxu0 %v7057_v62  ;;  %v286_v60 = vld [vmem:[%s8491_s1 + $0x4f0] sm:$0x11]  ;;  %v6846_v61 = vcombine.low %v59_v44, %v59_v44  ;;  %v7072_v62 = vcombine.low %v172_v45, %v284_v46  ;;  %v6863_v46 = vcombine.high %v67_v36, %v67_v36 }
  0x91   :  { %3757 = vmatprep.subr.bf16.mxu1 %v7059_v63  ;;  %v175_v63 = vld [vmem:[%s8491_s1 + $0x178] sm:$0xff]  ;;  %v7077_v4 = vcombine.high %v174_v59, %v286_v60 }
  0x95   :  { %3656 = vmatmul.mubr.bf16.vlgmr.msra.gmra.mxu0 %v6828_v1  ;;  %v7074_v1 = vcombine.low %v173_v49, %v285_v50 }
  0x96   :  { %3696 = vmatmul.mubr.bf16.vlgmr.msra.gmra.mxu1 %v6830_v5  ;;  %3718 = vmatpush1.bf16.xpose.msra.mxu0 %v7056_v6  ;;  %v7079_v5 = vcombine.high %v175_v63, %v287_v0  ;;  %v62_v6 = vld [vmem:[%s8490_s0 + $0x170] sm:$0xff] }
  0x97   :  { %3758 = vmatpush1.bf16.xpose.msra.mxu1 %v7058_v9  ;;  %3735 = vmatprep.mubr.bf16.mxu0 %v6833_v10  ;;  %v176_v9 = vld [vmem:[%s8491_s1 + $0x180] sm:$0xff]  ;;  %v6853_v16 = vcombine.high %v62_v6, %v62_v6  ;;  %v6852_v21 = vcombine.low %v62_v6, %v62_v6 }
  0x98   :  { %3775 = vmatprep.mubr.bf16.mxu1 %v6835_v11  ;;  %3797 = vmatprep.subr.bf16.mxu0 %v7061_v12  ;;  %v288_v10 = vld [vmem:[%s8491_s1 + $0x500] sm:$0x11]  ;;  %v6850_v11 = vcombine.low %v61_v58, %v61_v58  ;;  %v7076_v12 = vcombine.low %v174_v59, %v286_v60  ;;  %v69_v58 = vld [vmem:[%s8490_s0 + $0x1a8] sm:$0xff]  ;;  %v182_v59 = vld [vmem:[%s8491_s1 + $0x1b0] sm:$0xff] }
  0x99   :  { %3837 = vmatprep.subr.bf16.mxu1 %v7063_v13  ;;  %v177_v13 = vld [vmem:[%s8491_s1 + $0x188] sm:$0xff]  ;;  %v7081_v18 = vcombine.high %v176_v9, %v288_v10  ;;  %v294_v60 = vld [vmem:[%s8491_s1 + $0x530] sm:$0x11]  ;;  %v6867_v6 = vcombine.high %v69_v58, %v69_v58 }
  0x9d   :  { %3736 = vmatmul.mubr.bf16.vlgmr.msra.gmra.mxu0 %v6832_v15  ;;  %v7078_v15 = vcombine.low %v175_v63, %v287_v0  ;;  %v183_v0 = vld [vmem:[%s8491_s1 + $0x1b8] sm:$0xff] }
  0x9e   :  { %3776 = vmatmul.mubr.bf16.vlgmr.msra.gmra.mxu1 %v6834_v19  ;;  %3798 = vmatpush1.bf16.xpose.msra.mxu0 %v7060_v20  ;;  %v7083_v19 = vcombine.high %v177_v13, %v289_v14  ;;  %v64_v20 = vld [vmem:[%s8490_s0 + $0x180] sm:$0xff] }
  0x9f   :  { %3838 = vmatpush1.bf16.xpose.msra.mxu1 %v7062_v23  ;;  %3815 = vmatprep.mubr.bf16.mxu0 %v6837_v24  ;;  %v178_v23 = vld [vmem:[%s8491_s1 + $0x190] sm:$0xff]  ;;  %v6857_v30 = vcombine.high %v64_v20, %v64_v20  ;;  %v6856_v35 = vcombine.low %v64_v20, %v64_v20  ;;  %v296_v20 = vld [vmem:[%s8491_s1 + $0x540] sm:$0x11] }
  0xa0   :  { %3855 = vmatprep.mubr.bf16.mxu1 %v6839_v25  ;;  %3877 = vmatprep.subr.bf16.mxu0 %v7065_v26  ;;  %v290_v24 = vld [vmem:[%s8491_s1 + $0x510] sm:$0x11]  ;;  %v6854_v25 = vcombine.low %v63_v8, %v63_v8  ;;  %v7080_v26 = vcombine.low %v176_v9, %v288_v10 }
  0xa1   :  { %3917 = vmatprep.subr.bf16.mxu1 %v7067_v27  ;;  %v179_v27 = vld [vmem:[%s8491_s1 + $0x198] sm:$0xff]  ;;  %v7085_v32 = vcombine.high %v178_v23, %v290_v24 }
  0xa2   :  { %v7086_v44 = vcombine.low %v179_v27, %v291_v28 }
  0xa5   :  { %3816 = vmatmul.mubr.bf16.vlgmr.msra.gmra.mxu0 %v6836_v29  ;;  %v7082_v29 = vcombine.low %v177_v13, %v289_v14 }
  0xa6   :  { %3856 = vmatmul.mubr.bf16.vlgmr.msra.gmra.mxu1 %v6838_v33  ;;  %3878 = vmatpush1.bf16.xpose.msra.mxu0 %v7064_v34  ;;  %v7087_v33 = vcombine.high %v179_v27, %v291_v28  ;;  %v66_v34 = vld [vmem:[%s8490_s0 + $0x190] sm:$0xff] }
  0xa7   :  { %3918 = vmatpush1.bf16.xpose.msra.mxu1 %v7066_v37  ;;  %3895 = vmatprep.mubr.bf16.mxu0 %v6841_v38  ;;  %v180_v37 = vld [vmem:[%s8491_s1 + $0x1a0] sm:$0xff]  ;;  %v6861_v45 = vcombine.high %v66_v34, %v66_v34 }
  0xa8   :  { %3935 = vmatprep.mubr.bf16.mxu1 %v6843_v39  ;;  %3957 = vmatprep.subr.bf16.mxu0 %v7069_v40  ;;  %v292_v38 = vld [vmem:[%s8491_s1 + $0x520] sm:$0x11]  ;;  %v6858_v39 = vcombine.low %v65_v22, %v65_v22  ;;  %v7084_v40 = vcombine.low %v178_v23, %v290_v24  ;;  %v6866_v22 = vcombine.low %v69_v58, %v69_v58  ;;  %v185_v24 = vld [vmem:[%s8491_s1 + $0x1c8] sm:$0xff] }
  0xa9   :  { %3997 = vmatprep.subr.bf16.mxu1 %v7071_v41  ;;  %v181_v41 = vld [vmem:[%s8491_s1 + $0x1a8] sm:$0xff]  ;;  %v7088_v63 = vcombine.low %v180_v37, %v292_v38  ;;  %v7092_v23 = vcombine.low %v182_v59, %v294_v60 }
  0xaa   :  { %v7091_v49 = vcombine.high %v181_v41, %v293_v42 }
  0xad   :  { %3896 = vmatmul.mubr.bf16.vlgmr.msra.gmra.mxu0 %v6840_v43  ;;  %v6759_v43 = vld [vmem:[%s8492_s2] ss:$0 sm:$0xff] }
  0xae   :  { %3936 = vmatmul.mubr.bf16.vlgmr.msra.gmra.mxu1 %v6842_v47  ;;  %3958 = vmatpush1.bf16.xpose.msra.mxu0 %v7068_v48  ;;  %v7089_v47 = vcombine.high %v180_v37, %v292_v38 }
  0xaf   :  { %3998 = vmatpush1.bf16.xpose.msra.mxu1 %v7070_v51  ;;  %3975 = vmatprep.mubr.bf16.mxu0 %v6845_v52 }
  0xb0   :  { %4015 = vmatprep.mubr.bf16.mxu1 %v6847_v53  ;;  %4037 = vmatprep.subr.bf16.mxu0 %v7073_v54 }
  0xb1   :  { %4077 = vmatprep.subr.bf16.mxu1 %v7075_v55  ;;  %v68_v55 = vld [vmem:[%s8490_s0 + $0x1a0] sm:$0xff] }
  0xb5   :  { %3976 = vmatmul.mubr.bf16.vlgmr.msra.gmra.mxu0 %v6844_v57  ;;  %v6860_v57 = vcombine.low %v66_v34, %v66_v34 }
  0xb6   :  { %4016 = vmatmul.mubr.bf16.vlgmr.msra.gmra.mxu1 %v6846_v61  ;;  %4038 = vmatpush1.bf16.xpose.msra.mxu0 %v7072_v62  ;;  %v6862_v62 = vcombine.low %v67_v36, %v67_v36 }
  0xb7   :  { %4078 = vmatpush1.bf16.xpose.msra.mxu1 %v7074_v1  ;;  %4055 = vmatprep.mubr.bf16.mxu0 %v6849_v2  ;;  %v295_v1 = vld [vmem:[%s8491_s1 + $0x538] sm:$0x11] }
  0xb8   :  { %4095 = vmatprep.mubr.bf16.mxu1 %v6851_v3  ;;  %4117 = vmatprep.subr.bf16.mxu0 %v7077_v4  ;;  %v7090_v3 = vcombine.low %v181_v41, %v293_v42  ;;  %v6865_v4 = vcombine.high %v68_v55, %v68_v55  ;;  %v7095_v9 = vcombine.high %v183_v0, %v295_v1  ;;  %v73_v42 = vld [vmem:[%s8490_s0 + $0x1c8] sm:$0xff] }
  0xb9   :  { %4157 = vmatprep.subr.bf16.mxu1 %v7079_v5  ;;  %v7094_v27 = vcombine.low %v183_v0, %v295_v1 }
  0xbd   :  { %4056 = vmatmul.mubr.bf16.vlgmr.msra.gmra.mxu0 %v6848_v7  ;;  %v7093_v7 = vcombine.high %v182_v59, %v294_v60 }
  0xbe   :  { %4096 = vmatmul.mubr.bf16.vlgmr.msra.gmra.mxu1 %v6850_v11  ;;  %4118 = vmatpush1.bf16.xpose.msra.mxu0 %v7076_v12 }
  0xbf   :  { %4158 = vmatpush1.bf16.xpose.msra.mxu1 %v7078_v15  ;;  %4135 = vmatprep.mubr.bf16.mxu0 %v6853_v16  ;;  %v70_v15 = vld [vmem:[%s8490_s0 + $0x1b0] sm:$0xff] }
  0xc0   :  { %4175 = vmatprep.mubr.bf16.mxu1 %v6855_v17  ;;  %4197 = vmatprep.subr.bf16.mxu0 %v7081_v18  ;;  %v6864_v17 = vcombine.low %v68_v55, %v68_v55  ;;  %v71_v18 = vld [vmem:[%s8490_s0 + $0x1b8] sm:$0xff]  ;;  %v6869_v28 = vcombine.high %v70_v15, %v70_v15  ;;  %v6868_v41 = vcombine.low %v70_v15, %v70_v15 }
  0xc1   :  { %4237 = vmatprep.subr.bf16.mxu1 %v7083_v19  ;;  %v184_v19 = vld [vmem:[%s8491_s1 + $0x1c0] sm:$0xff] }
  0xc5   :  { %4136 = vmatmul.mubr.bf16.vlgmr.msra.gmra.mxu0 %v6852_v21 }
  0xc6   :  { %4176 = vmatmul.mubr.bf16.vlgmr.msra.gmra.mxu1 %v6854_v25  ;;  %4198 = vmatpush1.bf16.xpose.msra.mxu0 %v7080_v26  ;;  %v297_v25 = vld [vmem:[%s8491_s1 + $0x548] sm:$0x11] }
  0xc7   :  { %4238 = vmatpush1.bf16.xpose.msra.mxu1 %v7082_v29  ;;  %4215 = vmatprep.mubr.bf16.mxu0 %v6857_v30  ;;  %v6871_v30 = vcombine.high %v71_v18, %v71_v18 }
  0xc8   :  { %4255 = vmatprep.mubr.bf16.mxu1 %v6859_v31  ;;  %4277 = vmatprep.subr.bf16.mxu0 %v7085_v32  ;;  %v7097_v31 = vcombine.high %v184_v19, %v296_v20 }
  0xc9   :  { %4317 = vmatprep.subr.bf16.mxu1 %v7087_v33  ;;  %v7099_v33 = vcombine.high %v185_v24, %v297_v25 }
  0xcd   :  { %v2297_v48 = vpop.f32.mrf.mxu0  ;;  %4216 = vmatmul.mubr.bf16.vlgmr.msra.gmra.mxu0 %v6856_v35  ;;  %v2337_v51 = vpop.f32.mrf.mxu1 }
  0xce   :  { %v2298_v50 = vadd.f32 %v6759_v43, %v2297_v48  ;;  %4256 = vmatmul.mubr.bf16.vlgmr.msra.gmra.mxu1 %v6858_v39  ;;  %4278 = vmatpush1.bf16.xpose.msra.mxu0 %v7084_v40  ;;  %v72_v39 = vld [vmem:[%s8490_s0 + $0x1c0] sm:$0xff]  ;;  %v186_v43 = vld [vmem:[%s8491_s1 + $0x1d0] sm:$0xff]  ;;  %v187_v48 = vld [vmem:[%s8491_s1 + $0x1d8] sm:$0xff] }
  0xcf   :  { %4318 = vmatpush1.bf16.xpose.msra.mxu1 %v7086_v44  ;;  %v2299_v52 = vpop.f32.mrf.mxu0  ;;  %4295 = vmatprep.mubr.bf16.mxu0 %v6861_v45  ;;  %v2339_v54 = vpop.f32.mrf.mxu1  ;;  %v298_v44 = vld [vmem:[%s8491_s1 + $0x550] sm:$0x11]  ;;  %v6872_v1 = vcombine.low %v72_v39, %v72_v39 }
  0xd0   :  { %v2338_v53 = vadd.f32 %v2337_v51, %v2298_v50  ;;  %4335 = vmatprep.mubr.bf16.mxu1 %v6863_v46  ;;  %4357 = vmatprep.subr.bf16.mxu0 %v7089_v47  ;;  %v6870_v46 = vcombine.low %v71_v18, %v71_v18  ;;  %v7096_v47 = vcombine.low %v184_v19, %v296_v20 }
  0xd1   :  { %v2300_v56 = vpop.f32.mrf.mxu0  ;;  %4397 = vmatprep.subr.bf16.mxu1 %v7091_v49  ;;  %v2340_v61 = vpop.f32.mrf.mxu1  ;;  %v299_v49 = vld [vmem:[%s8491_s1 + $0x558] sm:$0x11]  ;;  %v7098_v51 = vcombine.low %v185_v24, %v297_v25  ;;  %v6873_v52 = vcombine.high %v72_v39, %v72_v39  ;;  %v6875_v54 = vcombine.high %v73_v42, %v73_v42  ;;  %v7101_v55 = vcombine.high %v186_v43, %v298_v44 }
  0xd3   :  { %v2301_v2 = vpop.f32.mrf.mxu0  ;;  %v2341_v5 = vpop.f32.mrf.mxu1 }
  0xd4   :  { %v75_v2 = vld [vmem:[%s8490_s0 + $0x1d8] sm:$0xff] }
  0xd5   :  { %v2377_v8 = vpop.f32.mrf.mxu0  ;;  %4296 = vmatmul.mubr.bf16.vlgmr.msra.gmra.mxu0 %v6860_v57  ;;  %v2417_v11 = vpop.f32.mrf.mxu1  ;;  %v7103_v57 = vcombine.high %v187_v48, %v299_v49 }
  0xd6   :  { %v2378_v10 = vadd.f32 %v2377_v8, %v2338_v53  ;;  %4336 = vmatmul.mubr.bf16.vlgmr.msra.gmra.mxu1 %v6862_v62  ;;  %4358 = vmatpush1.bf16.xpose.msra.mxu0 %v7088_v63  ;;  %v74_v63 = vld [vmem:[%s8490_s0 + $0x1d0] sm:$0xff]  ;;  %v189_v8 = vld [vmem:[%s8491_s1 + $0x1e8] sm:$0xff] }
  0xd7   :  { %4398 = vmatpush1.bf16.xpose.msra.mxu1 %v7090_v3  ;;  %v2379_v12 = vpop.f32.mrf.mxu0  ;;  %4375 = vmatprep.mubr.bf16.mxu0 %v6865_v4  ;;  %v2419_v14 = vpop.f32.mrf.mxu1  ;;  %v188_v3 = vld [vmem:[%s8491_s1 + $0x1e0] sm:$0xff]  ;;  %v6876_v25 = vcombine.low %v74_v63, %v74_v63 }
  0xd8   :  { %v2418_v13 = vadd.f32 %v2417_v11, %v2378_v10  ;;  %4415 = vmatprep.mubr.bf16.mxu1 %v6867_v6  ;;  %4437 = vmatprep.subr.bf16.mxu0 %v7093_v7  ;;  %v300_v4 = vld [vmem:[%s8491_s1 + $0x560] sm:$0x11]  ;;  %v6874_v6 = vcombine.low %v73_v42, %v73_v42  ;;  %v7100_v7 = vcombine.low %v186_v43, %v298_v44 }
  0xd9   :  { %v2380_v16 = vpop.f32.mrf.mxu0  ;;  %4477 = vmatprep.subr.bf16.mxu1 %v7095_v9  ;;  %v2420_v21 = vpop.f32.mrf.mxu1  ;;  %v301_v9 = vld [vmem:[%s8491_s1 + $0x568] sm:$0x11]  ;;  %v7102_v11 = vcombine.low %v187_v48, %v299_v49  ;;  %v6877_v12 = vcombine.high %v74_v63, %v74_v63  ;;  %v6879_v14 = vcombine.high %v75_v2, %v75_v2  ;;  %v7105_v15 = vcombine.high %v188_v3, %v300_v4 }
  0xdb   :  { %v2381_v26 = vpop.f32.mrf.mxu0  ;;  %v2421_v29 = vpop.f32.mrf.mxu1 }
  0xdc   :  { %v77_v26 = vld [vmem:[%s8490_s0 + $0x1e8] sm:$0xff] }
  0xdd   :  { %v2457_v32 = vpop.f32.mrf.mxu0  ;;  %4376 = vmatmul.mubr.bf16.vlgmr.msra.gmra.mxu0 %v6864_v17  ;;  %v2497_v35 = vpop.f32.mrf.mxu1  ;;  %v7107_v17 = vcombine.high %v189_v8, %v301_v9 }
  0xde   :  { %v2458_v34 = vadd.f32 %v2457_v32, %v2418_v13  ;;  %4416 = vmatmul.mubr.bf16.vlgmr.msra.gmra.mxu1 %v6866_v22  ;;  %4438 = vmatpush1.bf16.xpose.msra.mxu0 %v7092_v23  ;;  %v76_v23 = vld [vmem:[%s8490_s0 + $0x1e0] sm:$0xff]  ;;  %v191_v32 = vld [vmem:[%s8491_s1 + $0x1f8] sm:$0xff] }
  0xdf   :  { %4478 = vmatpush1.bf16.xpose.msra.mxu1 %v7094_v27  ;;  %v2459_v36 = vpop.f32.mrf.mxu0  ;;  %4455 = vmatprep.mubr.bf16.mxu0 %v6869_v28  ;;  %v2499_v38 = vpop.f32.mrf.mxu1  ;;  %v190_v27 = vld [vmem:[%s8491_s1 + $0x1f0] sm:$0xff]  ;;  %v6880_v49 = vcombine.low %v76_v23, %v76_v23 }
  0xe0   :  { %v2498_v37 = vadd.f32 %v2497_v35, %v2458_v34  ;;  %4495 = vmatprep.mubr.bf16.mxu1 %v6871_v30  ;;  %4517 = vmatprep.subr.bf16.mxu0 %v7097_v31  ;;  %v302_v28 = vld [vmem:[%s8491_s1 + $0x570] sm:$0x11]  ;;  %v6878_v30 = vcombine.low %v75_v2, %v75_v2  ;;  %v7104_v31 = vcombine.low %v188_v3, %v300_v4 }
  0xe1   :  { %v2460_v40 = vpop.f32.mrf.mxu0  ;;  %4557 = vmatprep.subr.bf16.mxu1 %v7099_v33  ;;  %v2500_v45 = vpop.f32.mrf.mxu1  ;;  %v303_v33 = vld [vmem:[%s8491_s1 + $0x578] sm:$0x11]  ;;  %v7106_v35 = vcombine.low %v189_v8, %v301_v9  ;;  %v6881_v36 = vcombine.high %v76_v23, %v76_v23  ;;  %v6883_v38 = vcombine.high %v77_v26, %v77_v26  ;;  %v7109_v39 = vcombine.high %v190_v27, %v302_v28 }
  0xe3   :  { %v2461_v50 = vpop.f32.mrf.mxu0  ;;  %v2501_v53 = vpop.f32.mrf.mxu1 }
  0xe4   :  { %v79_v50 = vld [vmem:[%s8490_s0 + $0x1f8] sm:$0xff] }
  0xe5   :  { %v2537_v56 = vpop.f32.mrf.mxu0  ;;  %4456 = vmatmul.mubr.bf16.vlgmr.msra.gmra.mxu0 %v6868_v41  ;;  %v2577_v59 = vpop.f32.mrf.mxu1  ;;  %v7111_v41 = vcombine.high %v191_v32, %v303_v33 }
  0xe6   :  { %v2538_v58 = vadd.f32 %v2537_v56, %v2498_v37  ;;  %4496 = vmatmul.mubr.bf16.vlgmr.msra.gmra.mxu1 %v6870_v46  ;;  %4518 = vmatpush1.bf16.xpose.msra.mxu0 %v7096_v47  ;;  %v78_v47 = vld [vmem:[%s8490_s0 + $0x1f0] sm:$0xff]  ;;  %v193_v56 = vld [vmem:[%s8491_s1 + $0x208] sm:$0xff] }
  0xe7   :  { %4558 = vmatpush1.bf16.xpose.msra.mxu1 %v7098_v51  ;;  %v2539_v60 = vpop.f32.mrf.mxu0  ;;  %4535 = vmatprep.mubr.bf16.mxu0 %v6873_v52  ;;  %v2579_v62 = vpop.f32.mrf.mxu1  ;;  %v192_v51 = vld [vmem:[%s8491_s1 + $0x200] sm:$0xff]  ;;  %v6884_v9 = vcombine.low %v78_v47, %v78_v47 }
  0xe8   :  { %v2578_v61 = vadd.f32 %v2577_v59, %v2538_v58  ;;  %4575 = vmatprep.mubr.bf16.mxu1 %v6875_v54  ;;  %4597 = vmatprep.subr.bf16.mxu0 %v7101_v55  ;;  %v304_v52 = vld [vmem:[%s8491_s1 + $0x580] sm:$0x11]  ;;  %v6882_v54 = vcombine.low %v77_v26, %v77_v26  ;;  %v7108_v55 = vcombine.low %v190_v27, %v302_v28 }
  0xe9   :  { %v2540_v0 = vpop.f32.mrf.mxu0  ;;  %4637 = vmatprep.subr.bf16.mxu1 %v7103_v57  ;;  %v2580_v5 = vpop.f32.mrf.mxu1  ;;  %v305_v57 = vld [vmem:[%s8491_s1 + $0x588] sm:$0x11]  ;;  %v7110_v59 = vcombine.low %v191_v32, %v303_v33  ;;  %v6885_v60 = vcombine.high %v78_v47, %v78_v47  ;;  %v6887_v62 = vcombine.high %v79_v50, %v79_v50  ;;  %v7113_v63 = vcombine.high %v192_v51, %v304_v52 }
  0xeb   :  { %v2541_v10 = vpop.f32.mrf.mxu0  ;;  %v2581_v13 = vpop.f32.mrf.mxu1 }
  0xec   :  { %v81_v10 = vld [vmem:[%s8490_s0 + $0x208] sm:$0xff] }
  0xed   :  { %v2617_v16 = vpop.f32.mrf.mxu0  ;;  %4536 = vmatmul.mubr.bf16.vlgmr.msra.gmra.mxu0 %v6872_v1  ;;  %v7115_v1 = vcombine.high %v193_v56, %v305_v57 }
  0xee   :  { %v2618_v18 = vadd.f32 %v2617_v16, %v2578_v61  ;;  %v2657_v19 = vpop.f32.mrf.mxu1  ;;  %4576 = vmatmul.mubr.bf16.vlgmr.msra.gmra.mxu1 %v6874_v6  ;;  %4598 = vmatpush1.bf16.xpose.msra.mxu0 %v7100_v7  ;;  %v80_v7 = vld [vmem:[%s8490_s0 + $0x200] sm:$0xff]  ;;  %v195_v16 = vld [vmem:[%s8491_s1 + $0x218] sm:$0xff] }
  0xef   :  { %4638 = vmatpush1.bf16.xpose.msra.mxu1 %v7102_v11  ;;  %v2619_v20 = vpop.f32.mrf.mxu0  ;;  %4615 = vmatprep.mubr.bf16.mxu0 %v6877_v12  ;;  %v194_v11 = vld [vmem:[%s8491_s1 + $0x210] sm:$0xff]  ;;  %v6888_v33 = vcombine.low %v80_v7, %v80_v7 }
  0xf0   :  { %v2658_v21 = vadd.f32 %v2657_v19, %v2618_v18  ;;  %v2659_v22 = vpop.f32.mrf.mxu1  ;;  %4655 = vmatprep.mubr.bf16.mxu1 %v6879_v14  ;;  %4677 = vmatprep.subr.bf16.mxu0 %v7105_v15  ;;  %v306_v12 = vld [vmem:[%s8491_s1 + $0x590] sm:$0x11]  ;;  %v6886_v14 = vcombine.low %v79_v50, %v79_v50  ;;  %v7112_v15 = vcombine.low %v192_v51, %v304_v52 }
  0xf1   :  { %v2620_v24 = vpop.f32.mrf.mxu0  ;;  %4717 = vmatprep.subr.bf16.mxu1 %v7107_v17  ;;  %v307_v17 = vld [vmem:[%s8491_s1 + $0x598] sm:$0x11]  ;;  %v7114_v19 = vcombine.low %v193_v56, %v305_v57  ;;  %v6889_v20 = vcombine.high %v80_v7, %v80_v7  ;;  %v6891_v22 = vcombine.high %v81_v10, %v81_v10  ;;  %v7117_v23 = vcombine.high %v194_v11, %v306_v12 }
  0xf2   :  { %v2660_v29 = vpop.f32.mrf.mxu1 }
  0xf3   :  { %v2621_v34 = vpop.f32.mrf.mxu0 }
  0xf4   :  { %v2661_v37 = vpop.f32.mrf.mxu1  ;;  %v83_v34 = vld [vmem:[%s8490_s0 + $0x218] sm:$0xff] }
  0xf5   :  { %v2697_v40 = vpop.f32.mrf.mxu0  ;;  %4616 = vmatmul.mubr.bf16.vlgmr.msra.gmra.mxu0 %v6876_v25  ;;  %v7119_v25 = vcombine.high %v195_v16, %v307_v17 }
  0xf6   :  { %v2698_v42 = vadd.f32 %v2697_v40, %v2658_v21  ;;  %v2737_v43 = vpop.f32.mrf.mxu1  ;;  %4656 = vmatmul.mubr.bf16.vlgmr.msra.gmra.mxu1 %v6878_v30  ;;  %4678 = vmatpush1.bf16.xpose.msra.mxu0 %v7104_v31  ;;  %v82_v31 = vld [vmem:[%s8490_s0 + $0x210] sm:$0xff]  ;;  %v197_v40 = vld [vmem:[%s8491_s1 + $0x228] sm:$0xff] }
  0xf7   :  { %4718 = vmatpush1.bf16.xpose.msra.mxu1 %v7106_v35  ;;  %v2699_v44 = vpop.f32.mrf.mxu0  ;;  %4695 = vmatprep.mubr.bf16.mxu0 %v6881_v36  ;;  %v196_v35 = vld [vmem:[%s8491_s1 + $0x220] sm:$0xff]  ;;  %v6892_v57 = vcombine.low %v82_v31, %v82_v31 }
  0xf8   :  { %v2738_v45 = vadd.f32 %v2737_v43, %v2698_v42  ;;  %v2739_v46 = vpop.f32.mrf.mxu1  ;;  %4735 = vmatprep.mubr.bf16.mxu1 %v6883_v38  ;;  %4757 = vmatprep.subr.bf16.mxu0 %v7109_v39  ;;  %v308_v36 = vld [vmem:[%s8491_s1 + $0x5a0] sm:$0x11]  ;;  %v6890_v38 = vcombine.low %v81_v10, %v81_v10  ;;  %v7116_v39 = vcombine.low %v194_v11, %v306_v12 }
  0xf9   :  { %v2700_v48 = vpop.f32.mrf.mxu0  ;;  %4797 = vmatprep.subr.bf16.mxu1 %v7111_v41  ;;  %v309_v41 = vld [vmem:[%s8491_s1 + $0x5a8] sm:$0x11]  ;;  %v7118_v43 = vcombine.low %v195_v16, %v307_v17  ;;  %v6893_v44 = vcombine.high %v82_v31, %v82_v31  ;;  %v6895_v46 = vcombine.high %v83_v34, %v83_v34  ;;  %v7121_v47 = vcombine.high %v196_v35, %v308_v36 }
  0xfa   :  { %v2740_v53 = vpop.f32.mrf.mxu1 }
  0xfb   :  { %v2701_v58 = vpop.f32.mrf.mxu0 }
  0xfc   :  { %v2741_v61 = vpop.f32.mrf.mxu1  ;;  %v85_v58 = vld [vmem:[%s8490_s0 + $0x228] sm:$0xff] }
  0xfd   :  { %v2777_v0 = vpop.f32.mrf.mxu0  ;;  %4696 = vmatmul.mubr.bf16.vlgmr.msra.gmra.mxu0 %v6880_v49  ;;  %v7123_v49 = vcombine.high %v197_v40, %v309_v41 }
  0xfe   :  { %v2778_v2 = vadd.f32 %v2777_v0, %v2738_v45  ;;  %v2817_v3 = vpop.f32.mrf.mxu1  ;;  %4736 = vmatmul.mubr.bf16.vlgmr.msra.gmra.mxu1 %v6882_v54  ;;  %4758 = vmatpush1.bf16.xpose.msra.mxu0 %v7108_v55  ;;  %v84_v55 = vld [vmem:[%s8490_s0 + $0x220] sm:$0xff]  ;;  %v199_v0 = vld [vmem:[%s8491_s1 + $0x238] sm:$0xff] }
  0xff   :  { %4798 = vmatpush1.bf16.xpose.msra.mxu1 %v7110_v59  ;;  %v2779_v4 = vpop.f32.mrf.mxu0  ;;  %4775 = vmatprep.mubr.bf16.mxu0 %v6885_v60  ;;  %v198_v59 = vld [vmem:[%s8491_s1 + $0x230] sm:$0xff]  ;;  %v6896_v17 = vcombine.low %v84_v55, %v84_v55 }
 0x100   :  { %v2818_v5 = vadd.f32 %v2817_v3, %v2778_v2  ;;  %v2819_v6 = vpop.f32.mrf.mxu1  ;;  %4815 = vmatprep.mubr.bf16.mxu1 %v6887_v62  ;;  %4837 = vmatprep.subr.bf16.mxu0 %v7113_v63  ;;  %v310_v60 = vld [vmem:[%s8491_s1 + $0x5b0] sm:$0x11]  ;;  %v6894_v62 = vcombine.low %v83_v34, %v83_v34  ;;  %v7120_v63 = vcombine.low %v196_v35, %v308_v36 }
 0x101   :  { %v2780_v8 = vpop.f32.mrf.mxu0  ;;  %4877 = vmatprep.subr.bf16.mxu1 %v7115_v1  ;;  %v311_v1 = vld [vmem:[%s8491_s1 + $0x5b8] sm:$0x11]  ;;  %v7122_v3 = vcombine.low %v197_v40, %v309_v41  ;;  %v6897_v4 = vcombine.high %v84_v55, %v84_v55  ;;  %v6899_v6 = vcombine.high %v85_v58, %v85_v58  ;;  %v7125_v7 = vcombine.high %v198_v59, %v310_v60 }
 0x102   :  { %v2820_v13 = vpop.f32.mrf.mxu1 }
 0x103   :  { %v2781_v18 = vpop.f32.mrf.mxu0 }
 0x104   :  { %v2821_v21 = vpop.f32.mrf.mxu1  ;;  %v87_v18 = vld [vmem:[%s8490_s0 + $0x238] sm:$0xff] }
 0x105   :  { %v2857_v24 = vpop.f32.mrf.mxu0  ;;  %4776 = vmatmul.mubr.bf16.vlgmr.msra.gmra.mxu0 %v6884_v9  ;;  %v7127_v9 = vcombine.high %v199_v0, %v311_v1 }
 0x106   :  { %v2858_v26 = vadd.f32 %v2857_v24, %v2818_v5  ;;  %v2897_v27 = vpop.f32.mrf.mxu1  ;;  %4816 = vmatmul.mubr.bf16.vlgmr.msra.gmra.mxu1 %v6886_v14  ;;  %4838 = vmatpush1.bf16.xpose.msra.mxu0 %v7112_v15  ;;  %v86_v15 = vld [vmem:[%s8490_s0 + $0x230] sm:$0xff]  ;;  %v201_v24 = vld [vmem:[%s8491_s1 + $0x248] sm:$0xff] }
 0x107   :  { %4878 = vmatpush1.bf16.xpose.msra.mxu1 %v7114_v19  ;;  %v2859_v28 = vpop.f32.mrf.mxu0  ;;  %4855 = vmatprep.mubr.bf16.mxu0 %v6889_v20  ;;  %v200_v19 = vld [vmem:[%s8491_s1 + $0x240] sm:$0xff]  ;;  %v6900_v41 = vcombine.low %v86_v15, %v86_v15 }
 0x108   :  { %v2898_v29 = vadd.f32 %v2897_v27, %v2858_v26  ;;  %v2899_v30 = vpop.f32.mrf.mxu1  ;;  %4895 = vmatprep.mubr.bf16.mxu1 %v6891_v22  ;;  %4917 = vmatprep.subr.bf16.mxu0 %v7117_v23  ;;  %v312_v20 = vld [vmem:[%s8491_s1 + $0x5c0] sm:$0x11]  ;;  %v6898_v22 = vcombine.low %v85_v58, %v85_v58  ;;  %v7124_v23 = vcombine.low %v198_v59, %v310_v60 }
 0x109   :  { %v2860_v32 = vpop.f32.mrf.mxu0  ;;  %4957 = vmatprep.subr.bf16.mxu1 %v7119_v25  ;;  %v313_v25 = vld [vmem:[%s8491_s1 + $0x5c8] sm:$0x11]  ;;  %v7126_v27 = vcombine.low %v199_v0, %v311_v1  ;;  %v6901_v28 = vcombine.high %v86_v15, %v86_v15  ;;  %v6903_v30 = vcombine.high %v87_v18, %v87_v18  ;;  %v7129_v31 = vcombine.high %v200_v19, %v312_v20 }
 0x10a   :  { %v2900_v37 = vpop.f32.mrf.mxu1 }
 0x10b   :  { %v2861_v42 = vpop.f32.mrf.mxu0 }
 0x10c   :  { %v2901_v45 = vpop.f32.mrf.mxu1  ;;  %v89_v42 = vld [vmem:[%s8490_s0 + $0x248] sm:$0xff] }
 0x10d   :  { %v2937_v48 = vpop.f32.mrf.mxu0  ;;  %4856 = vmatmul.mubr.bf16.vlgmr.msra.gmra.mxu0 %v6888_v33  ;;  %v7131_v33 = vcombine.high %v201_v24, %v313_v25 }
 0x10e   :  { %v2938_v50 = vadd.f32 %v2937_v48, %v2898_v29  ;;  %v2977_v51 = vpop.f32.mrf.mxu1  ;;  %4896 = vmatmul.mubr.bf16.vlgmr.msra.gmra.mxu1 %v6890_v38  ;;  %4918 = vmatpush1.bf16.xpose.msra.mxu0 %v7116_v39  ;;  %v88_v39 = vld [vmem:[%s8490_s0 + $0x240] sm:$0xff]  ;;  %v203_v48 = vld [vmem:[%s8491_s1 + $0x258] sm:$0xff] }
 0x10f   :  { %4958 = vmatpush1.bf16.xpose.msra.mxu1 %v7118_v43  ;;  %v2939_v52 = vpop.f32.mrf.mxu0  ;;  %4935 = vmatprep.mubr.bf16.mxu0 %v6893_v44  ;;  %v202_v43 = vld [vmem:[%s8491_s1 + $0x250] sm:$0xff]  ;;  %v6904_v1 = vcombine.low %v88_v39, %v88_v39 }
 0x110   :  { %v2978_v53 = vadd.f32 %v2977_v51, %v2938_v50  ;;  %v2979_v54 = vpop.f32.mrf.mxu1  ;;  %4975 = vmatprep.mubr.bf16.mxu1 %v6895_v46  ;;  %4997 = vmatprep.subr.bf16.mxu0 %v7121_v47  ;;  %v314_v44 = vld [vmem:[%s8491_s1 + $0x5d0] sm:$0x11]  ;;  %v6902_v46 = vcombine.low %v87_v18, %v87_v18  ;;  %v7128_v47 = vcombine.low %v200_v19, %v312_v20 }
 0x111   :  { %v2940_v56 = vpop.f32.mrf.mxu0  ;;  %5037 = vmatprep.subr.bf16.mxu1 %v7123_v49  ;;  %v315_v49 = vld [vmem:[%s8491_s1 + $0x5d8] sm:$0x11]  ;;  %v7130_v51 = vcombine.low %v201_v24, %v313_v25  ;;  %v6905_v52 = vcombine.high %v88_v39, %v88_v39  ;;  %v6907_v54 = vcombine.high %v89_v42, %v89_v42  ;;  %v7133_v55 = vcombine.high %v202_v43, %v314_v44 }
 0x112   :  { %v2980_v61 = vpop.f32.mrf.mxu1 }
 0x113   :  { %v2941_v2 = vpop.f32.mrf.mxu0 }
 0x114   :  { %v2981_v5 = vpop.f32.mrf.mxu1  ;;  %v91_v2 = vld [vmem:[%s8490_s0 + $0x258] sm:$0xff] }
 0x115   :  { %v3017_v8 = vpop.f32.mrf.mxu0  ;;  %4936 = vmatmul.mubr.bf16.vlgmr.msra.gmra.mxu0 %v6892_v57  ;;  %v7135_v57 = vcombine.high %v203_v48, %v315_v49 }
 0x116   :  { %v3018_v10 = vadd.f32 %v3017_v8, %v2978_v53  ;;  %v3057_v11 = vpop.f32.mrf.mxu1  ;;  %4976 = vmatmul.mubr.bf16.vlgmr.msra.gmra.mxu1 %v6894_v62  ;;  %4998 = vmatpush1.bf16.xpose.msra.mxu0 %v7120_v63  ;;  %v90_v63 = vld [vmem:[%s8490_s0 + $0x250] sm:$0xff]  ;;  %v205_v8 = vld [vmem:[%s8491_s1 + $0x268] sm:$0xff] }
 0x117   :  { %5038 = vmatpush1.bf16.xpose.msra.mxu1 %v7122_v3  ;;  %v3019_v12 = vpop.f32.mrf.mxu0  ;;  %5015 = vmatprep.mubr.bf16.mxu0 %v6897_v4  ;;  %v204_v3 = vld [vmem:[%s8491_s1 + $0x260] sm:$0xff]  ;;  %v6908_v25 = vcombine.low %v90_v63, %v90_v63 }
 0x118   :  { %v3058_v13 = vadd.f32 %v3057_v11, %v3018_v10  ;;  %v3059_v14 = vpop.f32.mrf.mxu1  ;;  %5055 = vmatprep.mubr.bf16.mxu1 %v6899_v6  ;;  %5077 = vmatprep.subr.bf16.mxu0 %v7125_v7  ;;  %v316_v4 = vld [vmem:[%s8491_s1 + $0x5e0] sm:$0x11]  ;;  %v6906_v6 = vcombine.low %v89_v42, %v89_v42  ;;  %v7132_v7 = vcombine.low %v202_v43, %v314_v44 }
 0x119   :  { %v3020_v16 = vpop.f32.mrf.mxu0  ;;  %5117 = vmatprep.subr.bf16.mxu1 %v7127_v9  ;;  %v317_v9 = vld [vmem:[%s8491_s1 + $0x5e8] sm:$0x11]  ;;  %v7134_v11 = vcombine.low %v203_v48, %v315_v49  ;;  %v6909_v12 = vcombine.high %v90_v63, %v90_v63  ;;  %v6911_v14 = vcombine.high %v91_v2, %v91_v2  ;;  %v7137_v15 = vcombine.high %v204_v3, %v316_v4 }
 0x11a   :  { %v3060_v21 = vpop.f32.mrf.mxu1 }
 0x11b   :  { %v3021_v26 = vpop.f32.mrf.mxu0 }
 0x11c   :  { %v3061_v29 = vpop.f32.mrf.mxu1  ;;  %v93_v26 = vld [vmem:[%s8490_s0 + $0x268] sm:$0xff] }
 0x11d   :  { %v3097_v32 = vpop.f32.mrf.mxu0  ;;  %5016 = vmatmul.mubr.bf16.vlgmr.msra.gmra.mxu0 %v6896_v17  ;;  %v7139_v17 = vcombine.high %v205_v8, %v317_v9 }
 0x11e   :  { %v3098_v34 = vadd.f32 %v3097_v32, %v3058_v13  ;;  %v3137_v35 = vpop.f32.mrf.mxu1  ;;  %5056 = vmatmul.mubr.bf16.vlgmr.msra.gmra.mxu1 %v6898_v22  ;;  %5078 = vmatpush1.bf16.xpose.msra.mxu0 %v7124_v23  ;;  %v92_v23 = vld [vmem:[%s8490_s0 + $0x260] sm:$0xff]  ;;  %v207_v32 = vld [vmem:[%s8491_s1 + $0x278] sm:$0xff] }
 0x11f   :  { %5118 = vmatpush1.bf16.xpose.msra.mxu1 %v7126_v27  ;;  %v3099_v36 = vpop.f32.mrf.mxu0  ;;  %5095 = vmatprep.mubr.bf16.mxu0 %v6901_v28  ;;  %v206_v27 = vld [vmem:[%s8491_s1 + $0x270] sm:$0xff]  ;;  %v6912_v49 = vcombine.low %v92_v23, %v92_v23 }
 0x120   :  { %v3138_v37 = vadd.f32 %v3137_v35, %v3098_v34  ;;  %v3139_v38 = vpop.f32.mrf.mxu1  ;;  %5135 = vmatprep.mubr.bf16.mxu1 %v6903_v30  ;;  %5157 = vmatprep.subr.bf16.mxu0 %v7129_v31  ;;  %v318_v28 = vld [vmem:[%s8491_s1 + $0x5f0] sm:$0x11]  ;;  %v6910_v30 = vcombine.low %v91_v2, %v91_v2  ;;  %v7136_v31 = vcombine.low %v204_v3, %v316_v4 }
 0x121   :  { %v3100_v40 = vpop.f32.mrf.mxu0  ;;  %5197 = vmatprep.subr.bf16.mxu1 %v7131_v33  ;;  %v319_v33 = vld [vmem:[%s8491_s1 + $0x5f8] sm:$0x11]  ;;  %v7138_v35 = vcombine.low %v205_v8, %v317_v9  ;;  %v6913_v36 = vcombine.high %v92_v23, %v92_v23  ;;  %v6915_v38 = vcombine.high %v93_v26, %v93_v26  ;;  %v7141_v39 = vcombine.high %v206_v27, %v318_v28 }
 0x122   :  { %v3140_v45 = vpop.f32.mrf.mxu1 }
 0x123   :  { %v3101_v50 = vpop.f32.mrf.mxu0 }
 0x124   :  { %v3141_v53 = vpop.f32.mrf.mxu1  ;;  %v95_v50 = vld [vmem:[%s8490_s0 + $0x278] sm:$0xff] }
 0x125   :  { %v3177_v56 = vpop.f32.mrf.mxu0  ;;  %5096 = vmatmul.mubr.bf16.vlgmr.msra.gmra.mxu0 %v6900_v41  ;;  %v7143_v41 = vcombine.high %v207_v32, %v319_v33 }
 0x126   :  { %v3178_v58 = vadd.f32 %v3177_v56, %v3138_v37  ;;  %v3217_v59 = vpop.f32.mrf.mxu1  ;;  %5136 = vmatmul.mubr.bf16.vlgmr.msra.gmra.mxu1 %v6902_v46  ;;  %5158 = vmatpush1.bf16.xpose.msra.mxu0 %v7128_v47  ;;  %v94_v47 = vld [vmem:[%s8490_s0 + $0x270] sm:$0xff]  ;;  %v209_v56 = vld [vmem:[%s8491_s1 + $0x288] sm:$0xff] }
 0x127   :  { %5198 = vmatpush1.bf16.xpose.msra.mxu1 %v7130_v51  ;;  %v3179_v60 = vpop.f32.mrf.mxu0  ;;  %5175 = vmatprep.mubr.bf16.mxu0 %v6905_v52  ;;  %v208_v51 = vld [vmem:[%s8491_s1 + $0x280] sm:$0xff]  ;;  %v6916_v9 = vcombine.low %v94_v47, %v94_v47 }
 0x128   :  { %v3218_v61 = vadd.f32 %v3217_v59, %v3178_v58  ;;  %v3219_v62 = vpop.f32.mrf.mxu1  ;;  %5215 = vmatprep.mubr.bf16.mxu1 %v6907_v54  ;;  %5237 = vmatprep.subr.bf16.mxu0 %v7133_v55  ;;  %v320_v52 = vld [vmem:[%s8491_s1 + $0x600] sm:$0x11]  ;;  %v6914_v54 = vcombine.low %v93_v26, %v93_v26  ;;  %v7140_v55 = vcombine.low %v206_v27, %v318_v28 }
 0x129   :  { %v3180_v0 = vpop.f32.mrf.mxu0  ;;  %5277 = vmatprep.subr.bf16.mxu1 %v7135_v57  ;;  %v321_v57 = vld [vmem:[%s8491_s1 + $0x608] sm:$0x11]  ;;  %v7142_v59 = vcombine.low %v207_v32, %v319_v33  ;;  %v6917_v60 = vcombine.high %v94_v47, %v94_v47  ;;  %v6919_v62 = vcombine.high %v95_v50, %v95_v50  ;;  %v7145_v63 = vcombine.high %v208_v51, %v320_v52 }
 0x12a   :  { %v3220_v5 = vpop.f32.mrf.mxu1 }
 0x12b   :  { %v3181_v10 = vpop.f32.mrf.mxu0 }
 0x12c   :  { %v3221_v13 = vpop.f32.mrf.mxu1  ;;  %v97_v10 = vld [vmem:[%s8490_s0 + $0x288] sm:$0xff] }
 0x12d   :  { %v3257_v16 = vpop.f32.mrf.mxu0  ;;  %5176 = vmatmul.mubr.bf16.vlgmr.msra.gmra.mxu0 %v6904_v1  ;;  %v7147_v1 = vcombine.high %v209_v56, %v321_v57 }
 0x12e   :  { %v3258_v18 = vadd.f32 %v3257_v16, %v3218_v61  ;;  %v3297_v19 = vpop.f32.mrf.mxu1  ;;  %5216 = vmatmul.mubr.bf16.vlgmr.msra.gmra.mxu1 %v6906_v6  ;;  %5238 = vmatpush1.bf16.xpose.msra.mxu0 %v7132_v7  ;;  %v96_v7 = vld [vmem:[%s8490_s0 + $0x280] sm:$0xff]  ;;  %v211_v16 = vld [vmem:[%s8491_s1 + $0x298] sm:$0xff] }
 0x12f   :  { %5278 = vmatpush1.bf16.xpose.msra.mxu1 %v7134_v11  ;;  %v3259_v20 = vpop.f32.mrf.mxu0  ;;  %5255 = vmatprep.mubr.bf16.mxu0 %v6909_v12  ;;  %v210_v11 = vld [vmem:[%s8491_s1 + $0x290] sm:$0xff]  ;;  %v6920_v33 = vcombine.low %v96_v7, %v96_v7 }
 0x130   :  { %v3298_v21 = vadd.f32 %v3297_v19, %v3258_v18  ;;  %v3299_v22 = vpop.f32.mrf.mxu1  ;;  %5295 = vmatprep.mubr.bf16.mxu1 %v6911_v14  ;;  %5317 = vmatprep.subr.bf16.mxu0 %v7137_v15  ;;  %v322_v12 = vld [vmem:[%s8491_s1 + $0x610] sm:$0x11]  ;;  %v6918_v14 = vcombine.low %v95_v50, %v95_v50  ;;  %v7144_v15 = vcombine.low %v208_v51, %v320_v52 }
 0x131   :  { %v3260_v24 = vpop.f32.mrf.mxu0  ;;  %5357 = vmatprep.subr.bf16.mxu1 %v7139_v17  ;;  %v323_v17 = vld [vmem:[%s8491_s1 + $0x618] sm:$0x11]  ;;  %v7146_v19 = vcombine.low %v209_v56, %v321_v57  ;;  %v6921_v20 = vcombine.high %v96_v7, %v96_v7  ;;  %v6923_v22 = vcombine.high %v97_v10, %v97_v10  ;;  %v7149_v23 = vcombine.high %v210_v11, %v322_v12 }
 0x132   :  { %v3300_v29 = vpop.f32.mrf.mxu1 }
 0x133   :  { %v3261_v34 = vpop.f32.mrf.mxu0 }
 0x134   :  { %v3301_v37 = vpop.f32.mrf.mxu1  ;;  %v99_v34 = vld [vmem:[%s8490_s0 + $0x298] sm:$0xff] }
 0x135   :  { %v3337_v40 = vpop.f32.mrf.mxu0  ;;  %5256 = vmatmul.mubr.bf16.vlgmr.msra.gmra.mxu0 %v6908_v25  ;;  %v7151_v25 = vcombine.high %v211_v16, %v323_v17 }
 0x136   :  { %v3338_v42 = vadd.f32 %v3337_v40, %v3298_v21  ;;  %v3377_v43 = vpop.f32.mrf.mxu1  ;;  %5296 = vmatmul.mubr.bf16.vlgmr.msra.gmra.mxu1 %v6910_v30  ;;  %5318 = vmatpush1.bf16.xpose.msra.mxu0 %v7136_v31  ;;  %v98_v31 = vld [vmem:[%s8490_s0 + $0x290] sm:$0xff]  ;;  %v213_v40 = vld [vmem:[%s8491_s1 + $0x2a8] sm:$0xff] }
 0x137   :  { %5358 = vmatpush1.bf16.xpose.msra.mxu1 %v7138_v35  ;;  %v3339_v44 = vpop.f32.mrf.mxu0  ;;  %5335 = vmatprep.mubr.bf16.mxu0 %v6913_v36  ;;  %v212_v35 = vld [vmem:[%s8491_s1 + $0x2a0] sm:$0xff]  ;;  %v6924_v57 = vcombine.low %v98_v31, %v98_v31 }
 0x138   :  { %v3378_v45 = vadd.f32 %v3377_v43, %v3338_v42  ;;  %v3379_v46 = vpop.f32.mrf.mxu1  ;;  %5375 = vmatprep.mubr.bf16.mxu1 %v6915_v38  ;;  %5397 = vmatprep.subr.bf16.mxu0 %v7141_v39  ;;  %v324_v36 = vld [vmem:[%s8491_s1 + $0x620] sm:$0x11]  ;;  %v6922_v38 = vcombine.low %v97_v10, %v97_v10  ;;  %v7148_v39 = vcombine.low %v210_v11, %v322_v12 }
 0x139   :  { %v3340_v48 = vpop.f32.mrf.mxu0  ;;  %5437 = vmatprep.subr.bf16.mxu1 %v7143_v41  ;;  %v325_v41 = vld [vmem:[%s8491_s1 + $0x628] sm:$0x11]  ;;  %v7150_v43 = vcombine.low %v211_v16, %v323_v17  ;;  %v6925_v44 = vcombine.high %v98_v31, %v98_v31  ;;  %v6927_v46 = vcombine.high %v99_v34, %v99_v34  ;;  %v7153_v47 = vcombine.high %v212_v35, %v324_v36 }
 0x13a   :  { %v3380_v53 = vpop.f32.mrf.mxu1 }
 0x13b   :  { %v3341_v58 = vpop.f32.mrf.mxu0 }
 0x13c   :  { %v3381_v61 = vpop.f32.mrf.mxu1  ;;  %v101_v58 = vld [vmem:[%s8490_s0 + $0x2a8] sm:$0xff] }
 0x13d   :  { %v3417_v0 = vpop.f32.mrf.mxu0  ;;  %5336 = vmatmul.mubr.bf16.vlgmr.msra.gmra.mxu0 %v6912_v49  ;;  %v7155_v49 = vcombine.high %v213_v40, %v325_v41 }
 0x13e   :  { %v3418_v2 = vadd.f32 %v3417_v0, %v3378_v45  ;;  %v3457_v3 = vpop.f32.mrf.mxu1  ;;  %5376 = vmatmul.mubr.bf16.vlgmr.msra.gmra.mxu1 %v6914_v54  ;;  %5398 = vmatpush1.bf16.xpose.msra.mxu0 %v7140_v55  ;;  %v100_v55 = vld [vmem:[%s8490_s0 + $0x2a0] sm:$0xff]  ;;  %v215_v0 = vld [vmem:[%s8491_s1 + $0x2b8] sm:$0xff] }
 0x13f   :  { %5438 = vmatpush1.bf16.xpose.msra.mxu1 %v7142_v59  ;;  %v3419_v4 = vpop.f32.mrf.mxu0  ;;  %5415 = vmatprep.mubr.bf16.mxu0 %v6917_v60  ;;  %v214_v59 = vld [vmem:[%s8491_s1 + $0x2b0] sm:$0xff]  ;;  %v6928_v17 = vcombine.low %v100_v55, %v100_v55 }
 0x140   :  { %v3458_v5 = vadd.f32 %v3457_v3, %v3418_v2  ;;  %v3459_v6 = vpop.f32.mrf.mxu1  ;;  %5455 = vmatprep.mubr.bf16.mxu1 %v6919_v62  ;;  %5477 = vmatprep.subr.bf16.mxu0 %v7145_v63  ;;  %v326_v60 = vld [vmem:[%s8491_s1 + $0x630] sm:$0x11]  ;;  %v6926_v62 = vcombine.low %v99_v34, %v99_v34  ;;  %v7152_v63 = vcombine.low %v212_v35, %v324_v36 }
 0x141   :  { %v3420_v8 = vpop.f32.mrf.mxu0  ;;  %5517 = vmatprep.subr.bf16.mxu1 %v7147_v1  ;;  %v327_v1 = vld [vmem:[%s8491_s1 + $0x638] sm:$0x11]  ;;  %v7154_v3 = vcombine.low %v213_v40, %v325_v41  ;;  %v6929_v4 = vcombine.high %v100_v55, %v100_v55  ;;  %v6931_v6 = vcombine.high %v101_v58, %v101_v58  ;;  %v7157_v7 = vcombine.high %v214_v59, %v326_v60 }
 0x142   :  { %v3460_v13 = vpop.f32.mrf.mxu1 }
 0x143   :  { %v3421_v18 = vpop.f32.mrf.mxu0 }
 0x144   :  { %v3461_v21 = vpop.f32.mrf.mxu1  ;;  %v103_v18 = vld [vmem:[%s8490_s0 + $0x2b8] sm:$0xff] }
 0x145   :  { %v3497_v24 = vpop.f32.mrf.mxu0  ;;  %5416 = vmatmul.mubr.bf16.vlgmr.msra.gmra.mxu0 %v6916_v9  ;;  %v7159_v9 = vcombine.high %v215_v0, %v327_v1 }
 0x146   :  { %v3498_v26 = vadd.f32 %v3497_v24, %v3458_v5  ;;  %v3537_v27 = vpop.f32.mrf.mxu1  ;;  %5456 = vmatmul.mubr.bf16.vlgmr.msra.gmra.mxu1 %v6918_v14  ;;  %5478 = vmatpush1.bf16.xpose.msra.mxu0 %v7144_v15  ;;  %v102_v15 = vld [vmem:[%s8490_s0 + $0x2b0] sm:$0xff]  ;;  %v217_v24 = vld [vmem:[%s8491_s1 + $0x2c8] sm:$0xff] }
 0x147   :  { %5518 = vmatpush1.bf16.xpose.msra.mxu1 %v7146_v19  ;;  %v3499_v28 = vpop.f32.mrf.mxu0  ;;  %5495 = vmatprep.mubr.bf16.mxu0 %v6921_v20  ;;  %v216_v19 = vld [vmem:[%s8491_s1 + $0x2c0] sm:$0xff]  ;;  %v6932_v41 = vcombine.low %v102_v15, %v102_v15 }
 0x148   :  { %v3538_v29 = vadd.f32 %v3537_v27, %v3498_v26  ;;  %v3539_v30 = vpop.f32.mrf.mxu1  ;;  %5535 = vmatprep.mubr.bf16.mxu1 %v6923_v22  ;;  %5557 = vmatprep.subr.bf16.mxu0 %v7149_v23  ;;  %v328_v20 = vld [vmem:[%s8491_s1 + $0x640] sm:$0x11]  ;;  %v6930_v22 = vcombine.low %v101_v58, %v101_v58  ;;  %v7156_v23 = vcombine.low %v214_v59, %v326_v60 }
 0x149   :  { %v3500_v32 = vpop.f32.mrf.mxu0  ;;  %5597 = vmatprep.subr.bf16.mxu1 %v7151_v25  ;;  %v329_v25 = vld [vmem:[%s8491_s1 + $0x648] sm:$0x11]  ;;  %v7158_v27 = vcombine.low %v215_v0, %v327_v1  ;;  %v6933_v28 = vcombine.high %v102_v15, %v102_v15  ;;  %v6935_v30 = vcombine.high %v103_v18, %v103_v18  ;;  %v7161_v31 = vcombine.high %v216_v19, %v328_v20 }
 0x14a   :  { %v3540_v37 = vpop.f32.mrf.mxu1 }
 0x14b   :  { %v3501_v42 = vpop.f32.mrf.mxu0 }
 0x14c   :  { %v3541_v45 = vpop.f32.mrf.mxu1  ;;  %v105_v42 = vld [vmem:[%s8490_s0 + $0x2c8] sm:$0xff] }
 0x14d   :  { %v3577_v48 = vpop.f32.mrf.mxu0  ;;  %5496 = vmatmul.mubr.bf16.vlgmr.msra.gmra.mxu0 %v6920_v33  ;;  %v7163_v33 = vcombine.high %v217_v24, %v329_v25 }
 0x14e   :  { %v3578_v50 = vadd.f32 %v3577_v48, %v3538_v29  ;;  %v3617_v51 = vpop.f32.mrf.mxu1  ;;  %5536 = vmatmul.mubr.bf16.vlgmr.msra.gmra.mxu1 %v6922_v38  ;;  %5558 = vmatpush1.bf16.xpose.msra.mxu0 %v7148_v39  ;;  %v104_v39 = vld [vmem:[%s8490_s0 + $0x2c0] sm:$0xff]  ;;  %v219_v48 = vld [vmem:[%s8491_s1 + $0x2d8] sm:$0xff] }
 0x14f   :  { %5598 = vmatpush1.bf16.xpose.msra.mxu1 %v7150_v43  ;;  %v3579_v52 = vpop.f32.mrf.mxu0  ;;  %5575 = vmatprep.mubr.bf16.mxu0 %v6925_v44  ;;  %v218_v43 = vld [vmem:[%s8491_s1 + $0x2d0] sm:$0xff]  ;;  %v6936_v1 = vcombine.low %v104_v39, %v104_v39 }
 0x150   :  { %v3618_v53 = vadd.f32 %v3617_v51, %v3578_v50  ;;  %v3619_v54 = vpop.f32.mrf.mxu1  ;;  %5615 = vmatprep.mubr.bf16.mxu1 %v6927_v46  ;;  %5637 = vmatprep.subr.bf16.mxu0 %v7153_v47  ;;  %v330_v44 = vld [vmem:[%s8491_s1 + $0x650] sm:$0x11]  ;;  %v6934_v46 = vcombine.low %v103_v18, %v103_v18  ;;  %v7160_v47 = vcombine.low %v216_v19, %v328_v20 }
 0x151   :  { %v3580_v56 = vpop.f32.mrf.mxu0  ;;  %5677 = vmatprep.subr.bf16.mxu1 %v7155_v49  ;;  %v331_v49 = vld [vmem:[%s8491_s1 + $0x658] sm:$0x11]  ;;  %v7162_v51 = vcombine.low %v217_v24, %v329_v25  ;;  %v6937_v52 = vcombine.high %v104_v39, %v104_v39  ;;  %v6939_v54 = vcombine.high %v105_v42, %v105_v42  ;;  %v7165_v55 = vcombine.high %v218_v43, %v330_v44 }
 0x152   :  { %v3620_v61 = vpop.f32.mrf.mxu1 }
 0x153   :  { %v3581_v2 = vpop.f32.mrf.mxu0 }
 0x154   :  { %v3621_v5 = vpop.f32.mrf.mxu1  ;;  %v107_v2 = vld [vmem:[%s8490_s0 + $0x2d8] sm:$0xff] }
 0x155   :  { %v3657_v8 = vpop.f32.mrf.mxu0  ;;  %5576 = vmatmul.mubr.bf16.vlgmr.msra.gmra.mxu0 %v6924_v57  ;;  %v7167_v57 = vcombine.high %v219_v48, %v331_v49 }
 0x156   :  { %v3658_v10 = vadd.f32 %v3657_v8, %v3618_v53  ;;  %v3697_v11 = vpop.f32.mrf.mxu1  ;;  %5616 = vmatmul.mubr.bf16.vlgmr.msra.gmra.mxu1 %v6926_v62  ;;  %5638 = vmatpush1.bf16.xpose.msra.mxu0 %v7152_v63  ;;  %v106_v63 = vld [vmem:[%s8490_s0 + $0x2d0] sm:$0xff]  ;;  %v221_v8 = vld [vmem:[%s8491_s1 + $0x2e8] sm:$0xff] }
 0x157   :  { %5678 = vmatpush1.bf16.xpose.msra.mxu1 %v7154_v3  ;;  %v3659_v12 = vpop.f32.mrf.mxu0  ;;  %5655 = vmatprep.mubr.bf16.mxu0 %v6929_v4  ;;  %v220_v3 = vld [vmem:[%s8491_s1 + $0x2e0] sm:$0xff]  ;;  %v6940_v25 = vcombine.low %v106_v63, %v106_v63 }
 0x158   :  { %v3698_v13 = vadd.f32 %v3697_v11, %v3658_v10  ;;  %v3699_v14 = vpop.f32.mrf.mxu1  ;;  %5695 = vmatprep.mubr.bf16.mxu1 %v6931_v6  ;;  %5717 = vmatprep.subr.bf16.mxu0 %v7157_v7  ;;  %v332_v4 = vld [vmem:[%s8491_s1 + $0x660] sm:$0x11]  ;;  %v6938_v6 = vcombine.low %v105_v42, %v105_v42  ;;  %v7164_v7 = vcombine.low %v218_v43, %v330_v44 }
 0x159   :  { %v3660_v16 = vpop.f32.mrf.mxu0  ;;  %5757 = vmatprep.subr.bf16.mxu1 %v7159_v9  ;;  %v333_v9 = vld [vmem:[%s8491_s1 + $0x668] sm:$0x11]  ;;  %v7166_v11 = vcombine.low %v219_v48, %v331_v49  ;;  %v6941_v12 = vcombine.high %v106_v63, %v106_v63  ;;  %v6943_v14 = vcombine.high %v107_v2, %v107_v2  ;;  %v7169_v15 = vcombine.high %v220_v3, %v332_v4 }
 0x15a   :  { %v3700_v21 = vpop.f32.mrf.mxu1 }
 0x15b   :  { %v3661_v26 = vpop.f32.mrf.mxu0 }
 0x15c   :  { %v3701_v29 = vpop.f32.mrf.mxu1  ;;  %v109_v26 = vld [vmem:[%s8490_s0 + $0x2e8] sm:$0xff] }
 0x15d   :  { %v3737_v32 = vpop.f32.mrf.mxu0  ;;  %5656 = vmatmul.mubr.bf16.vlgmr.msra.gmra.mxu0 %v6928_v17  ;;  %v7171_v17 = vcombine.high %v221_v8, %v333_v9 }
 0x15e   :  { %v3738_v34 = vadd.f32 %v3737_v32, %v3698_v13  ;;  %v3777_v35 = vpop.f32.mrf.mxu1  ;;  %5696 = vmatmul.mubr.bf16.vlgmr.msra.gmra.mxu1 %v6930_v22  ;;  %5718 = vmatpush1.bf16.xpose.msra.mxu0 %v7156_v23  ;;  %v108_v23 = vld [vmem:[%s8490_s0 + $0x2e0] sm:$0xff]  ;;  %v223_v32 = vld [vmem:[%s8491_s1 + $0x2f8] sm:$0xff] }
 0x15f   :  { %5758 = vmatpush1.bf16.xpose.msra.mxu1 %v7158_v27  ;;  %v3739_v36 = vpop.f32.mrf.mxu0  ;;  %5735 = vmatprep.mubr.bf16.mxu0 %v6933_v28  ;;  %v222_v27 = vld [vmem:[%s8491_s1 + $0x2f0] sm:$0xff]  ;;  %v6944_v49 = vcombine.low %v108_v23, %v108_v23 }
 0x160   :  { %v3778_v37 = vadd.f32 %v3777_v35, %v3738_v34  ;;  %v3779_v38 = vpop.f32.mrf.mxu1  ;;  %5775 = vmatprep.mubr.bf16.mxu1 %v6935_v30  ;;  %5797 = vmatprep.subr.bf16.mxu0 %v7161_v31  ;;  %v334_v28 = vld [vmem:[%s8491_s1 + $0x670] sm:$0x11]  ;;  %v6942_v30 = vcombine.low %v107_v2, %v107_v2  ;;  %v7168_v31 = vcombine.low %v220_v3, %v332_v4 }
 0x161   :  { %v3740_v40 = vpop.f32.mrf.mxu0  ;;  %5837 = vmatprep.subr.bf16.mxu1 %v7163_v33  ;;  %v335_v33 = vld [vmem:[%s8491_s1 + $0x678] sm:$0x11]  ;;  %v7170_v35 = vcombine.low %v221_v8, %v333_v9  ;;  %v6945_v36 = vcombine.high %v108_v23, %v108_v23  ;;  %v6947_v38 = vcombine.high %v109_v26, %v109_v26  ;;  %v7173_v39 = vcombine.high %v222_v27, %v334_v28 }
 0x162   :  { %v3780_v45 = vpop.f32.mrf.mxu1 }
 0x163   :  { %v3741_v50 = vpop.f32.mrf.mxu0 }
 0x164   :  { %v3781_v53 = vpop.f32.mrf.mxu1  ;;  %v111_v50 = vld [vmem:[%s8490_s0 + $0x2f8] sm:$0xff] }
 0x165   :  { %v3817_v56 = vpop.f32.mrf.mxu0  ;;  %5736 = vmatmul.mubr.bf16.vlgmr.msra.gmra.mxu0 %v6932_v41  ;;  %v7175_v41 = vcombine.high %v223_v32, %v335_v33 }
 0x166   :  { %v3818_v58 = vadd.f32 %v3817_v56, %v3778_v37  ;;  %v3857_v59 = vpop.f32.mrf.mxu1  ;;  %5776 = vmatmul.mubr.bf16.vlgmr.msra.gmra.mxu1 %v6934_v46  ;;  %5798 = vmatpush1.bf16.xpose.msra.mxu0 %v7160_v47  ;;  %v110_v47 = vld [vmem:[%s8490_s0 + $0x2f0] sm:$0xff]  ;;  %v225_v56 = vld [vmem:[%s8491_s1 + $0x308] sm:$0xff] }
 0x167   :  { %5838 = vmatpush1.bf16.xpose.msra.mxu1 %v7162_v51  ;;  %v3819_v60 = vpop.f32.mrf.mxu0  ;;  %5815 = vmatprep.mubr.bf16.mxu0 %v6937_v52  ;;  %v224_v51 = vld [vmem:[%s8491_s1 + $0x300] sm:$0xff]  ;;  %v6948_v9 = vcombine.low %v110_v47, %v110_v47 }
 0x168   :  { %v3858_v61 = vadd.f32 %v3857_v59, %v3818_v58  ;;  %v3859_v62 = vpop.f32.mrf.mxu1  ;;  %5855 = vmatprep.mubr.bf16.mxu1 %v6939_v54  ;;  %5877 = vmatprep.subr.bf16.mxu0 %v7165_v55  ;;  %v336_v52 = vld [vmem:[%s8491_s1 + $0x680] sm:$0x11]  ;;  %v6946_v54 = vcombine.low %v109_v26, %v109_v26  ;;  %v7172_v55 = vcombine.low %v222_v27, %v334_v28 }
 0x169   :  { %v3820_v0 = vpop.f32.mrf.mxu0  ;;  %5917 = vmatprep.subr.bf16.mxu1 %v7167_v57  ;;  %v337_v57 = vld [vmem:[%s8491_s1 + $0x688] sm:$0x11]  ;;  %v7174_v59 = vcombine.low %v223_v32, %v335_v33  ;;  %v6949_v60 = vcombine.high %v110_v47, %v110_v47  ;;  %v6951_v62 = vcombine.high %v111_v50, %v111_v50  ;;  %v7177_v63 = vcombine.high %v224_v51, %v336_v52 }
 0x16a   :  { %v3860_v5 = vpop.f32.mrf.mxu1 }
 0x16b   :  { %v3821_v10 = vpop.f32.mrf.mxu0 }
 0x16c   :  { %v3861_v13 = vpop.f32.mrf.mxu1  ;;  %v113_v10 = vld [vmem:[%s8490_s0 + $0x308] sm:$0xff] }
 0x16d   :  { %v3897_v16 = vpop.f32.mrf.mxu0  ;;  %5816 = vmatmul.mubr.bf16.vlgmr.msra.gmra.mxu0 %v6936_v1  ;;  %v7179_v1 = vcombine.high %v225_v56, %v337_v57 }
 0x16e   :  { %v3898_v18 = vadd.f32 %v3897_v16, %v3858_v61  ;;  %v3937_v19 = vpop.f32.mrf.mxu1  ;;  %5856 = vmatmul.mubr.bf16.vlgmr.msra.gmra.mxu1 %v6938_v6  ;;  %5878 = vmatpush1.bf16.xpose.msra.mxu0 %v7164_v7  ;;  %v112_v7 = vld [vmem:[%s8490_s0 + $0x300] sm:$0xff]  ;;  %v227_v16 = vld [vmem:[%s8491_s1 + $0x318] sm:$0xff] }
 0x16f   :  { %5918 = vmatpush1.bf16.xpose.msra.mxu1 %v7166_v11  ;;  %v3899_v20 = vpop.f32.mrf.mxu0  ;;  %5895 = vmatprep.mubr.bf16.mxu0 %v6941_v12  ;;  %v226_v11 = vld [vmem:[%s8491_s1 + $0x310] sm:$0xff]  ;;  %v6952_v33 = vcombine.low %v112_v7, %v112_v7 }
 0x170   :  { %v3938_v21 = vadd.f32 %v3937_v19, %v3898_v18  ;;  %v3939_v22 = vpop.f32.mrf.mxu1  ;;  %5935 = vmatprep.mubr.bf16.mxu1 %v6943_v14  ;;  %5957 = vmatprep.subr.bf16.mxu0 %v7169_v15  ;;  %v338_v12 = vld [vmem:[%s8491_s1 + $0x690] sm:$0x11]  ;;  %v6950_v14 = vcombine.low %v111_v50, %v111_v50  ;;  %v7176_v15 = vcombine.low %v224_v51, %v336_v52 }
 0x171   :  { %v3900_v24 = vpop.f32.mrf.mxu0  ;;  %5997 = vmatprep.subr.bf16.mxu1 %v7171_v17  ;;  %v339_v17 = vld [vmem:[%s8491_s1 + $0x698] sm:$0x11]  ;;  %v7178_v19 = vcombine.low %v225_v56, %v337_v57  ;;  %v6953_v20 = vcombine.high %v112_v7, %v112_v7  ;;  %v6955_v22 = vcombine.high %v113_v10, %v113_v10  ;;  %v7181_v23 = vcombine.high %v226_v11, %v338_v12 }
 0x172   :  { %v3940_v29 = vpop.f32.mrf.mxu1 }
 0x173   :  { %v3901_v34 = vpop.f32.mrf.mxu0 }
 0x174   :  { %v3941_v37 = vpop.f32.mrf.mxu1  ;;  %v115_v34 = vld [vmem:[%s8490_s0 + $0x318] sm:$0xff] }
 0x175   :  { %v3977_v40 = vpop.f32.mrf.mxu0  ;;  %5896 = vmatmul.mubr.bf16.vlgmr.msra.gmra.mxu0 %v6940_v25  ;;  %v7183_v25 = vcombine.high %v227_v16, %v339_v17 }
 0x176   :  { %v3978_v42 = vadd.f32 %v3977_v40, %v3938_v21  ;;  %v4017_v43 = vpop.f32.mrf.mxu1  ;;  %5936 = vmatmul.mubr.bf16.vlgmr.msra.gmra.mxu1 %v6942_v30  ;;  %5958 = vmatpush1.bf16.xpose.msra.mxu0 %v7168_v31  ;;  %v114_v31 = vld [vmem:[%s8490_s0 + $0x310] sm:$0xff]  ;;  %v229_v40 = vld [vmem:[%s8491_s1 + $0x328] sm:$0xff] }
 0x177   :  { %5998 = vmatpush1.bf16.xpose.msra.mxu1 %v7170_v35  ;;  %v3979_v44 = vpop.f32.mrf.mxu0  ;;  %5975 = vmatprep.mubr.bf16.mxu0 %v6945_v36  ;;  %v228_v35 = vld [vmem:[%s8491_s1 + $0x320] sm:$0xff]  ;;  %v6956_v57 = vcombine.low %v114_v31, %v114_v31 }
 0x178   :  { %v4018_v45 = vadd.f32 %v4017_v43, %v3978_v42  ;;  %v4019_v46 = vpop.f32.mrf.mxu1  ;;  %6015 = vmatprep.mubr.bf16.mxu1 %v6947_v38  ;;  %6037 = vmatprep.subr.bf16.mxu0 %v7173_v39  ;;  %v340_v36 = vld [vmem:[%s8491_s1 + $0x6a0] sm:$0x11]  ;;  %v6954_v38 = vcombine.low %v113_v10, %v113_v10  ;;  %v7180_v39 = vcombine.low %v226_v11, %v338_v12 }
 0x179   :  { %v3980_v48 = vpop.f32.mrf.mxu0  ;;  %6077 = vmatprep.subr.bf16.mxu1 %v7175_v41  ;;  %v341_v41 = vld [vmem:[%s8491_s1 + $0x6a8] sm:$0x11]  ;;  %v7182_v43 = vcombine.low %v227_v16, %v339_v17  ;;  %v6957_v44 = vcombine.high %v114_v31, %v114_v31  ;;  %v6959_v46 = vcombine.high %v115_v34, %v115_v34  ;;  %v7185_v47 = vcombine.high %v228_v35, %v340_v36 }
 0x17a   :  { %v4020_v53 = vpop.f32.mrf.mxu1 }
 0x17b   :  { %v3981_v58 = vpop.f32.mrf.mxu0 }
 0x17c   :  { %v4021_v61 = vpop.f32.mrf.mxu1  ;;  %v117_v58 = vld [vmem:[%s8490_s0 + $0x328] sm:$0xff] }
 0x17d   :  { %v4057_v0 = vpop.f32.mrf.mxu0  ;;  %5976 = vmatmul.mubr.bf16.vlgmr.msra.gmra.mxu0 %v6944_v49  ;;  %v7187_v49 = vcombine.high %v229_v40, %v341_v41 }
 0x17e   :  { %v4058_v2 = vadd.f32 %v4057_v0, %v4018_v45  ;;  %v4097_v3 = vpop.f32.mrf.mxu1  ;;  %6016 = vmatmul.mubr.bf16.vlgmr.msra.gmra.mxu1 %v6946_v54  ;;  %6038 = vmatpush1.bf16.xpose.msra.mxu0 %v7172_v55  ;;  %v116_v55 = vld [vmem:[%s8490_s0 + $0x320] sm:$0xff]  ;;  %v231_v0 = vld [vmem:[%s8491_s1 + $0x338] sm:$0xff] }
 0x17f   :  { %6078 = vmatpush1.bf16.xpose.msra.mxu1 %v7174_v59  ;;  %v4059_v4 = vpop.f32.mrf.mxu0  ;;  %6055 = vmatprep.mubr.bf16.mxu0 %v6949_v60  ;;  %v230_v59 = vld [vmem:[%s8491_s1 + $0x330] sm:$0xff]  ;;  %v6960_v17 = vcombine.low %v116_v55, %v116_v55 }
 0x180   :  { %v4098_v5 = vadd.f32 %v4097_v3, %v4058_v2  ;;  %v4099_v6 = vpop.f32.mrf.mxu1  ;;  %6095 = vmatprep.mubr.bf16.mxu1 %v6951_v62  ;;  %6117 = vmatprep.subr.bf16.mxu0 %v7177_v63  ;;  %v342_v60 = vld [vmem:[%s8491_s1 + $0x6b0] sm:$0x11]  ;;  %v6958_v62 = vcombine.low %v115_v34, %v115_v34  ;;  %v7184_v63 = vcombine.low %v228_v35, %v340_v36 }
 0x181   :  { %v4060_v8 = vpop.f32.mrf.mxu0  ;;  %6157 = vmatprep.subr.bf16.mxu1 %v7179_v1  ;;  %v343_v1 = vld [vmem:[%s8491_s1 + $0x6b8] sm:$0x11]  ;;  %v7186_v3 = vcombine.low %v229_v40, %v341_v41  ;;  %v6961_v4 = vcombine.high %v116_v55, %v116_v55  ;;  %v6963_v6 = vcombine.high %v117_v58, %v117_v58  ;;  %v7189_v7 = vcombine.high %v230_v59, %v342_v60 }
 0x182   :  { %v4100_v13 = vpop.f32.mrf.mxu1 }
 0x183   :  { %v4061_v18 = vpop.f32.mrf.mxu0 }
 0x184   :  { %v4101_v21 = vpop.f32.mrf.mxu1  ;;  %v119_v18 = vld [vmem:[%s8490_s0 + $0x338] sm:$0xff] }
 0x185   :  { %v4137_v24 = vpop.f32.mrf.mxu0  ;;  %6056 = vmatmul.mubr.bf16.vlgmr.msra.gmra.mxu0 %v6948_v9  ;;  %v7191_v9 = vcombine.high %v231_v0, %v343_v1 }
 0x186   :  { %v4138_v26 = vadd.f32 %v4137_v24, %v4098_v5  ;;  %v4177_v27 = vpop.f32.mrf.mxu1  ;;  %6096 = vmatmul.mubr.bf16.vlgmr.msra.gmra.mxu1 %v6950_v14  ;;  %6118 = vmatpush1.bf16.xpose.msra.mxu0 %v7176_v15  ;;  %v118_v15 = vld [vmem:[%s8490_s0 + $0x330] sm:$0xff]  ;;  %v233_v24 = vld [vmem:[%s8491_s1 + $0x348] sm:$0xff] }
 0x187   :  { %6158 = vmatpush1.bf16.xpose.msra.mxu1 %v7178_v19  ;;  %v4139_v28 = vpop.f32.mrf.mxu0  ;;  %6135 = vmatprep.mubr.bf16.mxu0 %v6953_v20  ;;  %v232_v19 = vld [vmem:[%s8491_s1 + $0x340] sm:$0xff]  ;;  %v6964_v41 = vcombine.low %v118_v15, %v118_v15 }
 0x188   :  { %v4178_v29 = vadd.f32 %v4177_v27, %v4138_v26  ;;  %v4179_v30 = vpop.f32.mrf.mxu1  ;;  %6175 = vmatprep.mubr.bf16.mxu1 %v6955_v22  ;;  %6197 = vmatprep.subr.bf16.mxu0 %v7181_v23  ;;  %v344_v20 = vld [vmem:[%s8491_s1 + $0x6c0] sm:$0x11]  ;;  %v6962_v22 = vcombine.low %v117_v58, %v117_v58  ;;  %v7188_v23 = vcombine.low %v230_v59, %v342_v60 }
 0x189   :  { %v4140_v32 = vpop.f32.mrf.mxu0  ;;  %6237 = vmatprep.subr.bf16.mxu1 %v7183_v25  ;;  %v345_v25 = vld [vmem:[%s8491_s1 + $0x6c8] sm:$0x11]  ;;  %v7190_v27 = vcombine.low %v231_v0, %v343_v1  ;;  %v6965_v28 = vcombine.high %v118_v15, %v118_v15  ;;  %v6967_v30 = vcombine.high %v119_v18, %v119_v18  ;;  %v7193_v31 = vcombine.high %v232_v19, %v344_v20 }
 0x18a   :  { %v4180_v37 = vpop.f32.mrf.mxu1 }
 0x18b   :  { %v4141_v42 = vpop.f32.mrf.mxu0 }
 0x18c   :  { %v4181_v45 = vpop.f32.mrf.mxu1  ;;  %v121_v42 = vld [vmem:[%s8490_s0 + $0x348] sm:$0xff] }
 0x18d   :  { %v4217_v48 = vpop.f32.mrf.mxu0  ;;  %6136 = vmatmul.mubr.bf16.vlgmr.msra.gmra.mxu0 %v6952_v33  ;;  %v7195_v33 = vcombine.high %v233_v24, %v345_v25 }
 0x18e   :  { %v4218_v50 = vadd.f32 %v4217_v48, %v4178_v29  ;;  %v4257_v51 = vpop.f32.mrf.mxu1  ;;  %6176 = vmatmul.mubr.bf16.vlgmr.msra.gmra.mxu1 %v6954_v38  ;;  %6198 = vmatpush1.bf16.xpose.msra.mxu0 %v7180_v39  ;;  %v120_v39 = vld [vmem:[%s8490_s0 + $0x340] sm:$0xff]  ;;  %v235_v48 = vld [vmem:[%s8491_s1 + $0x358] sm:$0xff] }
 0x18f   :  { %6238 = vmatpush1.bf16.xpose.msra.mxu1 %v7182_v43  ;;  %v4219_v52 = vpop.f32.mrf.mxu0  ;;  %6215 = vmatprep.mubr.bf16.mxu0 %v6957_v44  ;;  %v234_v43 = vld [vmem:[%s8491_s1 + $0x350] sm:$0xff]  ;;  %v6968_v1 = vcombine.low %v120_v39, %v120_v39 }
 0x190   :  { %v4258_v53 = vadd.f32 %v4257_v51, %v4218_v50  ;;  %v4259_v54 = vpop.f32.mrf.mxu1  ;;  %6255 = vmatprep.mubr.bf16.mxu1 %v6959_v46  ;;  %6277 = vmatprep.subr.bf16.mxu0 %v7185_v47  ;;  %v346_v44 = vld [vmem:[%s8491_s1 + $0x6d0] sm:$0x11]  ;;  %v6966_v46 = vcombine.low %v119_v18, %v119_v18  ;;  %v7192_v47 = vcombine.low %v232_v19, %v344_v20 }
 0x191   :  { %v4220_v56 = vpop.f32.mrf.mxu0  ;;  %6317 = vmatprep.subr.bf16.mxu1 %v7187_v49  ;;  %v347_v49 = vld [vmem:[%s8491_s1 + $0x6d8] sm:$0x11]  ;;  %v7194_v51 = vcombine.low %v233_v24, %v345_v25  ;;  %v6969_v52 = vcombine.high %v120_v39, %v120_v39  ;;  %v6971_v54 = vcombine.high %v121_v42, %v121_v42  ;;  %v7197_v55 = vcombine.high %v234_v43, %v346_v44 }
 0x192   :  { %v4260_v61 = vpop.f32.mrf.mxu1 }
 0x193   :  { %v4221_v2 = vpop.f32.mrf.mxu0 }
 0x194   :  { %v4261_v5 = vpop.f32.mrf.mxu1  ;;  %v123_v2 = vld [vmem:[%s8490_s0 + $0x358] sm:$0xff] }
 0x195   :  { %v4297_v8 = vpop.f32.mrf.mxu0  ;;  %6216 = vmatmul.mubr.bf16.vlgmr.msra.gmra.mxu0 %v6956_v57  ;;  %v7199_v57 = vcombine.high %v235_v48, %v347_v49 }
 0x196   :  { %v4298_v10 = vadd.f32 %v4297_v8, %v4258_v53  ;;  %v4337_v11 = vpop.f32.mrf.mxu1  ;;  %6256 = vmatmul.mubr.bf16.vlgmr.msra.gmra.mxu1 %v6958_v62  ;;  %6278 = vmatpush1.bf16.xpose.msra.mxu0 %v7184_v63  ;;  %v122_v63 = vld [vmem:[%s8490_s0 + $0x350] sm:$0xff]  ;;  %v237_v8 = vld [vmem:[%s8491_s1 + $0x368] sm:$0xff] }
 0x197   :  { %6318 = vmatpush1.bf16.xpose.msra.mxu1 %v7186_v3  ;;  %v4299_v12 = vpop.f32.mrf.mxu0  ;;  %6295 = vmatprep.mubr.bf16.mxu0 %v6961_v4  ;;  %v236_v3 = vld [vmem:[%s8491_s1 + $0x360] sm:$0xff]  ;;  %v6972_v25 = vcombine.low %v122_v63, %v122_v63 }
 0x198   :  { %v4338_v13 = vadd.f32 %v4337_v11, %v4298_v10  ;;  %v4339_v14 = vpop.f32.mrf.mxu1  ;;  %6335 = vmatprep.mubr.bf16.mxu1 %v6963_v6  ;;  %6357 = vmatprep.subr.bf16.mxu0 %v7189_v7  ;;  %v348_v4 = vld [vmem:[%s8491_s1 + $0x6e0] sm:$0x11]  ;;  %v6970_v6 = vcombine.low %v121_v42, %v121_v42  ;;  %v7196_v7 = vcombine.low %v234_v43, %v346_v44 }
 0x199   :  { %v4300_v16 = vpop.f32.mrf.mxu0  ;;  %6397 = vmatprep.subr.bf16.mxu1 %v7191_v9  ;;  %v349_v9 = vld [vmem:[%s8491_s1 + $0x6e8] sm:$0x11]  ;;  %v7198_v11 = vcombine.low %v235_v48, %v347_v49  ;;  %v6973_v12 = vcombine.high %v122_v63, %v122_v63  ;;  %v6975_v14 = vcombine.high %v123_v2, %v123_v2  ;;  %v7201_v15 = vcombine.high %v236_v3, %v348_v4 }
 0x19a   :  { %v4340_v21 = vpop.f32.mrf.mxu1 }
 0x19b   :  { %v4301_v26 = vpop.f32.mrf.mxu0 }
 0x19c   :  { %v4341_v29 = vpop.f32.mrf.mxu1  ;;  %v125_v26 = vld [vmem:[%s8490_s0 + $0x368] sm:$0xff] }
 0x19d   :  { %v4377_v32 = vpop.f32.mrf.mxu0  ;;  %6296 = vmatmul.mubr.bf16.vlgmr.msra.gmra.mxu0 %v6960_v17  ;;  %v7203_v17 = vcombine.high %v237_v8, %v349_v9 }
 0x19e   :  { %v4378_v34 = vadd.f32 %v4377_v32, %v4338_v13  ;;  %v4417_v35 = vpop.f32.mrf.mxu1  ;;  %6336 = vmatmul.mubr.bf16.vlgmr.msra.gmra.mxu1 %v6962_v22  ;;  %6358 = vmatpush1.bf16.xpose.msra.mxu0 %v7188_v23  ;;  %v124_v23 = vld [vmem:[%s8490_s0 + $0x360] sm:$0xff]  ;;  %v239_v32 = vld [vmem:[%s8491_s1 + $0x378] sm:$0xff] }
 0x19f   :  { %6398 = vmatpush1.bf16.xpose.msra.mxu1 %v7190_v27  ;;  %v4379_v36 = vpop.f32.mrf.mxu0  ;;  %6375 = vmatprep.mubr.bf16.mxu0 %v6965_v28  ;;  %v238_v27 = vld [vmem:[%s8491_s1 + $0x370] sm:$0xff]  ;;  %v6976_v49 = vcombine.low %v124_v23, %v124_v23 }
 0x1a0   :  { %v4418_v37 = vadd.f32 %v4417_v35, %v4378_v34  ;;  %v4419_v38 = vpop.f32.mrf.mxu1  ;;  %6415 = vmatprep.mubr.bf16.mxu1 %v6967_v30  ;;  %6437 = vmatprep.subr.bf16.mxu0 %v7193_v31  ;;  %v350_v28 = vld [vmem:[%s8491_s1 + $0x6f0] sm:$0x11]  ;;  %v6974_v30 = vcombine.low %v123_v2, %v123_v2  ;;  %v7200_v31 = vcombine.low %v236_v3, %v348_v4 }
 0x1a1   :  { %v4380_v40 = vpop.f32.mrf.mxu0  ;;  %6477 = vmatprep.subr.bf16.mxu1 %v7195_v33  ;;  %v351_v33 = vld [vmem:[%s8491_s1 + $0x6f8] sm:$0x11]  ;;  %v7202_v35 = vcombine.low %v237_v8, %v349_v9  ;;  %v6977_v36 = vcombine.high %v124_v23, %v124_v23  ;;  %v6979_v38 = vcombine.high %v125_v26, %v125_v26  ;;  %v7205_v39 = vcombine.high %v238_v27, %v350_v28 }
 0x1a2   :  { %v4420_v45 = vpop.f32.mrf.mxu1 }
 0x1a3   :  { %v4381_v50 = vpop.f32.mrf.mxu0 }
 0x1a4   :  { %v4421_v53 = vpop.f32.mrf.mxu1  ;;  %v127_v50 = vld [vmem:[%s8490_s0 + $0x378] sm:$0xff] }
 0x1a5   :  { %v4457_v56 = vpop.f32.mrf.mxu0  ;;  %6376 = vmatmul.mubr.bf16.vlgmr.msra.gmra.mxu0 %v6964_v41  ;;  %v7207_v41 = vcombine.high %v239_v32, %v351_v33  ;;  %v7204_v53 = vcombine.low %v238_v27, %v350_v28  ;;  %v6982_v4 = vcombine.low %v127_v50, %v127_v50 }
 0x1a6   :  { %v4458_v58 = vadd.f32 %v4457_v56, %v4418_v37  ;;  %v4497_v59 = vpop.f32.mrf.mxu1  ;;  %6416 = vmatmul.mubr.bf16.vlgmr.msra.gmra.mxu1 %v6966_v46  ;;  %6438 = vmatpush1.bf16.xpose.msra.mxu0 %v7192_v47  ;;  %v126_v47 = vld [vmem:[%s8490_s0 + $0x370] sm:$0xff]  ;;  %s7455_s0 = smov [#allocation2]  }
 0x1a7   :  { %6478 = vmatpush1.bf16.xpose.msra.mxu1 %v7194_v51  ;;  %v4459_v60 = vpop.f32.mrf.mxu0  ;;  %6455 = vmatprep.mubr.bf16.mxu0 %v6969_v52  ;;  %v6978_v52 = vcombine.low %v125_v26, %v125_v26  ;;  %v6981_v56 = vcombine.high %v126_v47, %v126_v47  ;;  %v6980_v2 = vcombine.low %v126_v47, %v126_v47  ;;  %s6751_s24 = sshll.u32 %s7455_s0, 4  ;;  %s6752_s24 = int_to_ptr.vmem [resolvable:$true] %s6751_s24 }
 0x1a8   :  { %v4498_v61 = vadd.f32 %v4497_v59, %v4458_v58  ;;  %v4499_v62 = vpop.f32.mrf.mxu1  ;;  %6495 = vmatprep.mubr.bf16.mxu1 %v6971_v54  ;;  %6517 = vmatprep.subr.bf16.mxu0 %v7197_v55  ;;  %v7206_v55 = vcombine.low %v239_v32, %v351_v33  ;;  %v6983_v58 = vcombine.high %v127_v50, %v127_v50  ;;  %s7433_s25 = scalar_lea.vmem %s6752_s24, 128  ;;  %p7438_p1 = scmp.lt.s32.totalorder %s6752_s24, %s6752_s24 }
 0x1a9   :  { %v4460_v0 = vpop.f32.mrf.mxu0  ;;  %6557 = vmatprep.subr.bf16.mxu1 %v7199_v57  ;;  %p7434_p0 = scmp.ne.s32.totalorder %s6752_s24, %s7433_s25  ;;  %p7439_p2 = scmp.lt.s32.totalorder %s7433_s25, %s7433_s25 }
 0x1aa   :  { %v4500_v5 = vpop.f32.mrf.mxu1 }
 0x1ab   :  { %v4461_v10 = vpop.f32.mrf.mxu0  ;;  %p7440_p3 = por %p7439_p2, %p7438_p1 }
 0x1ac   :  { %v4501_v13 = vpop.f32.mrf.mxu1 }
 0x1ad   :  { %v4537_v16 = vpop.f32.mrf.mxu0  ;;  %6456 = vmatmul.mubr.bf16.vlgmr.msra.gmra.mxu0 %v6968_v1  ;;  %p7441_p4 = pnand %p7440_p3, %p7434_p0 }
 0x1ae   :  { %v4538_v18 = vadd.f32 %v4537_v16, %v4498_v61  ;;  %v4577_v19 = vpop.f32.mrf.mxu1  ;;  %6496 = vmatmul.mubr.bf16.vlgmr.msra.gmra.mxu1 %v6970_v6  ;;  %6518 = vmatpush1.bf16.xpose.msra.mxu0 %v7196_v7 }
 0x1af   :  { %6558 = vmatpush1.bf16.xpose.msra.mxu1 %v7198_v11  ;;  %v4539_v20 = vpop.f32.mrf.mxu0  ;;  %6535 = vmatprep.mubr.bf16.mxu0 %v6973_v12 }
 0x1b0   :  { %v4578_v21 = vadd.f32 %v4577_v19, %v4538_v18  ;;  %v4579_v22 = vpop.f32.mrf.mxu1  ;;  %6575 = vmatprep.mubr.bf16.mxu1 %v6975_v14  ;;  %6597 = vmatprep.subr.bf16.mxu0 %v7201_v15 }
 0x1b1   :  { %v4540_v24 = vpop.f32.mrf.mxu0  ;;  %6637 = vmatprep.subr.bf16.mxu1 %v7203_v17 }
 0x1b2   :  { %v4580_v29 = vpop.f32.mrf.mxu1 }
 0x1b3   :  { %v4541_v34 = vpop.f32.mrf.mxu0 }
 0x1b4   :  { %v4581_v37 = vpop.f32.mrf.mxu1 }
 0x1b5   :  { %v4617_v40 = vpop.f32.mrf.mxu0  ;;  %6536 = vmatmul.mubr.bf16.vlgmr.msra.gmra.mxu0 %v6972_v25 }
 0x1b6   :  { %v4618_v42 = vadd.f32 %v4617_v40, %v4578_v21  ;;  %v4657_v43 = vpop.f32.mrf.mxu1  ;;  %6576 = vmatmul.mubr.bf16.vlgmr.msra.gmra.mxu1 %v6974_v30  ;;  %6598 = vmatpush1.bf16.xpose.msra.mxu0 %v7200_v31 }
 0x1b7   :  { %6638 = vmatpush1.bf16.xpose.msra.mxu1 %v7202_v35  ;;  %v4619_v44 = vpop.f32.mrf.mxu0  ;;  %6615 = vmatprep.mubr.bf16.mxu0 %v6977_v36 }
 0x1b8   :  { %v4658_v45 = vadd.f32 %v4657_v43, %v4618_v42  ;;  %v4659_v46 = vpop.f32.mrf.mxu1  ;;  %6655 = vmatprep.mubr.bf16.mxu1 %v6979_v38  ;;  %6677 = vmatprep.subr.bf16.mxu0 %v7205_v39 }
 0x1b9   :  { %v4620_v48 = vpop.f32.mrf.mxu0  ;;  %6717 = vmatprep.subr.bf16.mxu1 %v7207_v41 }
 0x1ba   :  { %v4660_v51 = vpop.f32.mrf.mxu1 }
 0x1bb   :  { %v4621_v54 = vpop.f32.mrf.mxu0 }
 0x1bc   :  { %v4661_v57 = vpop.f32.mrf.mxu1 }
 0x1bd   :  { %v4697_v59 = vpop.f32.mrf.mxu0  ;;  %6616 = vmatmul.mubr.bf16.vlgmr.msra.gmra.mxu0 %v6976_v49 }
 0x1be   :  { %v4698_v60 = vadd.f32 %v4697_v59, %v4658_v45  ;;  %v4737_v61 = vpop.f32.mrf.mxu1  ;;  %6656 = vmatmul.mubr.bf16.vlgmr.msra.gmra.mxu1 %v6978_v52  ;;  %6678 = vmatpush1.bf16.xpose.msra.mxu0 %v7204_v53 }
 0x1bf   :  { %6718 = vmatpush1.bf16.xpose.msra.mxu1 %v7206_v55  ;;  %v4699_v62 = vpop.f32.mrf.mxu0  ;;  %6695 = vmatprep.mubr.bf16.mxu0 %v6981_v56 }
 0x1c0   :  { %v4738_v63 = vadd.f32 %v4737_v61, %v4698_v60  ;;  %v4739_v0 = vpop.f32.mrf.mxu1  ;;  %6735 = vmatprep.mubr.bf16.mxu1 %v6983_v58 }
 0x1c1   :  { %v4700_v1 = vpop.f32.mrf.mxu0 }
 0x1c2   :  { %v4740_v3 = vpop.f32.mrf.mxu1 }
 0x1c3   :  { %v4701_v5 = vpop.f32.mrf.mxu0 }
 0x1c4   :  { %v4741_v6 = vpop.f32.mrf.mxu1 }
 0x1c5   :  { %v4777_v7 = vpop.f32.mrf.mxu0  ;;  %6696 = vmatmul.mubr.bf16.vlgmr.msra.gmra.mxu0 %v6980_v2 }
 0x1c6   :  { %v4778_v8 = vadd.f32 %v4777_v7, %v4738_v63  ;;  %v4817_v9 = vpop.f32.mrf.mxu1  ;;  %6736 = vmatmul.mubr.bf16.vlgmr.msra.gmra.mxu1 %v6982_v4 }
 0x1c7   :  { %v4779_v10 = vpop.f32.mrf.mxu0 }
 0x1c8   :  { %v4818_v11 = vadd.f32 %v4817_v9, %v4778_v8  ;;  %v4819_v12 = vpop.f32.mrf.mxu1 }
 0x1c9   :  { %v4780_v13 = vpop.f32.mrf.mxu0 }
 0x1ca   :  { %v4820_v14 = vpop.f32.mrf.mxu1 }
 0x1cb   :  { %v4781_v15 = vpop.f32.mrf.mxu0 }
 0x1cc   :  { %v4821_v16 = vpop.f32.mrf.mxu1 }
 0x1cd   :  { %v4857_v17 = vpop.f32.mrf.mxu0 }
 0x1ce   :  { %v4858_v18 = vadd.f32 %v4857_v17, %v4818_v11  ;;  %v4897_v19 = vpop.f32.mrf.mxu1 }
 0x1cf   :  { %v4859_v20 = vpop.f32.mrf.mxu0 }
 0x1d0   :  { %v4898_v21 = vadd.f32 %v4897_v19, %v4858_v18  ;;  %v4899_v22 = vpop.f32.mrf.mxu1 }
 0x1d1   :  { %v4860_v23 = vpop.f32.mrf.mxu0 }
 0x1d2   :  { %v4900_v24 = vpop.f32.mrf.mxu1 }
 0x1d3   :  { %v4861_v25 = vpop.f32.mrf.mxu0 }
 0x1d4   :  { %v4901_v26 = vpop.f32.mrf.mxu1 }
 0x1d5   :  { %v4937_v27 = vpop.f32.mrf.mxu0 }
 0x1d6   :  { %v4938_v28 = vadd.f32 %v4937_v27, %v4898_v21  ;;  %v4977_v29 = vpop.f32.mrf.mxu1 }
 0x1d7   :  { %v4939_v30 = vpop.f32.mrf.mxu0 }
 0x1d8   :  { %v4978_v31 = vadd.f32 %v4977_v29, %v4938_v28  ;;  %v4979_v32 = vpop.f32.mrf.mxu1 }
 0x1d9   :  { %v4940_v33 = vpop.f32.mrf.mxu0 }
 0x1da   :  { %v4980_v34 = vpop.f32.mrf.mxu1 }
 0x1db   :  { %v4941_v35 = vpop.f32.mrf.mxu0 }
 0x1dc   :  { %v4981_v36 = vpop.f32.mrf.mxu1 }
 0x1dd   :  { %v5017_v37 = vpop.f32.mrf.mxu0 }
 0x1de   :  { %v5018_v38 = vadd.f32 %v5017_v37, %v4978_v31  ;;  %v5057_v39 = vpop.f32.mrf.mxu1 }
 0x1df   :  { %v5019_v40 = vpop.f32.mrf.mxu0 }
 0x1e0   :  { %v5058_v41 = vadd.f32 %v5057_v39, %v5018_v38  ;;  %v5059_v42 = vpop.f32.mrf.mxu1 }
 0x1e1   :  { %v5020_v43 = vpop.f32.mrf.mxu0 }
 0x1e2   :  { %v5060_v44 = vpop.f32.mrf.mxu1 }
 0x1e3   :  { %v5021_v45 = vpop.f32.mrf.mxu0 }
 0x1e4   :  { %v5061_v46 = vpop.f32.mrf.mxu1 }
 0x1e5   :  { %v5097_v47 = vpop.f32.mrf.mxu0 }
 0x1e6   :  { %v5098_v48 = vadd.f32 %v5097_v47, %v5058_v41  ;;  %v5137_v49 = vpop.f32.mrf.mxu1 }
 0x1e7   :  { %v5099_v50 = vpop.f32.mrf.mxu0 }
 0x1e8   :  { %v5138_v51 = vadd.f32 %v5137_v49, %v5098_v48  ;;  %v5139_v52 = vpop.f32.mrf.mxu1 }
 0x1e9   :  { %v5100_v53 = vpop.f32.mrf.mxu0 }
 0x1ea   :  { %v5140_v54 = vpop.f32.mrf.mxu1 }
 0x1eb   :  { %v5101_v55 = vpop.f32.mrf.mxu0 }
 0x1ec   :  { %v5141_v56 = vpop.f32.mrf.mxu1 }
 0x1ed   :  { %v5177_v57 = vpop.f32.mrf.mxu0 }
 0x1ee   :  { %v5178_v58 = vadd.f32 %v5177_v57, %v5138_v51  ;;  %v5217_v59 = vpop.f32.mrf.mxu1 }
 0x1ef   :  { %v5179_v60 = vpop.f32.mrf.mxu0 }
 0x1f0   :  { %v5218_v61 = vadd.f32 %v5217_v59, %v5178_v58  ;;  %v5219_v62 = vpop.f32.mrf.mxu1 }
 0x1f1   :  { %v5180_v63 = vpop.f32.mrf.mxu0 }
 0x1f2   :  { %v5220_v0 = vpop.f32.mrf.mxu1 }
 0x1f3   :  { %v5181_v1 = vpop.f32.mrf.mxu0 }
 0x1f4   :  { %v5221_v2 = vpop.f32.mrf.mxu1 }
 0x1f5   :  { %v5257_v3 = vpop.f32.mrf.mxu0 }
 0x1f6   :  { %v5258_v4 = vadd.f32 %v5257_v3, %v5218_v61  ;;  %v5297_v5 = vpop.f32.mrf.mxu1 }
 0x1f7   :  { %v5259_v6 = vpop.f32.mrf.mxu0 }
 0x1f8   :  { %v5298_v7 = vadd.f32 %v5297_v5, %v5258_v4  ;;  %v5299_v8 = vpop.f32.mrf.mxu1 }
 0x1f9   :  { %v5260_v9 = vpop.f32.mrf.mxu0 }
 0x1fa   :  { %v5300_v10 = vpop.f32.mrf.mxu1 }
 0x1fb   :  { %v5261_v11 = vpop.f32.mrf.mxu0 }
 0x1fc   :  { %v5301_v12 = vpop.f32.mrf.mxu1 }
 0x1fd   :  { %v5337_v13 = vpop.f32.mrf.mxu0 }
 0x1fe   :  { %v5338_v14 = vadd.f32 %v5337_v13, %v5298_v7  ;;  %v5377_v15 = vpop.f32.mrf.mxu1 }
 0x1ff   :  { %v5339_v16 = vpop.f32.mrf.mxu0 }
 0x200   :  { %v5378_v17 = vadd.f32 %v5377_v15, %v5338_v14  ;;  %v5379_v18 = vpop.f32.mrf.mxu1 }
 0x201   :  { %v5340_v19 = vpop.f32.mrf.mxu0 }
 0x202   :  { %v5380_v20 = vpop.f32.mrf.mxu1 }
 0x203   :  { %v5341_v21 = vpop.f32.mrf.mxu0 }
 0x204   :  { %v5381_v22 = vpop.f32.mrf.mxu1 }
 0x205   :  { %v5417_v23 = vpop.f32.mrf.mxu0 }
 0x206   :  { %v5418_v24 = vadd.f32 %v5417_v23, %v5378_v17  ;;  %v5457_v25 = vpop.f32.mrf.mxu1 }
 0x207   :  { %v5419_v26 = vpop.f32.mrf.mxu0 }
 0x208   :  { %v5458_v27 = vadd.f32 %v5457_v25, %v5418_v24  ;;  %v5459_v28 = vpop.f32.mrf.mxu1 }
 0x209   :  { %v5420_v29 = vpop.f32.mrf.mxu0 }
 0x20a   :  { %v5460_v30 = vpop.f32.mrf.mxu1 }
 0x20b   :  { %v5421_v31 = vpop.f32.mrf.mxu0 }
 0x20c   :  { %v5461_v32 = vpop.f32.mrf.mxu1 }
 0x20d   :  { %v5497_v33 = vpop.f32.mrf.mxu0 }
 0x20e   :  { %v5537_v34 = vpop.f32.mrf.mxu1  ;;  %v5498_v0 = vadd.f32 %v5497_v33, %v5458_v27 }
 0x20f   :  { %v5499_v35 = vpop.f32.mrf.mxu0 }
 0x210   :  { %v5539_v36 = vpop.f32.mrf.mxu1  ;;  %v5538_v5 = vadd.f32 %v5537_v34, %v5498_v0 }
 0x211   :  { %v5500_v37 = vpop.f32.mrf.mxu0 }
 0x212   :  { %v5540_v38 = vpop.f32.mrf.mxu1 }
 0x213   :  { %v5501_v39 = vpop.f32.mrf.mxu0 }
 0x214   :  { %v5541_v40 = vpop.f32.mrf.mxu1 }
 0x215   :  { %v5577_v41 = vpop.f32.mrf.mxu0 }
 0x216   :  { %v5617_v42 = vpop.f32.mrf.mxu1  ;;  %v5578_v8 = vadd.f32 %v5577_v41, %v5538_v5 }
 0x217   :  { %v5579_v43 = vpop.f32.mrf.mxu0 }
 0x218   :  { %v5619_v44 = vpop.f32.mrf.mxu1  ;;  %v5618_v13 = vadd.f32 %v5617_v42, %v5578_v8 }
 0x219   :  { %v5580_v45 = vpop.f32.mrf.mxu0 }
 0x21a   :  { %v5620_v46 = vpop.f32.mrf.mxu1 }
 0x21b   :  { %v5581_v47 = vpop.f32.mrf.mxu0 }
 0x21c   :  { %v5621_v48 = vpop.f32.mrf.mxu1 }
 0x21d   :  { %v5657_v49 = vpop.f32.mrf.mxu0 }
 0x21e   :  { %v5697_v50 = vpop.f32.mrf.mxu1  ;;  %v5658_v16 = vadd.f32 %v5657_v49, %v5618_v13 }
 0x21f   :  { %v5659_v51 = vpop.f32.mrf.mxu0 }
 0x220   :  { %v5699_v52 = vpop.f32.mrf.mxu1  ;;  %v5698_v21 = vadd.f32 %v5697_v50, %v5658_v16 }
 0x221   :  { %v5660_v53 = vpop.f32.mrf.mxu0 }
 0x222   :  { %v5700_v54 = vpop.f32.mrf.mxu1 }
 0x223   :  { %v5661_v55 = vpop.f32.mrf.mxu0 }
 0x224   :  { %v5701_v56 = vpop.f32.mrf.mxu1 }
 0x225   :  { %v5737_v57 = vpop.f32.mrf.mxu0 }
 0x226   :  { %v5777_v58 = vpop.f32.mrf.mxu1  ;;  %v5738_v24 = vadd.f32 %v5737_v57, %v5698_v21 }
 0x227   :  { %v5739_v59 = vpop.f32.mrf.mxu0 }
 0x228   :  { %v5779_v60 = vpop.f32.mrf.mxu1  ;;  %v5778_v29 = vadd.f32 %v5777_v58, %v5738_v24 }
 0x229   :  { %v5740_v61 = vpop.f32.mrf.mxu0 }
 0x22a   :  { %v5780_v62 = vpop.f32.mrf.mxu1 }
 0x22b   :  { %v5741_v63 = vpop.f32.mrf.mxu0 }
 0x22c   :  { %v5781_v1 = vpop.f32.mrf.mxu1 }
 0x22d   :  { %v5817_v2 = vpop.f32.mrf.mxu0 }
 0x22e   :  { %v5857_v3 = vpop.f32.mrf.mxu1  ;;  %v5818_v32 = vadd.f32 %v5817_v2, %v5778_v29 }
 0x22f   :  { %v5819_v4 = vpop.f32.mrf.mxu0 }
 0x230   :  { %v5859_v6 = vpop.f32.mrf.mxu1  ;;  %v5858_v37 = vadd.f32 %v5857_v3, %v5818_v32 }
 0x231   :  { %v5820_v7 = vpop.f32.mrf.mxu0 }
 0x232   :  { %v5860_v9 = vpop.f32.mrf.mxu1 }
 0x233   :  { %v5821_v10 = vpop.f32.mrf.mxu0 }
 0x234   :  { %v5861_v11 = vpop.f32.mrf.mxu1 }
 0x235   :  { %v5897_v12 = vpop.f32.mrf.mxu0 }
 0x236   :  { %v5937_v14 = vpop.f32.mrf.mxu1  ;;  %v5898_v40 = vadd.f32 %v5897_v12, %v5858_v37 }
 0x237   :  { %v5899_v15 = vpop.f32.mrf.mxu0 }
 0x238   :  { %v5939_v17 = vpop.f32.mrf.mxu1  ;;  %v5938_v45 = vadd.f32 %v5937_v14, %v5898_v40 }
 0x239   :  { %v5900_v18 = vpop.f32.mrf.mxu0 }
 0x23a   :  { %v5940_v19 = vpop.f32.mrf.mxu1 }
 0x23b   :  { %v5901_v20 = vpop.f32.mrf.mxu0 }
 0x23c   :  { %v5941_v22 = vpop.f32.mrf.mxu1 }
 0x23d   :  { %v5977_v23 = vpop.f32.mrf.mxu0 }
 0x23e   :  { %v6017_v25 = vpop.f32.mrf.mxu1  ;;  %v5978_v48 = vadd.f32 %v5977_v23, %v5938_v45 }
 0x23f   :  { %v5979_v26 = vpop.f32.mrf.mxu0 }
 0x240   :  { %v6019_v27 = vpop.f32.mrf.mxu1  ;;  %v6018_v53 = vadd.f32 %v6017_v25, %v5978_v48 }
 0x241   :  { %v5980_v28 = vpop.f32.mrf.mxu0 }
 0x242   :  { %v6020_v30 = vpop.f32.mrf.mxu1 }
 0x243   :  { %v5981_v31 = vpop.f32.mrf.mxu0 }
 0x244   :  { %v6021_v33 = vpop.f32.mrf.mxu1 }
 0x245   :  { %v6057_v34 = vpop.f32.mrf.mxu0 }
 0x246   :  { %v6097_v35 = vpop.f32.mrf.mxu1  ;;  %v6058_v56 = vadd.f32 %v6057_v34, %v6018_v53 }
 0x247   :  { %v6059_v36 = vpop.f32.mrf.mxu0 }
 0x248   :  { %v6099_v38 = vpop.f32.mrf.mxu1  ;;  %v6098_v61 = vadd.f32 %v6097_v35, %v6058_v56 }
 0x249   :  { %v6060_v39 = vpop.f32.mrf.mxu0 }
 0x24a   :  { %v6100_v41 = vpop.f32.mrf.mxu1 }
 0x24b   :  { %v6061_v42 = vpop.f32.mrf.mxu0 }
 0x24c   :  { %v6101_v43 = vpop.f32.mrf.mxu1 }
 0x24d   :  { %v6137_v44 = vpop.f32.mrf.mxu0 }
 0x24e   :  { %v6177_v46 = vpop.f32.mrf.mxu1  ;;  %v6138_v0 = vadd.f32 %v6137_v44, %v6098_v61 }
 0x24f   :  { %v6139_v47 = vpop.f32.mrf.mxu0 }
 0x250   :  { %v6179_v49 = vpop.f32.mrf.mxu1  ;;  %v6178_v5 = vadd.f32 %v6177_v46, %v6138_v0 }
 0x251   :  { %v6140_v50 = vpop.f32.mrf.mxu0 }
 0x252   :  { %v6180_v51 = vpop.f32.mrf.mxu1 }
 0x253   :  { %v6141_v52 = vpop.f32.mrf.mxu0 }
 0x254   :  { %v6181_v54 = vpop.f32.mrf.mxu1 }
 0x255   :  { %v6217_v55 = vpop.f32.mrf.mxu0 }
 0x256   :  { %v6257_v57 = vpop.f32.mrf.mxu1  ;;  %v6218_v8 = vadd.f32 %v6217_v55, %v6178_v5 }
 0x257   :  { %v6219_v58 = vpop.f32.mrf.mxu0 }
 0x258   :  { %v6259_v59 = vpop.f32.mrf.mxu1  ;;  %v6258_v13 = vadd.f32 %v6257_v57, %v6218_v8 }
 0x259   :  { %v6220_v60 = vpop.f32.mrf.mxu0 }
 0x25a   :  { %v6260_v62 = vpop.f32.mrf.mxu1 }
 0x25b   :  { %v6221_v63 = vpop.f32.mrf.mxu0 }
 0x25c   :  { %v6261_v1 = vpop.f32.mrf.mxu1 }
 0x25d   :  { %v6297_v2 = vpop.f32.mrf.mxu0 }
 0x25e   :  { %v6337_v3 = vpop.f32.mrf.mxu1  ;;  %v6298_v16 = vadd.f32 %v6297_v2, %v6258_v13 }
 0x25f   :  { %v6299_v4 = vpop.f32.mrf.mxu0 }
 0x260   :  { %v6339_v6 = vpop.f32.mrf.mxu1  ;;  %v6338_v21 = vadd.f32 %v6337_v3, %v6298_v16 }
 0x261   :  { %v6300_v7 = vpop.f32.mrf.mxu0 }
 0x262   :  { %v6340_v9 = vpop.f32.mrf.mxu1 }
 0x263   :  { %v6301_v10 = vpop.f32.mrf.mxu0 }
 0x264   :  { %v6341_v11 = vpop.f32.mrf.mxu1 }
 0x265   :  { %v6377_v12 = vpop.f32.mrf.mxu0 }
 0x266   :  { %v6417_v14 = vpop.f32.mrf.mxu1  ;;  %v6378_v24 = vadd.f32 %v6377_v12, %v6338_v21 }
 0x267   :  { %v6379_v15 = vpop.f32.mrf.mxu0 }
 0x268   :  { %v6419_v17 = vpop.f32.mrf.mxu1  ;;  %v6418_v29 = vadd.f32 %v6417_v14, %v6378_v24 }
 0x269   :  { %v6380_v18 = vpop.f32.mrf.mxu0 }
 0x26a   :  { %v6420_v19 = vpop.f32.mrf.mxu1 }
 0x26b   :  { %v6381_v20 = vpop.f32.mrf.mxu0 }
 0x26c   :  { %v6421_v22 = vpop.f32.mrf.mxu1 }
 0x26d   :  { %v6457_v23 = vpop.f32.mrf.mxu0 }
 0x26e   :  { %v6497_v25 = vpop.f32.mrf.mxu1  ;;  %v6458_v32 = vadd.f32 %v6457_v23, %v6418_v29 }
 0x26f   :  { %v6459_v26 = vpop.f32.mrf.mxu0 }
 0x270   :  { %v6499_v27 = vpop.f32.mrf.mxu1  ;;  %v6498_v37 = vadd.f32 %v6497_v25, %v6458_v32 }
 0x271   :  { %v6460_v28 = vpop.f32.mrf.mxu0 }
 0x272   :  { %v6500_v30 = vpop.f32.mrf.mxu1 }
 0x273   :  { %v6461_v31 = vpop.f32.mrf.mxu0 }
 0x274   :  { %v6501_v33 = vpop.f32.mrf.mxu1 }
 0x275   :  { %v6537_v34 = vpop.f32.mrf.mxu0 }
 0x276   :  { %v6577_v35 = vpop.f32.mrf.mxu1  ;;  %v6538_v40 = vadd.f32 %v6537_v34, %v6498_v37 }
 0x277   :  { %v6539_v36 = vpop.f32.mrf.mxu0 }
 0x278   :  { %v6579_v38 = vpop.f32.mrf.mxu1  ;;  %v6578_v45 = vadd.f32 %v6577_v35, %v6538_v40 }
 0x279   :  { %v6540_v39 = vpop.f32.mrf.mxu0 }
 0x27a   :  { %v6580_v41 = vpop.f32.mrf.mxu1 }
 0x27b   :  { %v6541_v42 = vpop.f32.mrf.mxu0 }
 0x27c   :  { %v6581_v43 = vpop.f32.mrf.mxu1 }
 0x27d   :  { %v6617_v44 = vpop.f32.mrf.mxu0 }
 0x27e   :  { %v6657_v46 = vpop.f32.mrf.mxu1  ;;  %v6618_v48 = vadd.f32 %v6617_v44, %v6578_v45 }
 0x27f   :  { %v6619_v47 = vpop.f32.mrf.mxu0 }
 0x280   :  { %v6659_v49 = vpop.f32.mrf.mxu1  ;;  %v6658_v53 = vadd.f32 %v6657_v46, %v6618_v48 }
 0x281   :  { %v6620_v50 = vpop.f32.mrf.mxu0 }
 0x282   :  { %v6660_v51 = vpop.f32.mrf.mxu1 }
 0x283   :  { %v6621_v52 = vpop.f32.mrf.mxu0 }
 0x284   :  { %v6661_v54 = vpop.f32.mrf.mxu1 }
 0x285   :  { %v6697_v55 = vpop.f32.mrf.mxu0 }
 0x286   :  { %v6698_v56 = vadd.f32 %v6697_v55, %v6658_v53  ;;  %v6737_v57 = vpop.f32.mrf.mxu1 }
 0x287   :  { %v6699_v58 = vpop.f32.mrf.mxu0 }
 0x288   :  { %v6738_v59 = vadd.f32 %v6737_v57, %v6698_v56  ;;  %v6739_v60 = vpop.f32.mrf.mxu1 }
 0x289   :  { %v6700_v61 = vpop.f32.mrf.mxu0 }
 0x28a   :  { %v6740_v62 = vpop.f32.mrf.mxu1  ;;  %6744 = vst.msk [vmem:[#allocation2] sm:$0xff] %vm6743_vm0, %v6738_v59 }
 0x28b   :  { %v6701_v63 = vpop.f32.mrf.mxu0 }
 0x28c   :  { %7444 = shalt.err (!%p7441_p4)
}
 0x28d   :  { %6754 = dma.vmem_to_hbm [thread:$0]  %s6752_s24, 128, %s8493_s3, [#allocation3]   ;;  %v6741_v0 = vpop.f32.mrf.mxu1 }
 0x28e   :  { %7453 = dma.done.wait [#allocation3], 128  }
 0x28f   :  { %7454 = vsyncadd [#allocation3], 4294967168 }
 0x290   :  { %6758 = vsyncpa [#allocation3], 1 }

</bundles_post_ra>
